<compile_context>
chip_gen: v7x
topology: tpu7x:2x2x1
jax: 0.10.0
libtpu: 0.0.40
codegen_flags: <defaults>
</compile_context>

<pallas_src>
import functools

import jax
import jax.numpy as jnp
from jax.experimental import pallas as pl
from jax.experimental.pallas import tpu as pltpu


# ----------------------------------------------------------------------------
# Deterministic parameter initialization (synthetic weights, no checkpoint)
# ----------------------------------------------------------------------------
def _uniform(key, shape, fan_in):
    lim = 1.0 / jnp.sqrt(jnp.float32(fan_in))
    return jax.random.uniform(key, shape, jnp.float32, -lim, lim)


def init_linear(key, fin, fout):
    kw, kb = jax.random.split(key)
    return {"w": _uniform(kw, (fin, fout), fin), "b": _uniform(kb, (fout,), fin)}


def init_conv3x3(key, cin, cout):
    kw, kb = jax.random.split(key)
    return {"w": _uniform(kw, (3, 3, cin, cout), cin * 9),       # (ky, kx, ci, co)
            "b": _uniform(kb, (cout,), cin * 9)}


def init_conv1x1(key, cin, cout):
    kw, kb = jax.random.split(key)
    return {"w": _uniform(kw, (cin, cout), cin), "b": _uniform(kb, (cout,), cin)}


def init_convT2x2(key, cin, cout):
    kw, kb = jax.random.split(key)
    return {"w": _uniform(kw, (cin, 2, 2, cout), cin * 4),       # (ci, dy, dx, co)
            "b": _uniform(kb, (cout,), cin * 4)}


def init_bn(cout):
    return {"gamma": jnp.ones((cout,), jnp.float32),
            "beta": jnp.zeros((cout,), jnp.float32)}


def init_mlp_encoder(key, in_features, initial_out_features, repeat):
    dims = [in_features, initial_out_features]
    f = initial_out_features
    for _ in range(repeat // 2):
        f //= 2
        dims.append(f)
    for _ in range(repeat // 2):
        f *= 2
        dims.append(f)
    dims.append(in_features)
    keys = jax.random.split(key, len(dims) - 1)
    return [init_linear(k, a, b) for k, a, b in zip(keys, dims[:-1], dims[1:])]


def init_encoder_block(key, cin, cout):
    k1, k2 = jax.random.split(key)
    return {"conv1": init_conv3x3(k1, cin, cout), "bn1": init_bn(cout),
            "conv2": init_conv3x3(k2, cout, cout), "bn2": init_bn(cout)}


def init_unet(key, in_channels, out_channels, steps):
    n = len(steps)
    keys = jax.random.split(key, 3 * n + 2)
    kit = iter(keys)
    enc = [init_encoder_block(next(kit), in_channels, steps[0])]
    enc += [init_encoder_block(next(kit), steps[i], steps[i + 1]) for i in range(n - 1)]
    up = [init_convT2x2(next(kit), steps[i], steps[i - 1]) for i in range(n - 1, 0, -1)]
    dec = [init_conv3x3(next(kit), steps[i - 1] * 2, steps[i - 1]) for i in range(n - 1, 0, -1)]
    dec_final = init_conv1x1(next(kit), steps[0], out_channels)
    return {"enc": enc, "up": up, "dec": dec, "dec_final": dec_final}


def init_generator(key, in_channels, out_channels, channels_step, size, encoder_repeat):
    k_mlp, k_unet = jax.random.split(key)
    return {"mlp": init_mlp_encoder(k_mlp, size * size, size * 2, encoder_repeat),
            "unet": init_unet(k_unet, in_channels, out_channels, list(channels_step))}


# ----------------------------------------------------------------------------
# Weight folding: block-diagonal over the two generators, column-banded over width
# (built once at prepare time; column order of every slab is (g, x, c))
# ----------------------------------------------------------------------------
def _blockdiag2(a, b):
    z1 = jnp.zeros((a.shape[0], b.shape[1]), a.dtype)
    z2 = jnp.zeros((b.shape[0], a.shape[1]), b.dtype)
    return jnp.concatenate(
        [jnp.concatenate([a, z1], axis=1), jnp.concatenate([z2, b], axis=1)], axis=0)


def _band_conv3x3_folded(w2, W):
    """w2: (2, 3, 3, Cin, Cout) per-generator conv weights -> (3, 2*W*Cin, 2*W*Cout)."""
    G, Cin, Cout = w2.shape[0], w2.shape[3], w2.shape[4]
    xin = jnp.arange(W)[:, None, None]
    xout = jnp.arange(W)[None, :, None]
    kx = jnp.arange(3)[None, None, :]
    M = (xin == xout + kx - 1).astype(w2.dtype)                  # (Win, Wout, kx)
    band = jnp.einsum("pqk,gykio->gypiqo", M, w2)                # (g, ky, Win, Cin, Wout, Cout)
    eyeg = jnp.eye(G, dtype=w2.dtype)
    full = jnp.einsum("gh,gypiqo->ygpihqo", eyeg, band)
    return full.reshape(3, G * W * Cin, G * W * Cout)


def _band_convT2x2_folded(w2, Win):
    """w2: (2, Cin, 2, 2, Cout) -> (2[dy], 2*Win*Cin, 2*Wout*Cout)."""
    G, Cin, Cout = w2.shape[0], w2.shape[1], w2.shape[4]
    Wo = 2 * Win
    xi = jnp.arange(Win)[:, None, None]
    xo = jnp.arange(Wo)[None, :, None]
    dx = jnp.arange(2)[None, None, :]
    M = (xo == 2 * xi + dx).astype(w2.dtype)                     # (Win, Wo, dx)
    band = jnp.einsum("abd,gcydo->gyacbo", M, w2)                # (g, dy, Win, Cin, Wo, Cout)
    eyeg = jnp.eye(G, dtype=w2.dtype)
    full = jnp.einsum("gh,gyacbo->ygachbo", eyeg, band)
    return full.reshape(2, G * Win * Cin, G * Wo * Cout)


def _blockdiag_conv1x1_folded(w2, W):
    """w2: (2, Cin, Cout) -> (2*W*Cin, 2*W*Cout) per-pixel 1x1 conv, generator-folded."""
    G, Cin, Cout = w2.shape
    eye_w = jnp.eye(W, dtype=w2.dtype)
    eyeg = jnp.eye(G, dtype=w2.dtype)
    full = jnp.einsum("gh,px,gio->gpihxo", eyeg, eye_w, w2)
    return full.reshape(G * W * Cin, G * W * Cout)


def _bias_cols_folded(b2, W):
    """b2: (2, C) -> (1, 2*W*C) in (g, x, c) column order."""
    G, C = b2.shape
    return jnp.tile(b2[:, None, :], (1, W, 1)).reshape(1, G * W * C).astype(jnp.float32)


def _bn_group_matrix(C, W):
    """(2*W*C, 2*C) 0/1 matrix grouping (g, x, c) columns into per-(g, c) channels."""
    single = jnp.tile(jnp.eye(C, dtype=jnp.float32), (W, 1))     # (W*C, C)
    return _blockdiag2(single, single)


# --- batch-size dependent 0/1 selection matrices (built inside the jitted wrapper;
#     they only depend on static shapes, so XLA constant-folds them) ---
def _pool_col_select(W, C, parity):
    Mx = (jnp.arange(W)[:, None] == 2 * jnp.arange(W // 2)[None, :] + parity).astype(jnp.float32)
    P = jnp.einsum("gh,pq,cd->gpchqd", jnp.eye(2, dtype=jnp.float32), Mx,
                   jnp.eye(C, dtype=jnp.float32))
    return P.reshape(2 * W * C, 2 * (W // 2) * C)


def _pool_row_select(H, B, parity):
    My = (jnp.arange(H)[None, :] == 2 * jnp.arange(H // 2)[:, None] + parity).astype(jnp.float32)
    R = jnp.einsum("pq,bd->pbqd", My, jnp.eye(B, dtype=jnp.float32))
    return R.reshape((H // 2) * B, H * B)


def _up_row_interleave(Hin, B, dy):
    M = (jnp.arange(2 * Hin)[:, None] == 2 * jnp.arange(Hin)[None, :] + dy).astype(jnp.float32)
    R = jnp.einsum("pq,bd->pbqd", M, jnp.eye(B, dtype=jnp.float32))
    return R.reshape(2 * Hin * B, Hin * B)


# ----------------------------------------------------------------------------
# Prepare: fold wall/room generators into one set of banded / block-diagonal weights
# ----------------------------------------------------------------------------
def prepare_plan_generator(raw_wall, raw_room, size, steps, wall_out, room_out):
    S = size
    steps = tuple(steps)
    n = len(steps)
    assert n >= 2, "channels_step must have at least 2 entries"
    out_max = max(wall_out, room_out)
    # TODO(synk): if the two generators ever differ in channels_step / repeat / size, they
    #             can no longer be folded into one set of block-diagonal weights.
    assert len(raw_wall["mlp"]) == len(raw_room["mlp"])

    # MLP (generator 0 = wall, generator 1 = room); features folded into columns.
    mlp = []
    n_mlp = len(raw_wall["mlp"])
    for li in range(n_mlp):
        w = _blockdiag2(raw_wall["mlp"][li]["w"], raw_room["mlp"][li]["w"])
        b = jnp.concatenate([raw_wall["mlp"][li]["b"], raw_room["mlp"][li]["b"]])[None, :]
        if li == n_mlp - 1:
            # permute output columns (g, y, x) -> (y, g, x) so the kernel can fill the
            # y-major conv slab with plain row-block stores (no in-kernel transpose).
            w = w.reshape(w.shape[0], 2, S, S).transpose(0, 2, 1, 3).reshape(w.shape[0], 2 * S * S)
            b = b.reshape(1, 2, S, S).transpose(0, 2, 1, 3).reshape(1, 2 * S * S)
        mlp.append({"w": w.astype(jnp.bfloat16), "b": b.astype(jnp.float32)})

    enc = []
    for bi in range(n):
        Wb = S // (2 ** max(bi - 1, 0))
        bw, br = raw_wall["unet"]["enc"][bi], raw_room["unet"]["enc"][bi]
        w1 = jnp.stack([bw["conv1"]["w"], br["conv1"]["w"]], 0)
        w2 = jnp.stack([bw["conv2"]["w"], br["conv2"]["w"]], 0)
        b1 = jnp.stack([bw["conv1"]["b"], br["conv1"]["b"]], 0)
        b2 = jnp.stack([bw["conv2"]["b"], br["conv2"]["b"]], 0)
        gm = _bn_group_matrix(steps[bi], Wb)
        enc.append({
            "w1": _band_conv3x3_folded(w1, Wb).astype(jnp.bfloat16),
            "b1": _bias_cols_folded(b1, Wb),
            "g1": jnp.concatenate([bw["bn1"]["gamma"], br["bn1"]["gamma"]])[None, :],
            "be1": jnp.concatenate([bw["bn1"]["beta"], br["bn1"]["beta"]])[None, :],
            "w2": _band_conv3x3_folded(w2, Wb).astype(jnp.bfloat16),
            "b2": _bias_cols_folded(b2, Wb),
            "g2": jnp.concatenate([bw["bn2"]["gamma"], br["bn2"]["gamma"]])[None, :],
            "be2": jnp.concatenate([bw["bn2"]["beta"], br["bn2"]["beta"]])[None, :],
            "gm": gm,
            "gt": gm.T,
        })

    up, dec = [], []
    for li in range(n - 1):
        Win = S // (2 ** (n - 1 - li))
        Wo = 2 * Win
        Cu = steps[n - 2 - li]
        uw = jnp.stack([raw_wall["unet"]["up"][li]["w"], raw_room["unet"]["up"][li]["w"]], 0)
        ub = jnp.stack([raw_wall["unet"]["up"][li]["b"], raw_room["unet"]["up"][li]["b"]], 0)
        up.append({"w": _band_convT2x2_folded(uw, Win).astype(jnp.bfloat16),
                   "b": _bias_cols_folded(ub, Wo)})
        dw = jnp.stack([raw_wall["unet"]["dec"][li]["w"], raw_room["unet"]["dec"][li]["w"]], 0)
        db = jnp.stack([raw_wall["unet"]["dec"][li]["b"], raw_room["unet"]["dec"][li]["b"]], 0)
        band_up = _band_conv3x3_folded(dw[:, :, :, :Cu, :], Wo)   # rows for upconv channels
        band_sk = _band_conv3x3_folded(dw[:, :, :, Cu:, :], Wo)   # rows for skip channels
        dec.append({"w": jnp.concatenate([band_up, band_sk], axis=1).astype(jnp.bfloat16),
                    "b": _bias_cols_folded(db, Wo)})

    def _pad_final(w, b):
        if w.shape[1] < out_max:
            w = jnp.pad(w, ((0, 0), (0, out_max - w.shape[1])))
            b = jnp.pad(b, (0, out_max - b.shape[0]))
        return w, b

    fw, fb = _pad_final(raw_wall["unet"]["dec_final"]["w"], raw_wall["unet"]["dec_final"]["b"])
    rw, rb = _pad_final(raw_room["unet"]["dec_final"]["w"], raw_room["unet"]["dec_final"]["b"])
    final = {"w": _blockdiag_conv1x1_folded(jnp.stack([fw, rw], 0), S).astype(jnp.bfloat16),
             "b": _bias_cols_folded(jnp.stack([fb, rb], 0), S),
             # activation mask: 1 -> sigmoid (wall generator), 0 -> identity (room allocator)
             "mask": jnp.concatenate([jnp.ones((S * out_max,), jnp.float32),
                                      jnp.zeros((S * out_max,), jnp.float32)])[None, :]}

    return {"mlp": mlp, "enc": enc, "up": up, "dec": dec, "final": final}


# ----------------------------------------------------------------------------
# Forward pass: one fused Pallas kernel for the whole network
# ----------------------------------------------------------------------------
@functools.partial(jax.jit,
                   static_argnames=("size", "steps", "wall_out", "room_out", "masking"))
def plan_generator_fwd(prepared, floor_batch, walls_batch, *, size, steps,
                       wall_out, room_out, masking=False):
    S = size
    steps = tuple(steps)
    n = len(steps)
    out_max = max(wall_out, room_out)
    B = floor_batch.shape[0]
    G = 2
    EPS = 1e-5

    # generator 0 (wall) encodes the floor plan, generator 1 (room) encodes the walls
    x_in = jnp.concatenate([floor_batch.reshape(B, S * S),
                            walls_batch.reshape(B, S * S)], axis=1).astype(jnp.float32)

    # ---- flatten all kernel operands into one list and record their positions ----
    args = []

    def add(a):
        args.append(a)
        return len(args) - 1

    ix_x = add(x_in)
    mlp_ix = [(add(l["w"]), add(l["b"])) for l in prepared["mlp"]]
    keys_enc = ("w1", "b1", "g1", "be1", "w2", "b2", "g2", "be2", "gm", "gt")
    enc_ix = [{k: add(prepared["enc"][bi][k]) for k in keys_enc} for bi in range(n)]

    spatial = [S // (2 ** max(bi - 1, 0)) for bi in range(n)]     # size each block runs at
    pool_ix = [None] * n
    for bi in range(1, n):
        Wb, C = spatial[bi], steps[bi]
        pool_ix[bi] = (add(_pool_col_select(Wb, C, 0).astype(jnp.bfloat16)),
                       add(_pool_col_select(Wb, C, 1).astype(jnp.bfloat16)),
                       add(_pool_row_select(Wb, B, 0).astype(jnp.bfloat16)),
                       add(_pool_row_select(Wb, B, 1).astype(jnp.bfloat16)))

    up_ix, dec_ix = [], []
    for li in range(n - 1):
        Hin = S // (2 ** (n - 1 - li))
        up_ix.append({"w": add(prepared["up"][li]["w"]),
                      "b": add(prepared["up"][li]["b"]),
                      "r0": add(_up_row_interleave(Hin, B, 0).astype(jnp.bfloat16)),
                      "r1": add(_up_row_interleave(Hin, B, 1).astype(jnp.bfloat16))})
        d = {"w": add(prepared["dec"][li]["w"]), "b": add(prepared["dec"][li]["b"])}
        if li == n - 2:
            d.update({"w1": add(prepared["final"]["w"]),
                      "b1": add(prepared["final"]["b"]),
                      "mask": add(prepared["final"]["mask"])})
        dec_ix.append(d)

    # ---- bf16 VMEM scratch for the padded conv slabs, deduped by shape ----
    # Scaling guard: the largest slab is (S+2)*B x 2*S*C_max bf16 (tens of KiB here) and
    # total weights ~2 MiB.  If IMAGE_SIZE / batch / channels grow, keep everything well
    # under the ~32 MiB default scoped-VMEM limit (64 MiB physical on v7x, 128 MiB on
    # v5e/v6e) or introduce a row-tile grid and raise vmem_limit_bytes.
    scratch_shapes = []
    scratch_key = {}

    def scr_for(Hc, cols):
        key = ((Hc + 2) * B, cols)
        if key not in scratch_key:
            scratch_key[key] = len(scratch_shapes)
            scratch_shapes.append(pltpu.VMEM(key, jnp.bfloat16))
        return scratch_key[key]

    enc_scr = []
    for bi in range(n):
        cin1 = 1 if bi == 0 else steps[bi - 1]
        enc_scr.append((scr_for(spatial[bi], G * spatial[bi] * cin1),
                        scr_for(spatial[bi], G * spatial[bi] * steps[bi])))
    dec_scr = []
    for li in range(n - 1):
        Wo = S // (2 ** (n - 2 - li))
        dec_scr.append(scr_for(Wo, G * Wo * 2 * steps[n - 2 - li]))

    n_in = len(args)

    # ------------------------------------------------------------------ kernel
    def kernel(*refs):
        ins = refs[:n_in]
        out_ref = refs[n_in]
        scr = refs[n_in + 1:]

        def conv3x3(fill, scr_id, w_i, b_i, Hc):
            """3x3 'same' conv on a y-major (row = y*B + b), (g, x, c)-column slab."""
            xp = scr[scr_id]
            width = xp.shape[1]
            zrow = jnp.zeros((B, width), jnp.bfloat16)
            xp[pl.ds(0, B), :] = zrow                       # top padding row (y = -1)
            xp[pl.ds((Hc + 1) * B, B), :] = zrow            # bottom padding row (y = Hc)
            fill(xp)                                        # body rows [B, (Hc+1)*B)
            acc = None
            for ky in range(3):                             # 3 shifted-window matmuls
                a = xp[pl.ds(ky * B, Hc * B), :]
                d = jnp.dot(a, ins[w_i][ky], preferred_element_type=jnp.float32)
                acc = d if acc is None else acc + d
            return acc + ins[b_i][...]

        def bn_relu(a, e_ix, which, count):
            gamma = ins[e_ix["g" + which]][...]
            beta = ins[e_ix["be" + which]][...]
            gm = ins[e_ix["gm"]][...]
            gt = ins[e_ix["gt"]][...]
            s1 = jnp.sum(a, axis=0, keepdims=True)
            s2 = jnp.sum(a * a, axis=0, keepdims=True)
            grp = jnp.dot(jnp.concatenate([s1, s2], axis=0), gm,
                          preferred_element_type=jnp.float32)          # (2, 2C)
            inv = 1.0 / count
            mean = grp[0:1] * inv
            var = grp[1:2] * inv - mean * mean          # biased var (PyTorch normalization)
            scale = gamma * jax.lax.rsqrt(var + EPS)
            shift = beta - mean * scale
            cols = jnp.dot(jnp.concatenate([scale, shift], axis=0), gt,
                           preferred_element_type=jnp.float32)         # (2, K)
            return jnp.maximum(a * cols[0:1, :] + cols[1:2, :], 0.0)

        def maxpool(v, p_ix):
            pe, po, er, orow = p_ix
            vb = v.astype(jnp.bfloat16)
            left = jnp.dot(vb, ins[pe][...], preferred_element_type=jnp.float32)
            right = jnp.dot(vb, ins[po][...], preferred_element_type=jnp.float32)
            wmax = jnp.maximum(left, right).astype(jnp.bfloat16)
            top = jnp.dot(ins[er][...], wmax, preferred_element_type=jnp.float32)
            bot = jnp.dot(ins[orow][...], wmax, preferred_element_type=jnp.float32)
            return jnp.maximum(top, bot)

        def upconv(v, u_ix):
            vb = v.astype(jnp.bfloat16)
            p0 = jnp.dot(vb, ins[u_ix["w"]][0],
                         preferred_element_type=jnp.float32).astype(jnp.bfloat16)
            p1 = jnp.dot(vb, ins[u_ix["w"]][1],
                         preferred_element_type=jnp.float32).astype(jnp.bfloat16)
            y = (jnp.dot(ins[u_ix["r0"]][...], p0, preferred_element_type=jnp.float32)
                 + jnp.dot(ins[u_ix["r1"]][...], p1, preferred_element_type=jnp.float32))
            return y + ins[u_ix["b"]][...]

        # ---- MLP encoders (both generators at once via block-diagonal weights) ----
        h = ins[ix_x][...]
        for (wi, bi_) in mlp_ix:
            h = jnp.dot(h.astype(jnp.bfloat16), ins[wi][...],
                        preferred_element_type=jnp.float32) + ins[bi_][...]
            h = jnp.maximum(h, 0.0)
        # h: (B, S * 2S) f32, columns ordered (y, g, x)

        # ---- UNet encoder (skips taken AFTER pooling for blocks != 0, as in PyTorch) ----
        Hc = S
        skips = []
        xv = None
        for bi in range(n):
            if bi == 0:
                def fill(xp, hh=h):
                    for y in range(S):   # scatter the MLP output rows into the y-major slab
                        xp[pl.ds((y + 1) * B, B), :] = (
                            hh[:, y * 2 * S:(y + 1) * 2 * S].astype(jnp.bfloat16))
            else:
                def fill(xp, v=xv, rows=Hc * B):
                    xp[pl.ds(B, rows), :] = v.astype(jnp.bfloat16)
            a = conv3x3(fill, enc_scr[bi][0], enc_ix[bi]["w1"], enc_ix[bi]["b1"], Hc)
            a = bn_relu(a, enc_ix[bi], "1", float(B * Hc * Hc))

            def fill2(xp, v=a, rows=Hc * B):
                xp[pl.ds(B, rows), :] = v.astype(jnp.bfloat16)
            a = conv3x3(fill2, enc_scr[bi][1], enc_ix[bi]["w2"], enc_ix[bi]["b2"], Hc)
            a = bn_relu(a, enc_ix[bi], "2", float(B * Hc * Hc))
            if bi != 0:
                a = maxpool(a, pool_ix[bi])
                Hc //= 2
            skips.append(a)
            xv = a

        # ---- UNet decoder ----
        for li in range(n - 1):
            Ho = 2 * Hc
            Cu = steps[n - 2 - li]
            yv = upconv(xv, up_ix[li])                      # (Ho*B, G*Ho*Cu)
            skip = skips[n - 2 - li]
            cup = G * Ho * Cu

            def fillc(xp, a_up=yv, a_sk=skip, rows=Ho * B, cu=cup):
                # torch.cat([upconv(x), skip], dim=1) == disjoint column ranges of the slab
                xp[pl.ds(B, rows), pl.ds(0, cu)] = a_up.astype(jnp.bfloat16)
                xp[pl.ds(B, rows), pl.ds(cu, xp.shape[1] - cu)] = a_sk.astype(jnp.bfloat16)

            a = conv3x3(fillc, dec_scr[li], dec_ix[li]["w"], dec_ix[li]["b"], Ho)
            Hc = Ho
            if li < n - 2:
                xv = a
            else:
                # final 1x1 conv + per-generator activation (sigmoid for wall, identity for room)
                z = jnp.dot(a.astype(jnp.bfloat16), ins[dec_ix[li]["w1"]][...],
                            preferred_element_type=jnp.float32) + ins[dec_ix[li]["b1"]][...]
                m = ins[dec_ix[li]["mask"]][...]
                sig = 1.0 / (1.0 + jnp.exp(-z))
                out_ref[...] = m * sig + (1.0 - m) * z

    out = pl.pallas_call(
        kernel,
        out_shape=jax.ShapeDtypeStruct((S * B, G * S * out_max), jnp.float32),
        scratch_shapes=scratch_shapes,
    )(*args)

    # unfold: rows (y, b), cols (g, x, c)  ->  NCHW per generator (tiny XLA epilogue)
    r = out.reshape(S, B, G, S, out_max)
    walls = jnp.transpose(r[:, :, 0, :, :wall_out], (1, 3, 0, 2))
    rooms = jnp.transpose(r[:, :, 1, :, :room_out], (1, 3, 0, 2))
    if masking:
        walls = jnp.where(jnp.broadcast_to(floor_batch, walls.shape) == 0, 0.0, walls)
        rooms = jnp.where(jnp.broadcast_to(floor_batch, rooms.shape) == 0, 0.0, rooms)
    return walls, rooms


# ----------------------------------------------------------------------------
# Main
# ----------------------------------------------------------------------------
if __name__ == "__main__":
    IMAGE_SIZE = 16
    CHANNELS_STEP = (4, 8, 16)
    WALL_IN_CH, WALL_OUT_CH, WALL_REPEAT = 1, 1, 2
    ROOM_IN_CH, ROOM_OUT_CH, ROOM_REPEAT = 1, 4, 2
    BATCH = 2

    root = jax.random.PRNGKey(0)
    k_wall, k_room, k_floor, k_walls = jax.random.split(root, 4)

    raw_wall = init_generator(k_wall, WALL_IN_CH, WALL_OUT_CH, CHANNELS_STEP,
                              IMAGE_SIZE, WALL_REPEAT)
    raw_room = init_generator(k_room, ROOM_IN_CH, ROOM_OUT_CH, CHANNELS_STEP,
                              IMAGE_SIZE, ROOM_REPEAT)
    prepared = prepare_plan_generator(raw_wall, raw_room, IMAGE_SIZE, CHANNELS_STEP,
                                      WALL_OUT_CH, ROOM_OUT_CH)

    floor_batch = (jax.random.uniform(k_floor, (BATCH, 1, IMAGE_SIZE, IMAGE_SIZE)) > 0.5
                   ).astype(jnp.float32)
    walls_batch = (jax.random.uniform(k_walls, (BATCH, 1, IMAGE_SIZE, IMAGE_SIZE)) > 0.5
                   ).astype(jnp.float32)

    generated_walls, allocated_rooms = plan_generator_fwd(
        prepared, floor_batch, walls_batch,
        size=IMAGE_SIZE, steps=CHANNELS_STEP,
        wall_out=WALL_OUT_CH, room_out=ROOM_OUT_CH, masking=False)
    jax.block_until_ready((generated_walls, allocated_rooms))

    assert generated_walls.shape == (BATCH, WALL_OUT_CH, IMAGE_SIZE, IMAGE_SIZE)
    assert allocated_rooms.shape == (BATCH, ROOM_OUT_CH, IMAGE_SIZE, IMAGE_SIZE)
    assert bool(jnp.all(jnp.isfinite(generated_walls)))
    assert bool(jnp.all(jnp.isfinite(allocated_rooms)))
    print("KERNEL_OK")
</pallas_src>

<mosaic_0001>
module attributes {stable_mosaic.version = 11 : i64} {
  func.func @kernel(%arg0: memref<2x512xf32, #tpu.memory_space<vmem>>, %arg1: memref<512x64xbf16, #tpu.memory_space<vmem>>, %arg2: memref<1x64xf32, #tpu.memory_space<vmem>>, %arg3: memref<64x32xbf16, #tpu.memory_space<vmem>>, %arg4: memref<1x32xf32, #tpu.memory_space<vmem>>, %arg5: memref<32x64xbf16, #tpu.memory_space<vmem>>, %arg6: memref<1x64xf32, #tpu.memory_space<vmem>>, %arg7: memref<64x512xbf16, #tpu.memory_space<vmem>>, %arg8: memref<1x512xf32, #tpu.memory_space<vmem>>, %arg9: memref<3x32x128xbf16, #tpu.memory_space<vmem>>, %arg10: memref<1x128xf32, #tpu.memory_space<vmem>>, %arg11: memref<1x8xf32, #tpu.memory_space<vmem>>, %arg12: memref<1x8xf32, #tpu.memory_space<vmem>>, %arg13: memref<3x128x128xbf16, #tpu.memory_space<vmem>>, %arg14: memref<1x128xf32, #tpu.memory_space<vmem>>, %arg15: memref<1x8xf32, #tpu.memory_space<vmem>>, %arg16: memref<1x8xf32, #tpu.memory_space<vmem>>, %arg17: memref<128x8xf32, #tpu.memory_space<vmem>>, %arg18: memref<8x128xf32, #tpu.memory_space<vmem>>, %arg19: memref<3x128x256xbf16, #tpu.memory_space<vmem>>, %arg20: memref<1x256xf32, #tpu.memory_space<vmem>>, %arg21: memref<1x16xf32, #tpu.memory_space<vmem>>, %arg22: memref<1x16xf32, #tpu.memory_space<vmem>>, %arg23: memref<3x256x256xbf16, #tpu.memory_space<vmem>>, %arg24: memref<1x256xf32, #tpu.memory_space<vmem>>, %arg25: memref<1x16xf32, #tpu.memory_space<vmem>>, %arg26: memref<1x16xf32, #tpu.memory_space<vmem>>, %arg27: memref<256x16xf32, #tpu.memory_space<vmem>>, %arg28: memref<16x256xf32, #tpu.memory_space<vmem>>, %arg29: memref<3x128x256xbf16, #tpu.memory_space<vmem>>, %arg30: memref<1x256xf32, #tpu.memory_space<vmem>>, %arg31: memref<1x32xf32, #tpu.memory_space<vmem>>, %arg32: memref<1x32xf32, #tpu.memory_space<vmem>>, %arg33: memref<3x256x256xbf16, #tpu.memory_space<vmem>>, %arg34: memref<1x256xf32, #tpu.memory_space<vmem>>, %arg35: memref<1x32xf32, #tpu.memory_space<vmem>>, %arg36: memref<1x32xf32, #tpu.memory_space<vmem>>, %arg37: memref<256x32xf32, #tpu.memory_space<vmem>>, %arg38: memref<32x256xf32, #tpu.memory_space<vmem>>, %arg39: memref<256x128xbf16, #tpu.memory_space<vmem>>, %arg40: memref<256x128xbf16, #tpu.memory_space<vmem>>, %arg41: memref<16x32xbf16, #tpu.memory_space<vmem>>, %arg42: memref<16x32xbf16, #tpu.memory_space<vmem>>, %arg43: memref<256x128xbf16, #tpu.memory_space<vmem>>, %arg44: memref<256x128xbf16, #tpu.memory_space<vmem>>, %arg45: memref<8x16xbf16, #tpu.memory_space<vmem>>, %arg46: memref<8x16xbf16, #tpu.memory_space<vmem>>, %arg47: memref<2x128x128xbf16, #tpu.memory_space<vmem>>, %arg48: memref<1x128xf32, #tpu.memory_space<vmem>>, %arg49: memref<16x8xbf16, #tpu.memory_space<vmem>>, %arg50: memref<16x8xbf16, #tpu.memory_space<vmem>>, %arg51: memref<3x256x128xbf16, #tpu.memory_space<vmem>>, %arg52: memref<1x128xf32, #tpu.memory_space<vmem>>, %arg53: memref<2x128x128xbf16, #tpu.memory_space<vmem>>, %arg54: memref<1x128xf32, #tpu.memory_space<vmem>>, %arg55: memref<32x16xbf16, #tpu.memory_space<vmem>>, %arg56: memref<32x16xbf16, #tpu.memory_space<vmem>>, %arg57: memref<3x256x128xbf16, #tpu.memory_space<vmem>>, %arg58: memref<1x128xf32, #tpu.memory_space<vmem>>, %arg59: memref<128x128xbf16, #tpu.memory_space<vmem>>, %arg60: memref<1x128xf32, #tpu.memory_space<vmem>>, %arg61: memref<1x128xf32, #tpu.memory_space<vmem>>, %arg62: memref<32x128xf32, #tpu.memory_space<vmem>>, %arg63: memref<36x32xbf16, #tpu.memory_space<vmem>>, %arg64: memref<36x128xbf16, #tpu.memory_space<vmem>>, %arg65: memref<36x256xbf16, #tpu.memory_space<vmem>>, %arg66: memref<20x128xbf16, #tpu.memory_space<vmem>>, %arg67: memref<20x256xbf16, #tpu.memory_space<vmem>>) attributes {dimension_semantics = [], scalar_prefetch = 0 : i64, scratch_operands = 5 : i64, tpu.core_type = #tpu.core_type<tc>} {
    %c0 = arith.constant 0 : index
    %c0_0 = arith.constant 0 : index
    %0 = vector.load %arg0[%c0, %c0_0] : memref<2x512xf32, #tpu.memory_space<vmem>>, vector<2x512xf32>
    %1 = arith.truncf %0 : vector<2x512xf32> to vector<2x512xbf16>
    %c0_1 = arith.constant 0 : index
    %c0_2 = arith.constant 0 : index
    %2 = vector.load %arg1[%c0_1, %c0_2] : memref<512x64xbf16, #tpu.memory_space<vmem>>, vector<512x64xbf16>
    %cst = arith.constant dense<0.000000e+00> : vector<2x64xf32>
    %3 = tpu.matmul %1, %2, %cst {dimension_numbers = #tpu.dot_dimension_numbers<[1], [0], [0], [1], [0, 0, 1, 1], [], []>} : vector<2x512xbf16>, vector<512x64xbf16>, vector<2x64xf32> -> vector<2x64xf32>
    %c0_3 = arith.constant 0 : index
    %c0_4 = arith.constant 0 : index
    %4 = vector.load %arg2[%c0_3, %c0_4] : memref<1x64xf32, #tpu.memory_space<vmem>>, vector<1x64xf32>
    %5 = vector.broadcast %4 : vector<1x64xf32> to vector<2x64xf32>
    %6 = arith.addf %3, %5 : vector<2x64xf32>
    %cst_5 = arith.constant 0.000000e+00 : f32
    %7 = vector.broadcast %cst_5 : f32 to vector<2x64xf32>
    %8 = arith.maximumf %6, %7 : vector<2x64xf32>
    %9 = arith.truncf %8 : vector<2x64xf32> to vector<2x64xbf16>
    %c0_6 = arith.constant 0 : index
    %c0_7 = arith.constant 0 : index
    %10 = vector.load %arg3[%c0_6, %c0_7] : memref<64x32xbf16, #tpu.memory_space<vmem>>, vector<64x32xbf16>
    %cst_8 = arith.constant dense<0.000000e+00> : vector<2x32xf32>
    %11 = tpu.matmul %9, %10, %cst_8 {dimension_numbers = #tpu.dot_dimension_numbers<[1], [0], [0], [1], [0, 0, 1, 1], [], []>} : vector<2x64xbf16>, vector<64x32xbf16>, vector<2x32xf32> -> vector<2x32xf32>
    %c0_9 = arith.constant 0 : index
    %c0_10 = arith.constant 0 : index
    %12 = vector.load %arg4[%c0_9, %c0_10] : memref<1x32xf32, #tpu.memory_space<vmem>>, vector<1x32xf32>
    %13 = vector.broadcast %12 : vector<1x32xf32> to vector<2x32xf32>
    %14 = arith.addf %11, %13 : vector<2x32xf32>
    %cst_11 = arith.constant 0.000000e+00 : f32
    %15 = vector.broadcast %cst_11 : f32 to vector<2x32xf32>
    %16 = arith.maximumf %14, %15 : vector<2x32xf32>
    %17 = arith.truncf %16 : vector<2x32xf32> to vector<2x32xbf16>
    %c0_12 = arith.constant 0 : index
    %c0_13 = arith.constant 0 : index
    %18 = vector.load %arg5[%c0_12, %c0_13] : memref<32x64xbf16, #tpu.memory_space<vmem>>, vector<32x64xbf16>
    %cst_14 = arith.constant dense<0.000000e+00> : vector<2x64xf32>
    %19 = tpu.matmul %17, %18, %cst_14 {dimension_numbers = #tpu.dot_dimension_numbers<[1], [0], [0], [1], [0, 0, 1, 1], [], []>} : vector<2x32xbf16>, vector<32x64xbf16>, vector<2x64xf32> -> vector<2x64xf32>
    %c0_15 = arith.constant 0 : index
    %c0_16 = arith.constant 0 : index
    %20 = vector.load %arg6[%c0_15, %c0_16] : memref<1x64xf32, #tpu.memory_space<vmem>>, vector<1x64xf32>
    %21 = vector.broadcast %20 : vector<1x64xf32> to vector<2x64xf32>
    %22 = arith.addf %19, %21 : vector<2x64xf32>
    %cst_17 = arith.constant 0.000000e+00 : f32
    %23 = vector.broadcast %cst_17 : f32 to vector<2x64xf32>
    %24 = arith.maximumf %22, %23 : vector<2x64xf32>
    %25 = arith.truncf %24 : vector<2x64xf32> to vector<2x64xbf16>
    %c0_18 = arith.constant 0 : index
    %c0_19 = arith.constant 0 : index
    %26 = vector.load %arg7[%c0_18, %c0_19] : memref<64x512xbf16, #tpu.memory_space<vmem>>, vector<64x512xbf16>
    %cst_20 = arith.constant dense<0.000000e+00> : vector<2x512xf32>
    %27 = tpu.matmul %25, %26, %cst_20 {dimension_numbers = #tpu.dot_dimension_numbers<[1], [0], [0], [1], [0, 0, 1, 1], [], []>} : vector<2x64xbf16>, vector<64x512xbf16>, vector<2x512xf32> -> vector<2x512xf32>
    %c0_21 = arith.constant 0 : index
    %c0_22 = arith.constant 0 : index
    %28 = vector.load %arg8[%c0_21, %c0_22] : memref<1x512xf32, #tpu.memory_space<vmem>>, vector<1x512xf32>
    %29 = vector.broadcast %28 : vector<1x512xf32> to vector<2x512xf32>
    %30 = arith.addf %27, %29 : vector<2x512xf32>
    %cst_23 = arith.constant 0.000000e+00 : f32
    %31 = vector.broadcast %cst_23 : f32 to vector<2x512xf32>
    %32 = arith.maximumf %30, %31 : vector<2x512xf32>
    %cst_24 = arith.constant 0.000000e+00 : bf16
    %33 = vector.broadcast %cst_24 : bf16 to vector<2x32xbf16>
    %c0_25 = arith.constant 0 : index
    %c0_26 = arith.constant 0 : index
    %34 = vector.load %arg63[%c0_25, %c0_26] : memref<36x32xbf16, #tpu.memory_space<vmem>>, vector<2x32xbf16>
    tpu.vector_store %arg63[%c0_25, %c0_26], %33 {strides = array<i32>} : memref<36x32xbf16, #tpu.memory_space<vmem>>, vector<2x32xbf16>,
    %c34 = arith.constant 34 : index
    %c0_27 = arith.constant 0 : index
    %35 = vector.load %arg63[%c34, %c0_27] : memref<36x32xbf16, #tpu.memory_space<vmem>>, vector<2x32xbf16>
    tpu.vector_store %arg63[%c34, %c0_27], %33 {strides = array<i32>} : memref<36x32xbf16, #tpu.memory_space<vmem>>, vector<2x32xbf16>,
    %36 = vector.extract_strided_slice %32 {offsets = [0, 0], sizes = [2, 32], strides = [1, 1]} : vector<2x512xf32> to vector<2x32xf32>
    %37 = arith.truncf %36 : vector<2x32xf32> to vector<2x32xbf16>
    %c2 = arith.constant 2 : index
    %c0_28 = arith.constant 0 : index
    %38 = vector.load %arg63[%c2, %c0_28] : memref<36x32xbf16, #tpu.memory_space<vmem>>, vector<2x32xbf16>
    tpu.vector_store %arg63[%c2, %c0_28], %37 {strides = array<i32>} : memref<36x32xbf16, #tpu.memory_space<vmem>>, vector<2x32xbf16>,
    %39 = vector.extract_strided_slice %32 {offsets = [0, 32], sizes = [2, 32], strides = [1, 1]} : vector<2x512xf32> to vector<2x32xf32>
    %40 = arith.truncf %39 : vector<2x32xf32> to vector<2x32xbf16>
    %c4 = arith.constant 4 : index
    %c0_29 = arith.constant 0 : index
    %41 = vector.load %arg63[%c4, %c0_29] : memref<36x32xbf16, #tpu.memory_space<vmem>>, vector<2x32xbf16>
    tpu.vector_store %arg63[%c4, %c0_29], %40 {strides = array<i32>} : memref<36x32xbf16, #tpu.memory_space<vmem>>, vector<2x32xbf16>,
    %42 = vector.extract_strided_slice %32 {offsets = [0, 64], sizes = [2, 32], strides = [1, 1]} : vector<2x512xf32> to vector<2x32xf32>
    %43 = arith.truncf %42 : vector<2x32xf32> to vector<2x32xbf16>
    %c6 = arith.constant 6 : index
    %c0_30 = arith.constant 0 : index
    %44 = vector.load %arg63[%c6, %c0_30] : memref<36x32xbf16, #tpu.memory_space<vmem>>, vector<2x32xbf16>
    tpu.vector_store %arg63[%c6, %c0_30], %43 {strides = array<i32>} : memref<36x32xbf16, #tpu.memory_space<vmem>>, vector<2x32xbf16>,
    %45 = vector.extract_strided_slice %32 {offsets = [0, 96], sizes = [2, 32], strides = [1, 1]} : vector<2x512xf32> to vector<2x32xf32>
    %46 = arith.truncf %45 : vector<2x32xf32> to vector<2x32xbf16>
    %c8 = arith.constant 8 : index
    %c0_31 = arith.constant 0 : index
    %47 = vector.load %arg63[%c8, %c0_31] : memref<36x32xbf16, #tpu.memory_space<vmem>>, vector<2x32xbf16>
    tpu.vector_store %arg63[%c8, %c0_31], %46 {strides = array<i32>} : memref<36x32xbf16, #tpu.memory_space<vmem>>, vector<2x32xbf16>,
    %48 = vector.extract_strided_slice %32 {offsets = [0, 128], sizes = [2, 32], strides = [1, 1]} : vector<2x512xf32> to vector<2x32xf32>
    %49 = arith.truncf %48 : vector<2x32xf32> to vector<2x32xbf16>
    %c10 = arith.constant 10 : index
    %c0_32 = arith.constant 0 : index
    %50 = vector.load %arg63[%c10, %c0_32] : memref<36x32xbf16, #tpu.memory_space<vmem>>, vector<2x32xbf16>
    tpu.vector_store %arg63[%c10, %c0_32], %49 {strides = array<i32>} : memref<36x32xbf16, #tpu.memory_space<vmem>>, vector<2x32xbf16>,
    %51 = vector.extract_strided_slice %32 {offsets = [0, 160], sizes = [2, 32], strides = [1, 1]} : vector<2x512xf32> to vector<2x32xf32>
    %52 = arith.truncf %51 : vector<2x32xf32> to vector<2x32xbf16>
    %c12 = arith.constant 12 : index
    %c0_33 = arith.constant 0 : index
    %53 = vector.load %arg63[%c12, %c0_33] : memref<36x32xbf16, #tpu.memory_space<vmem>>, vector<2x32xbf16>
    tpu.vector_store %arg63[%c12, %c0_33], %52 {strides = array<i32>} : memref<36x32xbf16, #tpu.memory_space<vmem>>, vector<2x32xbf16>,
    %54 = vector.extract_strided_slice %32 {offsets = [0, 192], sizes = [2, 32], strides = [1, 1]} : vector<2x512xf32> to vector<2x32xf32>
    %55 = arith.truncf %54 : vector<2x32xf32> to vector<2x32xbf16>
    %c14 = arith.constant 14 : index
    %c0_34 = arith.constant 0 : index
    %56 = vector.load %arg63[%c14, %c0_34] : memref<36x32xbf16, #tpu.memory_space<vmem>>, vector<2x32xbf16>
    tpu.vector_store %arg63[%c14, %c0_34], %55 {strides = array<i32>} : memref<36x32xbf16, #tpu.memory_space<vmem>>, vector<2x32xbf16>,
    %57 = vector.extract_strided_slice %32 {offsets = [0, 224], sizes = [2, 32], strides = [1, 1]} : vector<2x512xf32> to vector<2x32xf32>
    %58 = arith.truncf %57 : vector<2x32xf32> to vector<2x32xbf16>
    %c16 = arith.constant 16 : index
    %c0_35 = arith.constant 0 : index
    %59 = vector.load %arg63[%c16, %c0_35] : memref<36x32xbf16, #tpu.memory_space<vmem>>, vector<2x32xbf16>
    tpu.vector_store %arg63[%c16, %c0_35], %58 {strides = array<i32>} : memref<36x32xbf16, #tpu.memory_space<vmem>>, vector<2x32xbf16>,
    %60 = vector.extract_strided_slice %32 {offsets = [0, 256], sizes = [2, 32], strides = [1, 1]} : vector<2x512xf32> to vector<2x32xf32>
    %61 = arith.truncf %60 : vector<2x32xf32> to vector<2x32xbf16>
    %c18 = arith.constant 18 : index
    %c0_36 = arith.constant 0 : index
    %62 = vector.load %arg63[%c18, %c0_36] : memref<36x32xbf16, #tpu.memory_space<vmem>>, vector<2x32xbf16>
    tpu.vector_store %arg63[%c18, %c0_36], %61 {strides = array<i32>} : memref<36x32xbf16, #tpu.memory_space<vmem>>, vector<2x32xbf16>,
    %63 = vector.extract_strided_slice %32 {offsets = [0, 288], sizes = [2, 32], strides = [1, 1]} : vector<2x512xf32> to vector<2x32xf32>
    %64 = arith.truncf %63 : vector<2x32xf32> to vector<2x32xbf16>
    %c20 = arith.constant 20 : index
    %c0_37 = arith.constant 0 : index
    %65 = vector.load %arg63[%c20, %c0_37] : memref<36x32xbf16, #tpu.memory_space<vmem>>, vector<2x32xbf16>
    tpu.vector_store %arg63[%c20, %c0_37], %64 {strides = array<i32>} : memref<36x32xbf16, #tpu.memory_space<vmem>>, vector<2x32xbf16>,
    %66 = vector.extract_strided_slice %32 {offsets = [0, 320], sizes = [2, 32], strides = [1, 1]} : vector<2x512xf32> to vector<2x32xf32>
    %67 = arith.truncf %66 : vector<2x32xf32> to vector<2x32xbf16>
    %c22 = arith.constant 22 : index
    %c0_38 = arith.constant 0 : index
    %68 = vector.load %arg63[%c22, %c0_38] : memref<36x32xbf16, #tpu.memory_space<vmem>>, vector<2x32xbf16>
    tpu.vector_store %arg63[%c22, %c0_38], %67 {strides = array<i32>} : memref<36x32xbf16, #tpu.memory_space<vmem>>, vector<2x32xbf16>,
    %69 = vector.extract_strided_slice %32 {offsets = [0, 352], sizes = [2, 32], strides = [1, 1]} : vector<2x512xf32> to vector<2x32xf32>
    %70 = arith.truncf %69 : vector<2x32xf32> to vector<2x32xbf16>
    %c24 = arith.constant 24 : index
    %c0_39 = arith.constant 0 : index
    %71 = vector.load %arg63[%c24, %c0_39] : memref<36x32xbf16, #tpu.memory_space<vmem>>, vector<2x32xbf16>
    tpu.vector_store %arg63[%c24, %c0_39], %70 {strides = array<i32>} : memref<36x32xbf16, #tpu.memory_space<vmem>>, vector<2x32xbf16>,
    %72 = vector.extract_strided_slice %32 {offsets = [0, 384], sizes = [2, 32], strides = [1, 1]} : vector<2x512xf32> to vector<2x32xf32>
    %73 = arith.truncf %72 : vector<2x32xf32> to vector<2x32xbf16>
    %c26 = arith.constant 26 : index
    %c0_40 = arith.constant 0 : index
    %74 = vector.load %arg63[%c26, %c0_40] : memref<36x32xbf16, #tpu.memory_space<vmem>>, vector<2x32xbf16>
    tpu.vector_store %arg63[%c26, %c0_40], %73 {strides = array<i32>} : memref<36x32xbf16, #tpu.memory_space<vmem>>, vector<2x32xbf16>,
    %75 = vector.extract_strided_slice %32 {offsets = [0, 416], sizes = [2, 32], strides = [1, 1]} : vector<2x512xf32> to vector<2x32xf32>
    %76 = arith.truncf %75 : vector<2x32xf32> to vector<2x32xbf16>
    %c28 = arith.constant 28 : index
    %c0_41 = arith.constant 0 : index
    %77 = vector.load %arg63[%c28, %c0_41] : memref<36x32xbf16, #tpu.memory_space<vmem>>, vector<2x32xbf16>
    tpu.vector_store %arg63[%c28, %c0_41], %76 {strides = array<i32>} : memref<36x32xbf16, #tpu.memory_space<vmem>>, vector<2x32xbf16>,
    %78 = vector.extract_strided_slice %32 {offsets = [0, 448], sizes = [2, 32], strides = [1, 1]} : vector<2x512xf32> to vector<2x32xf32>
    %79 = arith.truncf %78 : vector<2x32xf32> to vector<2x32xbf16>
    %c30 = arith.constant 30 : index
    %c0_42 = arith.constant 0 : index
    %80 = vector.load %arg63[%c30, %c0_42] : memref<36x32xbf16, #tpu.memory_space<vmem>>, vector<2x32xbf16>
    tpu.vector_store %arg63[%c30, %c0_42], %79 {strides = array<i32>} : memref<36x32xbf16, #tpu.memory_space<vmem>>, vector<2x32xbf16>,
    %81 = vector.extract_strided_slice %32 {offsets = [0, 480], sizes = [2, 32], strides = [1, 1]} : vector<2x512xf32> to vector<2x32xf32>
    %82 = arith.truncf %81 : vector<2x32xf32> to vector<2x32xbf16>
    %c32 = arith.constant 32 : index
    %c0_43 = arith.constant 0 : index
    %83 = vector.load %arg63[%c32, %c0_43] : memref<36x32xbf16, #tpu.memory_space<vmem>>, vector<2x32xbf16>
    tpu.vector_store %arg63[%c32, %c0_43], %82 {strides = array<i32>} : memref<36x32xbf16, #tpu.memory_space<vmem>>, vector<2x32xbf16>,
    %c0_44 = arith.constant 0 : index
    %c0_45 = arith.constant 0 : index
    %84 = vector.load %arg63[%c0_44, %c0_45] : memref<36x32xbf16, #tpu.memory_space<vmem>>, vector<32x32xbf16>
    %c0_46 = arith.constant 0 : index
    %c0_47 = arith.constant 0 : index
    %c0_48 = arith.constant 0 : index
    %85 = vector.load %arg9[%c0_46, %c0_47, %c0_48] : memref<3x32x128xbf16, #tpu.memory_space<vmem>>, vector<1x32x128xbf16>
    %86 = vector.shape_cast %85 : vector<1x32x128xbf16> to vector<32x128xbf16>
    %cst_49 = arith.constant dense<0.000000e+00> : vector<32x128xf32>
    %87 = tpu.matmul %84, %86, %cst_49 {dimension_numbers = #tpu.dot_dimension_numbers<[1], [0], [0], [1], [0, 0, 1, 1], [], []>} : vector<32x32xbf16>, vector<32x128xbf16>, vector<32x128xf32> -> vector<32x128xf32>
    %c2_50 = arith.constant 2 : index
    %c0_51 = arith.constant 0 : index
    %88 = vector.load %arg63[%c2_50, %c0_51] : memref<36x32xbf16, #tpu.memory_space<vmem>>, vector<32x32xbf16>
    %c1 = arith.constant 1 : index
    %c0_52 = arith.constant 0 : index
    %c0_53 = arith.constant 0 : index
    %89 = vector.load %arg9[%c1, %c0_52, %c0_53] : memref<3x32x128xbf16, #tpu.memory_space<vmem>>, vector<1x32x128xbf16>
    %90 = vector.shape_cast %89 : vector<1x32x128xbf16> to vector<32x128xbf16>
    %cst_54 = arith.constant dense<0.000000e+00> : vector<32x128xf32>
    %91 = tpu.matmul %88, %90, %cst_54 {dimension_numbers = #tpu.dot_dimension_numbers<[1], [0], [0], [1], [0, 0, 1, 1], [], []>} : vector<32x32xbf16>, vector<32x128xbf16>, vector<32x128xf32> -> vector<32x128xf32>
    %92 = arith.addf %87, %91 : vector<32x128xf32>
    %c4_55 = arith.constant 4 : index
    %c0_56 = arith.constant 0 : index
    %93 = vector.load %arg63[%c4_55, %c0_56] : memref<36x32xbf16, #tpu.memory_space<vmem>>, vector<32x32xbf16>
    %c2_57 = arith.constant 2 : index
    %c0_58 = arith.constant 0 : index
    %c0_59 = arith.constant 0 : index
    %94 = vector.load %arg9[%c2_57, %c0_58, %c0_59] : memref<3x32x128xbf16, #tpu.memory_space<vmem>>, vector<1x32x128xbf16>
    %95 = vector.shape_cast %94 : vector<1x32x128xbf16> to vector<32x128xbf16>
    %cst_60 = arith.constant dense<0.000000e+00> : vector<32x128xf32>
    %96 = tpu.matmul %93, %95, %cst_60 {dimension_numbers = #tpu.dot_dimension_numbers<[1], [0], [0], [1], [0, 0, 1, 1], [], []>} : vector<32x32xbf16>, vector<32x128xbf16>, vector<32x128xf32> -> vector<32x128xf32>
    %97 = arith.addf %92, %96 : vector<32x128xf32>
    %c0_61 = arith.constant 0 : index
    %c0_62 = arith.constant 0 : index
    %98 = vector.load %arg10[%c0_61, %c0_62] : memref<1x128xf32, #tpu.memory_space<vmem>>, vector<1x128xf32>
    %99 = vector.broadcast %98 : vector<1x128xf32> to vector<32x128xf32>
    %100 = arith.addf %97, %99 : vector<32x128xf32>
    %c0_63 = arith.constant 0 : index
    %c0_64 = arith.constant 0 : index
    %101 = vector.load %arg11[%c0_63, %c0_64] : memref<1x8xf32, #tpu.memory_space<vmem>>, vector<1x8xf32>
    %c0_65 = arith.constant 0 : index
    %c0_66 = arith.constant 0 : index
    %102 = vector.load %arg12[%c0_65, %c0_66] : memref<1x8xf32, #tpu.memory_space<vmem>>, vector<1x8xf32>
    %c0_67 = arith.constant 0 : index
    %c0_68 = arith.constant 0 : index
    %103 = vector.load %arg17[%c0_67, %c0_68] : memref<128x8xf32, #tpu.memory_space<vmem>>, vector<128x8xf32>
    %c0_69 = arith.constant 0 : index
    %c0_70 = arith.constant 0 : index
    %104 = vector.load %arg18[%c0_69, %c0_70] : memref<8x128xf32, #tpu.memory_space<vmem>>, vector<8x128xf32>
    %cst_71 = arith.constant dense<0.000000e+00> : vector<128xf32>
    %105 = vector.multi_reduction <add>, %100, %cst_71 [0] : vector<32x128xf32> to vector<128xf32>
    %106 = vector.shape_cast %105 : vector<128xf32> to vector<1x128xf32>
    %107 = arith.mulf %100, %100 : vector<32x128xf32>
    %cst_72 = arith.constant dense<0.000000e+00> : vector<128xf32>
    %108 = vector.multi_reduction <add>, %107, %cst_72 [0] : vector<32x128xf32> to vector<128xf32>
    %109 = vector.shape_cast %108 : vector<128xf32> to vector<1x128xf32>
    %110 = tpu.concatenate %106, %109 in 0 : vector<1x128xf32>, vector<1x128xf32> -> vector<2x128xf32>
    %cst_73 = arith.constant dense<0.000000e+00> : vector<2x8xf32>
    %111 = tpu.matmul %110, %103, %cst_73 {dimension_numbers = #tpu.dot_dimension_numbers<[1], [0], [0], [1], [0, 0, 1, 1], [], []>} : vector<2x128xf32>, vector<128x8xf32>, vector<2x8xf32> -> vector<2x8xf32>
    %112 = vector.extract_strided_slice %111 {offsets = [0, 0], sizes = [1, 8], strides = [1, 1]} : vector<2x8xf32> to vector<1x8xf32>
    %cst_74 = arith.constant 0.001953125 : f32
    %113 = vector.broadcast %cst_74 : f32 to vector<1x8xf32>
    %114 = arith.mulf %112, %113 : vector<1x8xf32>
    %115 = vector.extract_strided_slice %111 {offsets = [1, 0], sizes = [1, 8], strides = [1, 1]} : vector<2x8xf32> to vector<1x8xf32>
    %cst_75 = arith.constant 0.001953125 : f32
    %116 = vector.broadcast %cst_75 : f32 to vector<1x8xf32>
    %117 = arith.mulf %115, %116 : vector<1x8xf32>
    %118 = arith.mulf %114, %114 : vector<1x8xf32>
    %119 = arith.subf %117, %118 : vector<1x8xf32>
    %cst_76 = arith.constant 9.99999974E-6 : f32
    %120 = vector.broadcast %cst_76 : f32 to vector<1x8xf32>
    %121 = arith.addf %119, %120 : vector<1x8xf32>
    %122 = math.rsqrt %121 : vector<1x8xf32>
    %123 = arith.mulf %101, %122 : vector<1x8xf32>
    %124 = arith.mulf %114, %123 : vector<1x8xf32>
    %125 = arith.subf %102, %124 : vector<1x8xf32>
    %126 = tpu.concatenate %123, %125 in 0 : vector<1x8xf32>, vector<1x8xf32> -> vector<2x8xf32>
    %cst_77 = arith.constant dense<0.000000e+00> : vector<2x128xf32>
    %127 = tpu.matmul %126, %104, %cst_77 {dimension_numbers = #tpu.dot_dimension_numbers<[1], [0], [0], [1], [0, 0, 1, 1], [], []>} : vector<2x8xf32>, vector<8x128xf32>, vector<2x128xf32> -> vector<2x128xf32>
    %128 = vector.extract_strided_slice %127 {offsets = [0, 0], sizes = [1, 128], strides = [1, 1]} : vector<2x128xf32> to vector<1x128xf32>
    %129 = vector.broadcast %128 : vector<1x128xf32> to vector<32x128xf32>
    %130 = arith.mulf %100, %129 : vector<32x128xf32>
    %131 = vector.extract_strided_slice %127 {offsets = [1, 0], sizes = [1, 128], strides = [1, 1]} : vector<2x128xf32> to vector<1x128xf32>
    %132 = vector.broadcast %131 : vector<1x128xf32> to vector<32x128xf32>
    %133 = arith.addf %130, %132 : vector<32x128xf32>
    %cst_78 = arith.constant 0.000000e+00 : f32
    %134 = vector.broadcast %cst_78 : f32 to vector<32x128xf32>
    %135 = arith.maximumf %133, %134 : vector<32x128xf32>
    %cst_79 = arith.constant 0.000000e+00 : bf16
    %136 = vector.broadcast %cst_79 : bf16 to vector<2x128xbf16>
    %c0_80 = arith.constant 0 : index
    %c0_81 = arith.constant 0 : index
    %137 = vector.load %arg64[%c0_80, %c0_81] : memref<36x128xbf16, #tpu.memory_space<vmem>>, vector<2x128xbf16>
    tpu.vector_store %arg64[%c0_80, %c0_81], %136 {strides = array<i32>} : memref<36x128xbf16, #tpu.memory_space<vmem>>, vector<2x128xbf16>,
    %c34_82 = arith.constant 34 : index
    %c0_83 = arith.constant 0 : index
    %138 = vector.load %arg64[%c34_82, %c0_83] : memref<36x128xbf16, #tpu.memory_space<vmem>>, vector<2x128xbf16>
    tpu.vector_store %arg64[%c34_82, %c0_83], %136 {strides = array<i32>} : memref<36x128xbf16, #tpu.memory_space<vmem>>, vector<2x128xbf16>,
    %139 = arith.truncf %135 : vector<32x128xf32> to vector<32x128xbf16>
    %c2_84 = arith.constant 2 : index
    %c0_85 = arith.constant 0 : index
    %140 = vector.load %arg64[%c2_84, %c0_85] : memref<36x128xbf16, #tpu.memory_space<vmem>>, vector<32x128xbf16>
    tpu.vector_store %arg64[%c2_84, %c0_85], %139 {strides = array<i32>} : memref<36x128xbf16, #tpu.memory_space<vmem>>, vector<32x128xbf16>,
    %c0_86 = arith.constant 0 : index
    %c0_87 = arith.constant 0 : index
    %141 = vector.load %arg64[%c0_86, %c0_87] : memref<36x128xbf16, #tpu.memory_space<vmem>>, vector<32x128xbf16>
    %c0_88 = arith.constant 0 : index
    %c0_89 = arith.constant 0 : index
    %c0_90 = arith.constant 0 : index
    %142 = vector.load %arg13[%c0_88, %c0_89, %c0_90] : memref<3x128x128xbf16, #tpu.memory_space<vmem>>, vector<1x128x128xbf16>
    %143 = vector.shape_cast %142 : vector<1x128x128xbf16> to vector<128x128xbf16>
    %cst_91 = arith.constant dense<0.000000e+00> : vector<32x128xf32>
    %144 = tpu.matmul %141, %143, %cst_91 {dimension_numbers = #tpu.dot_dimension_numbers<[1], [0], [0], [1], [0, 0, 1, 1], [], []>} : vector<32x128xbf16>, vector<128x128xbf16>, vector<32x128xf32> -> vector<32x128xf32>
    %c2_92 = arith.constant 2 : index
    %c0_93 = arith.constant 0 : index
    %145 = vector.load %arg64[%c2_92, %c0_93] : memref<36x128xbf16, #tpu.memory_space<vmem>>, vector<32x128xbf16>
    %c1_94 = arith.constant 1 : index
    %c0_95 = arith.constant 0 : index
    %c0_96 = arith.constant 0 : index
    %146 = vector.load %arg13[%c1_94, %c0_95, %c0_96] : memref<3x128x128xbf16, #tpu.memory_space<vmem>>, vector<1x128x128xbf16>
    %147 = vector.shape_cast %146 : vector<1x128x128xbf16> to vector<128x128xbf16>
    %cst_97 = arith.constant dense<0.000000e+00> : vector<32x128xf32>
    %148 = tpu.matmul %145, %147, %cst_97 {dimension_numbers = #tpu.dot_dimension_numbers<[1], [0], [0], [1], [0, 0, 1, 1], [], []>} : vector<32x128xbf16>, vector<128x128xbf16>, vector<32x128xf32> -> vector<32x128xf32>
    %149 = arith.addf %144, %148 : vector<32x128xf32>
    %c4_98 = arith.constant 4 : index
    %c0_99 = arith.constant 0 : index
    %150 = vector.load %arg64[%c4_98, %c0_99] : memref<36x128xbf16, #tpu.memory_space<vmem>>, vector<32x128xbf16>
    %c2_100 = arith.constant 2 : index
    %c0_101 = arith.constant 0 : index
    %c0_102 = arith.constant 0 : index
    %151 = vector.load %arg13[%c2_100, %c0_101, %c0_102] : memref<3x128x128xbf16, #tpu.memory_space<vmem>>, vector<1x128x128xbf16>
    %152 = vector.shape_cast %151 : vector<1x128x128xbf16> to vector<128x128xbf16>
    %cst_103 = arith.constant dense<0.000000e+00> : vector<32x128xf32>
    %153 = tpu.matmul %150, %152, %cst_103 {dimension_numbers = #tpu.dot_dimension_numbers<[1], [0], [0], [1], [0, 0, 1, 1], [], []>} : vector<32x128xbf16>, vector<128x128xbf16>, vector<32x128xf32> -> vector<32x128xf32>
    %154 = arith.addf %149, %153 : vector<32x128xf32>
    %c0_104 = arith.constant 0 : index
    %c0_105 = arith.constant 0 : index
    %155 = vector.load %arg14[%c0_104, %c0_105] : memref<1x128xf32, #tpu.memory_space<vmem>>, vector<1x128xf32>
    %156 = vector.broadcast %155 : vector<1x128xf32> to vector<32x128xf32>
    %157 = arith.addf %154, %156 : vector<32x128xf32>
    %c0_106 = arith.constant 0 : index
    %c0_107 = arith.constant 0 : index
    %158 = vector.load %arg15[%c0_106, %c0_107] : memref<1x8xf32, #tpu.memory_space<vmem>>, vector<1x8xf32>
    %c0_108 = arith.constant 0 : index
    %c0_109 = arith.constant 0 : index
    %159 = vector.load %arg16[%c0_108, %c0_109] : memref<1x8xf32, #tpu.memory_space<vmem>>, vector<1x8xf32>
    %c0_110 = arith.constant 0 : index
    %c0_111 = arith.constant 0 : index
    %160 = vector.load %arg17[%c0_110, %c0_111] : memref<128x8xf32, #tpu.memory_space<vmem>>, vector<128x8xf32>
    %c0_112 = arith.constant 0 : index
    %c0_113 = arith.constant 0 : index
    %161 = vector.load %arg18[%c0_112, %c0_113] : memref<8x128xf32, #tpu.memory_space<vmem>>, vector<8x128xf32>
    %cst_114 = arith.constant dense<0.000000e+00> : vector<128xf32>
    %162 = vector.multi_reduction <add>, %157, %cst_114 [0] : vector<32x128xf32> to vector<128xf32>
    %163 = vector.shape_cast %162 : vector<128xf32> to vector<1x128xf32>
    %164 = arith.mulf %157, %157 : vector<32x128xf32>
    %cst_115 = arith.constant dense<0.000000e+00> : vector<128xf32>
    %165 = vector.multi_reduction <add>, %164, %cst_115 [0] : vector<32x128xf32> to vector<128xf32>
    %166 = vector.shape_cast %165 : vector<128xf32> to vector<1x128xf32>
    %167 = tpu.concatenate %163, %166 in 0 : vector<1x128xf32>, vector<1x128xf32> -> vector<2x128xf32>
    %cst_116 = arith.constant dense<0.000000e+00> : vector<2x8xf32>
    %168 = tpu.matmul %167, %160, %cst_116 {dimension_numbers = #tpu.dot_dimension_numbers<[1], [0], [0], [1], [0, 0, 1, 1], [], []>} : vector<2x128xf32>, vector<128x8xf32>, vector<2x8xf32> -> vector<2x8xf32>
    %169 = vector.extract_strided_slice %168 {offsets = [0, 0], sizes = [1, 8], strides = [1, 1]} : vector<2x8xf32> to vector<1x8xf32>
    %cst_117 = arith.constant 0.001953125 : f32
    %170 = vector.broadcast %cst_117 : f32 to vector<1x8xf32>
    %171 = arith.mulf %169, %170 : vector<1x8xf32>
    %172 = vector.extract_strided_slice %168 {offsets = [1, 0], sizes = [1, 8], strides = [1, 1]} : vector<2x8xf32> to vector<1x8xf32>
    %cst_118 = arith.constant 0.001953125 : f32
    %173 = vector.broadcast %cst_118 : f32 to vector<1x8xf32>
    %174 = arith.mulf %172, %173 : vector<1x8xf32>
    %175 = arith.mulf %171, %171 : vector<1x8xf32>
    %176 = arith.subf %174, %175 : vector<1x8xf32>
    %cst_119 = arith.constant 9.99999974E-6 : f32
    %177 = vector.broadcast %cst_119 : f32 to vector<1x8xf32>
    %178 = arith.addf %176, %177 : vector<1x8xf32>
    %179 = math.rsqrt %178 : vector<1x8xf32>
    %180 = arith.mulf %158, %179 : vector<1x8xf32>
    %181 = arith.mulf %171, %180 : vector<1x8xf32>
    %182 = arith.subf %159, %181 : vector<1x8xf32>
    %183 = tpu.concatenate %180, %182 in 0 : vector<1x8xf32>, vector<1x8xf32> -> vector<2x8xf32>
    %cst_120 = arith.constant dense<0.000000e+00> : vector<2x128xf32>
    %184 = tpu.matmul %183, %161, %cst_120 {dimension_numbers = #tpu.dot_dimension_numbers<[1], [0], [0], [1], [0, 0, 1, 1], [], []>} : vector<2x8xf32>, vector<8x128xf32>, vector<2x128xf32> -> vector<2x128xf32>
    %185 = vector.extract_strided_slice %184 {offsets = [0, 0], sizes = [1, 128], strides = [1, 1]} : vector<2x128xf32> to vector<1x128xf32>
    %186 = vector.broadcast %185 : vector<1x128xf32> to vector<32x128xf32>
    %187 = arith.mulf %157, %186 : vector<32x128xf32>
    %188 = vector.extract_strided_slice %184 {offsets = [1, 0], sizes = [1, 128], strides = [1, 1]} : vector<2x128xf32> to vector<1x128xf32>
    %189 = vector.broadcast %188 : vector<1x128xf32> to vector<32x128xf32>
    %190 = arith.addf %187, %189 : vector<32x128xf32>
    %cst_121 = arith.constant 0.000000e+00 : f32
    %191 = vector.broadcast %cst_121 : f32 to vector<32x128xf32>
    %192 = arith.maximumf %190, %191 : vector<32x128xf32>
    %cst_122 = arith.constant 0.000000e+00 : bf16
    %193 = vector.broadcast %cst_122 : bf16 to vector<2x128xbf16>
    %c0_123 = arith.constant 0 : index
    %c0_124 = arith.constant 0 : index
    %194 = vector.load %arg64[%c0_123, %c0_124] : memref<36x128xbf16, #tpu.memory_space<vmem>>, vector<2x128xbf16>
    tpu.vector_store %arg64[%c0_123, %c0_124], %193 {strides = array<i32>} : memref<36x128xbf16, #tpu.memory_space<vmem>>, vector<2x128xbf16>,
    %c34_125 = arith.constant 34 : index
    %c0_126 = arith.constant 0 : index
    %195 = vector.load %arg64[%c34_125, %c0_126] : memref<36x128xbf16, #tpu.memory_space<vmem>>, vector<2x128xbf16>
    tpu.vector_store %arg64[%c34_125, %c0_126], %193 {strides = array<i32>} : memref<36x128xbf16, #tpu.memory_space<vmem>>, vector<2x128xbf16>,
    %196 = arith.truncf %192 : vector<32x128xf32> to vector<32x128xbf16>
    %c2_127 = arith.constant 2 : index
    %c0_128 = arith.constant 0 : index
    %197 = vector.load %arg64[%c2_127, %c0_128] : memref<36x128xbf16, #tpu.memory_space<vmem>>, vector<32x128xbf16>
    tpu.vector_store %arg64[%c2_127, %c0_128], %196 {strides = array<i32>} : memref<36x128xbf16, #tpu.memory_space<vmem>>, vector<32x128xbf16>,
    %c0_129 = arith.constant 0 : index
    %c0_130 = arith.constant 0 : index
    %198 = vector.load %arg64[%c0_129, %c0_130] : memref<36x128xbf16, #tpu.memory_space<vmem>>, vector<32x128xbf16>
    %c0_131 = arith.constant 0 : index
    %c0_132 = arith.constant 0 : index
    %c0_133 = arith.constant 0 : index
    %199 = vector.load %arg19[%c0_131, %c0_132, %c0_133] : memref<3x128x256xbf16, #tpu.memory_space<vmem>>, vector<1x128x256xbf16>
    %200 = vector.shape_cast %199 : vector<1x128x256xbf16> to vector<128x256xbf16>
    %cst_134 = arith.constant dense<0.000000e+00> : vector<32x256xf32>
    %201 = tpu.matmul %198, %200, %cst_134 {dimension_numbers = #tpu.dot_dimension_numbers<[1], [0], [0], [1], [0, 0, 1, 1], [], []>} : vector<32x128xbf16>, vector<128x256xbf16>, vector<32x256xf32> -> vector<32x256xf32>
    %c2_135 = arith.constant 2 : index
    %c0_136 = arith.constant 0 : index
    %202 = vector.load %arg64[%c2_135, %c0_136] : memref<36x128xbf16, #tpu.memory_space<vmem>>, vector<32x128xbf16>
    %c1_137 = arith.constant 1 : index
    %c0_138 = arith.constant 0 : index
    %c0_139 = arith.constant 0 : index
    %203 = vector.load %arg19[%c1_137, %c0_138, %c0_139] : memref<3x128x256xbf16, #tpu.memory_space<vmem>>, vector<1x128x256xbf16>
    %204 = vector.shape_cast %203 : vector<1x128x256xbf16> to vector<128x256xbf16>
    %cst_140 = arith.constant dense<0.000000e+00> : vector<32x256xf32>
    %205 = tpu.matmul %202, %204, %cst_140 {dimension_numbers = #tpu.dot_dimension_numbers<[1], [0], [0], [1], [0, 0, 1, 1], [], []>} : vector<32x128xbf16>, vector<128x256xbf16>, vector<32x256xf32> -> vector<32x256xf32>
    %206 = arith.addf %201, %205 : vector<32x256xf32>
    %c4_141 = arith.constant 4 : index
    %c0_142 = arith.constant 0 : index
    %207 = vector.load %arg64[%c4_141, %c0_142] : memref<36x128xbf16, #tpu.memory_space<vmem>>, vector<32x128xbf16>
    %c2_143 = arith.constant 2 : index
    %c0_144 = arith.constant 0 : index
    %c0_145 = arith.constant 0 : index
    %208 = vector.load %arg19[%c2_143, %c0_144, %c0_145] : memref<3x128x256xbf16, #tpu.memory_space<vmem>>, vector<1x128x256xbf16>
    %209 = vector.shape_cast %208 : vector<1x128x256xbf16> to vector<128x256xbf16>
    %cst_146 = arith.constant dense<0.000000e+00> : vector<32x256xf32>
    %210 = tpu.matmul %207, %209, %cst_146 {dimension_numbers = #tpu.dot_dimension_numbers<[1], [0], [0], [1], [0, 0, 1, 1], [], []>} : vector<32x128xbf16>, vector<128x256xbf16>, vector<32x256xf32> -> vector<32x256xf32>
    %211 = arith.addf %206, %210 : vector<32x256xf32>
    %c0_147 = arith.constant 0 : index
    %c0_148 = arith.constant 0 : index
    %212 = vector.load %arg20[%c0_147, %c0_148] : memref<1x256xf32, #tpu.memory_space<vmem>>, vector<1x256xf32>
    %213 = vector.broadcast %212 : vector<1x256xf32> to vector<32x256xf32>
    %214 = arith.addf %211, %213 : vector<32x256xf32>
    %c0_149 = arith.constant 0 : index
    %c0_150 = arith.constant 0 : index
    %215 = vector.load %arg21[%c0_149, %c0_150] : memref<1x16xf32, #tpu.memory_space<vmem>>, vector<1x16xf32>
    %c0_151 = arith.constant 0 : index
    %c0_152 = arith.constant 0 : index
    %216 = vector.load %arg22[%c0_151, %c0_152] : memref<1x16xf32, #tpu.memory_space<vmem>>, vector<1x16xf32>
    %c0_153 = arith.constant 0 : index
    %c0_154 = arith.constant 0 : index
    %217 = vector.load %arg27[%c0_153, %c0_154] : memref<256x16xf32, #tpu.memory_space<vmem>>, vector<256x16xf32>
    %c0_155 = arith.constant 0 : index
    %c0_156 = arith.constant 0 : index
    %218 = vector.load %arg28[%c0_155, %c0_156] : memref<16x256xf32, #tpu.memory_space<vmem>>, vector<16x256xf32>
    %cst_157 = arith.constant dense<0.000000e+00> : vector<256xf32>
    %219 = vector.multi_reduction <add>, %214, %cst_157 [0] : vector<32x256xf32> to vector<256xf32>
    %220 = vector.shape_cast %219 : vector<256xf32> to vector<1x256xf32>
    %221 = arith.mulf %214, %214 : vector<32x256xf32>
    %cst_158 = arith.constant dense<0.000000e+00> : vector<256xf32>
    %222 = vector.multi_reduction <add>, %221, %cst_158 [0] : vector<32x256xf32> to vector<256xf32>
    %223 = vector.shape_cast %222 : vector<256xf32> to vector<1x256xf32>
    %224 = tpu.concatenate %220, %223 in 0 : vector<1x256xf32>, vector<1x256xf32> -> vector<2x256xf32>
    %cst_159 = arith.constant dense<0.000000e+00> : vector<2x16xf32>
    %225 = tpu.matmul %224, %217, %cst_159 {dimension_numbers = #tpu.dot_dimension_numbers<[1], [0], [0], [1], [0, 0, 1, 1], [], []>} : vector<2x256xf32>, vector<256x16xf32>, vector<2x16xf32> -> vector<2x16xf32>
    %226 = vector.extract_strided_slice %225 {offsets = [0, 0], sizes = [1, 16], strides = [1, 1]} : vector<2x16xf32> to vector<1x16xf32>
    %cst_160 = arith.constant 0.001953125 : f32
    %227 = vector.broadcast %cst_160 : f32 to vector<1x16xf32>
    %228 = arith.mulf %226, %227 : vector<1x16xf32>
    %229 = vector.extract_strided_slice %225 {offsets = [1, 0], sizes = [1, 16], strides = [1, 1]} : vector<2x16xf32> to vector<1x16xf32>
    %cst_161 = arith.constant 0.001953125 : f32
    %230 = vector.broadcast %cst_161 : f32 to vector<1x16xf32>
    %231 = arith.mulf %229, %230 : vector<1x16xf32>
    %232 = arith.mulf %228, %228 : vector<1x16xf32>
    %233 = arith.subf %231, %232 : vector<1x16xf32>
    %cst_162 = arith.constant 9.99999974E-6 : f32
    %234 = vector.broadcast %cst_162 : f32 to vector<1x16xf32>
    %235 = arith.addf %233, %234 : vector<1x16xf32>
    %236 = math.rsqrt %235 : vector<1x16xf32>
    %237 = arith.mulf %215, %236 : vector<1x16xf32>
    %238 = arith.mulf %228, %237 : vector<1x16xf32>
    %239 = arith.subf %216, %238 : vector<1x16xf32>
    %240 = tpu.concatenate %237, %239 in 0 : vector<1x16xf32>, vector<1x16xf32> -> vector<2x16xf32>
    %cst_163 = arith.constant dense<0.000000e+00> : vector<2x256xf32>
    %241 = tpu.matmul %240, %218, %cst_163 {dimension_numbers = #tpu.dot_dimension_numbers<[1], [0], [0], [1], [0, 0, 1, 1], [], []>} : vector<2x16xf32>, vector<16x256xf32>, vector<2x256xf32> -> vector<2x256xf32>
    %242 = vector.extract_strided_slice %241 {offsets = [0, 0], sizes = [1, 256], strides = [1, 1]} : vector<2x256xf32> to vector<1x256xf32>
    %243 = vector.broadcast %242 : vector<1x256xf32> to vector<32x256xf32>
    %244 = arith.mulf %214, %243 : vector<32x256xf32>
    %245 = vector.extract_strided_slice %241 {offsets = [1, 0], sizes = [1, 256], strides = [1, 1]} : vector<2x256xf32> to vector<1x256xf32>
    %246 = vector.broadcast %245 : vector<1x256xf32> to vector<32x256xf32>
    %247 = arith.addf %244, %246 : vector<32x256xf32>
    %cst_164 = arith.constant 0.000000e+00 : f32
    %248 = vector.broadcast %cst_164 : f32 to vector<32x256xf32>
    %249 = arith.maximumf %247, %248 : vector<32x256xf32>
    %cst_165 = arith.constant 0.000000e+00 : bf16
    %250 = vector.broadcast %cst_165 : bf16 to vector<2x256xbf16>
    %c0_166 = arith.constant 0 : index
    %c0_167 = arith.constant 0 : index
    %251 = vector.load %arg65[%c0_166, %c0_167] : memref<36x256xbf16, #tpu.memory_space<vmem>>, vector<2x256xbf16>
    tpu.vector_store %arg65[%c0_166, %c0_167], %250 {strides = array<i32>} : memref<36x256xbf16, #tpu.memory_space<vmem>>, vector<2x256xbf16>,
    %c34_168 = arith.constant 34 : index
    %c0_169 = arith.constant 0 : index
    %252 = vector.load %arg65[%c34_168, %c0_169] : memref<36x256xbf16, #tpu.memory_space<vmem>>, vector<2x256xbf16>
    tpu.vector_store %arg65[%c34_168, %c0_169], %250 {strides = array<i32>} : memref<36x256xbf16, #tpu.memory_space<vmem>>, vector<2x256xbf16>,
    %253 = arith.truncf %249 : vector<32x256xf32> to vector<32x256xbf16>
    %c2_170 = arith.constant 2 : index
    %c0_171 = arith.constant 0 : index
    %254 = vector.load %arg65[%c2_170, %c0_171] : memref<36x256xbf16, #tpu.memory_space<vmem>>, vector<32x256xbf16>
    tpu.vector_store %arg65[%c2_170, %c0_171], %253 {strides = array<i32>} : memref<36x256xbf16, #tpu.memory_space<vmem>>, vector<32x256xbf16>,
    %c0_172 = arith.constant 0 : index
    %c0_173 = arith.constant 0 : index
    %255 = vector.load %arg65[%c0_172, %c0_173] : memref<36x256xbf16, #tpu.memory_space<vmem>>, vector<32x256xbf16>
    %c0_174 = arith.constant 0 : index
    %c0_175 = arith.constant 0 : index
    %c0_176 = arith.constant 0 : index
    %256 = vector.load %arg23[%c0_174, %c0_175, %c0_176] : memref<3x256x256xbf16, #tpu.memory_space<vmem>>, vector<1x256x256xbf16>
    %257 = vector.shape_cast %256 : vector<1x256x256xbf16> to vector<256x256xbf16>
    %cst_177 = arith.constant dense<0.000000e+00> : vector<32x256xf32>
    %258 = tpu.matmul %255, %257, %cst_177 {dimension_numbers = #tpu.dot_dimension_numbers<[1], [0], [0], [1], [0, 0, 1, 1], [], []>} : vector<32x256xbf16>, vector<256x256xbf16>, vector<32x256xf32> -> vector<32x256xf32>
    %c2_178 = arith.constant 2 : index
    %c0_179 = arith.constant 0 : index
    %259 = vector.load %arg65[%c2_178, %c0_179] : memref<36x256xbf16, #tpu.memory_space<vmem>>, vector<32x256xbf16>
    %c1_180 = arith.constant 1 : index
    %c0_181 = arith.constant 0 : index
    %c0_182 = arith.constant 0 : index
    %260 = vector.load %arg23[%c1_180, %c0_181, %c0_182] : memref<3x256x256xbf16, #tpu.memory_space<vmem>>, vector<1x256x256xbf16>
    %261 = vector.shape_cast %260 : vector<1x256x256xbf16> to vector<256x256xbf16>
    %cst_183 = arith.constant dense<0.000000e+00> : vector<32x256xf32>
    %262 = tpu.matmul %259, %261, %cst_183 {dimension_numbers = #tpu.dot_dimension_numbers<[1], [0], [0], [1], [0, 0, 1, 1], [], []>} : vector<32x256xbf16>, vector<256x256xbf16>, vector<32x256xf32> -> vector<32x256xf32>
    %263 = arith.addf %258, %262 : vector<32x256xf32>
    %c4_184 = arith.constant 4 : index
    %c0_185 = arith.constant 0 : index
    %264 = vector.load %arg65[%c4_184, %c0_185] : memref<36x256xbf16, #tpu.memory_space<vmem>>, vector<32x256xbf16>
    %c2_186 = arith.constant 2 : index
    %c0_187 = arith.constant 0 : index
    %c0_188 = arith.constant 0 : index
    %265 = vector.load %arg23[%c2_186, %c0_187, %c0_188] : memref<3x256x256xbf16, #tpu.memory_space<vmem>>, vector<1x256x256xbf16>
    %266 = vector.shape_cast %265 : vector<1x256x256xbf16> to vector<256x256xbf16>
    %cst_189 = arith.constant dense<0.000000e+00> : vector<32x256xf32>
    %267 = tpu.matmul %264, %266, %cst_189 {dimension_numbers = #tpu.dot_dimension_numbers<[1], [0], [0], [1], [0, 0, 1, 1], [], []>} : vector<32x256xbf16>, vector<256x256xbf16>, vector<32x256xf32> -> vector<32x256xf32>
    %268 = arith.addf %263, %267 : vector<32x256xf32>
    %c0_190 = arith.constant 0 : index
    %c0_191 = arith.constant 0 : index
    %269 = vector.load %arg24[%c0_190, %c0_191] : memref<1x256xf32, #tpu.memory_space<vmem>>, vector<1x256xf32>
    %270 = vector.broadcast %269 : vector<1x256xf32> to vector<32x256xf32>
    %271 = arith.addf %268, %270 : vector<32x256xf32>
    %c0_192 = arith.constant 0 : index
    %c0_193 = arith.constant 0 : index
    %272 = vector.load %arg25[%c0_192, %c0_193] : memref<1x16xf32, #tpu.memory_space<vmem>>, vector<1x16xf32>
    %c0_194 = arith.constant 0 : index
    %c0_195 = arith.constant 0 : index
    %273 = vector.load %arg26[%c0_194, %c0_195] : memref<1x16xf32, #tpu.memory_space<vmem>>, vector<1x16xf32>
    %c0_196 = arith.constant 0 : index
    %c0_197 = arith.constant 0 : index
    %274 = vector.load %arg27[%c0_196, %c0_197] : memref<256x16xf32, #tpu.memory_space<vmem>>, vector<256x16xf32>
    %c0_198 = arith.constant 0 : index
    %c0_199 = arith.constant 0 : index
    %275 = vector.load %arg28[%c0_198, %c0_199] : memref<16x256xf32, #tpu.memory_space<vmem>>, vector<16x256xf32>
    %cst_200 = arith.constant dense<0.000000e+00> : vector<256xf32>
    %276 = vector.multi_reduction <add>, %271, %cst_200 [0] : vector<32x256xf32> to vector<256xf32>
    %277 = vector.shape_cast %276 : vector<256xf32> to vector<1x256xf32>
    %278 = arith.mulf %271, %271 : vector<32x256xf32>
    %cst_201 = arith.constant dense<0.000000e+00> : vector<256xf32>
    %279 = vector.multi_reduction <add>, %278, %cst_201 [0] : vector<32x256xf32> to vector<256xf32>
    %280 = vector.shape_cast %279 : vector<256xf32> to vector<1x256xf32>
    %281 = tpu.concatenate %277, %280 in 0 : vector<1x256xf32>, vector<1x256xf32> -> vector<2x256xf32>
    %cst_202 = arith.constant dense<0.000000e+00> : vector<2x16xf32>
    %282 = tpu.matmul %281, %274, %cst_202 {dimension_numbers = #tpu.dot_dimension_numbers<[1], [0], [0], [1], [0, 0, 1, 1], [], []>} : vector<2x256xf32>, vector<256x16xf32>, vector<2x16xf32> -> vector<2x16xf32>
    %283 = vector.extract_strided_slice %282 {offsets = [0, 0], sizes = [1, 16], strides = [1, 1]} : vector<2x16xf32> to vector<1x16xf32>
    %cst_203 = arith.constant 0.001953125 : f32
    %284 = vector.broadcast %cst_203 : f32 to vector<1x16xf32>
    %285 = arith.mulf %283, %284 : vector<1x16xf32>
    %286 = vector.extract_strided_slice %282 {offsets = [1, 0], sizes = [1, 16], strides = [1, 1]} : vector<2x16xf32> to vector<1x16xf32>
    %cst_204 = arith.constant 0.001953125 : f32
    %287 = vector.broadcast %cst_204 : f32 to vector<1x16xf32>
    %288 = arith.mulf %286, %287 : vector<1x16xf32>
    %289 = arith.mulf %285, %285 : vector<1x16xf32>
    %290 = arith.subf %288, %289 : vector<1x16xf32>
    %cst_205 = arith.constant 9.99999974E-6 : f32
    %291 = vector.broadcast %cst_205 : f32 to vector<1x16xf32>
    %292 = arith.addf %290, %291 : vector<1x16xf32>
    %293 = math.rsqrt %292 : vector<1x16xf32>
    %294 = arith.mulf %272, %293 : vector<1x16xf32>
    %295 = arith.mulf %285, %294 : vector<1x16xf32>
    %296 = arith.subf %273, %295 : vector<1x16xf32>
    %297 = tpu.concatenate %294, %296 in 0 : vector<1x16xf32>, vector<1x16xf32> -> vector<2x16xf32>
    %cst_206 = arith.constant dense<0.000000e+00> : vector<2x256xf32>
    %298 = tpu.matmul %297, %275, %cst_206 {dimension_numbers = #tpu.dot_dimension_numbers<[1], [0], [0], [1], [0, 0, 1, 1], [], []>} : vector<2x16xf32>, vector<16x256xf32>, vector<2x256xf32> -> vector<2x256xf32>
    %299 = vector.extract_strided_slice %298 {offsets = [0, 0], sizes = [1, 256], strides = [1, 1]} : vector<2x256xf32> to vector<1x256xf32>
    %300 = vector.broadcast %299 : vector<1x256xf32> to vector<32x256xf32>
    %301 = arith.mulf %271, %300 : vector<32x256xf32>
    %302 = vector.extract_strided_slice %298 {offsets = [1, 0], sizes = [1, 256], strides = [1, 1]} : vector<2x256xf32> to vector<1x256xf32>
    %303 = vector.broadcast %302 : vector<1x256xf32> to vector<32x256xf32>
    %304 = arith.addf %301, %303 : vector<32x256xf32>
    %cst_207 = arith.constant 0.000000e+00 : f32
    %305 = vector.broadcast %cst_207 : f32 to vector<32x256xf32>
    %306 = arith.maximumf %304, %305 : vector<32x256xf32>
    %307 = arith.truncf %306 : vector<32x256xf32> to vector<32x256xbf16>
    %c0_208 = arith.constant 0 : index
    %c0_209 = arith.constant 0 : index
    %308 = vector.load %arg39[%c0_208, %c0_209] : memref<256x128xbf16, #tpu.memory_space<vmem>>, vector<256x128xbf16>
    %cst_210 = arith.constant dense<0.000000e+00> : vector<32x128xf32>
    %309 = tpu.matmul %307, %308, %cst_210 {dimension_numbers = #tpu.dot_dimension_numbers<[1], [0], [0], [1], [0, 0, 1, 1], [], []>} : vector<32x256xbf16>, vector<256x128xbf16>, vector<32x128xf32> -> vector<32x128xf32>
    %c0_211 = arith.constant 0 : index
    %c0_212 = arith.constant 0 : index
    %310 = vector.load %arg40[%c0_211, %c0_212] : memref<256x128xbf16, #tpu.memory_space<vmem>>, vector<256x128xbf16>
    %cst_213 = arith.constant dense<0.000000e+00> : vector<32x128xf32>
    %311 = tpu.matmul %307, %310, %cst_213 {dimension_numbers = #tpu.dot_dimension_numbers<[1], [0], [0], [1], [0, 0, 1, 1], [], []>} : vector<32x256xbf16>, vector<256x128xbf16>, vector<32x128xf32> -> vector<32x128xf32>
    %312 = arith.maximumf %309, %311 : vector<32x128xf32>
    %313 = arith.truncf %312 : vector<32x128xf32> to vector<32x128xbf16>
    %c0_214 = arith.constant 0 : index
    %c0_215 = arith.constant 0 : index
    %314 = vector.load %arg41[%c0_214, %c0_215] : memref<16x32xbf16, #tpu.memory_space<vmem>>, vector<16x32xbf16>
    %cst_216 = arith.constant dense<0.000000e+00> : vector<16x128xf32>
    %315 = tpu.matmul %314, %313, %cst_216 {dimension_numbers = #tpu.dot_dimension_numbers<[1], [0], [0], [1], [0, 0, 1, 1], [], []>} : vector<16x32xbf16>, vector<32x128xbf16>, vector<16x128xf32> -> vector<16x128xf32>
    %c0_217 = arith.constant 0 : index
    %c0_218 = arith.constant 0 : index
    %316 = vector.load %arg42[%c0_217, %c0_218] : memref<16x32xbf16, #tpu.memory_space<vmem>>, vector<16x32xbf16>
    %cst_219 = arith.constant dense<0.000000e+00> : vector<16x128xf32>
    %317 = tpu.matmul %316, %313, %cst_219 {dimension_numbers = #tpu.dot_dimension_numbers<[1], [0], [0], [1], [0, 0, 1, 1], [], []>} : vector<16x32xbf16>, vector<32x128xbf16>, vector<16x128xf32> -> vector<16x128xf32>
    %318 = arith.maximumf %315, %317 : vector<16x128xf32>
    %cst_220 = arith.constant 0.000000e+00 : bf16
    %319 = vector.broadcast %cst_220 : bf16 to vector<2x128xbf16>
    %c0_221 = arith.constant 0 : index
    %c0_222 = arith.constant 0 : index
    %320 = vector.load %arg66[%c0_221, %c0_222] : memref<20x128xbf16, #tpu.memory_space<vmem>>, vector<2x128xbf16>
    tpu.vector_store %arg66[%c0_221, %c0_222], %319 {strides = array<i32>} : memref<20x128xbf16, #tpu.memory_space<vmem>>, vector<2x128xbf16>,
    %c18_223 = arith.constant 18 : index
    %c0_224 = arith.constant 0 : index
    %321 = vector.load %arg66[%c18_223, %c0_224] : memref<20x128xbf16, #tpu.memory_space<vmem>>, vector<2x128xbf16>
    tpu.vector_store %arg66[%c18_223, %c0_224], %319 {strides = array<i32>} : memref<20x128xbf16, #tpu.memory_space<vmem>>, vector<2x128xbf16>,
    %322 = arith.truncf %318 : vector<16x128xf32> to vector<16x128xbf16>
    %c2_225 = arith.constant 2 : index
    %c0_226 = arith.constant 0 : index
    %323 = vector.load %arg66[%c2_225, %c0_226] : memref<20x128xbf16, #tpu.memory_space<vmem>>, vector<16x128xbf16>
    tpu.vector_store %arg66[%c2_225, %c0_226], %322 {strides = array<i32>} : memref<20x128xbf16, #tpu.memory_space<vmem>>, vector<16x128xbf16>,
    %c0_227 = arith.constant 0 : index
    %c0_228 = arith.constant 0 : index
    %324 = vector.load %arg66[%c0_227, %c0_228] : memref<20x128xbf16, #tpu.memory_space<vmem>>, vector<16x128xbf16>
    %c0_229 = arith.constant 0 : index
    %c0_230 = arith.constant 0 : index
    %c0_231 = arith.constant 0 : index
    %325 = vector.load %arg29[%c0_229, %c0_230, %c0_231] : memref<3x128x256xbf16, #tpu.memory_space<vmem>>, vector<1x128x256xbf16>
    %326 = vector.shape_cast %325 : vector<1x128x256xbf16> to vector<128x256xbf16>
    %cst_232 = arith.constant dense<0.000000e+00> : vector<16x256xf32>
    %327 = tpu.matmul %324, %326, %cst_232 {dimension_numbers = #tpu.dot_dimension_numbers<[1], [0], [0], [1], [0, 0, 1, 1], [], []>} : vector<16x128xbf16>, vector<128x256xbf16>, vector<16x256xf32> -> vector<16x256xf32>
    %c2_233 = arith.constant 2 : index
    %c0_234 = arith.constant 0 : index
    %328 = vector.load %arg66[%c2_233, %c0_234] : memref<20x128xbf16, #tpu.memory_space<vmem>>, vector<16x128xbf16>
    %c1_235 = arith.constant 1 : index
    %c0_236 = arith.constant 0 : index
    %c0_237 = arith.constant 0 : index
    %329 = vector.load %arg29[%c1_235, %c0_236, %c0_237] : memref<3x128x256xbf16, #tpu.memory_space<vmem>>, vector<1x128x256xbf16>
    %330 = vector.shape_cast %329 : vector<1x128x256xbf16> to vector<128x256xbf16>
    %cst_238 = arith.constant dense<0.000000e+00> : vector<16x256xf32>
    %331 = tpu.matmul %328, %330, %cst_238 {dimension_numbers = #tpu.dot_dimension_numbers<[1], [0], [0], [1], [0, 0, 1, 1], [], []>} : vector<16x128xbf16>, vector<128x256xbf16>, vector<16x256xf32> -> vector<16x256xf32>
    %332 = arith.addf %327, %331 : vector<16x256xf32>
    %c4_239 = arith.constant 4 : index
    %c0_240 = arith.constant 0 : index
    %333 = vector.load %arg66[%c4_239, %c0_240] : memref<20x128xbf16, #tpu.memory_space<vmem>>, vector<16x128xbf16>
    %c2_241 = arith.constant 2 : index
    %c0_242 = arith.constant 0 : index
    %c0_243 = arith.constant 0 : index
    %334 = vector.load %arg29[%c2_241, %c0_242, %c0_243] : memref<3x128x256xbf16, #tpu.memory_space<vmem>>, vector<1x128x256xbf16>
    %335 = vector.shape_cast %334 : vector<1x128x256xbf16> to vector<128x256xbf16>
    %cst_244 = arith.constant dense<0.000000e+00> : vector<16x256xf32>
    %336 = tpu.matmul %333, %335, %cst_244 {dimension_numbers = #tpu.dot_dimension_numbers<[1], [0], [0], [1], [0, 0, 1, 1], [], []>} : vector<16x128xbf16>, vector<128x256xbf16>, vector<16x256xf32> -> vector<16x256xf32>
    %337 = arith.addf %332, %336 : vector<16x256xf32>
    %c0_245 = arith.constant 0 : index
    %c0_246 = arith.constant 0 : index
    %338 = vector.load %arg30[%c0_245, %c0_246] : memref<1x256xf32, #tpu.memory_space<vmem>>, vector<1x256xf32>
    %339 = vector.broadcast %338 : vector<1x256xf32> to vector<16x256xf32>
    %340 = arith.addf %337, %339 : vector<16x256xf32>
    %c0_247 = arith.constant 0 : index
    %c0_248 = arith.constant 0 : index
    %341 = vector.load %arg31[%c0_247, %c0_248] : memref<1x32xf32, #tpu.memory_space<vmem>>, vector<1x32xf32>
    %c0_249 = arith.constant 0 : index
    %c0_250 = arith.constant 0 : index
    %342 = vector.load %arg32[%c0_249, %c0_250] : memref<1x32xf32, #tpu.memory_space<vmem>>, vector<1x32xf32>
    %c0_251 = arith.constant 0 : index
    %c0_252 = arith.constant 0 : index
    %343 = vector.load %arg37[%c0_251, %c0_252] : memref<256x32xf32, #tpu.memory_space<vmem>>, vector<256x32xf32>
    %c0_253 = arith.constant 0 : index
    %c0_254 = arith.constant 0 : index
    %344 = vector.load %arg38[%c0_253, %c0_254] : memref<32x256xf32, #tpu.memory_space<vmem>>, vector<32x256xf32>
    %cst_255 = arith.constant dense<0.000000e+00> : vector<256xf32>
    %345 = vector.multi_reduction <add>, %340, %cst_255 [0] : vector<16x256xf32> to vector<256xf32>
    %346 = vector.shape_cast %345 : vector<256xf32> to vector<1x256xf32>
    %347 = arith.mulf %340, %340 : vector<16x256xf32>
    %cst_256 = arith.constant dense<0.000000e+00> : vector<256xf32>
    %348 = vector.multi_reduction <add>, %347, %cst_256 [0] : vector<16x256xf32> to vector<256xf32>
    %349 = vector.shape_cast %348 : vector<256xf32> to vector<1x256xf32>
    %350 = tpu.concatenate %346, %349 in 0 : vector<1x256xf32>, vector<1x256xf32> -> vector<2x256xf32>
    %cst_257 = arith.constant dense<0.000000e+00> : vector<2x32xf32>
    %351 = tpu.matmul %350, %343, %cst_257 {dimension_numbers = #tpu.dot_dimension_numbers<[1], [0], [0], [1], [0, 0, 1, 1], [], []>} : vector<2x256xf32>, vector<256x32xf32>, vector<2x32xf32> -> vector<2x32xf32>
    %352 = vector.extract_strided_slice %351 {offsets = [0, 0], sizes = [1, 32], strides = [1, 1]} : vector<2x32xf32> to vector<1x32xf32>
    %cst_258 = arith.constant 7.812500e-03 : f32
    %353 = vector.broadcast %cst_258 : f32 to vector<1x32xf32>
    %354 = arith.mulf %352, %353 : vector<1x32xf32>
    %355 = vector.extract_strided_slice %351 {offsets = [1, 0], sizes = [1, 32], strides = [1, 1]} : vector<2x32xf32> to vector<1x32xf32>
    %cst_259 = arith.constant 7.812500e-03 : f32
    %356 = vector.broadcast %cst_259 : f32 to vector<1x32xf32>
    %357 = arith.mulf %355, %356 : vector<1x32xf32>
    %358 = arith.mulf %354, %354 : vector<1x32xf32>
    %359 = arith.subf %357, %358 : vector<1x32xf32>
    %cst_260 = arith.constant 9.99999974E-6 : f32
    %360 = vector.broadcast %cst_260 : f32 to vector<1x32xf32>
    %361 = arith.addf %359, %360 : vector<1x32xf32>
    %362 = math.rsqrt %361 : vector<1x32xf32>
    %363 = arith.mulf %341, %362 : vector<1x32xf32>
    %364 = arith.mulf %354, %363 : vector<1x32xf32>
    %365 = arith.subf %342, %364 : vector<1x32xf32>
    %366 = tpu.concatenate %363, %365 in 0 : vector<1x32xf32>, vector<1x32xf32> -> vector<2x32xf32>
    %cst_261 = arith.constant dense<0.000000e+00> : vector<2x256xf32>
    %367 = tpu.matmul %366, %344, %cst_261 {dimension_numbers = #tpu.dot_dimension_numbers<[1], [0], [0], [1], [0, 0, 1, 1], [], []>} : vector<2x32xf32>, vector<32x256xf32>, vector<2x256xf32> -> vector<2x256xf32>
    %368 = vector.extract_strided_slice %367 {offsets = [0, 0], sizes = [1, 256], strides = [1, 1]} : vector<2x256xf32> to vector<1x256xf32>
    %369 = vector.broadcast %368 : vector<1x256xf32> to vector<16x256xf32>
    %370 = arith.mulf %340, %369 : vector<16x256xf32>
    %371 = vector.extract_strided_slice %367 {offsets = [1, 0], sizes = [1, 256], strides = [1, 1]} : vector<2x256xf32> to vector<1x256xf32>
    %372 = vector.broadcast %371 : vector<1x256xf32> to vector<16x256xf32>
    %373 = arith.addf %370, %372 : vector<16x256xf32>
    %cst_262 = arith.constant 0.000000e+00 : f32
    %374 = vector.broadcast %cst_262 : f32 to vector<16x256xf32>
    %375 = arith.maximumf %373, %374 : vector<16x256xf32>
    %cst_263 = arith.constant 0.000000e+00 : bf16
    %376 = vector.broadcast %cst_263 : bf16 to vector<2x256xbf16>
    %c0_264 = arith.constant 0 : index
    %c0_265 = arith.constant 0 : index
    %377 = vector.load %arg67[%c0_264, %c0_265] : memref<20x256xbf16, #tpu.memory_space<vmem>>, vector<2x256xbf16>
    tpu.vector_store %arg67[%c0_264, %c0_265], %376 {strides = array<i32>} : memref<20x256xbf16, #tpu.memory_space<vmem>>, vector<2x256xbf16>,
    %c18_266 = arith.constant 18 : index
    %c0_267 = arith.constant 0 : index
    %378 = vector.load %arg67[%c18_266, %c0_267] : memref<20x256xbf16, #tpu.memory_space<vmem>>, vector<2x256xbf16>
    tpu.vector_store %arg67[%c18_266, %c0_267], %376 {strides = array<i32>} : memref<20x256xbf16, #tpu.memory_space<vmem>>, vector<2x256xbf16>,
    %379 = arith.truncf %375 : vector<16x256xf32> to vector<16x256xbf16>
    %c2_268 = arith.constant 2 : index
    %c0_269 = arith.constant 0 : index
    %380 = vector.load %arg67[%c2_268, %c0_269] : memref<20x256xbf16, #tpu.memory_space<vmem>>, vector<16x256xbf16>
    tpu.vector_store %arg67[%c2_268, %c0_269], %379 {strides = array<i32>} : memref<20x256xbf16, #tpu.memory_space<vmem>>, vector<16x256xbf16>,
    %c0_270 = arith.constant 0 : index
    %c0_271 = arith.constant 0 : index
    %381 = vector.load %arg67[%c0_270, %c0_271] : memref<20x256xbf16, #tpu.memory_space<vmem>>, vector<16x256xbf16>
    %c0_272 = arith.constant 0 : index
    %c0_273 = arith.constant 0 : index
    %c0_274 = arith.constant 0 : index
    %382 = vector.load %arg33[%c0_272, %c0_273, %c0_274] : memref<3x256x256xbf16, #tpu.memory_space<vmem>>, vector<1x256x256xbf16>
    %383 = vector.shape_cast %382 : vector<1x256x256xbf16> to vector<256x256xbf16>
    %cst_275 = arith.constant dense<0.000000e+00> : vector<16x256xf32>
    %384 = tpu.matmul %381, %383, %cst_275 {dimension_numbers = #tpu.dot_dimension_numbers<[1], [0], [0], [1], [0, 0, 1, 1], [], []>} : vector<16x256xbf16>, vector<256x256xbf16>, vector<16x256xf32> -> vector<16x256xf32>
    %c2_276 = arith.constant 2 : index
    %c0_277 = arith.constant 0 : index
    %385 = vector.load %arg67[%c2_276, %c0_277] : memref<20x256xbf16, #tpu.memory_space<vmem>>, vector<16x256xbf16>
    %c1_278 = arith.constant 1 : index
    %c0_279 = arith.constant 0 : index
    %c0_280 = arith.constant 0 : index
    %386 = vector.load %arg33[%c1_278, %c0_279, %c0_280] : memref<3x256x256xbf16, #tpu.memory_space<vmem>>, vector<1x256x256xbf16>
    %387 = vector.shape_cast %386 : vector<1x256x256xbf16> to vector<256x256xbf16>
    %cst_281 = arith.constant dense<0.000000e+00> : vector<16x256xf32>
    %388 = tpu.matmul %385, %387, %cst_281 {dimension_numbers = #tpu.dot_dimension_numbers<[1], [0], [0], [1], [0, 0, 1, 1], [], []>} : vector<16x256xbf16>, vector<256x256xbf16>, vector<16x256xf32> -> vector<16x256xf32>
    %389 = arith.addf %384, %388 : vector<16x256xf32>
    %c4_282 = arith.constant 4 : index
    %c0_283 = arith.constant 0 : index
    %390 = vector.load %arg67[%c4_282, %c0_283] : memref<20x256xbf16, #tpu.memory_space<vmem>>, vector<16x256xbf16>
    %c2_284 = arith.constant 2 : index
    %c0_285 = arith.constant 0 : index
    %c0_286 = arith.constant 0 : index
    %391 = vector.load %arg33[%c2_284, %c0_285, %c0_286] : memref<3x256x256xbf16, #tpu.memory_space<vmem>>, vector<1x256x256xbf16>
    %392 = vector.shape_cast %391 : vector<1x256x256xbf16> to vector<256x256xbf16>
    %cst_287 = arith.constant dense<0.000000e+00> : vector<16x256xf32>
    %393 = tpu.matmul %390, %392, %cst_287 {dimension_numbers = #tpu.dot_dimension_numbers<[1], [0], [0], [1], [0, 0, 1, 1], [], []>} : vector<16x256xbf16>, vector<256x256xbf16>, vector<16x256xf32> -> vector<16x256xf32>
    %394 = arith.addf %389, %393 : vector<16x256xf32>
    %c0_288 = arith.constant 0 : index
    %c0_289 = arith.constant 0 : index
    %395 = vector.load %arg34[%c0_288, %c0_289] : memref<1x256xf32, #tpu.memory_space<vmem>>, vector<1x256xf32>
    %396 = vector.broadcast %395 : vector<1x256xf32> to vector<16x256xf32>
    %397 = arith.addf %394, %396 : vector<16x256xf32>
    %c0_290 = arith.constant 0 : index
    %c0_291 = arith.constant 0 : index
    %398 = vector.load %arg35[%c0_290, %c0_291] : memref<1x32xf32, #tpu.memory_space<vmem>>, vector<1x32xf32>
    %c0_292 = arith.constant 0 : index
    %c0_293 = arith.constant 0 : index
    %399 = vector.load %arg36[%c0_292, %c0_293] : memref<1x32xf32, #tpu.memory_space<vmem>>, vector<1x32xf32>
    %c0_294 = arith.constant 0 : index
    %c0_295 = arith.constant 0 : index
    %400 = vector.load %arg37[%c0_294, %c0_295] : memref<256x32xf32, #tpu.memory_space<vmem>>, vector<256x32xf32>
    %c0_296 = arith.constant 0 : index
    %c0_297 = arith.constant 0 : index
    %401 = vector.load %arg38[%c0_296, %c0_297] : memref<32x256xf32, #tpu.memory_space<vmem>>, vector<32x256xf32>
    %cst_298 = arith.constant dense<0.000000e+00> : vector<256xf32>
    %402 = vector.multi_reduction <add>, %397, %cst_298 [0] : vector<16x256xf32> to vector<256xf32>
    %403 = vector.shape_cast %402 : vector<256xf32> to vector<1x256xf32>
    %404 = arith.mulf %397, %397 : vector<16x256xf32>
    %cst_299 = arith.constant dense<0.000000e+00> : vector<256xf32>
    %405 = vector.multi_reduction <add>, %404, %cst_299 [0] : vector<16x256xf32> to vector<256xf32>
    %406 = vector.shape_cast %405 : vector<256xf32> to vector<1x256xf32>
    %407 = tpu.concatenate %403, %406 in 0 : vector<1x256xf32>, vector<1x256xf32> -> vector<2x256xf32>
    %cst_300 = arith.constant dense<0.000000e+00> : vector<2x32xf32>
    %408 = tpu.matmul %407, %400, %cst_300 {dimension_numbers = #tpu.dot_dimension_numbers<[1], [0], [0], [1], [0, 0, 1, 1], [], []>} : vector<2x256xf32>, vector<256x32xf32>, vector<2x32xf32> -> vector<2x32xf32>
    %409 = vector.extract_strided_slice %408 {offsets = [0, 0], sizes = [1, 32], strides = [1, 1]} : vector<2x32xf32> to vector<1x32xf32>
    %cst_301 = arith.constant 7.812500e-03 : f32
    %410 = vector.broadcast %cst_301 : f32 to vector<1x32xf32>
    %411 = arith.mulf %409, %410 : vector<1x32xf32>
    %412 = vector.extract_strided_slice %408 {offsets = [1, 0], sizes = [1, 32], strides = [1, 1]} : vector<2x32xf32> to vector<1x32xf32>
    %cst_302 = arith.constant 7.812500e-03 : f32
    %413 = vector.broadcast %cst_302 : f32 to vector<1x32xf32>
    %414 = arith.mulf %412, %413 : vector<1x32xf32>
    %415 = arith.mulf %411, %411 : vector<1x32xf32>
    %416 = arith.subf %414, %415 : vector<1x32xf32>
    %cst_303 = arith.constant 9.99999974E-6 : f32
    %417 = vector.broadcast %cst_303 : f32 to vector<1x32xf32>
    %418 = arith.addf %416, %417 : vector<1x32xf32>
    %419 = math.rsqrt %418 : vector<1x32xf32>
    %420 = arith.mulf %398, %419 : vector<1x32xf32>
    %421 = arith.mulf %411, %420 : vector<1x32xf32>
    %422 = arith.subf %399, %421 : vector<1x32xf32>
    %423 = tpu.concatenate %420, %422 in 0 : vector<1x32xf32>, vector<1x32xf32> -> vector<2x32xf32>
    %cst_304 = arith.constant dense<0.000000e+00> : vector<2x256xf32>
    %424 = tpu.matmul %423, %401, %cst_304 {dimension_numbers = #tpu.dot_dimension_numbers<[1], [0], [0], [1], [0, 0, 1, 1], [], []>} : vector<2x32xf32>, vector<32x256xf32>, vector<2x256xf32> -> vector<2x256xf32>
    %425 = vector.extract_strided_slice %424 {offsets = [0, 0], sizes = [1, 256], strides = [1, 1]} : vector<2x256xf32> to vector<1x256xf32>
    %426 = vector.broadcast %425 : vector<1x256xf32> to vector<16x256xf32>
    %427 = arith.mulf %397, %426 : vector<16x256xf32>
    %428 = vector.extract_strided_slice %424 {offsets = [1, 0], sizes = [1, 256], strides = [1, 1]} : vector<2x256xf32> to vector<1x256xf32>
    %429 = vector.broadcast %428 : vector<1x256xf32> to vector<16x256xf32>
    %430 = arith.addf %427, %429 : vector<16x256xf32>
    %cst_305 = arith.constant 0.000000e+00 : f32
    %431 = vector.broadcast %cst_305 : f32 to vector<16x256xf32>
    %432 = arith.maximumf %430, %431 : vector<16x256xf32>
    %433 = arith.truncf %432 : vector<16x256xf32> to vector<16x256xbf16>
    %c0_306 = arith.constant 0 : index
    %c0_307 = arith.constant 0 : index
    %434 = vector.load %arg43[%c0_306, %c0_307] : memref<256x128xbf16, #tpu.memory_space<vmem>>, vector<256x128xbf16>
    %cst_308 = arith.constant dense<0.000000e+00> : vector<16x128xf32>
    %435 = tpu.matmul %433, %434, %cst_308 {dimension_numbers = #tpu.dot_dimension_numbers<[1], [0], [0], [1], [0, 0, 1, 1], [], []>} : vector<16x256xbf16>, vector<256x128xbf16>, vector<16x128xf32> -> vector<16x128xf32>
    %c0_309 = arith.constant 0 : index
    %c0_310 = arith.constant 0 : index
    %436 = vector.load %arg44[%c0_309, %c0_310] : memref<256x128xbf16, #tpu.memory_space<vmem>>, vector<256x128xbf16>
    %cst_311 = arith.constant dense<0.000000e+00> : vector<16x128xf32>
    %437 = tpu.matmul %433, %436, %cst_311 {dimension_numbers = #tpu.dot_dimension_numbers<[1], [0], [0], [1], [0, 0, 1, 1], [], []>} : vector<16x256xbf16>, vector<256x128xbf16>, vector<16x128xf32> -> vector<16x128xf32>
    %438 = arith.maximumf %435, %437 : vector<16x128xf32>
    %439 = arith.truncf %438 : vector<16x128xf32> to vector<16x128xbf16>
    %c0_312 = arith.constant 0 : index
    %c0_313 = arith.constant 0 : index
    %440 = vector.load %arg45[%c0_312, %c0_313] : memref<8x16xbf16, #tpu.memory_space<vmem>>, vector<8x16xbf16>
    %cst_314 = arith.constant dense<0.000000e+00> : vector<8x128xf32>
    %441 = tpu.matmul %440, %439, %cst_314 {dimension_numbers = #tpu.dot_dimension_numbers<[1], [0], [0], [1], [0, 0, 1, 1], [], []>} : vector<8x16xbf16>, vector<16x128xbf16>, vector<8x128xf32> -> vector<8x128xf32>
    %c0_315 = arith.constant 0 : index
    %c0_316 = arith.constant 0 : index
    %442 = vector.load %arg46[%c0_315, %c0_316] : memref<8x16xbf16, #tpu.memory_space<vmem>>, vector<8x16xbf16>
    %cst_317 = arith.constant dense<0.000000e+00> : vector<8x128xf32>
    %443 = tpu.matmul %442, %439, %cst_317 {dimension_numbers = #tpu.dot_dimension_numbers<[1], [0], [0], [1], [0, 0, 1, 1], [], []>} : vector<8x16xbf16>, vector<16x128xbf16>, vector<8x128xf32> -> vector<8x128xf32>
    %444 = arith.maximumf %441, %443 : vector<8x128xf32>
    %445 = arith.truncf %444 : vector<8x128xf32> to vector<8x128xbf16>
    %c0_318 = arith.constant 0 : index
    %c0_319 = arith.constant 0 : index
    %c0_320 = arith.constant 0 : index
    %446 = vector.load %arg47[%c0_318, %c0_319, %c0_320] : memref<2x128x128xbf16, #tpu.memory_space<vmem>>, vector<1x128x128xbf16>
    %447 = vector.shape_cast %446 : vector<1x128x128xbf16> to vector<128x128xbf16>
    %cst_321 = arith.constant dense<0.000000e+00> : vector<8x128xf32>
    %448 = tpu.matmul %445, %447, %cst_321 {dimension_numbers = #tpu.dot_dimension_numbers<[1], [0], [0], [1], [0, 0, 1, 1], [], []>} : vector<8x128xbf16>, vector<128x128xbf16>, vector<8x128xf32> -> vector<8x128xf32>
    %449 = arith.truncf %448 : vector<8x128xf32> to vector<8x128xbf16>
    %c1_322 = arith.constant 1 : index
    %c0_323 = arith.constant 0 : index
    %c0_324 = arith.constant 0 : index
    %450 = vector.load %arg47[%c1_322, %c0_323, %c0_324] : memref<2x128x128xbf16, #tpu.memory_space<vmem>>, vector<1x128x128xbf16>
    %451 = vector.shape_cast %450 : vector<1x128x128xbf16> to vector<128x128xbf16>
    %cst_325 = arith.constant dense<0.000000e+00> : vector<8x128xf32>
    %452 = tpu.matmul %445, %451, %cst_325 {dimension_numbers = #tpu.dot_dimension_numbers<[1], [0], [0], [1], [0, 0, 1, 1], [], []>} : vector<8x128xbf16>, vector<128x128xbf16>, vector<8x128xf32> -> vector<8x128xf32>
    %453 = arith.truncf %452 : vector<8x128xf32> to vector<8x128xbf16>
    %c0_326 = arith.constant 0 : index
    %c0_327 = arith.constant 0 : index
    %454 = vector.load %arg49[%c0_326, %c0_327] : memref<16x8xbf16, #tpu.memory_space<vmem>>, vector<16x8xbf16>
    %cst_328 = arith.constant dense<0.000000e+00> : vector<16x128xf32>
    %455 = tpu.matmul %454, %449, %cst_328 {dimension_numbers = #tpu.dot_dimension_numbers<[1], [0], [0], [1], [0, 0, 1, 1], [], []>} : vector<16x8xbf16>, vector<8x128xbf16>, vector<16x128xf32> -> vector<16x128xf32>
    %c0_329 = arith.constant 0 : index
    %c0_330 = arith.constant 0 : index
    %456 = vector.load %arg50[%c0_329, %c0_330] : memref<16x8xbf16, #tpu.memory_space<vmem>>, vector<16x8xbf16>
    %cst_331 = arith.constant dense<0.000000e+00> : vector<16x128xf32>
    %457 = tpu.matmul %456, %453, %cst_331 {dimension_numbers = #tpu.dot_dimension_numbers<[1], [0], [0], [1], [0, 0, 1, 1], [], []>} : vector<16x8xbf16>, vector<8x128xbf16>, vector<16x128xf32> -> vector<16x128xf32>
    %458 = arith.addf %455, %457 : vector<16x128xf32>
    %c0_332 = arith.constant 0 : index
    %c0_333 = arith.constant 0 : index
    %459 = vector.load %arg48[%c0_332, %c0_333] : memref<1x128xf32, #tpu.memory_space<vmem>>, vector<1x128xf32>
    %460 = vector.broadcast %459 : vector<1x128xf32> to vector<16x128xf32>
    %461 = arith.addf %458, %460 : vector<16x128xf32>
    %cst_334 = arith.constant 0.000000e+00 : bf16
    %462 = vector.broadcast %cst_334 : bf16 to vector<2x256xbf16>
    %c0_335 = arith.constant 0 : index
    %c0_336 = arith.constant 0 : index
    %463 = vector.load %arg67[%c0_335, %c0_336] : memref<20x256xbf16, #tpu.memory_space<vmem>>, vector<2x256xbf16>
    tpu.vector_store %arg67[%c0_335, %c0_336], %462 {strides = array<i32>} : memref<20x256xbf16, #tpu.memory_space<vmem>>, vector<2x256xbf16>,
    %c18_337 = arith.constant 18 : index
    %c0_338 = arith.constant 0 : index
    %464 = vector.load %arg67[%c18_337, %c0_338] : memref<20x256xbf16, #tpu.memory_space<vmem>>, vector<2x256xbf16>
    tpu.vector_store %arg67[%c18_337, %c0_338], %462 {strides = array<i32>} : memref<20x256xbf16, #tpu.memory_space<vmem>>, vector<2x256xbf16>,
    %465 = arith.truncf %461 : vector<16x128xf32> to vector<16x128xbf16>
    %c2_339 = arith.constant 2 : index
    %c0_340 = arith.constant 0 : index
    %466 = vector.load %arg67[%c2_339, %c0_340] : memref<20x256xbf16, #tpu.memory_space<vmem>>, vector<16x128xbf16>
    tpu.vector_store %arg67[%c2_339, %c0_340], %465 {strides = array<i32>} : memref<20x256xbf16, #tpu.memory_space<vmem>>, vector<16x128xbf16>,
    %467 = arith.truncf %318 : vector<16x128xf32> to vector<16x128xbf16>
    %c2_341 = arith.constant 2 : index
    %c128 = arith.constant 128 : index
    %468 = vector.load %arg67[%c2_341, %c128] : memref<20x256xbf16, #tpu.memory_space<vmem>>, vector<16x128xbf16>
    tpu.vector_store %arg67[%c2_341, %c128], %467 {strides = array<i32>} : memref<20x256xbf16, #tpu.memory_space<vmem>>, vector<16x128xbf16>,
    %c0_342 = arith.constant 0 : index
    %c0_343 = arith.constant 0 : index
    %469 = vector.load %arg67[%c0_342, %c0_343] : memref<20x256xbf16, #tpu.memory_space<vmem>>, vector<16x256xbf16>
    %c0_344 = arith.constant 0 : index
    %c0_345 = arith.constant 0 : index
    %c0_346 = arith.constant 0 : index
    %470 = vector.load %arg51[%c0_344, %c0_345, %c0_346] : memref<3x256x128xbf16, #tpu.memory_space<vmem>>, vector<1x256x128xbf16>
    %471 = vector.shape_cast %470 : vector<1x256x128xbf16> to vector<256x128xbf16>
    %cst_347 = arith.constant dense<0.000000e+00> : vector<16x128xf32>
    %472 = tpu.matmul %469, %471, %cst_347 {dimension_numbers = #tpu.dot_dimension_numbers<[1], [0], [0], [1], [0, 0, 1, 1], [], []>} : vector<16x256xbf16>, vector<256x128xbf16>, vector<16x128xf32> -> vector<16x128xf32>
    %c2_348 = arith.constant 2 : index
    %c0_349 = arith.constant 0 : index
    %473 = vector.load %arg67[%c2_348, %c0_349] : memref<20x256xbf16, #tpu.memory_space<vmem>>, vector<16x256xbf16>
    %c1_350 = arith.constant 1 : index
    %c0_351 = arith.constant 0 : index
    %c0_352 = arith.constant 0 : index
    %474 = vector.load %arg51[%c1_350, %c0_351, %c0_352] : memref<3x256x128xbf16, #tpu.memory_space<vmem>>, vector<1x256x128xbf16>
    %475 = vector.shape_cast %474 : vector<1x256x128xbf16> to vector<256x128xbf16>
    %cst_353 = arith.constant dense<0.000000e+00> : vector<16x128xf32>
    %476 = tpu.matmul %473, %475, %cst_353 {dimension_numbers = #tpu.dot_dimension_numbers<[1], [0], [0], [1], [0, 0, 1, 1], [], []>} : vector<16x256xbf16>, vector<256x128xbf16>, vector<16x128xf32> -> vector<16x128xf32>
    %477 = arith.addf %472, %476 : vector<16x128xf32>
    %c4_354 = arith.constant 4 : index
    %c0_355 = arith.constant 0 : index
    %478 = vector.load %arg67[%c4_354, %c0_355] : memref<20x256xbf16, #tpu.memory_space<vmem>>, vector<16x256xbf16>
    %c2_356 = arith.constant 2 : index
    %c0_357 = arith.constant 0 : index
    %c0_358 = arith.constant 0 : index
    %479 = vector.load %arg51[%c2_356, %c0_357, %c0_358] : memref<3x256x128xbf16, #tpu.memory_space<vmem>>, vector<1x256x128xbf16>
    %480 = vector.shape_cast %479 : vector<1x256x128xbf16> to vector<256x128xbf16>
    %cst_359 = arith.constant dense<0.000000e+00> : vector<16x128xf32>
    %481 = tpu.matmul %478, %480, %cst_359 {dimension_numbers = #tpu.dot_dimension_numbers<[1], [0], [0], [1], [0, 0, 1, 1], [], []>} : vector<16x256xbf16>, vector<256x128xbf16>, vector<16x128xf32> -> vector<16x128xf32>
    %482 = arith.addf %477, %481 : vector<16x128xf32>
    %c0_360 = arith.constant 0 : index
    %c0_361 = arith.constant 0 : index
    %483 = vector.load %arg52[%c0_360, %c0_361] : memref<1x128xf32, #tpu.memory_space<vmem>>, vector<1x128xf32>
    %484 = vector.broadcast %483 : vector<1x128xf32> to vector<16x128xf32>
    %485 = arith.addf %482, %484 : vector<16x128xf32>
    %486 = arith.truncf %485 : vector<16x128xf32> to vector<16x128xbf16>
    %c0_362 = arith.constant 0 : index
    %c0_363 = arith.constant 0 : index
    %c0_364 = arith.constant 0 : index
    %487 = vector.load %arg53[%c0_362, %c0_363, %c0_364] : memref<2x128x128xbf16, #tpu.memory_space<vmem>>, vector<1x128x128xbf16>
    %488 = vector.shape_cast %487 : vector<1x128x128xbf16> to vector<128x128xbf16>
    %cst_365 = arith.constant dense<0.000000e+00> : vector<16x128xf32>
    %489 = tpu.matmul %486, %488, %cst_365 {dimension_numbers = #tpu.dot_dimension_numbers<[1], [0], [0], [1], [0, 0, 1, 1], [], []>} : vector<16x128xbf16>, vector<128x128xbf16>, vector<16x128xf32> -> vector<16x128xf32>
    %490 = arith.truncf %489 : vector<16x128xf32> to vector<16x128xbf16>
    %c1_366 = arith.constant 1 : index
    %c0_367 = arith.constant 0 : index
    %c0_368 = arith.constant 0 : index
    %491 = vector.load %arg53[%c1_366, %c0_367, %c0_368] : memref<2x128x128xbf16, #tpu.memory_space<vmem>>, vector<1x128x128xbf16>
    %492 = vector.shape_cast %491 : vector<1x128x128xbf16> to vector<128x128xbf16>
    %cst_369 = arith.constant dense<0.000000e+00> : vector<16x128xf32>
    %493 = tpu.matmul %486, %492, %cst_369 {dimension_numbers = #tpu.dot_dimension_numbers<[1], [0], [0], [1], [0, 0, 1, 1], [], []>} : vector<16x128xbf16>, vector<128x128xbf16>, vector<16x128xf32> -> vector<16x128xf32>
    %494 = arith.truncf %493 : vector<16x128xf32> to vector<16x128xbf16>
    %c0_370 = arith.constant 0 : index
    %c0_371 = arith.constant 0 : index
    %495 = vector.load %arg55[%c0_370, %c0_371] : memref<32x16xbf16, #tpu.memory_space<vmem>>, vector<32x16xbf16>
    %cst_372 = arith.constant dense<0.000000e+00> : vector<32x128xf32>
    %496 = tpu.matmul %495, %490, %cst_372 {dimension_numbers = #tpu.dot_dimension_numbers<[1], [0], [0], [1], [0, 0, 1, 1], [], []>} : vector<32x16xbf16>, vector<16x128xbf16>, vector<32x128xf32> -> vector<32x128xf32>
    %c0_373 = arith.constant 0 : index
    %c0_374 = arith.constant 0 : index
    %497 = vector.load %arg56[%c0_373, %c0_374] : memref<32x16xbf16, #tpu.memory_space<vmem>>, vector<32x16xbf16>
    %cst_375 = arith.constant dense<0.000000e+00> : vector<32x128xf32>
    %498 = tpu.matmul %497, %494, %cst_375 {dimension_numbers = #tpu.dot_dimension_numbers<[1], [0], [0], [1], [0, 0, 1, 1], [], []>} : vector<32x16xbf16>, vector<16x128xbf16>, vector<32x128xf32> -> vector<32x128xf32>
    %499 = arith.addf %496, %498 : vector<32x128xf32>
    %c0_376 = arith.constant 0 : index
    %c0_377 = arith.constant 0 : index
    %500 = vector.load %arg54[%c0_376, %c0_377] : memref<1x128xf32, #tpu.memory_space<vmem>>, vector<1x128xf32>
    %501 = vector.broadcast %500 : vector<1x128xf32> to vector<32x128xf32>
    %502 = arith.addf %499, %501 : vector<32x128xf32>
    %cst_378 = arith.constant 0.000000e+00 : bf16
    %503 = vector.broadcast %cst_378 : bf16 to vector<2x256xbf16>
    %c0_379 = arith.constant 0 : index
    %c0_380 = arith.constant 0 : index
    %504 = vector.load %arg65[%c0_379, %c0_380] : memref<36x256xbf16, #tpu.memory_space<vmem>>, vector<2x256xbf16>
    tpu.vector_store %arg65[%c0_379, %c0_380], %503 {strides = array<i32>} : memref<36x256xbf16, #tpu.memory_space<vmem>>, vector<2x256xbf16>,
    %c34_381 = arith.constant 34 : index
    %c0_382 = arith.constant 0 : index
    %505 = vector.load %arg65[%c34_381, %c0_382] : memref<36x256xbf16, #tpu.memory_space<vmem>>, vector<2x256xbf16>
    tpu.vector_store %arg65[%c34_381, %c0_382], %503 {strides = array<i32>} : memref<36x256xbf16, #tpu.memory_space<vmem>>, vector<2x256xbf16>,
    %506 = arith.truncf %502 : vector<32x128xf32> to vector<32x128xbf16>
    %c2_383 = arith.constant 2 : index
    %c0_384 = arith.constant 0 : index
    %507 = vector.load %arg65[%c2_383, %c0_384] : memref<36x256xbf16, #tpu.memory_space<vmem>>, vector<32x128xbf16>
    tpu.vector_store %arg65[%c2_383, %c0_384], %506 {strides = array<i32>} : memref<36x256xbf16, #tpu.memory_space<vmem>>, vector<32x128xbf16>,
    %508 = arith.truncf %192 : vector<32x128xf32> to vector<32x128xbf16>
    %c2_385 = arith.constant 2 : index
    %c128_386 = arith.constant 128 : index
    %509 = vector.load %arg65[%c2_385, %c128_386] : memref<36x256xbf16, #tpu.memory_space<vmem>>, vector<32x128xbf16>
    tpu.vector_store %arg65[%c2_385, %c128_386], %508 {strides = array<i32>} : memref<36x256xbf16, #tpu.memory_space<vmem>>, vector<32x128xbf16>,
    %c0_387 = arith.constant 0 : index
    %c0_388 = arith.constant 0 : index
    %510 = vector.load %arg65[%c0_387, %c0_388] : memref<36x256xbf16, #tpu.memory_space<vmem>>, vector<32x256xbf16>
    %c0_389 = arith.constant 0 : index
    %c0_390 = arith.constant 0 : index
    %c0_391 = arith.constant 0 : index
    %511 = vector.load %arg57[%c0_389, %c0_390, %c0_391] : memref<3x256x128xbf16, #tpu.memory_space<vmem>>, vector<1x256x128xbf16>
    %512 = vector.shape_cast %511 : vector<1x256x128xbf16> to vector<256x128xbf16>
    %cst_392 = arith.constant dense<0.000000e+00> : vector<32x128xf32>
    %513 = tpu.matmul %510, %512, %cst_392 {dimension_numbers = #tpu.dot_dimension_numbers<[1], [0], [0], [1], [0, 0, 1, 1], [], []>} : vector<32x256xbf16>, vector<256x128xbf16>, vector<32x128xf32> -> vector<32x128xf32>
    %c2_393 = arith.constant 2 : index
    %c0_394 = arith.constant 0 : index
    %514 = vector.load %arg65[%c2_393, %c0_394] : memref<36x256xbf16, #tpu.memory_space<vmem>>, vector<32x256xbf16>
    %c1_395 = arith.constant 1 : index
    %c0_396 = arith.constant 0 : index
    %c0_397 = arith.constant 0 : index
    %515 = vector.load %arg57[%c1_395, %c0_396, %c0_397] : memref<3x256x128xbf16, #tpu.memory_space<vmem>>, vector<1x256x128xbf16>
    %516 = vector.shape_cast %515 : vector<1x256x128xbf16> to vector<256x128xbf16>
    %cst_398 = arith.constant dense<0.000000e+00> : vector<32x128xf32>
    %517 = tpu.matmul %514, %516, %cst_398 {dimension_numbers = #tpu.dot_dimension_numbers<[1], [0], [0], [1], [0, 0, 1, 1], [], []>} : vector<32x256xbf16>, vector<256x128xbf16>, vector<32x128xf32> -> vector<32x128xf32>
    %518 = arith.addf %513, %517 : vector<32x128xf32>
    %c4_399 = arith.constant 4 : index
    %c0_400 = arith.constant 0 : index
    %519 = vector.load %arg65[%c4_399, %c0_400] : memref<36x256xbf16, #tpu.memory_space<vmem>>, vector<32x256xbf16>
    %c2_401 = arith.constant 2 : index
    %c0_402 = arith.constant 0 : index
    %c0_403 = arith.constant 0 : index
    %520 = vector.load %arg57[%c2_401, %c0_402, %c0_403] : memref<3x256x128xbf16, #tpu.memory_space<vmem>>, vector<1x256x128xbf16>
    %521 = vector.shape_cast %520 : vector<1x256x128xbf16> to vector<256x128xbf16>
    %cst_404 = arith.constant dense<0.000000e+00> : vector<32x128xf32>
    %522 = tpu.matmul %519, %521, %cst_404 {dimension_numbers = #tpu.dot_dimension_numbers<[1], [0], [0], [1], [0, 0, 1, 1], [], []>} : vector<32x256xbf16>, vector<256x128xbf16>, vector<32x128xf32> -> vector<32x128xf32>
    %523 = arith.addf %518, %522 : vector<32x128xf32>
    %c0_405 = arith.constant 0 : index
    %c0_406 = arith.constant 0 : index
    %524 = vector.load %arg58[%c0_405, %c0_406] : memref<1x128xf32, #tpu.memory_space<vmem>>, vector<1x128xf32>
    %525 = vector.broadcast %524 : vector<1x128xf32> to vector<32x128xf32>
    %526 = arith.addf %523, %525 : vector<32x128xf32>
    %527 = arith.truncf %526 : vector<32x128xf32> to vector<32x128xbf16>
    %c0_407 = arith.constant 0 : index
    %c0_408 = arith.constant 0 : index
    %528 = vector.load %arg59[%c0_407, %c0_408] : memref<128x128xbf16, #tpu.memory_space<vmem>>, vector<128x128xbf16>
    %cst_409 = arith.constant dense<0.000000e+00> : vector<32x128xf32>
    %529 = tpu.matmul %527, %528, %cst_409 {dimension_numbers = #tpu.dot_dimension_numbers<[1], [0], [0], [1], [0, 0, 1, 1], [], []>} : vector<32x128xbf16>, vector<128x128xbf16>, vector<32x128xf32> -> vector<32x128xf32>
    %c0_410 = arith.constant 0 : index
    %c0_411 = arith.constant 0 : index
    %530 = vector.load %arg60[%c0_410, %c0_411] : memref<1x128xf32, #tpu.memory_space<vmem>>, vector<1x128xf32>
    %531 = vector.broadcast %530 : vector<1x128xf32> to vector<32x128xf32>
    %532 = arith.addf %529, %531 : vector<32x128xf32>
    %c0_412 = arith.constant 0 : index
    %c0_413 = arith.constant 0 : index
    %533 = vector.load %arg61[%c0_412, %c0_413] : memref<1x128xf32, #tpu.memory_space<vmem>>, vector<1x128xf32>
    %cst_414 = arith.constant 0.000000e+00 : f32
    %534 = vector.broadcast %cst_414 : f32 to vector<32x128xf32>
    %535 = arith.subf %534, %532 : vector<32x128xf32>
    %536 = math.exp %535 : vector<32x128xf32>
    %cst_415 = arith.constant 1.000000e+00 : f32
    %537 = vector.broadcast %cst_415 : f32 to vector<32x128xf32>
    %538 = arith.addf %537, %536 : vector<32x128xf32>
    %cst_416 = arith.constant 1.000000e+00 : f32
    %539 = vector.broadcast %cst_416 : f32 to vector<32x128xf32>
    %540 = arith.divf %539, %538 : vector<32x128xf32>
    %541 = vector.broadcast %533 : vector<1x128xf32> to vector<32x128xf32>
    %542 = arith.mulf %541, %540 : vector<32x128xf32>
    %cst_417 = arith.constant 1.000000e+00 : f32
    %543 = vector.broadcast %cst_417 : f32 to vector<1x128xf32>
    %544 = arith.subf %543, %533 : vector<1x128xf32>
    %545 = vector.broadcast %544 : vector<1x128xf32> to vector<32x128xf32>
    %546 = arith.mulf %545, %532 : vector<32x128xf32>
    %547 = arith.addf %542, %546 : vector<32x128xf32>
    %c0_418 = arith.constant 0 : index
    %c0_419 = arith.constant 0 : index
    %548 = vector.load %arg62[%c0_418, %c0_419] : memref<32x128xf32, #tpu.memory_space<vmem>>, vector<32x128xf32>
    tpu.vector_store %arg62[%c0_418, %c0_419], %547 {strides = array<i32>} : memref<32x128xf32, #tpu.memory_space<vmem>>, vector<32x128xf32>,
    return
  }
}

</mosaic_0001>

<bundles_post_ra>
// kernel: plan_generator_fwd.1
= control target key start
LH: loop header
LB: loop body
LE: loop exit
PB: predicated region body
PF: predicated region fallthrough
CT: control target
= control target key end

     0   :  { %s12872_s6 = smov 1   ;;  %s12873_s10 = smov 2   ;;  %s14809_s0 = inlined_call_operand.smem [shape: u32[63], index: -1, kind: input, shape index: {}] }
   0x1   :  { %s12962_s5 = sld [smem:[%s14809_s0]]   ;;  %s12874_s14 = smov 3  }
   0x2   :  { %s12967_s9 = sld [smem:[%s14809_s0 + %s12872_s6]]   ;;  %s12875_s18 = smov 4  }
   0x3   :  { %s12972_s13 = sld [smem:[%s14809_s0 + %s12873_s10]]   ;;  %s12876_s22 = smov 5  }
   0x4   :  { %s12977_s17 = sld [smem:[%s14809_s0 + %s12874_s14]]   ;;  %s12877_s26 = smov 6  }
   0x5   :  { %s12982_s21 = sld [smem:[%s14809_s0 + %s12875_s18]]   ;;  %s12878_s30 = smov 7  }
   0x6   :  { %s12987_s25 = sld [smem:[%s14809_s0 + %s12876_s22]]   ;;  %s12879_s4 = smov 8  }
   0x7   :  { %s12992_s29 = sld [smem:[%s14809_s0 + %s12877_s26]]   ;;  %s12880_s10 = smov 9  }
   0x8   :  { %s12997_s3 = sld [smem:[%s14809_s0 + %s12878_s30]]   ;;  %s12881_s15 = smov 10  }
   0x9   :  { %s13002_s8 = sld [smem:[%s14809_s0 + %s12879_s4]]   ;;  %s12882_s20 = smov 11  }
   0xa   :  { %s13007_s14 = sld [smem:[%s14809_s0 + %s12880_s10]]   ;;  %s12883_s26 = smov 12  }
   0xb   :  { %14832 = sst [smem:[#allocation30_spill]] %s12982_s21  ;;  %s12884_s1 = smov 13  }
   0xc   :  { %s13012_s19 = sld [smem:[%s14809_s0 + %s12881_s15]]   ;;  %s12885_s7 = smov 14  }
   0xd   :  { %14833 = sst [smem:[#allocation31_spill]] %s12992_s29  ;;  %s12886_s15 = smov 15  }
   0xe   :  { %14834 = sst [smem:[#allocation32_spill]] %s12997_s3  ;;  %s12887_s22 = smov 16  }
   0xf   :  { %14835 = sst [smem:[#allocation33_spill]] %s13002_s8  ;;  %s12888_s28 = smov 17  }
  0x10   :  { %14836 = sst [smem:[#allocation34_spill]] %s13007_s14 }
  0x11   :  { %s13017_s24 = sld [smem:[%s14809_s0 + %s12882_s20]]  }
  0x12   :  { %14837 = sst [smem:[#allocation35_spill]] %s13012_s19 }
  0x13   :  { %s13022_s30 = sld [smem:[%s14809_s0 + %s12883_s26]]  }
  0x14   :  { %s13027_s6 = sld [smem:[%s14809_s0 + %s12884_s1]]  }
  0x15   :  { %s13032_s12 = sld [smem:[%s14809_s0 + %s12885_s7]]   ;;  %s12889_s7 = smov 18  }
  0x16   :  { %s13037_s20 = sld [smem:[%s14809_s0 + %s12886_s15]]   ;;  %s12890_s15 = smov 19  }
  0x17   :  { %14838 = sst [smem:[#allocation36_spill]] %s13017_s24 }
  0x18   :  { %s13042_s27 = sld [smem:[%s14809_s0 + %s12887_s22]]   ;;  %s12891_s22 = smov 20  }
  0x19   :  { %14839 = sst [smem:[#allocation37_spill]] %s13022_s30 }
  0x1a   :  { %14840 = sst [smem:[#allocation38_spill]] %s13027_s6 }
  0x1b   :  { %14841 = sst [smem:[#allocation39_spill]] %s13032_s12 }
  0x1c   :  { %14842 = sst [smem:[#allocation40_spill]] %s13037_s20 }
  0x1d   :  { %s13047_s4 = sld [smem:[%s14809_s0 + %s12888_s28]]   ;;  %s12892_s28 = smov 21  }
  0x1e   :  { %14843 = sst [smem:[#allocation41_spill]] %s13042_s27 }
  0x1f   :  { %s13052_s12 = sld [smem:[%s14809_s0 + %s12889_s7]]   ;;  %s12893_s7 = smov 22  }
  0x20   :  { %s13057_s20 = sld [smem:[%s14809_s0 + %s12890_s15]]   ;;  %s12894_s15 = smov 23  }
  0x21   :  { %s13062_s27 = sld [smem:[%s14809_s0 + %s12891_s22]]   ;;  %s12895_s22 = smov 24  }
  0x22   :  { %s13067_s30 = sld [smem:[%s14809_s0 + %s12892_s28]]   ;;  %s12896_s28 = smov 25  }
  0x23   :  { %14844 = sst [smem:[#allocation42_spill]] %s13047_s4 }
  0x24   :  { %s13072_s24 = sld [smem:[%s14809_s0 + %s12893_s7]]   ;;  %s12897_s7 = smov 26  }
  0x25   :  { %14845 = sst [smem:[#allocation43_spill]] %s13052_s12 }
  0x26   :  { %14846 = sst [smem:[#allocation44_spill]] %s13057_s20 }
  0x27   :  { %14847 = sst [smem:[#allocation45_spill]] %s13062_s27 }
  0x28   :  { %14848 = sst [smem:[#allocation46_spill]] %s13067_s30 }
  0x29   :  { %s13077_s20 = sld [smem:[%s14809_s0 + %s12894_s15]]   ;;  %s12898_s15 = smov 27  }
  0x2a   :  { %14849 = sst [smem:[#allocation47_spill]] %s13072_s24 }
  0x2b   :  { %s13082_s27 = sld [smem:[%s14809_s0 + %s12895_s22]]   ;;  %s12899_s22 = smov 28  }
  0x2c   :  { %s13087_s30 = sld [smem:[%s14809_s0 + %s12896_s28]]   ;;  %s12900_s28 = smov 29  }
  0x2d   :  { %s13092_s24 = sld [smem:[%s14809_s0 + %s12897_s7]]   ;;  %s12901_s7 = smov 30  }
  0x2e   :  { %s13112_s6 = sld [smem:[%s14809_s0 + %s12901_s7]]   ;;  %s12905_s7 = smov 34  }
  0x2f   :  { %14850 = sst [smem:[#allocation48_spill]] %s13077_s20 }
  0x30   :  { %s13097_s20 = sld [smem:[%s14809_s0 + %s12898_s15]]   ;;  %s12902_s15 = smov 31  }
  0x31   :  { %14851 = sst [smem:[#allocation49_spill]] %s13082_s27 }
  0x32   :  { %14852 = sst [smem:[#allocation50_spill]] %s13087_s30 }
  0x33   :  { %s13102_s27 = sld [smem:[%s14809_s0 + %s12899_s22]]   ;;  %s12903_s22 = smov 32  }
  0x34   :  { %s13107_s30 = sld [smem:[%s14809_s0 + %s12900_s28]]   ;;  %s12904_s28 = smov 33  }
  0x35   :  { %14856 = sst [smem:[#allocation54_spill]] %s13112_s6 }
  0x36   :  { %14853 = sst [smem:[#allocation51_spill]] %s13097_s20 }
  0x37   :  { %s13117_s20 = sld [smem:[%s14809_s0 + %s12902_s15]]   ;;  %s12906_s15 = smov 35  }
  0x38   :  { %s13132_s6 = sld [smem:[%s14809_s0 + %s12905_s7]]   ;;  %s12909_s7 = smov 38  }
  0x39   :  { %14854 = sst [smem:[#allocation52_spill]] %s13102_s27 }
  0x3a   :  { %14855 = sst [smem:[#allocation53_spill]] %s13107_s30 }
  0x3b   :  { %s13122_s27 = sld [smem:[%s14809_s0 + %s12903_s22]]   ;;  %s12907_s22 = smov 36  }
  0x3c   :  { %s13127_s30 = sld [smem:[%s14809_s0 + %s12904_s28]]   ;;  %s12908_s28 = smov 37  }
  0x3d   :  { %s13137_s12 = sld [smem:[%s14809_s0 + %s12906_s15]]   ;;  %s12910_s15 = smov 39  }
  0x3e   :  { %14858 = sst [smem:[#allocation56_spill]] %s13132_s6 }
  0x3f   :  { %s13142_s19 = sld [smem:[%s14809_s0 + %s12907_s22]]   ;;  %s12911_s22 = smov 40  }
  0x40   :  { %s13152_s6 = sld [smem:[%s14809_s0 + %s12909_s7]]   ;;  %s12913_s7 = smov 42  }
  0x41   :  { %s13157_s4 = sld [smem:[%s14809_s0 + %s12910_s15]]   ;;  %s12914_s15 = smov 43  }
  0x42   :  { %14857 = sst [smem:[#allocation55_spill]] %s13127_s30 }
  0x43   :  { %s13147_s30 = sld [smem:[%s14809_s0 + %s12908_s28]]   ;;  %s12912_s28 = smov 41  }
  0x44   :  { %s13162_s14 = sld [smem:[%s14809_s0 + %s12911_s22]]   ;;  %s12915_s22 = smov 44  }
  0x46   :  { %14860 = sst [smem:[#allocation58_spill]] %s13152_s6 }
  0x47   :  { %14861 = sst [smem:[#allocation59_spill]] %s13157_s4 }
  0x48   :  { %s13172_s6 = sld [smem:[%s14809_s0 + %s12913_s7]]   ;;  %s12917_s7 = smov 46  }
  0x49   :  { %14859 = sst [smem:[#allocation57_spill]] %s13147_s30 }
  0x4a   :  { %14862 = sst [smem:[#allocation60_spill]] %s13162_s14 }
  0x4b   :  { %s13167_s30 = sld [smem:[%s14809_s0 + %s12912_s28]]   ;;  %s12916_s28 = smov 45  }
  0x4c   :  { %s13177_s4 = sld [smem:[%s14809_s0 + %s12914_s15]]   ;;  %s12918_s15 = smov 47  }
  0x4d   :  { %s13182_s14 = sld [smem:[%s14809_s0 + %s12915_s22]]   ;;  %s12919_s22 = smov 48  }
  0x4e   :  { %14864 = sst [smem:[#allocation62_spill]] %s13172_s6 }
  0x4f   :  { %s13192_s6 = sld [smem:[%s14809_s0 + %s12917_s7]]   ;;  %s12921_s7 = smov 50  }
  0x51   :  { %14863 = sst [smem:[#allocation61_spill]] %s13167_s30 }
  0x52   :  { %14865 = sst [smem:[#allocation63_spill]] %s13177_s4 }
  0x53   :  { %14866 = sst [smem:[#allocation64_spill]] %s13182_s14 }
  0x54   :  { %s13187_s30 = sld [smem:[%s14809_s0 + %s12916_s28]]   ;;  %s12920_s28 = smov 49  }
  0x55   :  { %14868 = sst [smem:[#allocation66_spill]] %s13192_s6 }
  0x56   :  { %s13197_s4 = sld [smem:[%s14809_s0 + %s12918_s15]]   ;;  %s12922_s15 = smov 51  }
  0x57   :  { %s13202_s14 = sld [smem:[%s14809_s0 + %s12919_s22]]   ;;  %s12923_s22 = smov 52  }
  0x58   :  { %s13212_s6 = sld [smem:[%s14809_s0 + %s12921_s7]]   ;;  %s12925_s7 = smov 54  }
  0x59   :  { %s13222_s8 = sld [smem:[%s14809_s0 + %s12923_s22]]   ;;  %s12927_s22 = smov 56  }
  0x5a   :  { %14867 = sst [smem:[#allocation65_spill]] %s13187_s30 }
  0x5b   :  { %s13207_s30 = sld [smem:[%s14809_s0 + %s12920_s28]]   ;;  %s12924_s28 = smov 53  }
  0x5c   :  { %14869 = sst [smem:[#allocation67_spill]] %s13197_s4 }
  0x5d   :  { %s13217_s4 = sld [smem:[%s14809_s0 + %s12922_s15]]   ;;  %s12926_s15 = smov 55  }
  0x5e   :  { %14871 = sst [smem:[#allocation69_spill]] %s13212_s6 }
  0x5f   :  { %s13232_s6 = sld [smem:[%s14809_s0 + %s12925_s7]]   ;;  %s12929_s7 = smov 58  }
  0x60   :  { %s13242_s29 = sld [smem:[%s14809_s0 + %s12927_s22]]   ;;  %s12931_s22 = smov 60  }
  0x61   :  { %14870 = sst [smem:[#allocation68_spill]] %s13207_s30 }
  0x62   :  { %s13227_s30 = sld [smem:[%s14809_s0 + %s12924_s28]]   ;;  %s12928_s28 = smov 57  }
  0x63   :  { %14872 = sst [smem:[#allocation70_spill]] %s13217_s4 }
  0x64   :  { %s13237_s4 = sld [smem:[%s14809_s0 + %s12926_s15]]   ;;  %s12930_s15 = smov 59  }
  0x65   :  { %s13252_s21 = sld [smem:[%s14809_s0 + %s12929_s7]]   ;;  %s12933_s7 = smov 62  }
  0x66   :  { %14875 = sst [smem:[#allocation73_spill]] %s13242_s29 }
  0x67   :  { %s13262_s29 = sld [smem:[%s14809_s0 + %s12931_s22]]  }
  0x68   :  { %14873 = sst [smem:[#allocation71_spill]] %s13227_s30 }
  0x69   :  { %s13247_s30 = sld [smem:[%s14809_s0 + %s12928_s28]]   ;;  %s12932_s28 = smov 61  }
  0x6a   :  { %14874 = sst [smem:[#allocation72_spill]] %s13237_s4 }
  0x6b   :  { %s13257_s4 = sld [smem:[%s14809_s0 + %s12930_s15]]  }
  0x6c   :  { %s13272_s3 = sld [smem:[%s14809_s0 + %s12933_s7]]  }
  0x6f   :  { %14876 = sst [smem:[#allocation74_spill]] %s13247_s30 }
  0x70   :  { %s13267_s30 = sld [smem:[%s14809_s0 + %s12932_s28]]  }
  0x71   :  { %130 = vsyncpa [#allocation8], 0 }
  0x72   :  { %131 = vsyncpa [#allocation10], 0 }
  0x73   :  { %132 = vsyncpa [#allocation13], 0 }
  0x74   :  { %133 = vsyncpa [#allocation16], 0 }
  0x75   :  { %134 = vsyncpa [#allocation19], 0 }
  0x76   :  { %135 = vsyncpa [#allocation22], 0  ;;  %s12934_s15 = smov [#allocation9]   ;;  %s12935_s18 = smov [#allocation12]  }
  0x77   :  { %s212_s16 = sshll.u32 %s12934_s15, 4  ;;  %s236_s22 = sshll.u32 %s12935_s18, 4  ;;  %s213_s16 = int_to_ptr.vmem [resolvable:$true] %s212_s16  ;;  %s237_s22 = int_to_ptr.vmem [resolvable:$true] %s236_s22 }
  0x78   :  { %s12618_s23 = scalar_lea.hbm %s13117_s20, 16 }
  0x79   :  { %p12619_p0 = scmp.ne.s32.totalorder %s13117_s20, %s12618_s23  ;;  %p12622_p1 = scmp.lt.u32.totalorder %s12618_s23, %s13117_s20 }
  0x7b   :  { %p12624_p2 = pnand %p12622_p1, %p12619_p0 }
  0x7d   :  { %12627 = shalt.err (!%p12624_p2)
}
  0x7e   :  { %s12628_s0 = scalar_lea.vmem %s213_s16, 16  ;;  %s12632_s26 = scalar_lea.vmem %s213_s16, 32 }
  0x7f   :  { %p12629_p3 = scmp.ne.s32.totalorder %s213_s16, %s12628_s0  ;;  %p12633_p4 = scmp.lt.s32.totalorder %s213_s16, %s213_s16 }
  0x80   :  { %p12634_p5 = scmp.lt.s32.totalorder %s12632_s26, %s12628_s0 }
  0x82   :  { %p12635_p6 = por %p12634_p5, %p12633_p4 }
  0x84   :  { %p12636_p7 = pnand %p12635_p6, %p12629_p3 }
  0x86   :  { %12639 = shalt.err (!%p12636_p7)
}
  0x87   :  { %215 = dma.hbm_to_vmem [thread:$0]  %s13117_s20, 16, %s213_s16, [#allocation10]  }
  0x88   :  { %s12640_s28 = scalar_lea.hbm %s13137_s12, 16 }
  0x89   :  { %p12641_p8 = scmp.ne.s32.totalorder %s13137_s12, %s12640_s28  ;;  %p12644_p9 = scmp.lt.u32.totalorder %s12640_s28, %s13137_s12 }
  0x8b   :  { %p12646_p10 = pnand %p12644_p9, %p12641_p8 }
  0x8d   :  { %12649 = shalt.err (!%p12646_p10)
}
  0x8e   :  { %s12650_s1 = scalar_lea.vmem %s237_s22, 16  ;;  %s12654_s2 = scalar_lea.vmem %s237_s22, 32 }
  0x8f   :  { %p12651_p11 = scmp.ne.s32.totalorder %s237_s22, %s12650_s1  ;;  %p12655_p12 = scmp.lt.s32.totalorder %s237_s22, %s237_s22 }
  0x90   :  { %p12656_p13 = scmp.lt.s32.totalorder %s12654_s2, %s12650_s1 }
  0x92   :  { %p12657_p0 = por %p12656_p13, %p12655_p12 }
  0x94   :  { %p12658_p1 = pnand %p12657_p0, %p12651_p11 }
  0x96   :  { %12661 = shalt.err (!%p12658_p1)
}
  0x97   :  { %239 = dma.hbm_to_vmem [thread:$0]  %s13137_s12, 16, %s237_s22, [#allocation13]  }
  0x98   :  { %s12936_s7 = smov [#allocation15]   ;;  %s12937_s10 = smov [#allocation18]  }
  0x99   :  { %s278_s20 = sshll.u32 %s12936_s7, 4  ;;  %s306_s11 = sshll.u32 %s12937_s10, 4  ;;  %s279_s20 = int_to_ptr.vmem [resolvable:$true] %s278_s20  ;;  %s307_s11 = int_to_ptr.vmem [resolvable:$true] %s306_s11 }
  0x9a   :  { %s12662_s15 = scalar_lea.hbm %s13202_s14, 16 }
  0x9b   :  { %p12663_p2 = scmp.ne.s32.totalorder %s13202_s14, %s12662_s15  ;;  %p12666_p3 = scmp.lt.u32.totalorder %s12662_s15, %s13202_s14 }
  0x9d   :  { %p12668_p4 = pnand %p12666_p3, %p12663_p2 }
  0x9f   :  { %12671 = shalt.err (!%p12668_p4)
}
  0xa0   :  { %s12672_s16 = scalar_lea.vmem %s279_s20, 16  ;;  %s12676_s18 = scalar_lea.vmem %s279_s20, 32 }
  0xa1   :  { %p12673_p5 = scmp.ne.s32.totalorder %s279_s20, %s12672_s16  ;;  %p12677_p6 = scmp.lt.s32.totalorder %s279_s20, %s279_s20 }
  0xa2   :  { %p12678_p7 = scmp.lt.s32.totalorder %s12676_s18, %s12672_s16 }
  0xa4   :  { %p12679_p8 = por %p12678_p7, %p12677_p6 }
  0xa6   :  { %p12680_p9 = pnand %p12679_p8, %p12673_p5 }
  0xa8   :  { %12683 = shalt.err (!%p12680_p9)
}
  0xa9   :  { %281 = dma.hbm_to_vmem [thread:$0]  %s13202_s14, 16, %s279_s20, [#allocation16]  }
  0xaa   :  { %s12684_s12 = scalar_lea.hbm %s13232_s6, 16 }
  0xab   :  { %p12685_p10 = scmp.ne.s32.totalorder %s13232_s6, %s12684_s12  ;;  %p12688_p11 = scmp.lt.u32.totalorder %s12684_s12, %s13232_s6 }
  0xad   :  { %p12690_p12 = pnand %p12688_p11, %p12685_p10 }
  0xaf   :  { %12693 = shalt.err (!%p12690_p12)
}
  0xb0   :  { %s12694_s22 = scalar_lea.vmem %s307_s11, 16  ;;  %s12698_s23 = scalar_lea.vmem %s307_s11, 32 }
  0xb1   :  { %p12695_p13 = scmp.ne.s32.totalorder %s307_s11, %s12694_s22  ;;  %p12699_p0 = scmp.lt.s32.totalorder %s307_s11, %s307_s11 }
  0xb2   :  { %p12700_p1 = scmp.lt.s32.totalorder %s12698_s23, %s12694_s22 }
  0xb4   :  { %p12701_p2 = por %p12700_p1, %p12699_p0 }
  0xb6   :  { %p12702_p3 = pnand %p12701_p2, %p12695_p13 }
  0xb8   :  { %12705 = shalt.err (!%p12702_p3)
}
  0xb9   :  { %309 = dma.hbm_to_vmem [thread:$0]  %s13232_s6, 16, %s307_s11, [#allocation19]  }
  0xba   :  { %s12938_s0 = smov [#allocation21]   ;;  %s12939_s26 = smov [#allocation7]  }
  0xbb   :  { %s334_s14 = sshll.u32 %s12938_s0, 4  ;;  %s194_s28 = sshll.u32 %s12939_s26, 4  ;;  %s335_s14 = int_to_ptr.vmem [resolvable:$true] %s334_s14  ;;  %s195_s28 = int_to_ptr.vmem [resolvable:$true] %s194_s28 }
  0xbc   :  { %s12706_s1 = scalar_lea.hbm %s13262_s29, 16 }
  0xbd   :  { %p12707_p4 = scmp.ne.s32.totalorder %s13262_s29, %s12706_s1  ;;  %p12710_p5 = scmp.lt.u32.totalorder %s12706_s1, %s13262_s29 }
  0xbf   :  { %p12712_p6 = pnand %p12710_p5, %p12707_p4 }
  0xc1   :  { %12715 = shalt.err (!%p12712_p6)
}
  0xc2   :  { %s12716_s2 = scalar_lea.vmem %s335_s14, 16  ;;  %s12720_s7 = scalar_lea.vmem %s335_s14, 32 }
  0xc3   :  { %p12717_p7 = scmp.ne.s32.totalorder %s335_s14, %s12716_s2  ;;  %p12721_p8 = scmp.lt.s32.totalorder %s335_s14, %s335_s14 }
  0xc4   :  { %p12722_p9 = scmp.lt.s32.totalorder %s12720_s7, %s12716_s2 }
  0xc6   :  { %p12723_p10 = por %p12722_p9, %p12721_p8 }
  0xc8   :  { %p12724_p11 = pnand %p12723_p10, %p12717_p7 }
  0xca   :  { %12727 = shalt.err (!%p12724_p11)
}
  0xcb   :  { %337 = dma.hbm_to_vmem [thread:$0]  %s13262_s29, 16, %s335_s14, [#allocation22]  }
  0xcc   :  { %s12728_s6 = scalar_lea.hbm %s13092_s24, 16 }
  0xcd   :  { %p12729_p12 = scmp.ne.s32.totalorder %s13092_s24, %s12728_s6  ;;  %p12732_p13 = scmp.lt.u32.totalorder %s12728_s6, %s13092_s24 }
  0xcf   :  { %p12734_p0 = pnand %p12732_p13, %p12729_p12 }
  0xd1   :  { %12737 = shalt.err (!%p12734_p0)
}
  0xd2   :  { %s12738_s20 = scalar_lea.vmem %s195_s28, 16  ;;  %s12742_s10 = scalar_lea.vmem %s195_s28, 32 }
  0xd3   :  { %p12739_p1 = scmp.ne.s32.totalorder %s195_s28, %s12738_s20  ;;  %p12743_p2 = scmp.lt.s32.totalorder %s195_s28, %s195_s28 }
  0xd4   :  { %p12744_p3 = scmp.lt.s32.totalorder %s12742_s10, %s12738_s20 }
  0xd6   :  { %p12745_p4 = por %p12744_p3, %p12743_p2 }
  0xd8   :  { %p12746_p5 = pnand %p12745_p4, %p12739_p1 }
  0xda   :  { %12749 = shalt.err (!%p12746_p5)
}
  0xdb   :  { %197 = dma.hbm_to_vmem [thread:$0]  %s13092_s24, 16, %s195_s28, [#allocation8]  }
  0xdc   :  { %s12940_s11 = smov [#allocation11]   ;;  %s12941_s15 = smov [#allocation14]  }
  0xdd   :  { %s222_s29 = sshll.u32 %s12940_s11, 4  ;;  %s246_s16 = sshll.u32 %s12941_s15, 4  ;;  %s223_s29 = int_to_ptr.vmem [resolvable:$true] %s222_s29  ;;  %s247_s16 = int_to_ptr.vmem [resolvable:$true] %s246_s16 }
  0xde   :  { %s12750_s18 = scalar_lea.hbm %s13122_s27, 16 }
  0xdf   :  { %p12751_p6 = scmp.ne.s32.totalorder %s13122_s27, %s12750_s18  ;;  %p12754_p7 = scmp.lt.u32.totalorder %s12750_s18, %s13122_s27 }
  0xe1   :  { %p12756_p8 = pnand %p12754_p7, %p12751_p6 }
  0xe3   :  { %12759 = shalt.err (!%p12756_p8)
}
  0xe4   :  { %s12760_s12 = scalar_lea.vmem %s223_s29, 16  ;;  %s12764_s22 = scalar_lea.vmem %s223_s29, 32 }
  0xe5   :  { %p12761_p9 = scmp.ne.s32.totalorder %s223_s29, %s12760_s12  ;;  %p12765_p10 = scmp.lt.s32.totalorder %s223_s29, %s223_s29 }
  0xe6   :  { %p12766_p11 = scmp.lt.s32.totalorder %s12764_s22, %s12760_s12 }
  0xe8   :  { %p12767_p12 = por %p12766_p11, %p12765_p10 }
  0xea   :  { %p12768_p13 = pnand %p12767_p12, %p12761_p9 }
  0xec   :  { %12771 = shalt.err (!%p12768_p13)
}
  0xed   :  { %225 = dma.hbm_to_vmem [thread:$0]  %s13122_s27, 16, %s223_s29, [#allocation10]  }
  0xee   :  { %s12772_s24 = scalar_lea.hbm %s13142_s19, 16 }
  0xef   :  { %p12773_p0 = scmp.ne.s32.totalorder %s13142_s19, %s12772_s24  ;;  %p12776_p1 = scmp.lt.u32.totalorder %s12772_s24, %s13142_s19 }
  0xf1   :  { %p12778_p2 = pnand %p12776_p1, %p12773_p0 }
  0xf3   :  { %12781 = shalt.err (!%p12778_p2)
}
  0xf4   :  { %s12782_s23 = scalar_lea.vmem %s247_s16, 16  ;;  %s12786_s0 = scalar_lea.vmem %s247_s16, 32 }
  0xf5   :  { %p12783_p3 = scmp.ne.s32.totalorder %s247_s16, %s12782_s23  ;;  %p12787_p4 = scmp.lt.s32.totalorder %s247_s16, %s247_s16 }
  0xf6   :  { %p12788_p5 = scmp.lt.s32.totalorder %s12786_s0, %s12782_s23 }
  0xf8   :  { %p12789_p6 = por %p12788_p5, %p12787_p4 }
  0xfa   :  { %p12790_p7 = pnand %p12789_p6, %p12783_p3 }
  0xfc   :  { %12793 = shalt.err (!%p12790_p7)
}
  0xfd   :  { %249 = dma.hbm_to_vmem [thread:$0]  %s13142_s19, 16, %s247_s16, [#allocation13]  }
  0xfe   :  { %s12942_s14 = smov [#allocation17]   ;;  %s12943_s26 = smov [#allocation20]  }
  0xff   :  { %s294_s27 = sshll.u32 %s12942_s14, 4  ;;  %s322_s28 = sshll.u32 %s12943_s26, 4  ;;  %s295_s27 = int_to_ptr.vmem [resolvable:$true] %s294_s27  ;;  %s323_s28 = int_to_ptr.vmem [resolvable:$true] %s322_s28 }
 0x100   :  { %s12794_s1 = scalar_lea.hbm %s13222_s8, 16 }
 0x101   :  { %p12795_p8 = scmp.ne.s32.totalorder %s13222_s8, %s12794_s1  ;;  %p12798_p9 = scmp.lt.u32.totalorder %s12794_s1, %s13222_s8 }
 0x103   :  { %p12800_p10 = pnand %p12798_p9, %p12795_p8 }
 0x105   :  { %12803 = shalt.err (!%p12800_p10)
}
 0x106   :  { %s12804_s2 = scalar_lea.vmem %s295_s27, 16  ;;  %s12808_s7 = scalar_lea.vmem %s295_s27, 32 }
 0x107   :  { %p12805_p11 = scmp.ne.s32.totalorder %s295_s27, %s12804_s2  ;;  %p12809_p12 = scmp.lt.s32.totalorder %s295_s27, %s295_s27 }
 0x108   :  { %p12810_p13 = scmp.lt.s32.totalorder %s12808_s7, %s12804_s2 }
 0x10a   :  { %p12811_p0 = por %p12810_p13, %p12809_p12 }
 0x10c   :  { %p12812_p1 = pnand %p12811_p0, %p12805_p11 }
 0x10e   :  { %12815 = shalt.err (!%p12812_p1)
}
 0x10f   :  { %297 = dma.hbm_to_vmem [thread:$0]  %s13222_s8, 16, %s295_s27, [#allocation16]  }
 0x110   :  { %s12816_s19 = scalar_lea.hbm %s13252_s21, 16 }
 0x111   :  { %p12817_p2 = scmp.ne.s32.totalorder %s13252_s21, %s12816_s19  ;;  %p12820_p3 = scmp.lt.u32.totalorder %s12816_s19, %s13252_s21 }
 0x113   :  { %p12822_p4 = pnand %p12820_p3, %p12817_p2 }
 0x115   :  { %12825 = shalt.err (!%p12822_p4)
}
 0x116   :  { %s12826_s6 = scalar_lea.vmem %s323_s28, 16  ;;  %s12830_s20 = scalar_lea.vmem %s323_s28, 32 }
 0x117   :  { %p12827_p5 = scmp.ne.s32.totalorder %s323_s28, %s12826_s6  ;;  %p12831_p6 = scmp.lt.s32.totalorder %s323_s28, %s323_s28 }
 0x118   :  { %p12832_p7 = scmp.lt.s32.totalorder %s12830_s20, %s12826_s6 }
 0x11a   :  { %p12833_p8 = por %p12832_p7, %p12831_p6 }
 0x11c   :  { %p12834_p9 = pnand %p12833_p8, %p12827_p5 }
 0x11e   :  { %12837 = shalt.err (!%p12834_p9)
}
 0x11f   :  { %325 = dma.hbm_to_vmem [thread:$0]  %s13252_s21, 16, %s323_s28, [#allocation19]  }
 0x120   :  { %s12944_s10 = smov [#allocation23]   ;;  %s12838_s11 = scalar_lea.hbm %s13267_s30, 16 }
 0x121   :  { %s344_s8 = sshll.u32 %s12944_s10, 4  ;;  %p12839_p10 = scmp.ne.s32.totalorder %s13267_s30, %s12838_s11  ;;  %s345_s8 = int_to_ptr.vmem [resolvable:$true] %s344_s8 }
 0x122   :  { %p12842_p11 = scmp.lt.u32.totalorder %s12838_s11, %s13267_s30 }
 0x124   :  { %p12844_p12 = pnand %p12842_p11, %p12839_p10 }
 0x126   :  { %12847 = shalt.err (!%p12844_p12)
}
 0x127   :  { %s12848_s29 = scalar_lea.vmem %s345_s8, 16  ;;  %s12852_s15 = scalar_lea.vmem %s345_s8, 32 }
 0x128   :  { %p12849_p13 = scmp.ne.s32.totalorder %s345_s8, %s12848_s29  ;;  %p12853_p0 = scmp.lt.s32.totalorder %s345_s8, %s345_s8 }
 0x129   :  { %p12854_p1 = scmp.lt.s32.totalorder %s12852_s15, %s12848_s29 }
 0x12b   :  { %p12855_p2 = por %p12854_p1, %p12853_p0 }
 0x12d   :  { %p12856_p3 = pnand %p12855_p2, %p12849_p13 }
 0x12f   :  { %12859 = shalt.err (!%p12856_p3)
}
 0x130   :  { %347 = dma.hbm_to_vmem [thread:$0]  %s13267_s30, 16, %s345_s8, [#allocation22]  }
 0x131   :  { %12860 = dma.done.wait [#allocation8], 16  }
 0x132   :  { %12861 = vsyncadd [#allocation8], 4294967280 }
 0x133   :  { %12862 = dma.done.wait [#allocation10], 32  }
 0x134   :  { %12863 = vsyncadd [#allocation10], 4294967264 }
 0x135   :  { %12864 = dma.done.wait [#allocation13], 32  }
 0x136   :  { %12865 = vsyncadd [#allocation13], 4294967264 }
 0x137   :  { %12866 = dma.done.wait [#allocation16], 32  }
 0x138   :  { %12867 = vsyncadd [#allocation16], 4294967264 }
 0x139   :  { %12868 = dma.done.wait [#allocation19], 32  }
 0x13a   :  { %12869 = vsyncadd [#allocation19], 4294967264 }
 0x13b   :  { %12870 = dma.done.wait [#allocation22], 32  }
 0x13c   :  { %12871 = vsyncadd [#allocation22], 4294967264  ;;  %v11806_v0 = vld [vmem:[%s12967_s9 + $0x40] sm:$0xff]   ;;  %v11810_v4 = vld [vmem:[%s12967_s9 + $0x48] sm:$0xff]   ;;  %v12945_v22 = vmov 1983009808   ;;  %v388_v24 = vlaneseq }
 0x13d   :  { %v11807_v1 = vld [vmem:[%s12967_s9 + $0xc0] sm:$0xff]   ;;  %10532 = vmatprep.subr.bf16.mxu0 %v11806_v0  ;;  %v11811_v5 = vld [vmem:[%s12967_s9 + $0xc8] sm:$0xff]   ;;  %v11814_v8 = vld [vmem:[%s12967_s9 + $0x50] sm:$0xff]   ;;  %v386_v23 = vunpack.c.l.s4 %v12945_v22  ;;  %v12946_v41 = vmov 0.0   ;;  %vm12947_vm0 = vmmov 0   ;;  %vm793_vm1 = vcmask 523264  }
 0x13e   :  { %v11808_v2 = vld [vmem:[%s12967_s9] sm:$0xff]   ;;  %10554 = vmatprep.subr.bf16.mxu1 %v11807_v1  ;;  %v11812_v6 = vld [vmem:[%s12967_s9 + $0x8] sm:$0xff]   ;;  %v11815_v9 = vld [vmem:[%s12967_s9 + $0xd0] sm:$0xff]   ;;  %v13344_v30 = vshrl.u32 %v388_v24, 7  ;;  %vm862_vm2 = vcmask 261120   ;;  %vm1117_vm3 = vcmask 254977  }
 0x13f   :  { %v11809_v3 = vld [vmem:[%s12967_s9 + $0x80] sm:$0xff]   ;;  %10533 = vmatpush3.bf16.msra.mxu0 %v11808_v2  ;;  %v11813_v7 = vld [vmem:[%s12967_s9 + $0x88] sm:$0xff]   ;;  %v11816_v10 = vld [vmem:[%s12967_s9 + $0x10] sm:$0xff]   ;;  %v387_v29 = vunpack.c.0.s8 %v386_v23  ;;  %vm1115_vm4 = vcmask 253952   ;;  %s14881_s21 = sld [smem:[#allocation34_spill]]  ;;  %s12950_s30 = smov 96  }
 0x140   :  { %10555 = vmatpush3.bf16.msra.mxu1 %v11809_v3  ;;  %10534 = vmatprep.subr.bf16.mxu0 %v11810_v4  ;;  %v11817_v11 = vld [vmem:[%s12967_s9 + $0x90] sm:$0xff]   ;;  %v11818_v12 = vld [vmem:[%s12967_s9 + $0x58] sm:$0xff]   ;;  %v11822_v16 = vld [vmem:[%s12967_s9 + $0x60] sm:$0xff]   ;;  %s12951_s16 = smov 64   ;;  %s14882_s18 = sld [smem:[#allocation42_spill]]  ;;  %vm1130_vm5 = vcmask 256002  }
 0x141   :  { %10556 = vmatprep.subr.bf16.mxu1 %v11811_v5  ;;  %v11819_v13 = vld [vmem:[%s12967_s9 + $0xd8] sm:$0xff]   ;;  %v11823_v17 = vld [vmem:[%s12967_s9 + $0xe0] sm:$0xff]   ;;  %v11826_v20 = vld [vmem:[%s12967_s9 + $0x68] sm:$0xff]   ;;  %v390_v35 = vsub.s32 %v387_v29, %v13344_v30  ;;  %vm1136_vm6 = vcmask 257027   ;;  %vm1233_vm7 = vcmask 1046528   ;;  %vm1389_vm8 = vcmask 1045504  }
 0x142   :  { %v11820_v14 = vld [vmem:[%s12967_s9 + $0x18] sm:$0xff]   ;;  %v11824_v18 = vld [vmem:[%s12967_s9 + $0x20] sm:$0xff]   ;;  %v11827_v21 = vld [vmem:[%s12967_s9 + $0xe8] sm:$0xff]   ;;  %s14883_s12 = sld [smem:[#allocation35_spill]]  ;;  %vm1518_vm9 = vcmask 1040384   ;;  %s14885_s24 = sld [smem:[#allocation38_spill]] }
 0x143   :  { %10535 = vmatpush3.bf16.msra.mxu0 %v11812_v6  ;;  %v11821_v15 = vld [vmem:[%s12967_s9 + $0x98] sm:$0xff]   ;;  %v11825_v19 = vld [vmem:[%s12967_s9 + $0xa0] sm:$0xff]   ;;  %v11828_v25 = vld [vmem:[%s12967_s9 + $0x28] sm:$0xff]   ;;  %s14884_s22 = sld [smem:[#allocation43_spill]]  ;;  %s14886_s23 = sld [smem:[#allocation36_spill]]  ;;  %vm1625_vm10 = vcmask 64512  }
 0x144   :  { %10557 = vmatpush3.bf16.msra.mxu1 %v11813_v7  ;;  %10536 = vmatprep.subr.bf16.mxu0 %v11814_v8  ;;  %v11829_v26 = vld [vmem:[%s12967_s9 + $0xa8] sm:$0xff]   ;;  %v11830_v27 = vld [vmem:[%s12967_s9 + $0x70] sm:$0xff]   ;;  %v11834_v33 = vld [vmem:[%s12967_s9 + $0x78] sm:$0xff]   ;;  %s14887_s0 = sld [smem:[#allocation37_spill]]  ;;  %vm1734_vm11 = vcmask 1044484   ;;  %s14890_s14 = sld [smem:[#allocation39_spill]] }
 0x145   :  { %10558 = vmatprep.subr.bf16.mxu1 %v11815_v9  ;;  %v11831_v28 = vld [vmem:[%s12967_s9 + $0xf0] sm:$0xff]   ;;  %v11835_v34 = vld [vmem:[%s12967_s9 + $0xf8] sm:$0xff]   ;;  %v382_v38 = vld [vmem:[%s12962_s5] sm:$0xff]  ;;  %s14877_s5 = sld [smem:[#allocation32_spill]]  ;;  %s14891_s27 = sld [smem:[#allocation44_spill]]  ;;  %vm3146_vm13 = vcmask 130048  }
 0x146   :  { %v11832_v31 = vld [vmem:[%s12967_s9 + $0x30] sm:$0xff]   ;;  %v11836_v36 = vld [vmem:[%s12967_s9 + $0x38] sm:$0xff]   ;;  %v391_v39 = vrot.slane %v382_v38, %v390_v35  ;;  %v384_v40 = vcombine.high %v382_v38, %v382_v38  ;;  %v11839_v44 = vld [vmem:[%s12977_s17] sm:$0xff]   ;;  %s14892_s26 = sld [smem:[#allocation40_spill]]  ;;  %s14893_s28 = sld [smem:[#allocation41_spill]]  ;;  %vm7430_vm14 = vcmask 1043456  }
 0x147   :  { %10537 = vmatpush3.bf16.msra.mxu0 %v11816_v10  ;;  %v11833_v32 = vld [vmem:[%s12967_s9 + $0xb0] sm:$0xff]   ;;  %v11837_v37 = vld [vmem:[%s12967_s9 + $0xb8] sm:$0xff]   ;;  %v11840_v50 = vld [vmem:[%s12977_s17 + $0x8] sm:$0xff]   ;;  %s14878_s9 = sld [smem:[#allocation30_spill]]  ;;  %s14894_s1 = sld [smem:[#allocation51_spill]] }
 0x148   :  { %10559 = vmatpush3.bf16.msra.mxu1 %v11817_v11  ;;  %10538 = vmatprep.subr.bf16.mxu0 %v11818_v12  ;;  %v399_v42 = vcombine.high %v391_v39, %v391_v39  ;;  %v398_v43 = vrot.slane %v384_v40, %v390_v35  ;;  %v405_v45 = vpack.c.bf16 %v391_v39, %v391_v39  ;;  %v11841_v51 = vld [vmem:[%s12977_s17 + $0x10] sm:$0xff]   ;;  %v11842_v52 = vld [vmem:[%s12977_s17 + $0x18] sm:$0xff]   ;;  %v9405_v53 = vld [vmem:[%s12972_s13] ss:$0 sm:$0xff]  ;;  %s14879_s13 = sld [smem:[#allocation31_spill]]  ;;  %s14880_s17 = sld [smem:[#allocation33_spill]] }
 0x149   :  { %10560 = vmatprep.subr.bf16.mxu1 %v11819_v13  ;;  %v11843_v4 = vld [vmem:[%s12987_s25] sm:$0xff]   ;;  %v11844_v5 = vld [vmem:[%s12987_s25 + $0x8] sm:$0xff]   ;;  %v13406_v40 = vsub.s32 0, %v13344_v30  ;;  %s12949_s25 = smov 32   ;;  %vm13558_vm12 = vmor %vm1518_vm9, %vm1734_vm11  ;;  %s14895_s2 = sld [smem:[#allocation45_spill]] }
 0x14a   :  { %v406_v46 = vpack.c.bf16 %v399_v42, %v399_v42  ;;  %v400_v47 = vcombine.high %v398_v43, %v398_v43  ;;  %v407_v48 = vpack.c.bf16 %v398_v43, %v398_v43  ;;  %v936_v42 = vsub.s32 2, %v13344_v30  ;;  %s14896_s7 = sld [smem:[#allocation52_spill]]  ;;  %s14897_s19 = sld [smem:[#allocation48_spill]] }
 0x14b   :  { %10539 = vmatpush3.bf16.msra.mxu0 %v11820_v14  ;;  %v11847_v6 = vld [vmem:[%s14877_s5 + $0x4] ss:$16 sps:$4 sm:$0xff]   ;;  %v11848_v7 = vld [vmem:[%s14877_s5 + $0x8] ss:$16 sps:$4 sm:$0xff]   ;;  %v11850_v8 = vld [vmem:[%s14877_s5 + $0xc] ss:$16 sps:$4 sm:$0xff]  }
 0x14c   :  { %10561 = vmatpush3.bf16.msra.mxu1 %v11821_v15  ;;  %10540 = vmatprep.subr.bf16.mxu0 %v11822_v16  ;;  %v408_v49 = vpack.c.bf16 %v400_v47, %v400_v47  ;;  %v11856_v9 = vld [vmem:[%s14877_s5 + $0x2c] ss:$16 sps:$4 sm:$0xff]   ;;  %v11854_v10 = vld [vmem:[%s14877_s5 + $0x28] ss:$16 sps:$4 sm:$0xff]   ;;  %v11853_v22 = vld [vmem:[%s14877_s5 + $0x24] ss:$16 sps:$4 sm:$0xff]  }
 0x14d   :  { %10562 = vmatprep.subr.bf16.mxu1 %v11823_v17  ;;  %704 = vmatprep.mubr.bf16.mxu0 %v406_v46  ;;  %v11862_v11 = vld [vmem:[%s14877_s5 + $0x4c] ss:$16 sps:$4 sm:$0xff]   ;;  %v11860_v12 = vld [vmem:[%s14877_s5 + $0x48] ss:$16 sps:$4 sm:$0xff]   ;;  %v9438_v13 = vld [vmem:[%s14878_s9] ss:$0 sm:$0xff] }
 0x14e   :  { %744 = vmatprep.mubr.bf16.mxu1 %v408_v49  ;;  %v11851_v23 = vld [vmem:[%s14877_s5 + $0x20] ss:$16 sps:$4 sm:$0xff]   ;;  %v11859_v24 = vld [vmem:[%s14877_s5 + $0x44] ss:$16 sps:$4 sm:$0xff]   ;;  %v11866_v29 = vld [vmem:[%s14877_s5 + $0x68] ss:$16 sps:$4 sm:$0xff]  }
 0x14f   :  { %10541 = vmatpush3.bf16.msra.mxu0 %v11824_v18  ;;  %v13410_v43 = vsub.s32 1, %v13344_v30  ;;  %s14898_s6 = sld [smem:[#allocation46_spill]]  ;;  %s14899_s20 = sld [smem:[#allocation47_spill]] }
 0x150   :  { %10563 = vmatpush3.bf16.msra.mxu1 %v11825_v19  ;;  %10542 = vmatprep.subr.bf16.mxu0 %v11826_v20  ;;  %v11845_v20 = vld [vmem:[%s14877_s5] ss:$16 sps:$4 sm:$0xff]   ;;  %s14900_s10 = sld [smem:[#allocation49_spill]]  ;;  %s14901_s8 = sld [smem:[#allocation59_spill]] }
 0x151   :  { %10564 = vmatprep.subr.bf16.mxu1 %v11827_v21  ;;  %s14902_s11 = sld [smem:[#allocation50_spill]]  ;;  %s14903_s29 = sld [smem:[#allocation60_spill]] }
 0x152   :  { %s14904_s15 = sld [smem:[#allocation61_spill]]  ;;  %s14906_s9 = sld [smem:[#allocation62_spill]] }
 0x153   :  { %10543 = vmatpush3.bf16.msra.mxu0 %v11828_v25  ;;  %v11857_v25 = vld [vmem:[%s14877_s5 + $0x40] ss:$16 sps:$4 sm:$0xff]  }
 0x154   :  { %10565 = vmatpush3.bf16.msra.mxu1 %v11829_v26  ;;  %10544 = vmatprep.subr.bf16.mxu0 %v11830_v27  ;;  %v11865_v26 = vld [vmem:[%s14877_s5 + $0x64] ss:$16 sps:$4 sm:$0xff]   ;;  %v11868_v27 = vld [vmem:[%s14877_s5 + $0x6c] ss:$16 sps:$4 sm:$0xff]  }
 0x155   :  { %10566 = vmatprep.subr.bf16.mxu1 %v11831_v28  ;;  %v11863_v28 = vld [vmem:[%s14877_s5 + $0x60] ss:$16 sps:$4 sm:$0xff]   ;;  %s14905_s5 = sld [smem:[#allocation53_spill]] }
 0x157   :  { %10545 = vmatpush3.bf16.msra.mxu0 %v11832_v31  ;;  %v12948_v31 = vmov 0  }
 0x158   :  { %10567 = vmatpush3.bf16.msra.mxu1 %v11833_v32  ;;  %10546 = vmatprep.subr.bf16.mxu0 %v11834_v33  ;;  %1719 = vst [vmem:[#allocation3] sm:$0x1] %v12948_v31  ;;  %3261 = vst [vmem:[#allocation4] sm:$0x11] %v12948_v31  ;;  %v9444_v32 = vld [vmem:[%s14879_s13] ss:$0 sm:$0xff] }
 0x159   :  { %10568 = vmatprep.subr.bf16.mxu1 %v11835_v34  ;;  %3262 = vst [vmem:[#allocation4 + $0x20] sm:$0x22] %v12948_v31  ;;  %4916 = vst [vmem:[#allocation5] sm:$0x1] %v12948_v31  ;;  %s14907_s13 = sld [smem:[#allocation57_spill]] }
 0x15a   :  { %5689 = vst [vmem:[#allocation6] sm:$0x11] %v12948_v31  ;;  %5690 = vst [vmem:[#allocation6 + $0x10] sm:$0x22] %v12948_v31 }
 0x15b   :  { %10547 = vmatpush3.bf16.msra.mxu0 %v11836_v36  ;;  %1116 = vst.msk [vmem:[#allocation2] sm:$0x1] %vm1115_vm4, %v12948_v31 }
 0x15c   :  { %10569 = vmatpush3.bf16.msra.mxu1 %v11837_v37  ;;  %11120 = vmatprep.subr.bf16.mxu0 %v12946_v41 }
 0x15d   :  { %11132 = vmatprep.subr.bf16.mxu1 %v12946_v41 }
 0x15e   :  { %705 = vmatmul.mubr.bf16.vlgmr.msra.gmra.mrb[0].mxu0 %v405_v45  ;;  %v940_v45 = vsub.s32 3, %v13344_v30 }
 0x15f   :  { %11121 = vmatpush3.bf16.msra.mxu0 %v11839_v44  ;;  %745 = vmatmul.mubr.bf16.vlgmr.msra.gmra.mrb[0].mxu1 %v407_v48  ;;  %v924_v44 = vld [vmem:[%s14880_s17] sm:$0xf]  ;;  %s14908_s17 = sld [smem:[#allocation54_spill]] }
 0x160   :  { %11122 = vmatprep.subr.bf16.mxu0 %v12946_v41  ;;  %11128 = vmatprep.mubr.msk.bf16.mxu0 %vm12947_vm0, %v12946_v41  ;;  %v929_v46 = vrot.slane %v924_v44, %v13406_v40  ;;  %v937_v47 = vrot.slane %v924_v44, %v936_v42  ;;  %v933_v48 = vrot.slane %v924_v44, %v13410_v43 }
 0x161   :  { %11136 = vmatprep.mubr.msk.bf16.mxu1 %vm12947_vm0, %v12946_v41  ;;  %11133 = vmatpush3.bf16.msra.mxu1 %v11843_v4  ;;  %v941_v49 = vrot.slane %v924_v44, %v940_v45 }
 0x162   :  { %11134 = vmatprep.subr.bf16.mxu1 %v12946_v41 }
 0x163   :  { %11123 = vmatpush3.bf16.msra.mxu0 %v11840_v50 }
 0x164   :  { %11124 = vmatprep.subr.bf16.mxu0 %v12946_v41 }
 0x165   :  { %11135 = vmatpush3.bf16.msra.mxu1 %v11844_v5 }
 0x166   :  { %1029 = vmatprep.subr.bf16.mxu1 %v11847_v6 }
 0x167   :  { %11125 = vmatpush3.bf16.msra.mxu0 %v11841_v51 }
 0x168   :  { %11126 = vmatprep.subr.bf16.mxu0 %v12946_v41 }
 0x16b   :  { %11127 = vmatpush3.bf16.msra.mxu0 %v11842_v52 }
 0x16c   :  { %1070 = vmatprep.subr.bf16.mxu0 %v11850_v8 }
 0x231   :  { %v10548_v54 = vpop.f32.mrb[0].mxu0 }
 0x232   :  { %v10549_v55 = vpop.f32.mrb[1].mxu0  ;;  %v10570_v56 = vpop.f32.mrb[0].mxu1 }
 0x233   :  { %v10550_v57 = vadd.f32 %v10549_v55, %v10548_v54  ;;  %v10551_v58 = vpop.f32.mrb[2].mxu0  ;;  %v10571_v59 = vpop.f32.mrb[1].mxu1 }
 0x234   :  { %v10552_v60 = vpop.f32.mrb[3].mxu0  ;;  %v10572_v62 = vadd.f32 %v10571_v59, %v10570_v56  ;;  %v10573_v63 = vpop.f32.mrb[2].mxu1 }
 0x235   :  { %v707_v61 = vadd.f32 %v10550_v57, %v9405_v53  ;;  %v10574_v0 = vpop.f32.mrb[3].mxu1 }
 0x237   :  { %v747_v1 = vadd.f32 %v10572_v62, %v707_v61 }
 0x239   :  { %v752_v2 = vmax.f32 %v747_v1, 0.0 }
 0x23b   :  { %v753_v3 = vpack.c.bf16 %v752_v2, %v752_v2 }
 0x23d   :  { %11129 = vmatmul.mubr.msk.bf16.vlgmr.msra.gmra.mrb[4].mxu0 %vm793_vm1, %v753_v3 }
 0x23e   :  { %1071 = vmatpush1.bf16.msra.mxu0 %v11848_v7  ;;  %1102 = vmatprep.mubr.bf16.mxu0 %v12948_v31 }
 0x23f   :  { %1072 = vmatprep.subr.bf16.mxu0 %v11856_v9 }
 0x242   :  { %1073 = vmatpush1.bf16.msra.mxu0 %v11854_v10 }
 0x243   :  { %1074 = vmatprep.subr.bf16.mxu0 %v11862_v11 }
 0x246   :  { %1075 = vmatpush1.bf16.msra.mxu0 %v11860_v12 }
 0x247   :  { %1076 = vmatprep.subr.bf16.mxu0 %v11868_v27 }
 0x24a   :  { %1077 = vmatpush1.bf16.msra.mxu0 %v11866_v29 }
 0x310   :  { %v831_v14 = vpop.f32.mrb[4].mxu0 }
 0x311   :  { %v832_v15 = vadd.f32 %v9438_v13, %v831_v14  ;;  %v11130_v16 = vpop.f32.mrb[5].mxu0  ;;  %v11869_v13 = vld [vmem:[%s14881_s21 + $0x10] sm:$0xff]   ;;  %v11870_v14 = vld [vmem:[%s14881_s21 + $0x18] sm:$0xff]  }
 0x312   :  { %v834_v17 = vpop.f32.mrb[6].mxu0 }
 0x313   :  { %v837_v18 = vmax.f32 %v832_v15, 0.0  ;;  %v11131_v19 = vpop.f32.mrb[7].mxu0 }
 0x315   :  { %v838_v21 = vpack.c.bf16 %v837_v18, %v837_v18 }
 0x317   :  { %11137 = vmatmul.mubr.msk.bf16.vlgmr.msra.gmra.mrb[4].mxu1 %vm862_vm2, %v838_v21  ;;  %v1479_v21 = vld [vmem:[%s14882_s18] sm:$0xff] }
 0x318   :  { %1030 = vmatpush1.bf16.msra.mxu1 %v11845_v20  ;;  %1061 = vmatprep.mubr.bf16.mxu1 %v12948_v31  ;;  %v11875_v20 = vld [vmem:[%s14881_s21] sm:$0xff]  }
 0x319   :  { %1031 = vmatprep.subr.bf16.mxu1 %v11853_v22  ;;  %v1480_v22 = vld [vmem:[%s14882_s18 + $0x8] sm:$0xff] }
 0x31c   :  { %1032 = vmatpush1.bf16.msra.mxu1 %v11851_v23  ;;  %v12952_v23 = vmov 0.0|0.0  }
 0x31d   :  { %1033 = vmatprep.subr.bf16.mxu1 %v11859_v24  ;;  %11456 = vmatprep.subr.bf16.mxu0 %v12952_v23  ;;  %v13430_v24 = vpack.c.bf16 %v1480_v22, %v1479_v21  ;;  %v9496_v22 = vld [vmem:[%s14883_s12] ss:$0 sm:$0xff]  ;;  %s14914_s12 = sld [smem:[#allocation65_spill]] }
 0x320   :  { %1034 = vmatpush1.bf16.msra.mxu1 %v11857_v25 }
 0x321   :  { %1035 = vmatprep.subr.bf16.mxu1 %v11865_v26 }
 0x324   :  { %1036 = vmatpush1.bf16.msra.mxu1 %v11863_v28 }
 0x325   :  { %11140 = vmatprep.subr.bf16.mxu1 %v11869_v13 }
 0x3ea   :  { %v900_v33 = vpop.f32.mrb[4].mxu1 }
 0x3eb   :  { %v901_v34 = vadd.f32 %v9444_v32, %v900_v33  ;;  %v11138_v35 = vpop.f32.mrb[5].mxu1 }
 0x3ec   :  { %v903_v36 = vpop.f32.mrb[6].mxu1 }
 0x3ed   :  { %v906_v37 = vmax.f32 %v901_v34, 0.0  ;;  %v11139_v38 = vpop.f32.mrb[7].mxu1 }
 0x3ef   :  { %v907_v39 = vpack.c.bf16 %v906_v37, %v906_v37 }
 0x3f1   :  { %9464 = vmatmul.mubr.msk.bf16.vlgmr.msra.gmra.mrb[8].mxu1 %vm793_vm1, %v907_v39  ;;  %9465 = vmatmul.mubr.msk.bf16.vlgmr.msra.gmra.mrb[8].mxu0 %vm793_vm1, %v907_v39 }
 0x3f2   :  { %11196 = vmatprep.mubr.msk.f32.mxu0 %vm12947_vm0, %v12946_v41  ;;  %11141 = vmatpush3.bf16.msra.mxu1 %v11869_v13  ;;  %v1489_v13 = vld [vmem:[%s14882_s18 + $0x50] sm:$0xff] }
 0x3f3   :  { %11142 = vmatprep.subr.bf16.mxu1 %v11870_v14  ;;  %11458 = vmatpush3.bf16.msra.mxu0 %v13430_v24 }
 0x3f4   :  { %11459 = vmatprep.subr.bf16.mxu0 %v12952_v23 }
 0x3f6   :  { %11143 = vmatpush3.bf16.msra.mxu1 %v11870_v14  ;;  %v1490_v14 = vld [vmem:[%s14882_s18 + $0x58] sm:$0xff] }
 0x3f7   :  { %11148 = vmatprep.subr.bf16.mxu1 %v11875_v20 }
 0x4c4   :  { %v1063_v50 = vpop.f32.mrb[8].mxu1  ;;  %v1104_v51 = vpop.f32.mrb[8].mxu0 }
 0x4c5   :  { %v1064_v52 = vadd.f32 %v1063_v50, %v929_v46  ;;  %v1105_v53 = vadd.f32 %v1104_v51, %v937_v47  ;;  %v1065_v54 = vpop.f32.mrb[9].mxu1  ;;  %v1106_v55 = vpop.f32.mrb[9].mxu0 }
 0x4c6   :  { %v1066_v56 = vadd.f32 %v1065_v54, %v933_v48  ;;  %v1107_v57 = vadd.f32 %v1106_v55, %v941_v49  ;;  %v1067_v58 = vpop.f32.mrb[10].mxu1  ;;  %v1108_v59 = vpop.f32.mrb[10].mxu0  ;;  %v11878_v55 = vld [vmem:[%s14881_s21 + $0x20] sm:$0xff]  }
 0x4c7   :  { %v1111_v60 = vmax.f32 %v1064_v52, 0.0  ;;  %v1113_v61 = vmax.f32 %v1105_v53, 0.0  ;;  %v1068_v62 = vpop.f32.mrb[11].mxu1  ;;  %v1109_v63 = vpop.f32.mrb[11].mxu0  ;;  %v11876_v52 = vld [vmem:[%s14881_s21 + $0x8] sm:$0xff]  }
 0x4c8   :  { %v1112_v0 = vmax.f32 %v1066_v56, 0.0  ;;  %v1114_v1 = vmax.f32 %v1107_v57, 0.0 }
 0x4c9   :  { %v10506_v2 = vpack.c.bf16 %v1111_v60, %v1111_v60  ;;  %v10508_v3 = vpack.c.bf16 %v1113_v61, %v1113_v61  ;;  %v11879_v60 = vld [vmem:[%s14881_s21 + $0x28] sm:$0xff]   ;;  %s14909_s21 = sld [smem:[#allocation58_spill]] }
 0x4ca   :  { %v10507_v4 = vpack.c.bf16 %v1112_v0, %v1112_v0  ;;  %v10509_v5 = vpack.c.bf16 %v1114_v1, %v1114_v1  ;;  %v1481_v1 = vld [vmem:[%s14882_s18 + $0x10] sm:$0xff] }
 0x4cb   :  { %v1123_v6 = vrot.slane %v10506_v2, 7  ;;  %v1167_v7 = vrot.slane %v10508_v3, 7  ;;  %1138 = vrot.lane.b32.xlu1 %v10506_v2, %s12949_s25  ;;  %1180 = vrot.lane.b32.xlu0 %v10508_v3, %s12949_s25  ;;  %v1126_v10 = vrot.slane %v10506_v2, 6  ;;  %v1132_v11 = vrot.slane %v10506_v2, 5  ;;  %v1482_v2 = vld [vmem:[%s14882_s18 + $0x18] sm:$0xff] }
 0x4cc   :  { %v1146_v8 = vrot.slane %v10507_v4, 7  ;;  %v1188_v9 = vrot.slane %v10509_v5, 7  ;;  %v1175_v12 = vrot.slane %v10508_v3, 5  ;;  %v1149_v15 = vrot.slane %v10507_v4, 6 }
 0x4cd   :  { %1125 = vst.msk [vmem:[#allocation2] sm:$0x2] %vm1117_vm3, %v1123_v6  ;;  %1169 = vst.msk [vmem:[#allocation2 + $0x8] sm:$0x2] %vm1117_vm3, %v1167_v7  ;;  %v1170_v16 = vrot.slane %v10508_v3, 6  ;;  %v1191_v17 = vrot.slane %v10509_v5, 6  ;;  %v13464_v3 = vpack.c.bf16 %v1482_v2, %v1481_v1 }
 0x4ce   :  { %1148 = vst.msk [vmem:[#allocation2 + $0x4] sm:$0x2] %vm1117_vm3, %v1146_v8  ;;  %1190 = vst.msk [vmem:[#allocation2 + $0xc] sm:$0x2] %vm1117_vm3, %v1188_v9  ;;  %v1154_v18 = vrot.slane %v10507_v4, 5  ;;  %v1196_v19 = vrot.slane %v10509_v5, 5 }
 0x4cf   :  { %1159 = vrot.lane.b32.xlu1 %v10507_v4, %s12949_s25  ;;  %1127 = vrot.lane.b32.xlu0 %v1126_v10, %s12950_s30  ;;  %v1483_v4 = vld [vmem:[%s14882_s18 + $0x20] sm:$0xff]  ;;  %v1485_v7 = vld [vmem:[%s14882_s18 + $0x30] sm:$0xff] }
 0x4d0   :  { %11461 = vmatpush3.bf16.msra.mxu0 %v13464_v3  ;;  %v1486_v8 = vld [vmem:[%s14882_s18 + $0x38] sm:$0xff]  ;;  %v1487_v10 = vld [vmem:[%s14882_s18 + $0x40] sm:$0xff] }
 0x4d1   :  { %11462 = vmatprep.subr.bf16.mxu0 %v12952_v23  ;;  %v13476_v9 = vpack.c.bf16 %v1486_v8, %v1485_v7 }
 0x4d3   :  { %1133 = vrot.lane.b32.xlu0 %v1132_v11, %s12951_s16  ;;  %1176 = vrot.lane.b32.xlu1 %v1175_v12, %s12951_s16  ;;  %v1488_v11 = vld [vmem:[%s14882_s18 + $0x48] sm:$0xff] }
 0x4d4   :  { %v11469_v12 = vpack.c.bf16 %v1488_v11, %v1487_v10  ;;  %v1477_v11 = vld [vmem:[%s14886_s23] sm:$0x1]  ;;  %s14917_s23 = sld [smem:[#allocation70_spill]] }
 0x4d7   :  { %1150 = vrot.lane.b32.xlu1 %v1149_v15, %s12950_s30  ;;  %1171 = vrot.lane.b32.xlu0 %v1170_v16, %s12950_s30  ;;  %v11472_v15 = vpack.c.bf16 %v1490_v14, %v1489_v13  ;;  %v1491_v16 = vld [vmem:[%s14882_s18 + $0x60] sm:$0xff] }
 0x4d8   :  { %v1478_v14 = vld [vmem:[%s14887_s0] sm:$0x1]  ;;  %s14918_s0 = sld [smem:[#allocation68_spill]] }
 0x4db   :  { %1192 = vrot.lane.b32.xlu1 %v1191_v17, %s12950_s30  ;;  %1155 = vrot.lane.b32.xlu0 %v1154_v18, %s12951_s16  ;;  %v1492_v17 = vld [vmem:[%s14882_s18 + $0x68] sm:$0xff]  ;;  %s14911_s30 = sld [smem:[#allocation56_spill]] }
 0x4dc   :  { %v11475_v18 = vpack.c.bf16 %v1492_v17, %v1491_v16 }
 0x4df   :  { %1201 = vrot.lane.b32.xlu1 %v10509_v5, %s12949_s25  ;;  %1197 = vrot.lane.b32.xlu0 %v1196_v19, %s12951_s16  ;;  %v1484_v5 = vld [vmem:[%s14882_s18 + $0x28] sm:$0xff]  ;;  %v1493_v19 = vld [vmem:[%s14882_s18 + $0x70] sm:$0xff]  ;;  %s14910_s25 = sld [smem:[#allocation55_spill]] }
 0x4e0   :  { %v13470_v6 = vpack.c.bf16 %v1484_v5, %v1483_v4  ;;  %v12953_v5 = vmov 1966171168   ;;  %s14912_s16 = sld [smem:[#allocation63_spill]] }
 0x4e2   :  { %11464 = vmatpush3.bf16.msra.mxu0 %v13470_v6 }
 0x4e3   :  { %11465 = vmatprep.subr.bf16.mxu0 %v12952_v23 }
 0x4e6   :  { %11467 = vmatpush3.bf16.msra.mxu0 %v13476_v9 }
 0x4e7   :  { %11468 = vmatprep.subr.bf16.mxu0 %v12952_v23 }
 0x4ea   :  { %11470 = vmatpush3.bf16.msra.mxu0 %v11469_v12 }
 0x4eb   :  { %11471 = vmatprep.subr.bf16.mxu0 %v12952_v23 }
 0x4ee   :  { %11473 = vmatpush3.bf16.msra.mxu0 %v11472_v15 }
 0x4ef   :  { %11474 = vmatprep.subr.bf16.mxu0 %v12952_v23 }
 0x4f2   :  { %11476 = vmatpush3.bf16.msra.mxu0 %v11475_v18 }
 0x4f3   :  { %11477 = vmatprep.subr.bf16.mxu0 %v12952_v23 }
 0x53d   :  { %v1139_v25 = vpop.permute.xlu1 %1138  ;;  %v1181_v26 = vpop.permute.xlu0 %1180 }
 0x53e   :  { %1141 = vst.msk [vmem:[#allocation2 + $0x4] sm:$0x1] %vm1115_vm4, %v1139_v25  ;;  %1183 = vst.msk [vmem:[#allocation2 + $0xc] sm:$0x1] %vm1115_vm4, %v1181_v26 }
 0x541   :  { %v1160_v27 = vpop.permute.xlu1 %1159  ;;  %v1128_v28 = vpop.permute.xlu0 %1127 }
 0x542   :  { %1162 = vst.msk [vmem:[#allocation2 + $0x8] sm:$0x1] %vm1115_vm4, %v1160_v27 }
 0x543   :  { %1131 = vst.msk [vmem:[#allocation2] sm:$0x4] %vm1130_vm5, %v1128_v28 }
 0x545   :  { %v1134_v29 = vpop.permute.xlu0 %1133  ;;  %v1177_v32 = vpop.permute.xlu1 %1176 }
 0x546   :  { %1137 = vst.msk [vmem:[#allocation2] sm:$0x8] %vm1136_vm6, %v1134_v29  ;;  %1179 = vst.msk [vmem:[#allocation2 + $0x8] sm:$0x8] %vm1136_vm6, %v1177_v32 }
 0x549   :  { %v1151_v33 = vpop.permute.xlu1 %1150  ;;  %v1172_v34 = vpop.permute.xlu0 %1171 }
 0x54a   :  { %1153 = vst.msk [vmem:[#allocation2 + $0x4] sm:$0x4] %vm1130_vm5, %v1151_v33  ;;  %1174 = vst.msk [vmem:[#allocation2 + $0x8] sm:$0x4] %vm1130_vm5, %v1172_v34 }
 0x54d   :  { %v1193_v35 = vpop.permute.xlu1 %1192  ;;  %v1156_v36 = vpop.permute.xlu0 %1155  ;;  %v1213_v42 = vld [vmem:[#allocation2] sm:$0xe] }
 0x54e   :  { %1195 = vst.msk [vmem:[#allocation2 + $0xc] sm:$0x4] %vm1130_vm5, %v1193_v35  ;;  %v1205_v51 = vld [vmem:[#allocation2] sm:$0xf] }
 0x54f   :  { %1158 = vst.msk [vmem:[#allocation2 + $0x4] sm:$0x8] %vm1136_vm6, %v1156_v36  ;;  %v1376_v56 = vld [vmem:[#allocation2] sm:$0xc] }
 0x551   :  { %v1202_v37 = vpop.permute.xlu1 %1201  ;;  %v1198_v38 = vpop.permute.xlu0 %1197 }
 0x552   :  { %1204 = vst.msk [vmem:[#allocation2 + $0x10] sm:$0x1] %vm1115_vm4, %v1202_v37 }
 0x553   :  { %1200 = vst.msk [vmem:[#allocation2 + $0xc] sm:$0x8] %vm1136_vm6, %v1198_v38 }
 0x556   :  { %v1206_v39 = vld [vmem:[#allocation2 + $0x4] sm:$0xf] }
 0x557   :  { %v9474_v44 = vcombine.low %v1213_v42, %v1206_v39  ;;  %v9481_v54 = vcombine.low %v1205_v51, %v1206_v39  ;;  %v9490_v57 = vcombine.low %v1376_v56, %v1206_v39 }
 0x559   :  { %v11873_v46 = vld [vmem:[#allocation2 + $0x10] ss:$0 sps:$4 sm:$0x11]   ;;  %v1234_v47 = vrot.slane %v9474_v44, 1  ;;  %v1390_v59 = vrot.slane %v9490_v57, 2 }
 0x55a   :  { %v11872_v45 = vld [vmem:[#allocation2 + $0x8] sm:$0xff]   ;;  %v1237_v49 = vrot.slane %v11873_v46, 1  ;;  %v11880_v62 = vld [vmem:[#allocation2 + $0x10] ss:$0 sps:$4 sm:$0x33]  }
 0x55b   :  { %v1235_v48 = vrot.slane %v11872_v45, 1  ;;  %v1391_v58 = vrot.slane %v11872_v45, 2  ;;  %v1393_v63 = vrot.slane %v11880_v62, 2 }
 0x55d   :  { %v1236_v50 = vsel %vm1233_vm7, %v1234_v47, %v1235_v48  ;;  %v1238_v53 = vsel %vm1233_vm7, %v1235_v48, %v1237_v49  ;;  %v1392_v61 = vsel %vm1389_vm8, %v1390_v59, %v1391_v58  ;;  %v1394_v0 = vsel %vm1389_vm8, %v1391_v58, %v1393_v63 }
 0x55e   :  { %11144 = vmatprep.mubr.msk.bf16.mxu1 %vm862_vm2, %v1236_v50 }
 0x55f   :  { %11145 = vmatmul.mubr.msk.bf16.vlgmr.msra.gmra.mrb[12].mxu1 %vm862_vm2, %v1238_v53 }
 0x560   :  { %11152 = vmatprep.mubr.msk.bf16.mxu1 %vm862_vm2, %v9481_v54  ;;  %11149 = vmatpush3.bf16.msra.mxu1 %v11875_v20  ;;  %v1494_v20 = vld [vmem:[%s14882_s18 + $0x78] sm:$0xff]  ;;  %s14913_s18 = sld [smem:[#allocation64_spill]] }
 0x561   :  { %11150 = vmatprep.subr.bf16.mxu1 %v11876_v52  ;;  %v11478_v21 = vpack.c.bf16 %v1494_v20, %v1493_v19  ;;  %v11883_v19 = vld [vmem:[%s14885_s24 + $0x50] sm:$0xff]   ;;  %v11884_v20 = vld [vmem:[%s14885_s24 + $0x58] sm:$0xff]  }
 0x563   :  { %11479 = vmatpush3.bf16.msra.mxu0 %v11478_v21 }
 0x564   :  { %11151 = vmatpush3.bf16.msra.mxu1 %v11876_v52  ;;  %11480 = vmatprep.subr.bf16.mxu0 %v12952_v23 }
 0x565   :  { %11156 = vmatprep.subr.bf16.mxu1 %v11878_v55 }
 0x56b   :  { %11153 = vmatmul.mubr.msk.bf16.vlgmr.msra.gmra.mrb[12].mxu1 %vm862_vm2, %v11872_v45 }
 0x56c   :  { %11160 = vmatprep.mubr.msk.bf16.mxu1 %vm862_vm2, %v1392_v61  ;;  %11157 = vmatpush3.bf16.msra.mxu1 %v11878_v55  ;;  %v11881_v61 = vld [vmem:[%s14885_s24 + $0x40] sm:$0xff]  }
 0x56d   :  { %11158 = vmatprep.subr.bf16.mxu1 %v11879_v60 }
 0x570   :  { %11159 = vmatpush3.bf16.msra.mxu1 %v11879_v60 }
 0x571   :  { %11199 = vmatprep.subr.mxu1 %v12946_v41 }
 0x577   :  { %11161 = vmatmul.mubr.msk.bf16.vlgmr.msra.gmra.mrb[12].mxu1 %vm862_vm2, %v1394_v0 }
 0x578   :  { %11201 = vmatprep.mubr.msk.f32.mxu1 %vm12947_vm0, %v12946_v41 }
 0x64a   :  { %v11162_v25 = vpop.f32.mrb[12].mxu1 }
 0x64b   :  { %v1447_v26 = vpop.f32.mrb[13].mxu1  ;;  %v13495_v32 = vadd.f32 %v11162_v25, %v9496_v22  ;;  %v11887_v25 = vld [vmem:[%s14885_s24 + $0x70] sm:$0xff]  }
 0x64c   :  { %v13493_v27 = vadd.f32 %v9496_v22, %v1447_v26  ;;  %v11163_v28 = vpop.f32.mrb[14].mxu1  ;;  %v11888_v26 = vld [vmem:[%s14885_s24 + $0x78] sm:$0xff]  }
 0x64d   :  { %v1450_v29 = vpop.f32.mrb[15].mxu1  ;;  %v13501_v35 = vadd.f32 %v11163_v28, %v9496_v22  ;;  %v1507_v38 = vmul.f32 %v13495_v32, %v13495_v32  ;;  %v11891_v28 = vld [vmem:[%s14885_s24] sm:$0xff]  }
 0x64e   :  { %v13497_v33 = vadd.f32 %v9496_v22, %v1450_v29  ;;  %v1505_v34 = vmul.f32 %v13493_v27, %v13493_v27  ;;  %v11886_v22 = vld [vmem:[%s14885_s24 + $0x68] sm:$0xff]  }
 0x64f   :  { %v1508_v44 = vmul.f32 %v13501_v35, %v13501_v35 }
 0x650   :  { %v1496_v36 = vadd.f32 %v13497_v33, %v13493_v27  ;;  %v1506_v37 = vmul.f32 %v13497_v33, %v13497_v33 }
 0x652   :  { %v1497_v39 = vadd.f32 %v1496_v36, %v13495_v32  ;;  %v1509_v42 = vadd.f32 %v1506_v37, %v1505_v34 }
 0x654   :  { %v1498_v45 = vadd.f32 %v1497_v39, %v13501_v35  ;;  %v1510_v46 = vadd.f32 %v1509_v42, %v1507_v38 }
 0x656   :  { %v1499_v47 = vrot.slane %v1498_v45, 4  ;;  %v1511_v48 = vadd.f32 %v1510_v46, %v1508_v44 }
 0x658   :  { %v1500_v49 = vadd.f32 %v1499_v47, %v1498_v45  ;;  %v1512_v50 = vrot.slane %v1511_v48, 4 }
 0x65a   :  { %v1501_v51 = vrot.slane %v1500_v49, 2  ;;  %v1513_v52 = vadd.f32 %v1512_v50, %v1511_v48 }
 0x65c   :  { %v1502_v53 = vadd.f32 %v1501_v51, %v1500_v49  ;;  %v1514_v54 = vrot.slane %v1513_v52, 2 }
 0x65e   :  { %v1503_v55 = vrot.slane %v1502_v53, 1  ;;  %v1515_v56 = vadd.f32 %v1514_v54, %v1513_v52 }
 0x660   :  { %v1516_v57 = vrot.slane %v1515_v56, 1  ;;  %v1504_v58 = vadd.f32 %v1503_v55, %v1502_v53 }
 0x662   :  { %v1517_v59 = vadd.f32 %v1516_v57, %v1515_v56 }
 0x664   :  { %v1519_v60 = vsel %vm1518_vm9, %v1504_v58, %v1517_v59 }
 0x665   :  { %11197 = vmatmul.mubr.f32.vlgmr.msra.gmra.mrb[12].mxu0 %v1519_v60 }
 0x666   :  { %11482 = vmatpush3.bf16.msra.mxu0 %v13430_v24  ;;  %11296 = vmatprep.mubr.msk.f32.mxu0 %vm12947_vm0, %v12946_v41  ;;  %v13529_v24 = vld [vmem:[%s14884_s22] sm:$0xff]  ;;  %s14915_s22 = sld [smem:[#allocation66_spill]] }
 0x667   :  { %11483 = vmatprep.subr.bf16.mxu0 %v12952_v23  ;;  %11200 = vmatpush3.msra.mxu1 %v13529_v24 }
 0x668   :  { %11204 = vmatprep.subr.bf16.mxu1 %v11881_v61 }
 0x66a   :  { %11485 = vmatpush3.bf16.msra.mxu0 %v13464_v3 }
 0x66b   :  { %11486 = vmatprep.subr.bf16.mxu0 %v12952_v23 }
 0x66e   :  { %11488 = vmatpush3.bf16.msra.mxu0 %v13470_v6 }
 0x66f   :  { %11489 = vmatprep.subr.bf16.mxu0 %v12952_v23 }
 0x672   :  { %11491 = vmatpush3.bf16.msra.mxu0 %v13476_v9 }
 0x673   :  { %11492 = vmatprep.subr.bf16.mxu0 %v12952_v23 }
 0x676   :  { %11494 = vmatpush3.bf16.msra.mxu0 %v11469_v12 }
 0x677   :  { %11495 = vmatprep.subr.bf16.mxu0 %v12952_v23 }
 0x67a   :  { %11497 = vmatpush3.bf16.msra.mxu0 %v11472_v15 }
 0x67b   :  { %11498 = vmatprep.subr.bf16.mxu0 %v12952_v23 }
 0x67e   :  { %11500 = vmatpush3.bf16.msra.mxu0 %v11475_v18  ;;  %v11882_v18 = vld [vmem:[%s14885_s24 + $0x48] sm:$0xff]  }
 0x67f   :  { %11501 = vmatprep.subr.bf16.mxu0 %v12952_v23  ;;  %v1600_v23 = vunpack.c.l.s4 %v12953_v5 }
 0x681   :  { %v1601_v6 = vunpack.c.0.s8 %v1600_v23 }
 0x682   :  { %11503 = vmatpush3.bf16.msra.mxu0 %v11478_v21  ;;  %v11885_v21 = vld [vmem:[%s14885_s24 + $0x60] sm:$0xff]  }
 0x683   :  { %11299 = vmatprep.subr.mxu0 %v12946_v41  ;;  %v13534_v7 = vsub.s32 %v1601_v6, %v13344_v30 }
 0x738   :  { %v1586_v62 = vpop.f32.mrb[12].mxu0 }
 0x739   :  { %v1590_v63 = vmul.f32 0.001953125, %v1586_v62  ;;  %v11198_v0 = vpop.f32.mrb[13].mxu0 }
 0x73b   :  { %v1591_v1 = vmul.f32 %v1590_v63, %v1590_v63 }
 0x73d   :  { %v1593_v2 = vrot.slane %v1591_v1, 7 }
 0x73f   :  { %v1595_v3 = vsub.f32 %v1590_v63, %v1593_v2 }
 0x741   :  { %v1596_v4 = vadd.f32 1e-05, %v1595_v3 }
 0x743   :  { %12590 = vrsqrt.f32 %v1596_v4 }
 0x74d   :  { %v12591_v8 = vpop.eup %12590 }
 0x74e   :  { %v1605_v9 = vrot.slane %v12591_v8, %v13534_v7 }
 0x750   :  { %v1606_v10 = vcombine.high %v1605_v9, %v1605_v9 }
 0x752   :  { %v1613_v12 = vrot.slane %v1606_v10, %v13534_v7 }
 0x754   :  { %v1615_v13 = vmul.f32 %v1613_v12, %v1477_v11  ;;  %v11894_v12 = vld [vmem:[%s14885_s24 + $0x8] sm:$0xff]  }
 0x756   :  { %v1616_v15 = vmul.f32 %v1615_v13, %v1590_v63 }
 0x758   :  { %v1617_v16 = vsub.f32 %v1478_v14, %v1616_v15  ;;  %v11895_v15 = vld [vmem:[%s14885_s24 + $0x10] sm:$0xff]  }
 0x75a   :  { %v1622_v17 = vrot.slane %v1617_v16, %v13406_v40  ;;  %v11896_v16 = vld [vmem:[%s14885_s24 + $0x18] sm:$0xff]  }
 0x75c   :  { %v1624_v30 = vsel %vm1518_vm9, %v1615_v13, %v1622_v17  ;;  %v11897_v17 = vld [vmem:[%s14885_s24 + $0x20] sm:$0xff]  }
 0x75d   :  { %11202 = vmatmul.mubr.msk.f32.vlgmr.msra.gmra.mrb[16].mxu1 %vm1625_vm10, %v1624_v30  ;;  %v11898_v30 = vld [vmem:[%s14885_s24 + $0x28] sm:$0xff]  }
 0x75e   :  { %11205 = vmatpush3.bf16.msra.mxu1 %v11881_v61 }
 0x75f   :  { %11206 = vmatprep.subr.bf16.mxu1 %v11882_v18 }
 0x762   :  { %11207 = vmatpush3.bf16.msra.mxu1 %v11882_v18  ;;  %v11899_v18 = vld [vmem:[%s14885_s24 + $0x30] sm:$0xff]  }
 0x763   :  { %11208 = vmatprep.subr.bf16.mxu1 %v11883_v19 }
 0x766   :  { %11209 = vmatpush3.bf16.msra.mxu1 %v11883_v19  ;;  %v11900_v19 = vld [vmem:[%s14885_s24 + $0x38] sm:$0xff]  }
 0x767   :  { %11210 = vmatprep.subr.bf16.mxu1 %v11884_v20 }
 0x76a   :  { %11211 = vmatpush3.bf16.msra.mxu1 %v11884_v20 }
 0x76b   :  { %11212 = vmatprep.subr.bf16.mxu1 %v11885_v21 }
 0x76e   :  { %11213 = vmatpush3.bf16.msra.mxu1 %v11885_v21 }
 0x76f   :  { %11214 = vmatprep.subr.bf16.mxu1 %v11886_v22 }
 0x772   :  { %11215 = vmatpush3.bf16.msra.mxu1 %v11886_v22  ;;  %v11901_v22 = vld [vmem:[%s14885_s24 + $0x80] sm:$0xff]  }
 0x773   :  { %11216 = vmatprep.subr.bf16.mxu1 %v11887_v25 }
 0x776   :  { %11217 = vmatpush3.bf16.msra.mxu1 %v11887_v25 }
 0x777   :  { %11218 = vmatprep.subr.bf16.mxu1 %v11888_v26 }
 0x77a   :  { %11219 = vmatpush3.bf16.msra.mxu1 %v11888_v26 }
 0x77b   :  { %11224 = vmatprep.subr.bf16.mxu1 %v11891_v28 }
 0x830   :  { %v1695_v29 = vpop.f32.mrb[16].mxu1 }
 0x831   :  { %v1702_v34 = vrot.slane %v1695_v29, %v13406_v40  ;;  %v11203_v36 = vpop.f32.mrb[17].mxu1  ;;  %v1710_v37 = vrot.slane %v1695_v29, %v13410_v43 }
 0x832   :  { %v11904_v36 = vld [vmem:[%s14885_s24 + $0x98] sm:$0xff]  }
 0x833   :  { %v1703_v38 = vmul.f32 %v1702_v34, %v13493_v27  ;;  %v1704_v39 = vmul.f32 %v1702_v34, %v13497_v33  ;;  %v1705_v42 = vmul.f32 %v1702_v34, %v13495_v32  ;;  %v1706_v44 = vmul.f32 %v1702_v34, %v13501_v35  ;;  %v11903_v34 = vld [vmem:[%s14885_s24 + $0x90] sm:$0xff]  }
 0x835   :  { %v1711_v45 = vadd.f32 %v1710_v37, %v1703_v38  ;;  %v1712_v46 = vadd.f32 %v1710_v37, %v1704_v39  ;;  %v1713_v47 = vadd.f32 %v1710_v37, %v1705_v42  ;;  %v1714_v48 = vadd.f32 %v1710_v37, %v1706_v44  ;;  %v11905_v37 = vld [vmem:[%s14885_s24 + $0xa0] sm:$0xff]   ;;  %v11906_v38 = vld [vmem:[%s14885_s24 + $0xa8] sm:$0xff]   ;;  %v11907_v39 = vld [vmem:[%s14885_s24 + $0xb0] sm:$0xff]  }
 0x836   :  { %v11908_v42 = vld [vmem:[%s14885_s24 + $0xb8] sm:$0xff]  }
 0x837   :  { %v1715_v49 = vmax.f32 %v1711_v45, 0.0  ;;  %v1716_v50 = vmax.f32 %v1712_v46, 0.0  ;;  %v1717_v51 = vmax.f32 %v1713_v47, 0.0  ;;  %v1718_v52 = vmax.f32 %v1714_v48, 0.0  ;;  %v9564_v46 = vld [vmem:[%s14890_s14] ss:$0 sm:$0xff] }
 0x838   :  { %s14919_s14 = sld [smem:[#allocation69_spill]] }
 0x839   :  { %v10510_v53 = vpack.c.bf16 %v1715_v49, %v1715_v49  ;;  %v10511_v54 = vpack.c.bf16 %v1716_v50, %v1716_v50  ;;  %v10512_v55 = vpack.c.bf16 %v1717_v51, %v1717_v51  ;;  %v10513_v56 = vpack.c.bf16 %v1718_v52, %v1718_v52 }
 0x83b   :  { %v1736_v27 = vrot.slane %v10510_v53, 7  ;;  %v1738_v57 = vrot.slane %v10511_v54, 7  ;;  %v1741_v33 = vrot.slane %v10512_v55, 7  ;;  %v1744_v58 = vrot.slane %v10513_v56, 7 }
 0x83d   :  { %v1737_v35 = vrot.slane %v1736_v27, 4  ;;  %v1740_v59 = vrot.slane %v1738_v57, 4  ;;  %v1743_v60 = vrot.slane %v1741_v33, 4  ;;  %v1746_v61 = vrot.slane %v1744_v58, 4  ;;  %1752 = vst [vmem:[#allocation3] sm:$0xe] %v1736_v27 }
 0x83f   :  { %v1739_v62 = vsel %vm13558_vm12, %v1737_v35, %v1738_v57  ;;  %v1742_v63 = vsel %vm13558_vm12, %v1740_v59, %v1741_v33  ;;  %v1745_v0 = vsel %vm13558_vm12, %v1743_v60, %v1744_v58  ;;  %1756 = vst [vmem:[#allocation3 + $0x10] sm:$0x1] %v1746_v61 }
 0x840   :  { %1753 = vst [vmem:[#allocation3 + $0x4] sm:$0xf] %v1739_v62  ;;  %1754 = vst [vmem:[#allocation3 + $0x8] sm:$0xf] %v1742_v63 }
 0x841   :  { %1755 = vst [vmem:[#allocation3 + $0xc] sm:$0xf] %v1745_v0 }
 0x844   :  { %v1757_v1 = vld [vmem:[#allocation3] sm:$0xf] }
 0x845   :  { %v1777_v2 = vld [vmem:[#allocation3] sm:$0xe]  ;;  %2399 = vst [vmem:[#allocation3] sm:$0x1] %v12948_v31 }
 0x846   :  { %v11892_v3 = vld [vmem:[#allocation3 + $0x10] ss:$0 sps:$4 sm:$0x11]   ;;  %v2015_v20 = vld [vmem:[#allocation3] sm:$0xc] }
 0x847   :  { %v1758_v4 = vld [vmem:[#allocation3 + $0x4] sm:$0xf]  ;;  %v1812_v6 = vrot.slane %v11892_v3, 1  ;;  %v13571_v8 = vld [vmem:[#allocation3 + $0x10] ss:$0 sps:$4 sm:$0x33]  }
 0x848   :  { %v9518_v5 = vcombine.low %v1777_v2, %v1758_v4  ;;  %v13569_v23 = vld [vmem:[#allocation3 + $0x8] sm:$0xff]   ;;  %v9529_v14 = vcombine.low %v1757_v1, %v1758_v4  ;;  %v9554_v21 = vcombine.low %v2015_v20, %v1758_v4  ;;  %v2043_v44 = vrot.slane %v13571_v8, 2 }
 0x849   :  { %v1810_v10 = vrot.slane %v13569_v23, 1  ;;  %v2041_v26 = vrot.slane %v13569_v23, 2  ;;  %v2159_v20 = vld [vmem:[%s14892_s26] sm:$0x1]  ;;  %s14921_s26 = sld [smem:[#allocation73_spill]] }
 0x84a   :  { %v1809_v9 = vrot.slane %v9518_v5, 1  ;;  %v2040_v25 = vrot.slane %v9554_v21, 2 }
 0x84b   :  { %v1813_v13 = vsel %vm1233_vm7, %v1810_v10, %v1812_v6  ;;  %v2044_v45 = vsel %vm1389_vm8, %v2041_v26, %v2043_v44  ;;  %v11921_v44 = vld [vmem:[%s14891_s27 + $0xb4] ss:$8 sps:$4 sm:$0xff]  }
 0x84c   :  { %v1811_v11 = vsel %vm1233_vm7, %v1809_v9, %v1810_v10  ;;  %v2042_v29 = vsel %vm1389_vm8, %v2040_v25, %v2041_v26  ;;  %v2160_v25 = vld [vmem:[%s14893_s28] sm:$0x1]  ;;  %s14922_s28 = sld [smem:[#allocation74_spill]] }
 0x84d   :  { %11220 = vmatprep.mubr.bf16.mxu1 %v1811_v11  ;;  %v11912_v11 = vld [vmem:[%s14891_s27 + $0x84] ss:$8 sps:$4 sm:$0xff]  }
 0x84e   :  { %11221 = vmatmul.mubr.bf16.vlgmr.msra.gmra.mrb[20].mxu1 %v1813_v13 }
 0x84f   :  { %11225 = vmatpush3.bf16.msra.mxu1 %v11891_v28  ;;  %11240 = vmatprep.mubr.bf16.mxu1 %v9529_v14  ;;  %v11902_v28 = vld [vmem:[%s14885_s24 + $0x88] sm:$0xff]   ;;  %s14916_s24 = sld [smem:[#allocation67_spill]] }
 0x850   :  { %11226 = vmatprep.subr.bf16.mxu1 %v11894_v12 }
 0x853   :  { %11227 = vmatpush3.bf16.msra.mxu1 %v11894_v12 }
 0x854   :  { %11228 = vmatprep.subr.bf16.mxu1 %v11895_v15 }
 0x857   :  { %11229 = vmatpush3.bf16.msra.mxu1 %v11895_v15 }
 0x858   :  { %11230 = vmatprep.subr.bf16.mxu1 %v11896_v16 }
 0x85b   :  { %11231 = vmatpush3.bf16.msra.mxu1 %v11896_v16 }
 0x85c   :  { %11232 = vmatprep.subr.bf16.mxu1 %v11897_v17 }
 0x85f   :  { %11233 = vmatpush3.bf16.msra.mxu1 %v11897_v17 }
 0x860   :  { %11234 = vmatprep.subr.bf16.mxu1 %v11898_v30 }
 0x863   :  { %11235 = vmatpush3.bf16.msra.mxu1 %v11898_v30 }
 0x864   :  { %11236 = vmatprep.subr.bf16.mxu1 %v11899_v18 }
 0x867   :  { %11237 = vmatpush3.bf16.msra.mxu1 %v11899_v18 }
 0x868   :  { %11238 = vmatprep.subr.bf16.mxu1 %v11900_v19 }
 0x86b   :  { %11239 = vmatpush3.bf16.msra.mxu1 %v11900_v19 }
 0x86c   :  { %11244 = vmatprep.subr.bf16.mxu1 %v11901_v22 }
 0x86e   :  { %11241 = vmatmul.mubr.bf16.vlgmr.msra.gmra.mrb[20].mxu1 %v13569_v23 }
 0x86f   :  { %11245 = vmatpush3.bf16.msra.mxu1 %v11901_v22  ;;  %11260 = vmatprep.mubr.bf16.mxu1 %v2042_v29 }
 0x870   :  { %11246 = vmatprep.subr.bf16.mxu1 %v11902_v28 }
 0x873   :  { %11247 = vmatpush3.bf16.msra.mxu1 %v11902_v28 }
 0x874   :  { %11248 = vmatprep.subr.bf16.mxu1 %v11903_v34 }
 0x877   :  { %11249 = vmatpush3.bf16.msra.mxu1 %v11903_v34  ;;  %v11910_v34 = vld [vmem:[%s14891_s27 + $0x80] ss:$8 sps:$4 sm:$0xff]  }
 0x878   :  { %11250 = vmatprep.subr.bf16.mxu1 %v11904_v36 }
 0x87b   :  { %11251 = vmatpush3.bf16.msra.mxu1 %v11904_v36 }
 0x87c   :  { %11252 = vmatprep.subr.bf16.mxu1 %v11905_v37 }
 0x87f   :  { %11253 = vmatpush3.bf16.msra.mxu1 %v11905_v37  ;;  %v11915_v37 = vld [vmem:[%s14891_s27 + $0x94] ss:$8 sps:$4 sm:$0xff]  }
 0x880   :  { %11254 = vmatprep.subr.bf16.mxu1 %v11906_v38 }
 0x883   :  { %11255 = vmatpush3.bf16.msra.mxu1 %v11906_v38  ;;  %v11913_v38 = vld [vmem:[%s14891_s27 + $0x90] ss:$8 sps:$4 sm:$0xff]  }
 0x884   :  { %11256 = vmatprep.subr.bf16.mxu1 %v11907_v39 }
 0x887   :  { %11257 = vmatpush3.bf16.msra.mxu1 %v11907_v39  ;;  %v11918_v39 = vld [vmem:[%s14891_s27 + $0xa4] ss:$8 sps:$4 sm:$0xff]  }
 0x888   :  { %11258 = vmatprep.subr.bf16.mxu1 %v11908_v42 }
 0x88b   :  { %11259 = vmatpush3.bf16.msra.mxu1 %v11908_v42  ;;  %v11916_v42 = vld [vmem:[%s14891_s27 + $0xa0] ss:$8 sps:$4 sm:$0xff]  }
 0x88e   :  { %11261 = vmatmul.mubr.bf16.vlgmr.msra.gmra.mrb[20].mxu1 %v2044_v45  ;;  %v11919_v45 = vld [vmem:[%s14891_s27 + $0xb0] ss:$8 sps:$4 sm:$0xff]  }
 0x961   :  { %v11262_v47 = vpop.f32.mrb[20].mxu1 }
 0x962   :  { %v2129_v48 = vpop.f32.mrb[21].mxu1  ;;  %v13599_v52 = vadd.f32 %v11262_v47, %v9564_v46  ;;  %v11922_v47 = vld [vmem:[%s14891_s27 + $0xc0] ss:$8 sps:$4 sm:$0xff]  }
 0x963   :  { %v13597_v49 = vadd.f32 %v9564_v46, %v2129_v48  ;;  %v11263_v50 = vpop.f32.mrb[22].mxu1  ;;  %v11925_v48 = vld [vmem:[%s14891_s27 + $0xd0] ss:$8 sps:$4 sm:$0xff]  }
 0x964   :  { %v2132_v51 = vpop.f32.mrb[23].mxu1  ;;  %v13605_v55 = vadd.f32 %v11263_v50, %v9564_v46  ;;  %v2189_v57 = vmul.f32 %v13599_v52, %v13599_v52  ;;  %v11927_v50 = vld [vmem:[%s14891_s27 + $0xd4] ss:$8 sps:$4 sm:$0xff]  }
 0x965   :  { %v13601_v53 = vadd.f32 %v9564_v46, %v2132_v51  ;;  %v2187_v54 = vmul.f32 %v13597_v49, %v13597_v49  ;;  %v11924_v46 = vld [vmem:[%s14891_s27 + $0xc4] ss:$8 sps:$4 sm:$0xff]  }
 0x966   :  { %v2190_v35 = vmul.f32 %v13605_v55, %v13605_v55  ;;  %v11930_v51 = vld [vmem:[%s14891_s27 + $0xe4] ss:$8 sps:$4 sm:$0xff]  }
 0x967   :  { %v2178_v56 = vadd.f32 %v13601_v53, %v13597_v49  ;;  %v2188_v27 = vmul.f32 %v13601_v53, %v13601_v53 }
 0x969   :  { %v2179_v33 = vadd.f32 %v2178_v56, %v13599_v52  ;;  %v2191_v58 = vadd.f32 %v2188_v27, %v2187_v54  ;;  %v11928_v54 = vld [vmem:[%s14891_s27 + $0xe0] ss:$8 sps:$4 sm:$0xff]   ;;  %v11933_v56 = vld [vmem:[%s14891_s27 + $0xf4] ss:$8 sps:$4 sm:$0xff]   ;;  %v11931_v27 = vld [vmem:[%s14891_s27 + $0xf0] ss:$8 sps:$4 sm:$0xff]  }
 0x96b   :  { %v2180_v59 = vadd.f32 %v2179_v33, %v13605_v55  ;;  %v2192_v60 = vadd.f32 %v2191_v58, %v2189_v57  ;;  %v11936_v57 = vld [vmem:[%s14891_s27 + $0x4] ss:$8 sps:$4 sm:$0xff]  }
 0x96d   :  { %v2181_v61 = vrot.slane %v2180_v59, 4  ;;  %v2193_v62 = vadd.f32 %v2192_v60, %v2190_v35 }
 0x96f   :  { %v2182_v63 = vadd.f32 %v2181_v61, %v2180_v59  ;;  %v2194_v0 = vrot.slane %v2193_v62, 4 }
 0x971   :  { %v2183_v1 = vrot.slane %v2182_v63, 2  ;;  %v2195_v2 = vadd.f32 %v2194_v0, %v2193_v62 }
 0x973   :  { %v2184_v3 = vadd.f32 %v2183_v1, %v2182_v63  ;;  %v2196_v4 = vrot.slane %v2195_v2, 2 }
 0x975   :  { %v2185_v5 = vrot.slane %v2184_v3, 1  ;;  %v2197_v23 = vadd.f32 %v2196_v4, %v2195_v2 }
 0x977   :  { %v2198_v6 = vrot.slane %v2197_v23, 1  ;;  %v2186_v8 = vadd.f32 %v2185_v5, %v2184_v3 }
 0x979   :  { %v2199_v9 = vadd.f32 %v2198_v6, %v2197_v23 }
 0x97b   :  { %v2200_v10 = vsel %vm1518_vm9, %v2186_v8, %v2199_v9 }
 0x97c   :  { %11297 = vmatmul.mubr.f32.vlgmr.msra.gmra.mrb[14].mxu0 %v2200_v10 }
 0x97d   :  { %11300 = vmatpush3.msra.mxu0 %v13529_v24  ;;  %11301 = vmatprep.mubr.msk.f32.mxu0 %vm12947_vm0, %v12946_v41 }
 0x97e   :  { %2573 = vmatprep.subr.bf16.mxu0 %v11912_v11 }
 0xa4f   :  { %v2267_v12 = vpop.f32.mrb[14].mxu0 }
 0xa50   :  { %v2271_v13 = vmul.f32 0.001953125, %v2267_v12  ;;  %v11298_v14 = vpop.f32.mrb[15].mxu0 }
 0xa52   :  { %v2272_v15 = vmul.f32 %v2271_v13, %v2271_v13 }
 0xa54   :  { %v2274_v16 = vrot.slane %v2272_v15, 7 }
 0xa56   :  { %v2276_v17 = vsub.f32 %v2271_v13, %v2274_v16 }
 0xa58   :  { %v2277_v30 = vadd.f32 1e-05, %v2276_v17 }
 0xa5a   :  { %12592 = vrsqrt.f32 %v2277_v30 }
 0xa64   :  { %v12593_v18 = vpop.eup %12592 }
 0xa65   :  { %v2286_v24 = vrot.slane %v12593_v18, %v13534_v7 }
 0xa67   :  { %v2287_v19 = vcombine.high %v2286_v24, %v2286_v24 }
 0xa69   :  { %v2294_v21 = vrot.slane %v2287_v19, %v13534_v7 }
 0xa6b   :  { %v2296_v22 = vmul.f32 %v2294_v21, %v2159_v20 }
 0xa6d   :  { %v2297_v26 = vmul.f32 %v2296_v22, %v2271_v13 }
 0xa6f   :  { %v2298_v28 = vsub.f32 %v2160_v25, %v2297_v26  ;;  %v11934_v25 = vld [vmem:[%s14891_s27] ss:$8 sps:$4 sm:$0xff]  }
 0xa71   :  { %v2303_v29 = vrot.slane %v2298_v28, %v13406_v40 }
 0xa73   :  { %v2305_v36 = vsel %vm1518_vm9, %v2296_v22, %v2303_v29 }
 0xa74   :  { %11302 = vmatmul.mubr.msk.f32.vlgmr.msra.gmra.mrb[16].mxu0 %vm1625_vm10, %v2305_v36  ;;  %v11941_v36 = vld [vmem:[%s14891_s27 + $0x14] ss:$8 sps:$4 sm:$0xff]  }
 0xa75   :  { %2574 = vmatpush1.bf16.msra.mxu0 %v11910_v34  ;;  %2605 = vmatprep.mubr.bf16.mxu0 %v12948_v31 }
 0xa76   :  { %2575 = vmatprep.subr.bf16.mxu0 %v11915_v37 }
 0xa79   :  { %2576 = vmatpush1.bf16.msra.mxu0 %v11913_v38 }
 0xa7a   :  { %2577 = vmatprep.subr.bf16.mxu0 %v11918_v39 }
 0xa7d   :  { %2578 = vmatpush1.bf16.msra.mxu0 %v11916_v42  ;;  %v11939_v42 = vld [vmem:[%s14891_s27 + $0x10] ss:$8 sps:$4 sm:$0xff]  }
 0xa7e   :  { %2579 = vmatprep.subr.bf16.mxu0 %v11921_v44  ;;  %v11944_v44 = vld [vmem:[%s14891_s27 + $0x24] ss:$8 sps:$4 sm:$0xff]  }
 0xa81   :  { %2580 = vmatpush1.bf16.msra.mxu0 %v11919_v45 }
 0xa82   :  { %2581 = vmatprep.subr.bf16.mxu0 %v11924_v46  ;;  %v11942_v46 = vld [vmem:[%s14891_s27 + $0x20] ss:$8 sps:$4 sm:$0xff]  }
 0xa85   :  { %2582 = vmatpush1.bf16.msra.mxu0 %v11922_v47  ;;  %v11948_v47 = vld [vmem:[%s14891_s27 + $0x34] ss:$8 sps:$4 sm:$0xff]  }
 0xa86   :  { %2583 = vmatprep.subr.bf16.mxu0 %v11927_v50  ;;  %v11946_v50 = vld [vmem:[%s14891_s27 + $0x30] ss:$8 sps:$4 sm:$0xff]  }
 0xa89   :  { %2584 = vmatpush1.bf16.msra.mxu0 %v11925_v48 }
 0xa8a   :  { %2585 = vmatprep.subr.bf16.mxu0 %v11930_v51  ;;  %v11951_v51 = vld [vmem:[%s14891_s27 + $0x44] ss:$8 sps:$4 sm:$0xff]  }
 0xa8d   :  { %2586 = vmatpush1.bf16.msra.mxu0 %v11928_v54  ;;  %v11949_v54 = vld [vmem:[%s14891_s27 + $0x40] ss:$8 sps:$4 sm:$0xff]  }
 0xa8e   :  { %2587 = vmatprep.subr.bf16.mxu0 %v11933_v56  ;;  %v11954_v56 = vld [vmem:[%s14891_s27 + $0x54] ss:$8 sps:$4 sm:$0xff]  }
 0xa91   :  { %2588 = vmatpush1.bf16.msra.mxu0 %v11931_v27  ;;  %v11952_v27 = vld [vmem:[%s14891_s27 + $0x50] ss:$8 sps:$4 sm:$0xff]  }
 0xa92   :  { %2711 = vmatprep.subr.bf16.mxu0 %v11936_v57  ;;  %v11957_v57 = vld [vmem:[%s14891_s27 + $0x64] ss:$8 sps:$4 sm:$0xff]  }
 0xb47   :  { %v2375_v33 = vpop.f32.mrb[16].mxu0 }
 0xb48   :  { %v2382_v58 = vrot.slane %v2375_v33, %v13406_v40  ;;  %v11303_v35 = vpop.f32.mrb[17].mxu0  ;;  %v2390_v59 = vrot.slane %v2375_v33, %v13410_v43  ;;  %v11955_v33 = vld [vmem:[%s14891_s27 + $0x60] ss:$8 sps:$4 sm:$0xff]  }
 0xb49   :  { %v11958_v35 = vld [vmem:[%s14891_s27 + $0x70] ss:$8 sps:$4 sm:$0xff]  }
 0xb4a   :  { %v2383_v60 = vmul.f32 %v2382_v58, %v13597_v49  ;;  %v2384_v61 = vmul.f32 %v2382_v58, %v13601_v53  ;;  %v2385_v62 = vmul.f32 %v2382_v58, %v13599_v52  ;;  %v2386_v63 = vmul.f32 %v2382_v58, %v13605_v55  ;;  %v11960_v58 = vld [vmem:[%s14891_s27 + $0x74] ss:$8 sps:$4 sm:$0xff]  }
 0xb4c   :  { %v2391_v0 = vadd.f32 %v2390_v59, %v2383_v60  ;;  %v2392_v1 = vadd.f32 %v2390_v59, %v2384_v61  ;;  %v2393_v2 = vadd.f32 %v2390_v59, %v2385_v62  ;;  %v2394_v3 = vadd.f32 %v2390_v59, %v2386_v63  ;;  %v11964_v59 = vld [vmem:[%s14891_s27 + $0x104] ss:$8 sps:$4 sm:$0xff]   ;;  %v11962_v61 = vld [vmem:[%s14891_s27 + $0x100] ss:$8 sps:$4 sm:$0xff]   ;;  %v11967_v63 = vld [vmem:[%s14891_s27 + $0x114] ss:$8 sps:$4 sm:$0xff]  }
 0xb4e   :  { %v2395_v4 = vmax.f32 %v2391_v0, 0.0  ;;  %v2396_v5 = vmax.f32 %v2392_v1, 0.0  ;;  %v2397_v23 = vmax.f32 %v2393_v2, 0.0  ;;  %v2398_v6 = vmax.f32 %v2394_v3, 0.0  ;;  %v11965_v0 = vld [vmem:[%s14891_s27 + $0x110] ss:$8 sps:$4 sm:$0xff]  }
 0xb4f   :  { %v11970_v1 = vld [vmem:[%s14891_s27 + $0x124] ss:$8 sps:$4 sm:$0xff]   ;;  %v11968_v2 = vld [vmem:[%s14891_s27 + $0x120] ss:$8 sps:$4 sm:$0xff]   ;;  %v11973_v3 = vld [vmem:[%s14891_s27 + $0x134] ss:$8 sps:$4 sm:$0xff]  }
 0xb50   :  { %v10514_v8 = vpack.c.bf16 %v2395_v4, %v2395_v4  ;;  %v10515_v9 = vpack.c.bf16 %v2396_v5, %v2396_v5  ;;  %v10516_v10 = vpack.c.bf16 %v2397_v23, %v2397_v23  ;;  %v10517_v11 = vpack.c.bf16 %v2398_v6, %v2398_v6  ;;  %v11971_v4 = vld [vmem:[%s14891_s27 + $0x130] ss:$8 sps:$4 sm:$0xff]   ;;  %v11976_v5 = vld [vmem:[%s14891_s27 + $0x144] ss:$8 sps:$4 sm:$0xff]   ;;  %v11974_v23 = vld [vmem:[%s14891_s27 + $0x140] ss:$8 sps:$4 sm:$0xff]  }
 0xb51   :  { %v11979_v6 = vld [vmem:[%s14891_s27 + $0x154] ss:$8 sps:$4 sm:$0xff]  }
 0xb52   :  { %v13652_v12 = vrot.slane %v10514_v8, 7  ;;  %v2415_v49 = vrot.slane %v10515_v9, 7  ;;  %v2418_v53 = vrot.slane %v10516_v10, 7  ;;  %v2421_v13 = vrot.slane %v10517_v11, 7  ;;  %v11977_v8 = vld [vmem:[%s14891_s27 + $0x150] ss:$8 sps:$4 sm:$0xff]  }
 0xb53   :  { %v11982_v9 = vld [vmem:[%s14891_s27 + $0x164] ss:$8 sps:$4 sm:$0xff]   ;;  %v11980_v10 = vld [vmem:[%s14891_s27 + $0x160] ss:$8 sps:$4 sm:$0xff]   ;;  %v11985_v11 = vld [vmem:[%s14891_s27 + $0x174] ss:$8 sps:$4 sm:$0xff]  }
 0xb54   :  { %v2414_v52 = vrot.slane %v13652_v12, 4  ;;  %v2417_v55 = vrot.slane %v2415_v49, 4  ;;  %v2420_v14 = vrot.slane %v2418_v53, 4  ;;  %v13655_v15 = vrot.slane %v2421_v13, 4  ;;  %2429 = vst [vmem:[#allocation3] sm:$0xe] %v13652_v12 }
 0xb56   :  { %v13660_v16 = vsel %vm13558_vm12, %v2414_v52, %v2415_v49  ;;  %v13664_v17 = vsel %vm13558_vm12, %v2417_v55, %v2418_v53  ;;  %v13668_v30 = vsel %vm13558_vm12, %v2420_v14, %v2421_v13  ;;  %2433 = vst [vmem:[#allocation3 + $0x10] sm:$0x1] %v13655_v15  ;;  %v11983_v49 = vld [vmem:[%s14891_s27 + $0x170] ss:$8 sps:$4 sm:$0xff]   ;;  %v2975_v55 = vld [vmem:[%s14894_s1 + $0x80] sm:$0xff]  ;;  %v2976_v14 = vld [vmem:[%s14894_s1 + $0x88] sm:$0xff] }
 0xb57   :  { %2430 = vst [vmem:[#allocation3 + $0x4] sm:$0xf] %v13660_v16  ;;  %2431 = vst [vmem:[#allocation3 + $0x8] sm:$0xf] %v13664_v17  ;;  %s14920_s27 = sld [smem:[#allocation71_spill]] }
 0xb58   :  { %2432 = vst [vmem:[#allocation3 + $0xc] sm:$0xf] %v13668_v30 }
 0xb5b   :  { %v2454_v18 = vld [vmem:[#allocation3] sm:$0xe] }
 0xb5c   :  { %v2764_v24 = vld [vmem:[#allocation3] sm:$0xc] }
 0xb5d   :  { %v11945_v38 = vld [vmem:[#allocation3 + $0x10] ss:$0 sps:$4 sm:$0x11]   ;;  %v2434_v60 = vld [vmem:[#allocation3] sm:$0xf] }
 0xb5e   :  { %v2435_v19 = vld [vmem:[#allocation3 + $0x4] sm:$0xf]  ;;  %v2489_v45 = vrot.slane %v11945_v38, 1  ;;  %v11987_v53 = vld [vmem:[#allocation3 + $0x10] ss:$0 sps:$4 sm:$0x33]  }
 0xb5f   :  { %v9586_v20 = vcombine.low %v2454_v18, %v2435_v19  ;;  %v13674_v21 = vld [vmem:[#allocation3 + $0x8] sm:$0xff]   ;;  %v9638_v22 = vcombine.low %v2764_v24, %v2435_v19  ;;  %v9605_v62 = vcombine.low %v2434_v60, %v2435_v19  ;;  %v2792_v13 = vrot.slane %v11987_v53, 2  ;;  %v2960_v19 = vld [vmem:[%s14894_s1 + $0x8] sm:$0xff]  ;;  %v2969_v60 = vld [vmem:[%s14894_s1 + $0x50] sm:$0xff] }
 0xb60   :  { %v2487_v28 = vrot.slane %v13674_v21, 1  ;;  %v2790_v34 = vrot.slane %v13674_v21, 2  ;;  %v11504_v18 = vpack.c.bf16 %v2976_v14, %v2975_v55  ;;  %v2959_v24 = vld [vmem:[%s14894_s1] sm:$0xff] }
 0xb61   :  { %v2486_v26 = vrot.slane %v9586_v20, 1  ;;  %v2789_v29 = vrot.slane %v9638_v22, 2  ;;  %v11506_v20 = vpack.c.bf16 %v2960_v19, %v2959_v24  ;;  %v2977_v22 = vld [vmem:[%s14894_s1 + $0x90] sm:$0xff]  ;;  %v2963_v38 = vld [vmem:[%s14894_s1 + $0x20] sm:$0xff] }
 0xb62   :  { %v2490_v48 = vsel %vm1233_vm7, %v2487_v28, %v2489_v45  ;;  %v2793_v52 = vsel %vm1389_vm8, %v2790_v34, %v2792_v13  ;;  %11505 = vmatprep.subr.bf16.mxu1 %v11504_v18  ;;  %v2982_v45 = vld [vmem:[%s14894_s1 + $0xb8] sm:$0xff] }
 0xb63   :  { %v2488_v37 = vsel %vm1233_vm7, %v2486_v26, %v2487_v28  ;;  %v13684_v39 = vsel %vm1389_vm8, %v2789_v29, %v2790_v34  ;;  %11507 = vmatpush3.bf16.msra.mxu1 %v11506_v20  ;;  %v2961_v26 = vld [vmem:[%s14894_s1 + $0x10] sm:$0xff]  ;;  %v2962_v28 = vld [vmem:[%s14894_s1 + $0x18] sm:$0xff]  ;;  %v2979_v34 = vld [vmem:[%s14894_s1 + $0xa0] sm:$0xff] }
 0xb64   :  { %2606 = vmatmul.mubr.bf16.vlgmr.msra.gmra.mrb[20].mxu0 %v2488_v37  ;;  %v11510_v29 = vpack.c.bf16 %v2962_v28, %v2961_v26 }
 0xb65   :  { %2712 = vmatpush1.bf16.msra.mxu0 %v11934_v25  ;;  %2615 = vmatprep.mubr.bf16.mxu0 %v12948_v31  ;;  %v2978_v25 = vld [vmem:[%s14894_s1 + $0x98] sm:$0xff] }
 0xb66   :  { %2713 = vmatprep.subr.bf16.mxu0 %v11941_v36  ;;  %v2980_v36 = vld [vmem:[%s14894_s1 + $0xa8] sm:$0xff] }
 0xb67   :  { %v11512_v37 = vpack.c.bf16 %v2980_v36, %v2979_v34 }
 0xb69   :  { %2714 = vmatpush1.bf16.msra.mxu0 %v11939_v42 }
 0xb6a   :  { %2715 = vmatprep.subr.bf16.mxu0 %v11944_v44  ;;  %v2981_v44 = vld [vmem:[%s14894_s1 + $0xb0] sm:$0xff] }
 0xb6c   :  { %2616 = vmatmul.mubr.bf16.gmra.mrb[24].mxu0 %v2490_v48  ;;  %v2966_v48 = vld [vmem:[%s14894_s1 + $0x38] sm:$0xff] }
 0xb6d   :  { %2716 = vmatpush1.bf16.msra.mxu0 %v11942_v46  ;;  %2743 = vmatprep.mubr.bf16.mxu0 %v12948_v31  ;;  %v11516_v46 = vpack.c.bf16 %v2982_v45, %v2981_v44 }
 0xb6e   :  { %2717 = vmatprep.subr.bf16.mxu0 %v11948_v47  ;;  %v2965_v47 = vld [vmem:[%s14894_s1 + $0x30] sm:$0xff] }
 0xb71   :  { %2718 = vmatpush1.bf16.msra.mxu0 %v11946_v50  ;;  %v11518_v50 = vpack.c.bf16 %v2966_v48, %v2965_v47 }
 0xb72   :  { %2719 = vmatprep.subr.bf16.mxu0 %v11951_v51  ;;  %v2983_v51 = vld [vmem:[%s14894_s1 + $0xc0] sm:$0xff] }
 0xb75   :  { %2720 = vmatpush1.bf16.msra.mxu0 %v11949_v54  ;;  %v2984_v54 = vld [vmem:[%s14894_s1 + $0xc8] sm:$0xff] }
 0xb76   :  { %2721 = vmatprep.subr.bf16.mxu0 %v11954_v56  ;;  %v11520_v56 = vpack.c.bf16 %v2984_v54, %v2983_v51 }
 0xb79   :  { %2722 = vmatpush1.bf16.msra.mxu0 %v11952_v27  ;;  %v2967_v27 = vld [vmem:[%s14894_s1 + $0x40] sm:$0xff] }
 0xb7a   :  { %2723 = vmatprep.subr.bf16.mxu0 %v11957_v57  ;;  %v2968_v57 = vld [vmem:[%s14894_s1 + $0x48] sm:$0xff] }
 0xb7d   :  { %2724 = vmatpush1.bf16.msra.mxu0 %v11955_v33  ;;  %v11522_v33 = vpack.c.bf16 %v2968_v57, %v2967_v27 }
 0xb7e   :  { %2725 = vmatprep.subr.bf16.mxu0 %v11960_v58  ;;  %v2985_v58 = vld [vmem:[%s14894_s1 + $0xd0] sm:$0xff] }
 0xb81   :  { %2726 = vmatpush1.bf16.msra.mxu0 %v11958_v35  ;;  %v2986_v35 = vld [vmem:[%s14894_s1 + $0xd8] sm:$0xff] }
 0xb82   :  { %2876 = vmatprep.subr.bf16.mxu0 %v11964_v59  ;;  %v11524_v59 = vpack.c.bf16 %v2986_v35, %v2985_v58 }
 0xb84   :  { %2744 = vmatmul.mubr.bf16.vlgmr.msra.gmra.mrb[20].mxu0 %v9605_v62 }
 0xb85   :  { %2877 = vmatpush1.bf16.msra.mxu0 %v11962_v61  ;;  %2753 = vmatprep.mubr.bf16.mxu0 %v12948_v31  ;;  %v2970_v61 = vld [vmem:[%s14894_s1 + $0x58] sm:$0xff] }
 0xb86   :  { %2878 = vmatprep.subr.bf16.mxu0 %v11967_v63  ;;  %v11526_v62 = vpack.c.bf16 %v2970_v61, %v2969_v60  ;;  %v2987_v63 = vld [vmem:[%s14894_s1 + $0xe0] sm:$0xff] }
 0xb89   :  { %2879 = vmatpush1.bf16.msra.mxu0 %v11965_v0  ;;  %v2988_v0 = vld [vmem:[%s14894_s1 + $0xe8] sm:$0xff] }
 0xb8a   :  { %2880 = vmatprep.subr.bf16.mxu0 %v11970_v1  ;;  %v2971_v1 = vld [vmem:[%s14894_s1 + $0x60] sm:$0xff] }
 0xb8c   :  { %2754 = vmatmul.mubr.bf16.gmra.mrb[24].mxu0 %v13674_v21  ;;  %v11508_v21 = vpack.c.bf16 %v2978_v25, %v2977_v22 }
 0xb8d   :  { %2881 = vmatpush1.bf16.msra.mxu0 %v11968_v2  ;;  %2908 = vmatprep.mubr.bf16.mxu0 %v12948_v31  ;;  %v11528_v2 = vpack.c.bf16 %v2988_v0, %v2987_v63 }
 0xb8e   :  { %2882 = vmatprep.subr.bf16.mxu0 %v11973_v3  ;;  %11509 = vmatprep.subr.bf16.mxu1 %v11508_v21  ;;  %v2972_v3 = vld [vmem:[%s14894_s1 + $0x68] sm:$0xff] }
 0xb8f   :  { %11511 = vmatpush3.bf16.msra.mxu1 %v11510_v29 }
 0xb90   :  { %11513 = vmatprep.subr.bf16.mxu1 %v11512_v37 }
 0xb91   :  { %2883 = vmatpush1.bf16.msra.mxu0 %v11971_v4  ;;  %v2989_v4 = vld [vmem:[%s14894_s1 + $0xf0] sm:$0xff] }
 0xb92   :  { %2884 = vmatprep.subr.bf16.mxu0 %v11976_v5  ;;  %v2990_v5 = vld [vmem:[%s14894_s1 + $0xf8] sm:$0xff] }
 0xb95   :  { %2885 = vmatpush1.bf16.msra.mxu0 %v11974_v23  ;;  %v11530_v23 = vpack.c.bf16 %v2972_v3, %v2971_v1 }
 0xb96   :  { %2886 = vmatprep.subr.bf16.mxu0 %v11979_v6  ;;  %v11532_v6 = vpack.c.bf16 %v2990_v5, %v2989_v4 }
 0xb99   :  { %2887 = vmatpush1.bf16.msra.mxu0 %v11977_v8  ;;  %v2973_v8 = vld [vmem:[%s14894_s1 + $0x70] sm:$0xff] }
 0xb9a   :  { %2888 = vmatprep.subr.bf16.mxu0 %v11982_v9  ;;  %v2974_v9 = vld [vmem:[%s14894_s1 + $0x78] sm:$0xff] }
 0xb9d   :  { %2889 = vmatpush1.bf16.msra.mxu0 %v11980_v10  ;;  %v11534_v10 = vpack.c.bf16 %v2974_v9, %v2973_v8 }
 0xb9e   :  { %2890 = vmatprep.subr.bf16.mxu0 %v11985_v11  ;;  %v2937_v11 = vld [vmem:[%s14895_s2] sm:$0x3] }
 0xb9f   :  { %v2942_v53 = vrot.slane %v2937_v11, %v13406_v40 }
 0xba1   :  { %2891 = vmatpush1.bf16.msra.mxu0 %v11983_v49 }
 0xba4   :  { %2909 = vmatmul.mubr.bf16.vlgmr.msra.gmra.mrb[20].mxu0 %v13684_v39  ;;  %v2964_v39 = vld [vmem:[%s14894_s1 + $0x28] sm:$0xff] }
 0xba5   :  { %2918 = vmatprep.mubr.bf16.mxu0 %v12948_v31  ;;  %v11514_v42 = vpack.c.bf16 %v2964_v39, %v2963_v38 }
 0xba7   :  { %11515 = vmatpush3.bf16.msra.mxu1 %v11514_v42 }
 0xba8   :  { %11517 = vmatprep.subr.bf16.mxu1 %v11516_v46 }
 0xbab   :  { %11519 = vmatpush3.bf16.msra.mxu1 %v11518_v50 }
 0xbac   :  { %2919 = vmatmul.mubr.bf16.gmra.mrb[24].mxu0 %v2793_v52  ;;  %11521 = vmatprep.subr.bf16.mxu1 %v11520_v56  ;;  %v2946_v52 = vrot.slane %v2937_v11, %v13410_v43 }
 0xbaf   :  { %11523 = vmatpush3.bf16.msra.mxu1 %v11522_v33 }
 0xbb0   :  { %11525 = vmatprep.subr.bf16.mxu1 %v11524_v59 }
 0xbb3   :  { %11527 = vmatpush3.bf16.msra.mxu1 %v11526_v62 }
 0xbb4   :  { %11529 = vmatprep.subr.bf16.mxu1 %v11528_v2 }
 0xbb7   :  { %11531 = vmatpush3.bf16.msra.mxu1 %v11530_v23 }
 0xbb8   :  { %11533 = vmatprep.subr.bf16.mxu1 %v11532_v6 }
 0xbbb   :  { %11535 = vmatpush3.bf16.msra.mxu1 %v11534_v10 }
 0xc77   :  { %v2910_v49 = vpop.f32.mrb[20].mxu0 }
 0xc78   :  { %v2912_v13 = vpop.f32.mrb[21].mxu0  ;;  %v13765_v19 = vadd.f32 %v2942_v53, %v2910_v49 }
 0xc79   :  { %v2914_v55 = vpop.f32.mrb[22].mxu0  ;;  %v13767_v20 = vadd.f32 %v2946_v52, %v2912_v13 }
 0xc7a   :  { %v13761_v14 = vadd.f32 %v2942_v53, %v2914_v55  ;;  %v2916_v18 = vpop.f32.mrb[23].mxu0  ;;  %v3013_v26 = vmul.f32 %v13765_v19, %v13765_v19 }
 0xc7b   :  { %v13763_v24 = vadd.f32 %v2946_v52, %v2916_v18  ;;  %v3014_v36 = vmul.f32 %v13767_v20, %v13767_v20 }
 0xc7c   :  { %v3015_v22 = vmul.f32 %v13761_v14, %v13761_v14  ;;  %v2995_v28 = vadd.f32 %v13761_v14, %v13765_v19 }
 0xc7d   :  { %v3016_v25 = vmul.f32 %v13763_v24, %v13763_v24  ;;  %v3004_v37 = vadd.f32 %v13763_v24, %v13767_v20 }
 0xc7e   :  { %v3021_v42 = vadd.f32 %v3015_v22, %v3013_v26 }
 0xc7f   :  { %v2920_v21 = vpop.f32.mrb[24].mxu0  ;;  %v3030_v48 = vadd.f32 %v3016_v25, %v3014_v36  ;;  %v2994_v36 = vld [vmem:[%s14896_s7 + $0x18] sm:$0xff] }
 0xc80   :  { %v13777_v29 = vadd.f32 %v2942_v53, %v2920_v21  ;;  %v2922_v34 = vpop.f32.mrb[25].mxu0 }
 0xc81   :  { %v13783_v38 = vadd.f32 %v2946_v52, %v2922_v34  ;;  %v2924_v39 = vpop.f32.mrb[26].mxu0  ;;  %v2992_v34 = vld [vmem:[%s14896_s7 + $0x8] sm:$0xff] }
 0xc82   :  { %v2996_v44 = vadd.f32 %v2995_v28, %v13777_v29  ;;  %v3017_v45 = vmul.f32 %v13777_v29, %v13777_v29  ;;  %v13788_v46 = vadd.f32 %v2942_v53, %v2924_v39  ;;  %v2926_v47 = vpop.f32.mrb[27].mxu0  ;;  %v2991_v39 = vld [vmem:[%s14896_s7] sm:$0xff] }
 0xc83   :  { %v3005_v50 = vadd.f32 %v3004_v37, %v13783_v38  ;;  %v3018_v51 = vmul.f32 %v13783_v38, %v13783_v38  ;;  %v13793_v54 = vadd.f32 %v2946_v52, %v2926_v47  ;;  %v11536_v37 = vpack.c.bf16 %v2994_v36, %v2992_v34  ;;  %v12020_v34 = vld [vmem:[%s14897_s19 + $0x1a4] ss:$8 sps:$4 sm:$0xff]   ;;  %v12018_v36 = vld [vmem:[%s14897_s19 + $0x1a0] ss:$8 sps:$4 sm:$0xff]  }
 0xc84   :  { %v3022_v56 = vadd.f32 %v3021_v42, %v3017_v45  ;;  %v2997_v27 = vadd.f32 %v2996_v44, %v13788_v46  ;;  %v3019_v57 = vmul.f32 %v13788_v46, %v13788_v46  ;;  %v2993_v42 = vld [vmem:[%s14896_s7 + $0x10] sm:$0xff]  ;;  %v11990_v45 = vld [vmem:[%s14897_s19 + $0x104] ss:$8 sps:$4 sm:$0xff]  }
 0xc85   :  { %v3031_v33 = vadd.f32 %v3030_v48, %v3018_v51  ;;  %v3006_v58 = vadd.f32 %v3005_v50, %v13793_v54  ;;  %v3020_v35 = vmul.f32 %v13793_v54, %v13793_v54  ;;  %v11538_v44 = vpack.c.bf16 %v2993_v42, %v2991_v39  ;;  %11537 = vmatprep.subr.bf16.mxu1 %v11536_v37  ;;  %v12023_v37 = vld [vmem:[%s14897_s19 + $0x1b4] ss:$8 sps:$4 sm:$0xff]   ;;  %v12021_v39 = vld [vmem:[%s14897_s19 + $0x1b0] ss:$8 sps:$4 sm:$0xff]   ;;  %v12026_v42 = vld [vmem:[%s14897_s19 + $0x1c4] ss:$8 sps:$4 sm:$0xff]  }
 0xc86   :  { %v2998_v59 = vrot.slane %v2997_v27, 4  ;;  %v3023_v60 = vadd.f32 %v3022_v56, %v3019_v57 }
 0xc87   :  { %v3007_v61 = vrot.slane %v3006_v58, 4  ;;  %v3032_v62 = vadd.f32 %v3031_v33, %v3020_v35 }
 0xc88   :  { %v2999_v63 = vadd.f32 %v2998_v59, %v2997_v27  ;;  %v3024_v0 = vrot.slane %v3023_v60, 4 }
 0xc89   :  { %v3008_v1 = vadd.f32 %v3007_v61, %v3006_v58  ;;  %v3033_v2 = vrot.slane %v3032_v62, 4 }
 0xc8a   :  { %v3000_v3 = vrot.slane %v2999_v63, 2  ;;  %v3025_v4 = vadd.f32 %v3024_v0, %v3023_v60  ;;  %v2957_v60 = vld [vmem:[%s14898_s6] sm:$0x1] }
 0xc8b   :  { %v3009_v5 = vrot.slane %v3008_v1, 2  ;;  %v3034_v23 = vadd.f32 %v3033_v2, %v3032_v62 }
 0xc8c   :  { %v3001_v6 = vadd.f32 %v3000_v3, %v2999_v63  ;;  %v3026_v8 = vrot.slane %v3025_v4, 2  ;;  %v2958_v63 = vld [vmem:[%s14899_s20] sm:$0x1] }
 0xc8d   :  { %v3010_v9 = vadd.f32 %v3009_v5, %v3008_v1  ;;  %v3035_v10 = vrot.slane %v3034_v23, 2  ;;  %v11988_v3 = vld [vmem:[%s14897_s19 + $0x100] ss:$8 sps:$4 sm:$0xff]  }
 0xc8e   :  { %v3027_v11 = vadd.f32 %v3026_v8, %v3025_v4  ;;  %v3002_v13 = vrot.slane %v3001_v6, 1  ;;  %v11993_v4 = vld [vmem:[%s14897_s19 + $0x114] ss:$8 sps:$4 sm:$0xff]   ;;  %v11994_v8 = vld [vmem:[%s14897_s19 + $0x120] ss:$8 sps:$4 sm:$0xff]  }
 0xc8f   :  { %v3011_v49 = vrot.slane %v3010_v9, 1  ;;  %v3036_v53 = vadd.f32 %v3035_v10, %v3034_v23  ;;  %v11991_v23 = vld [vmem:[%s14897_s19 + $0x110] ss:$8 sps:$4 sm:$0xff]  }
 0xc90   :  { %v3028_v52 = vrot.slane %v3027_v11, 1  ;;  %v3003_v21 = vadd.f32 %v3002_v13, %v3001_v6  ;;  %v11996_v6 = vld [vmem:[%s14897_s19 + $0x124] ss:$8 sps:$4 sm:$0xff]   ;;  %v11997_v10 = vld [vmem:[%s14897_s19 + $0x130] ss:$8 sps:$4 sm:$0xff]  }
 0xc91   :  { %v3037_v55 = vrot.slane %v3036_v53, 1  ;;  %v3012_v22 = vadd.f32 %v3011_v49, %v3010_v9  ;;  %v11999_v9 = vld [vmem:[%s14897_s19 + $0x134] ss:$8 sps:$4 sm:$0xff]   ;;  %v12000_v49 = vld [vmem:[%s14897_s19 + $0x140] ss:$8 sps:$4 sm:$0xff]  }
 0xc92   :  { %v3029_v18 = vadd.f32 %v3028_v52, %v3027_v11  ;;  %v12002_v11 = vld [vmem:[%s14897_s19 + $0x144] ss:$8 sps:$4 sm:$0xff]   ;;  %v12003_v13 = vld [vmem:[%s14897_s19 + $0x150] ss:$8 sps:$4 sm:$0xff]  }
 0xc93   :  { %v3038_v25 = vadd.f32 %v3037_v55, %v3036_v53  ;;  %v12005_v53 = vld [vmem:[%s14897_s19 + $0x154] ss:$8 sps:$4 sm:$0xff]   ;;  %v12008_v52 = vld [vmem:[%s14897_s19 + $0x164] ss:$8 sps:$4 sm:$0xff]   ;;  %v12006_v55 = vld [vmem:[%s14897_s19 + $0x160] ss:$8 sps:$4 sm:$0xff]  }
 0xc94   :  { %v3039_v28 = vsel %vm1518_vm9, %v3003_v21, %v3029_v18  ;;  %v12011_v18 = vld [vmem:[%s14897_s19 + $0x174] ss:$8 sps:$4 sm:$0xff]   ;;  %v12012_v21 = vld [vmem:[%s14897_s19 + $0x180] ss:$8 sps:$4 sm:$0xff]  }
 0xc95   :  { %v3040_v26 = vsel %vm1518_vm9, %v3012_v22, %v3038_v25  ;;  %v12009_v22 = vld [vmem:[%s14897_s19 + $0x170] ss:$8 sps:$4 sm:$0xff]   ;;  %v12014_v25 = vld [vmem:[%s14897_s19 + $0x184] ss:$8 sps:$4 sm:$0xff]  }
 0xc96   :  { %3105 = vmatprep.mubr.f32.mxu1 %v3040_v26  ;;  %v12017_v26 = vld [vmem:[%s14897_s19 + $0x194] ss:$8 sps:$4 sm:$0xff]  }
 0xc97   :  { %3106 = vmatmul.mubr.f32.vlgmr.msra.gmra.mrb[18].mxu1 %v3039_v28  ;;  %v12015_v28 = vld [vmem:[%s14897_s19 + $0x190] ss:$8 sps:$4 sm:$0xff]  }
 0xc98   :  { %3214 = vmatprep.mubr.f32.mxu1 %v12946_v41  ;;  %11539 = vmatpush1.bf16.msra.mxu1 %v11538_v44  ;;  %v12024_v44 = vld [vmem:[%s14897_s19 + $0x1c0] ss:$8 sps:$4 sm:$0xff]  }
 0xc99   :  { %3570 = vmatprep.subr.bf16.mxu1 %v11990_v45  ;;  %v12029_v45 = vld [vmem:[%s14897_s19 + $0x1d4] ss:$8 sps:$4 sm:$0xff]  }
 0xd6a   :  { %v10696_v47 = vpop.f32.mrb[18].mxu1 }
 0xd6b   :  { %v10697_v48 = vpop.f32.mrb[19].mxu1 }
 0xd6c   :  { %v10698_v50 = vadd.f32 %v10697_v48, %v10696_v47  ;;  %v12027_v47 = vld [vmem:[%s14897_s19 + $0x1d0] ss:$8 sps:$4 sm:$0xff]   ;;  %v12030_v48 = vld [vmem:[%s14897_s19 + $0x1e0] ss:$8 sps:$4 sm:$0xff]  }
 0xd6e   :  { %v3111_v51 = vmul.f32 0.001953125, %v10698_v50  ;;  %v12032_v50 = vld [vmem:[%s14897_s19 + $0x1e4] ss:$8 sps:$4 sm:$0xff]  }
 0xd70   :  { %v3112_v56 = vmul.f32 %v3111_v51, %v3111_v51 }
 0xd72   :  { %v3114_v27 = vrot.slane %v3112_v56, 7  ;;  %v12033_v56 = vld [vmem:[%s14897_s19 + $0x1f0] ss:$8 sps:$4 sm:$0xff]  }
 0xd74   :  { %v3116_v57 = vsub.f32 %v3111_v51, %v3114_v27  ;;  %v12038_v27 = vld [vmem:[%s14897_s19 + $0x4] ss:$8 sps:$4 sm:$0xff]  }
 0xd76   :  { %v3117_v33 = vadd.f32 1e-05, %v3116_v57 }
 0xd78   :  { %12594 = vrsqrt.f32 %v3117_v33 }
 0xd82   :  { %v12595_v58 = vpop.eup %12594 }
 0xd83   :  { %v3126_v35 = vrot.slane %v12595_v58, %v13534_v7 }
 0xd85   :  { %v3127_v59 = vcombine.high %v3126_v35, %v3126_v35 }
 0xd87   :  { %v3134_v61 = vrot.slane %v3127_v59, %v13534_v7 }
 0xd89   :  { %v3136_v62 = vmul.f32 %v3134_v61, %v2957_v60 }
 0xd8b   :  { %v3137_v0 = vmul.f32 %v3136_v62, %v3111_v51  ;;  %v12035_v51 = vld [vmem:[%s14897_s19 + $0x1f4] ss:$8 sps:$4 sm:$0xff]  }
 0xd8d   :  { %v3138_v1 = vsub.f32 %v2958_v63, %v3137_v0 }
 0xd8f   :  { %v3143_v2 = vrot.slane %v3138_v1, %v13406_v40 }
 0xd91   :  { %v3145_v5 = vsel %vm1518_vm9, %v3136_v62, %v3143_v2 }
 0xd92   :  { %9656 = vmatmul.mubr.msk.f32.vlgmr.msra.gmra.mrb[24].mxu1 %vm3146_vm13, %v3145_v5 }
 0xd93   :  { %3571 = vmatpush1.bf16.msra.mxu1 %v11988_v3 }
 0xd94   :  { %3572 = vmatprep.subr.bf16.mxu1 %v11993_v4 }
 0xd97   :  { %3573 = vmatpush1.bf16.msra.mxu1 %v11991_v23 }
 0xd98   :  { %3574 = vmatprep.subr.bf16.mxu1 %v11996_v6 }
 0xd9b   :  { %3575 = vmatpush1.bf16.msra.mxu1 %v11994_v8 }
 0xd9c   :  { %3576 = vmatprep.subr.bf16.mxu1 %v11999_v9 }
 0xd9f   :  { %3577 = vmatpush1.bf16.msra.mxu1 %v11997_v10 }
 0xda0   :  { %3578 = vmatprep.subr.bf16.mxu1 %v12002_v11 }
 0xda3   :  { %3579 = vmatpush1.bf16.msra.mxu1 %v12000_v49 }
 0xda4   :  { %3580 = vmatprep.subr.bf16.mxu1 %v12005_v53 }
 0xda7   :  { %3581 = vmatpush1.bf16.msra.mxu1 %v12003_v13 }
 0xda8   :  { %3582 = vmatprep.subr.bf16.mxu1 %v12008_v52 }
 0xdab   :  { %3583 = vmatpush1.bf16.msra.mxu1 %v12006_v55 }
 0xdac   :  { %3584 = vmatprep.subr.bf16.mxu1 %v12011_v18 }
 0xdaf   :  { %3585 = vmatpush1.bf16.msra.mxu1 %v12009_v22 }
 0xdb0   :  { %3586 = vmatprep.subr.bf16.mxu1 %v12014_v25 }
 0xdb3   :  { %3587 = vmatpush1.bf16.msra.mxu1 %v12012_v21 }
 0xdb4   :  { %3588 = vmatprep.subr.bf16.mxu1 %v12017_v26 }
 0xdb7   :  { %3589 = vmatpush1.bf16.msra.mxu1 %v12015_v28 }
 0xdb8   :  { %3590 = vmatprep.subr.bf16.mxu1 %v12020_v34 }
 0xdbb   :  { %3591 = vmatpush1.bf16.msra.mxu1 %v12018_v36 }
 0xdbc   :  { %3592 = vmatprep.subr.bf16.mxu1 %v12023_v37 }
 0xdbf   :  { %3593 = vmatpush1.bf16.msra.mxu1 %v12021_v39 }
 0xdc0   :  { %3594 = vmatprep.subr.bf16.mxu1 %v12026_v42 }
 0xdc3   :  { %3595 = vmatpush1.bf16.msra.mxu1 %v12024_v44 }
 0xdc4   :  { %3596 = vmatprep.subr.bf16.mxu1 %v12029_v45 }
 0xdc7   :  { %3597 = vmatpush1.bf16.msra.mxu1 %v12027_v47 }
 0xdc8   :  { %3598 = vmatprep.subr.bf16.mxu1 %v12032_v50 }
 0xdcb   :  { %3599 = vmatpush1.bf16.msra.mxu1 %v12030_v48 }
 0xdcc   :  { %3600 = vmatprep.subr.bf16.mxu1 %v12035_v51 }
 0xdcf   :  { %3601 = vmatpush1.bf16.msra.mxu1 %v12033_v56 }
 0xdd0   :  { %3792 = vmatprep.subr.bf16.mxu1 %v12038_v27 }
 0xe65   :  { %v3216_v57 = vpop.f32.mrb[24].mxu1 }
 0xe66   :  { %v3224_v33 = vrot.slane %v3216_v57, %v13406_v40  ;;  %v3218_v58 = vpop.f32.mrb[25].mxu1  ;;  %v3240_v35 = vrot.slane %v3216_v57, %v13410_v43 }
 0xe67   :  { %v3228_v59 = vrot.slane %v3218_v58, %v13406_v40  ;;  %v3244_v60 = vrot.slane %v3218_v58, %v13410_v43 }
 0xe68   :  { %v3229_v61 = vmul.f32 %v3224_v33, %v13765_v19  ;;  %v3231_v62 = vmul.f32 %v3224_v33, %v13761_v14  ;;  %v3233_v63 = vmul.f32 %v3224_v33, %v13777_v29  ;;  %v3235_v0 = vmul.f32 %v3224_v33, %v13788_v46 }
 0xe69   :  { %v3230_v1 = vmul.f32 %v3228_v59, %v13767_v20  ;;  %v3232_v2 = vmul.f32 %v3228_v59, %v13763_v24  ;;  %v3234_v3 = vmul.f32 %v3228_v59, %v13783_v38  ;;  %v3236_v4 = vmul.f32 %v3228_v59, %v13793_v54 }
 0xe6a   :  { %v3245_v5 = vadd.f32 %v3240_v35, %v3229_v61  ;;  %v3247_v23 = vadd.f32 %v3240_v35, %v3231_v62  ;;  %v3249_v6 = vadd.f32 %v3240_v35, %v3233_v63  ;;  %v3251_v8 = vadd.f32 %v3240_v35, %v3235_v0  ;;  %v12036_v35 = vld [vmem:[%s14897_s19] ss:$8 sps:$4 sm:$0xff]   ;;  %v12042_v61 = vld [vmem:[%s14897_s19 + $0x14] ss:$8 sps:$4 sm:$0xff]   ;;  %v12040_v0 = vld [vmem:[%s14897_s19 + $0x10] ss:$8 sps:$4 sm:$0xff]  }
 0xe6b   :  { %v3246_v9 = vadd.f32 %v3244_v60, %v3230_v1  ;;  %v3248_v19 = vadd.f32 %v3244_v60, %v3232_v2  ;;  %v3250_v10 = vadd.f32 %v3244_v60, %v3234_v3  ;;  %v3252_v14 = vadd.f32 %v3244_v60, %v3236_v4  ;;  %v12043_v2 = vld [vmem:[%s14897_s19 + $0x20] ss:$8 sps:$4 sm:$0xff]   ;;  %v12049_v3 = vld [vmem:[%s14897_s19 + $0x34] ss:$8 sps:$4 sm:$0xff]  }
 0xe6c   :  { %v3253_v11 = vmax.f32 %v3245_v5, 0.0  ;;  %v3255_v29 = vmax.f32 %v3247_v23, 0.0  ;;  %v3257_v49 = vmax.f32 %v3249_v6, 0.0  ;;  %v3259_v46 = vmax.f32 %v3251_v8, 0.0  ;;  %v12047_v23 = vld [vmem:[%s14897_s19 + $0x30] ss:$8 sps:$4 sm:$0xff]  }
 0xe6d   :  { %v3254_v53 = vmax.f32 %v3246_v9, 0.0  ;;  %v3256_v20 = vmax.f32 %v3248_v19, 0.0  ;;  %v3258_v13 = vmax.f32 %v3250_v10, 0.0  ;;  %v3260_v24 = vmax.f32 %v3252_v14, 0.0  ;;  %v12052_v6 = vld [vmem:[%s14897_s19 + $0x44] ss:$8 sps:$4 sm:$0xff]  }
 0xe6e   :  { %v12050_v8 = vld [vmem:[%s14897_s19 + $0x40] ss:$8 sps:$4 sm:$0xff]   ;;  %v12055_v9 = vld [vmem:[%s14897_s19 + $0x54] ss:$8 sps:$4 sm:$0xff]   ;;  %v12053_v19 = vld [vmem:[%s14897_s19 + $0x50] ss:$8 sps:$4 sm:$0xff]  }
 0xe6f   :  { %v10518_v52 = vpack.c.bf16 %v3254_v53, %v3253_v11  ;;  %v10519_v38 = vpack.c.bf16 %v3256_v20, %v3255_v29  ;;  %v10520_v55 = vpack.c.bf16 %v3258_v13, %v3257_v49  ;;  %v10521_v54 = vpack.c.bf16 %v3260_v24, %v3259_v46  ;;  %v12058_v10 = vld [vmem:[%s14897_s19 + $0x64] ss:$8 sps:$4 sm:$0xff]   ;;  %v12056_v14 = vld [vmem:[%s14897_s19 + $0x60] ss:$8 sps:$4 sm:$0xff]   ;;  %v12061_v11 = vld [vmem:[%s14897_s19 + $0x74] ss:$8 sps:$4 sm:$0xff]  }
 0xe70   :  { %v12059_v29 = vld [vmem:[%s14897_s19 + $0x70] ss:$8 sps:$4 sm:$0xff]   ;;  %v12064_v49 = vld [vmem:[%s14897_s19 + $0x84] ss:$8 sps:$4 sm:$0xff]   ;;  %v12062_v46 = vld [vmem:[%s14897_s19 + $0x80] ss:$8 sps:$4 sm:$0xff]  }
 0xe71   :  { %v3283_v18 = vrot.slane %v10518_v52, 7  ;;  %v3285_v22 = vrot.slane %v10519_v38, 7  ;;  %v3288_v25 = vrot.slane %v10520_v55, 7  ;;  %v3291_v21 = vrot.slane %v10521_v54, 7  ;;  %v12067_v53 = vld [vmem:[%s14897_s19 + $0x94] ss:$8 sps:$4 sm:$0xff]  }
 0xe72   :  { %v12065_v20 = vld [vmem:[%s14897_s19 + $0x90] ss:$8 sps:$4 sm:$0xff]   ;;  %v12070_v13 = vld [vmem:[%s14897_s19 + $0xa4] ss:$8 sps:$4 sm:$0xff]   ;;  %v12068_v24 = vld [vmem:[%s14897_s19 + $0xa0] ss:$8 sps:$4 sm:$0xff]  }
 0xe73   :  { %v3284_v26 = vrot.slane %v3283_v18, 4  ;;  %v3287_v28 = vrot.slane %v3285_v22, 4  ;;  %v3290_v34 = vrot.slane %v3288_v25, 4  ;;  %v3293_v36 = vrot.slane %v3291_v21, 4  ;;  %3299 = vst [vmem:[#allocation4] sm:$0xee] %v3283_v18 }
 0xe74   :  { %v12073_v52 = vld [vmem:[%s14897_s19 + $0xb4] ss:$8 sps:$4 sm:$0xff]   ;;  %v12071_v38 = vld [vmem:[%s14897_s19 + $0xb0] ss:$8 sps:$4 sm:$0xff]   ;;  %v12076_v55 = vld [vmem:[%s14897_s19 + $0xc4] ss:$8 sps:$4 sm:$0xff]  }
 0xe75   :  { %v13862_v37 = vsel %vm13558_vm12, %v3284_v26, %v3285_v22  ;;  %v3289_v39 = vsel %vm13558_vm12, %v3287_v28, %v3288_v25  ;;  %v3292_v42 = vsel %vm13558_vm12, %v3290_v34, %v3291_v21  ;;  %3303 = vst [vmem:[#allocation4 + $0x20] sm:$0x11] %v3293_v36  ;;  %v12074_v54 = vld [vmem:[%s14897_s19 + $0xc0] ss:$8 sps:$4 sm:$0xff]   ;;  %v12079_v18 = vld [vmem:[%s14897_s19 + $0xd4] ss:$8 sps:$4 sm:$0xff]  }
 0xe76   :  { %3300 = vst [vmem:[#allocation4 + $0x8] sm:$0xff] %v13862_v37  ;;  %3301 = vst [vmem:[#allocation4 + $0x10] sm:$0xff] %v3289_v39  ;;  %v13869_v44 = vcombine.high %v3289_v39, %v3292_v42  ;;  %v13871_v45 = vcombine.low %v3289_v39, %v3292_v42  ;;  %v12077_v22 = vld [vmem:[%s14897_s19 + $0xd0] ss:$8 sps:$4 sm:$0xff]   ;;  %v12082_v25 = vld [vmem:[%s14897_s19 + $0xe4] ss:$8 sps:$4 sm:$0xff]  }
 0xe77   :  { %3302 = vst [vmem:[#allocation4 + $0x18] sm:$0xff] %v3292_v42  ;;  %8529 = vst [vmem:[#allocation4 + $0xc] sm:$0xf] %v13660_v16  ;;  %v12080_v21 = vld [vmem:[%s14897_s19 + $0xe0] ss:$8 sps:$4 sm:$0xff]  }
 0xe78   :  { %8530 = vst [vmem:[#allocation4 + $0x14] sm:$0xf] %v13664_v17  ;;  %8531 = vst [vmem:[#allocation4 + $0x1c] sm:$0xf] %v13668_v30  ;;  %v3400_v16 = vrot.slane %v13869_v44, 1  ;;  %v3397_v33 = vrot.slane %v13871_v45, 1 }
 0xe79   :  { %v12085_v26 = vld [vmem:[%s14897_s19 + $0xf4] ss:$8 sps:$4 sm:$0xff]   ;;  %v12083_v28 = vld [vmem:[%s14897_s19 + $0xf0] ss:$8 sps:$4 sm:$0xff]   ;;  %v12088_v34 = vld [vmem:[%s14897_s19 + $0x204] ss:$8 sps:$4 sm:$0xff]  }
 0xe7a   :  { %v3340_v47 = vld [vmem:[#allocation4] sm:$0xee]  ;;  %v12091_v42 = vld [vmem:[%s14897_s19 + $0x214] ss:$8 sps:$4 sm:$0xff]  }
 0xe7b   :  { %v13876_v48 = vld [vmem:[#allocation4] sm:$0xff]  ;;  %v9694_v51 = vcombine.high %v3340_v47, %v13862_v37  ;;  %v9693_v56 = vcombine.low %v3340_v47, %v13862_v37 }
 0xe7c   :  { %v13878_v50 = vld [vmem:[#allocation4] sm:$0xcc]  ;;  %8493 = vst [vmem:[#allocation4] sm:$0x11] %v12948_v31  ;;  %v3341_v17 = vld [vmem:[#allocation4 + $0x20] sm:$0x11]  ;;  %v9732_v5 = vcombine.high %v13876_v48, %v13862_v37  ;;  %v9731_v39 = vcombine.low %v13876_v48, %v13862_v37 }
 0xe7d   :  { %8528 = vst [vmem:[#allocation4 + $0x4] sm:$0xe] %v13652_v12  ;;  %v13885_v27 = vld [vmem:[#allocation4 + $0x20] sm:$0x33]  ;;  %v3399_v30 = vrot.slane %v9694_v51, 1  ;;  %v3396_v57 = vrot.slane %v9693_v56, 1  ;;  %v9698_v58 = vcombine.high %v3341_v17, %v3341_v17  ;;  %v9697_v62 = vcombine.low %v3341_v17, %v3341_v17 }
 0xe7e   :  { %8494 = vst [vmem:[#allocation4 + $0x20] sm:$0x22] %v12948_v31  ;;  %8532 = vst [vmem:[#allocation4 + $0x24] sm:$0x1] %v13655_v15  ;;  %v12045_v15 = vld [vmem:[%s14897_s19 + $0x24] ss:$8 sps:$4 sm:$0xff]   ;;  %v9798_v47 = vcombine.high %v13878_v50, %v13862_v37 }
 0xe7f   :  { %v3401_v12 = vsel %vm1233_vm7, %v3399_v30, %v3400_v16  ;;  %v3398_v59 = vsel %vm1233_vm7, %v3396_v57, %v3397_v33  ;;  %v3404_v60 = vrot.slane %v9698_v58, 1  ;;  %v3402_v1 = vrot.slane %v9697_v62, 1  ;;  %v12086_v36 = vld [vmem:[%s14897_s19 + $0x200] ss:$8 sps:$4 sm:$0xff]   ;;  %v12089_v51 = vld [vmem:[%s14897_s19 + $0x210] ss:$8 sps:$4 sm:$0xff]  }
 0xe80   :  { %3602 = vmatprep.mubr.bf16.mxu1 %v3401_v12  ;;  %v12094_v56 = vld [vmem:[%s14897_s19 + $0x224] ss:$8 sps:$4 sm:$0xff]   ;;  %v12092_v17 = vld [vmem:[%s14897_s19 + $0x220] ss:$8 sps:$4 sm:$0xff]   ;;  %v3894_v48 = vrot.slane %v13869_v44, 2 }
 0xe81   :  { %3603 = vmatmul.mubr.bf16.vlgmr.msra.gmra.mrb[28].mxu1 %v3398_v59  ;;  %v3405_v63 = vsel %vm1233_vm7, %v3400_v16, %v3404_v60  ;;  %v3403_v4 = vsel %vm1233_vm7, %v3397_v33, %v3402_v1  ;;  %v3893_v16 = vrot.slane %v9798_v47, 2  ;;  %v12097_v30 = vld [vmem:[%s14897_s19 + $0x234] ss:$8 sps:$4 sm:$0xff]   ;;  %v12095_v33 = vld [vmem:[%s14897_s19 + $0x230] ss:$8 sps:$4 sm:$0xff]   ;;  %v4151_v47 = vld [vmem:[%s14894_s1 + $0x20] sm:$0xff] }
 0xe82   :  { %3793 = vmatpush1.bf16.msra.mxu1 %v12036_v35  ;;  %3612 = vmatprep.mubr.bf16.mxu1 %v3405_v63  ;;  %v12100_v58 = vld [vmem:[%s14897_s19 + $0x244] ss:$8 sps:$4 sm:$0xff]   ;;  %v12098_v35 = vld [vmem:[%s14897_s19 + $0x240] ss:$8 sps:$4 sm:$0xff]   ;;  %v12103_v12 = vld [vmem:[%s14897_s19 + $0x254] ss:$8 sps:$4 sm:$0xff]  }
 0xe83   :  { %3794 = vmatprep.subr.bf16.mxu1 %v12042_v61  ;;  %v3895_v57 = vsel %vm1389_vm8, %v3893_v16, %v3894_v48  ;;  %v12101_v59 = vld [vmem:[%s14897_s19 + $0x250] ss:$8 sps:$4 sm:$0xff]   ;;  %v12106_v60 = vld [vmem:[%s14897_s19 + $0x264] ss:$8 sps:$4 sm:$0xff]   ;;  %v12104_v61 = vld [vmem:[%s14897_s19 + $0x260] ss:$8 sps:$4 sm:$0xff]  }
 0xe84   :  { %v12109_v62 = vld [vmem:[%s14897_s19 + $0x274] ss:$8 sps:$4 sm:$0xff]   ;;  %v12107_v63 = vld [vmem:[%s14897_s19 + $0x270] ss:$8 sps:$4 sm:$0xff]  }
 0xe85   :  { %v12115_v1 = vld [vmem:[%s14897_s19 + $0x294] ss:$8 sps:$4 sm:$0xff]  }
 0xe86   :  { %3795 = vmatpush1.bf16.msra.mxu1 %v12040_v0  ;;  %v12112_v0 = vld [vmem:[%s14897_s19 + $0x284] ss:$8 sps:$4 sm:$0xff]   ;;  %v4169_v16 = vld [vmem:[%s14894_s1 + $0xb0] sm:$0xff] }
 0xe87   :  { %3796 = vmatprep.subr.bf16.mxu1 %v12045_v15  ;;  %v12110_v15 = vld [vmem:[%s14897_s19 + $0x280] ss:$8 sps:$4 sm:$0xff]   ;;  %v14762_v32 = vld [vmem:[#allocation4 + $0x14] ss:$8 sps:$4 sm:$0xff]  }
 0xe89   :  { %3613 = vmatmul.mubr.bf16.gmra.mrb[32].mxu1 %v3403_v4  ;;  %v12116_v4 = vld [vmem:[%s14897_s19 + $0x2a0] ss:$8 sps:$4 sm:$0xff]  }
 0xe8a   :  { %3797 = vmatpush1.bf16.msra.mxu1 %v12043_v2  ;;  %3824 = vmatprep.mubr.bf16.mxu1 %v9732_v5  ;;  %v12113_v2 = vld [vmem:[%s14897_s19 + $0x290] ss:$8 sps:$4 sm:$0xff]   ;;  %v12121_v5 = vld [vmem:[%s14897_s19 + $0x2b4] ss:$8 sps:$4 sm:$0xff]  }
 0xe8b   :  { %3798 = vmatprep.subr.bf16.mxu1 %v12049_v3  ;;  %v12118_v3 = vld [vmem:[%s14897_s19 + $0x2a4] ss:$8 sps:$4 sm:$0xff]  }
 0xe8e   :  { %3799 = vmatpush1.bf16.msra.mxu1 %v12047_v23  ;;  %v12119_v23 = vld [vmem:[%s14897_s19 + $0x2b0] ss:$8 sps:$4 sm:$0xff]  }
 0xe8f   :  { %3800 = vmatprep.subr.bf16.mxu1 %v12052_v6  ;;  %v12124_v6 = vld [vmem:[%s14897_s19 + $0x2c4] ss:$8 sps:$4 sm:$0xff]  }
 0xe92   :  { %3801 = vmatpush1.bf16.msra.mxu1 %v12050_v8  ;;  %v12122_v8 = vld [vmem:[%s14897_s19 + $0x2c0] ss:$8 sps:$4 sm:$0xff]  }
 0xe93   :  { %3802 = vmatprep.subr.bf16.mxu1 %v12055_v9  ;;  %v12127_v9 = vld [vmem:[%s14897_s19 + $0x2d4] ss:$8 sps:$4 sm:$0xff]  }
 0xe96   :  { %3803 = vmatpush1.bf16.msra.mxu1 %v12053_v19  ;;  %v12125_v19 = vld [vmem:[%s14897_s19 + $0x2d0] ss:$8 sps:$4 sm:$0xff]  }
 0xe97   :  { %3804 = vmatprep.subr.bf16.mxu1 %v12058_v10  ;;  %v12130_v10 = vld [vmem:[%s14897_s19 + $0x2e4] ss:$8 sps:$4 sm:$0xff]  }
 0xe9a   :  { %3805 = vmatpush1.bf16.msra.mxu1 %v12056_v14  ;;  %v12128_v14 = vld [vmem:[%s14897_s19 + $0x2e0] ss:$8 sps:$4 sm:$0xff]  }
 0xe9b   :  { %3806 = vmatprep.subr.bf16.mxu1 %v12061_v11  ;;  %v12133_v11 = vld [vmem:[%s14897_s19 + $0x2f4] ss:$8 sps:$4 sm:$0xff]  }
 0xe9e   :  { %3807 = vmatpush1.bf16.msra.mxu1 %v12059_v29  ;;  %v9797_v29 = vcombine.low %v13878_v50, %v13862_v37  ;;  %v9799_v37 = vcombine.low %v13885_v27, %v13885_v27 }
 0xe9f   :  { %3808 = vmatprep.subr.bf16.mxu1 %v12064_v49  ;;  %v9800_v49 = vcombine.high %v13885_v27, %v13885_v27  ;;  %v4148_v27 = vld [vmem:[%s14894_s1 + $0x8] sm:$0xff] }
 0xea2   :  { %3809 = vmatpush1.bf16.msra.mxu1 %v12062_v46  ;;  %v12131_v46 = vld [vmem:[%s14897_s19 + $0x2f0] ss:$8 sps:$4 sm:$0xff]  }
 0xea3   :  { %3810 = vmatprep.subr.bf16.mxu1 %v12067_v53  ;;  %v3890_v53 = vrot.slane %v9797_v29, 2 }
 0xea6   :  { %3811 = vmatpush1.bf16.msra.mxu1 %v12065_v20  ;;  %v3898_v20 = vrot.slane %v9800_v49, 2  ;;  %v4125_v49 = vld [vmem:[%s14900_s10] sm:$0x3] }
 0xea7   :  { %3812 = vmatprep.subr.bf16.mxu1 %v12070_v13  ;;  %v3891_v13 = vrot.slane %v13871_v45, 2 }
 0xea8   :  { %v3899_v50 = vsel %vm1389_vm8, %v3894_v48, %v3898_v20 }
 0xeaa   :  { %3813 = vmatpush1.bf16.msra.mxu1 %v12068_v24  ;;  %v3892_v24 = vsel %vm1389_vm8, %v3890_v53, %v3891_v13  ;;  %v4130_v53 = vrot.slane %v4125_v49, %v13406_v40 }
 0xeab   :  { %3814 = vmatprep.subr.bf16.mxu1 %v12073_v52  ;;  %v3896_v52 = vrot.slane %v9799_v37, 2 }
 0xeae   :  { %3815 = vmatpush1.bf16.msra.mxu1 %v12071_v38  ;;  %v3897_v38 = vsel %vm1389_vm8, %v3891_v13, %v3896_v52  ;;  %v4134_v13 = vrot.slane %v4125_v49, %v13410_v43 }
 0xeaf   :  { %3816 = vmatprep.subr.bf16.mxu1 %v12076_v55  ;;  %v4164_v55 = vld [vmem:[%s14894_s1 + $0x88] sm:$0xff] }
 0xeb2   :  { %3817 = vmatpush1.bf16.msra.mxu1 %v12074_v54 }
 0xeb3   :  { %3818 = vmatprep.subr.bf16.mxu1 %v12079_v18  ;;  %v4147_v18 = vld [vmem:[%s14894_s1] sm:$0xff] }
 0xeb6   :  { %3819 = vmatpush1.bf16.msra.mxu1 %v12077_v22  ;;  %v11542_v22 = vpack.c.bf16 %v4148_v27, %v4147_v18 }
 0xeb7   :  { %3820 = vmatprep.subr.bf16.mxu1 %v12082_v25  ;;  %v4166_v25 = vld [vmem:[%s14894_s1 + $0x98] sm:$0xff] }
 0xeba   :  { %3821 = vmatpush1.bf16.msra.mxu1 %v12080_v21 }
 0xebb   :  { %3822 = vmatprep.subr.bf16.mxu1 %v12085_v26  ;;  %v4149_v26 = vld [vmem:[%s14894_s1 + $0x10] sm:$0xff] }
 0xebe   :  { %3823 = vmatpush1.bf16.msra.mxu1 %v12083_v28  ;;  %v4150_v28 = vld [vmem:[%s14894_s1 + $0x18] sm:$0xff] }
 0xebf   :  { %4064 = vmatprep.subr.bf16.mxu1 %v12088_v34  ;;  %v11546_v34 = vpack.c.bf16 %v4150_v28, %v4149_v26 }
 0xec1   :  { %3825 = vmatmul.mubr.bf16.vlgmr.msra.gmra.mrb[28].mxu1 %v9731_v39  ;;  %v4168_v39 = vld [vmem:[%s14894_s1 + $0xa8] sm:$0xff] }
 0xec2   :  { %3834 = vmatprep.mubr.bf16.mxu1 %v13869_v44  ;;  %4065 = vmatpush1.bf16.msra.mxu1 %v12086_v36  ;;  %v4165_v44 = vld [vmem:[%s14894_s1 + $0x90] sm:$0xff]  ;;  %v4167_v36 = vld [vmem:[%s14894_s1 + $0xa0] sm:$0xff] }
 0xec3   :  { %4066 = vmatprep.subr.bf16.mxu1 %v12091_v42  ;;  %v11544_v21 = vpack.c.bf16 %v4166_v25, %v4165_v44  ;;  %v11548_v42 = vpack.c.bf16 %v4168_v39, %v4167_v36 }
 0xec6   :  { %4067 = vmatpush1.bf16.msra.mxu1 %v12089_v51  ;;  %v4152_v51 = vld [vmem:[%s14894_s1 + $0x28] sm:$0xff] }
 0xec7   :  { %4068 = vmatprep.subr.bf16.mxu1 %v12094_v56  ;;  %v11550_v56 = vpack.c.bf16 %v4152_v51, %v4151_v47 }
 0xec9   :  { %3835 = vmatmul.mubr.bf16.gmra.mrb[32].mxu1 %v13871_v45  ;;  %v4163_v45 = vld [vmem:[%s14894_s1 + $0x80] sm:$0xff] }
 0xeca   :  { %4069 = vmatpush1.bf16.msra.mxu1 %v12092_v17  ;;  %4096 = vmatprep.mubr.bf16.mxu1 %v3895_v57  ;;  %v11540_v54 = vpack.c.bf16 %v4164_v55, %v4163_v45  ;;  %v4170_v17 = vld [vmem:[%s14894_s1 + $0xb8] sm:$0xff] }
 0xecb   :  { %4070 = vmatprep.subr.bf16.mxu1 %v12097_v30  ;;  %v11552_v48 = vpack.c.bf16 %v4170_v17, %v4169_v16  ;;  %v4153_v30 = vld [vmem:[%s14894_s1 + $0x30] sm:$0xff]  ;;  %v4154_v57 = vld [vmem:[%s14894_s1 + $0x38] sm:$0xff] }
 0xecc   :  { %11541 = vmatprep.subr.bf16.mxu0 %v11540_v54 }
 0xecd   :  { %11543 = vmatpush3.bf16.msra.mxu0 %v11542_v22 }
 0xece   :  { %4071 = vmatpush1.bf16.msra.mxu1 %v12095_v33  ;;  %11545 = vmatprep.subr.bf16.mxu0 %v11544_v21  ;;  %v11554_v33 = vpack.c.bf16 %v4154_v57, %v4153_v30 }
 0xecf   :  { %4072 = vmatprep.subr.bf16.mxu1 %v12100_v58  ;;  %v4171_v58 = vld [vmem:[%s14894_s1 + $0xc0] sm:$0xff] }
 0xed1   :  { %11547 = vmatpush3.bf16.msra.mxu0 %v11546_v34 }
 0xed2   :  { %4073 = vmatpush1.bf16.msra.mxu1 %v12098_v35  ;;  %11549 = vmatprep.subr.bf16.mxu0 %v11548_v42  ;;  %v4172_v35 = vld [vmem:[%s14894_s1 + $0xc8] sm:$0xff] }
 0xed3   :  { %4074 = vmatprep.subr.bf16.mxu1 %v12103_v12  ;;  %v11556_v12 = vpack.c.bf16 %v4172_v35, %v4171_v58 }
 0xed5   :  { %11551 = vmatpush3.bf16.msra.mxu0 %v11550_v56 }
 0xed6   :  { %4075 = vmatpush1.bf16.msra.mxu1 %v12101_v59  ;;  %11553 = vmatprep.subr.bf16.mxu0 %v11552_v48  ;;  %v4155_v59 = vld [vmem:[%s14894_s1 + $0x40] sm:$0xff] }
 0xed7   :  { %4076 = vmatprep.subr.bf16.mxu1 %v12106_v60  ;;  %v4156_v60 = vld [vmem:[%s14894_s1 + $0x48] sm:$0xff] }
 0xed9   :  { %11555 = vmatpush3.bf16.msra.mxu0 %v11554_v33 }
 0xeda   :  { %4077 = vmatpush1.bf16.msra.mxu1 %v12104_v61  ;;  %v11558_v61 = vpack.c.bf16 %v4156_v60, %v4155_v59  ;;  %11557 = vmatprep.subr.bf16.mxu0 %v11556_v12 }
 0xedb   :  { %4078 = vmatprep.subr.bf16.mxu1 %v12109_v62  ;;  %v4173_v62 = vld [vmem:[%s14894_s1 + $0xd0] sm:$0xff] }
 0xedd   :  { %11559 = vmatpush3.bf16.msra.mxu0 %v11558_v61 }
 0xede   :  { %4079 = vmatpush1.bf16.msra.mxu1 %v12107_v63  ;;  %v4174_v63 = vld [vmem:[%s14894_s1 + $0xd8] sm:$0xff] }
 0xedf   :  { %4080 = vmatprep.subr.bf16.mxu1 %v12112_v0  ;;  %v11560_v0 = vpack.c.bf16 %v4174_v63, %v4173_v62 }
 0xee1   :  { %11561 = vmatprep.subr.bf16.mxu0 %v11560_v0 }
 0xee2   :  { %4081 = vmatpush1.bf16.msra.mxu1 %v12110_v15  ;;  %v4157_v15 = vld [vmem:[%s14894_s1 + $0x50] sm:$0xff] }
 0xee3   :  { %4082 = vmatprep.subr.bf16.mxu1 %v12115_v1  ;;  %v4158_v1 = vld [vmem:[%s14894_s1 + $0x58] sm:$0xff] }
 0xee6   :  { %4083 = vmatpush1.bf16.msra.mxu1 %v12113_v2  ;;  %v11562_v2 = vpack.c.bf16 %v4158_v1, %v4157_v15 }
 0xee7   :  { %4084 = vmatprep.subr.bf16.mxu1 %v12118_v3  ;;  %v4175_v3 = vld [vmem:[%s14894_s1 + $0xe0] sm:$0xff] }
 0xee8   :  { %11563 = vmatpush3.bf16.msra.mxu0 %v11562_v2 }
 0xeea   :  { %4085 = vmatpush1.bf16.msra.mxu1 %v12116_v4  ;;  %v4176_v4 = vld [vmem:[%s14894_s1 + $0xe8] sm:$0xff] }
 0xeeb   :  { %4086 = vmatprep.subr.bf16.mxu1 %v12121_v5  ;;  %v11564_v5 = vpack.c.bf16 %v4176_v4, %v4175_v3 }
 0xeed   :  { %11565 = vmatprep.subr.bf16.mxu0 %v11564_v5 }
 0xeee   :  { %4087 = vmatpush1.bf16.msra.mxu1 %v12119_v23  ;;  %v4159_v23 = vld [vmem:[%s14894_s1 + $0x60] sm:$0xff] }
 0xeef   :  { %4088 = vmatprep.subr.bf16.mxu1 %v12124_v6  ;;  %v4160_v6 = vld [vmem:[%s14894_s1 + $0x68] sm:$0xff] }
 0xef2   :  { %4089 = vmatpush1.bf16.msra.mxu1 %v12122_v8  ;;  %v4177_v8 = vld [vmem:[%s14894_s1 + $0xf0] sm:$0xff] }
 0xef3   :  { %4090 = vmatprep.subr.bf16.mxu1 %v12127_v9  ;;  %v11566_v9 = vpack.c.bf16 %v4160_v6, %v4159_v23 }
 0xef5   :  { %11567 = vmatpush3.bf16.msra.mxu0 %v11566_v9 }
 0xef6   :  { %4091 = vmatpush1.bf16.msra.mxu1 %v12125_v19  ;;  %v4178_v19 = vld [vmem:[%s14894_s1 + $0xf8] sm:$0xff] }
 0xef7   :  { %4092 = vmatprep.subr.bf16.mxu1 %v12130_v10  ;;  %v4161_v10 = vld [vmem:[%s14894_s1 + $0x70] sm:$0xff] }
 0xefa   :  { %4093 = vmatpush1.bf16.msra.mxu1 %v12128_v14  ;;  %v4162_v14 = vld [vmem:[%s14894_s1 + $0x78] sm:$0xff]  ;;  %s14923_s1 = sld [smem:[#allocation72_spill]] }
 0xefb   :  { %4094 = vmatprep.subr.bf16.mxu1 %v12133_v11  ;;  %v11568_v11 = vpack.c.bf16 %v4178_v19, %v4177_v8  ;;  %v11570_v29 = vpack.c.bf16 %v4162_v14, %v4161_v10 }
 0xefd   :  { %11569 = vmatprep.subr.bf16.mxu0 %v11568_v11 }
 0xefe   :  { %4095 = vmatpush1.bf16.msra.mxu1 %v12131_v46  ;;  %11571 = vmatpush3.bf16.msra.mxu0 %v11570_v29 }
 0xf01   :  { %4097 = vmatmul.mubr.bf16.vlgmr.msra.gmra.mrb[28].mxu1 %v3892_v24 }
 0xf02   :  { %4106 = vmatprep.mubr.bf16.mxu1 %v3899_v50 }
 0xf09   :  { %4107 = vmatmul.mubr.bf16.gmra.mrb[32].mxu1 %v3897_v38 }
 0xfd4   :  { %v4098_v46 = vpop.f32.mrb[28].mxu1 }
 0xfd5   :  { %v4100_v20 = vpop.f32.mrb[29].mxu1  ;;  %v14020_v38 = vadd.f32 %v4130_v53, %v4098_v46 }
 0xfd6   :  { %v4102_v24 = vpop.f32.mrb[30].mxu1  ;;  %v14022_v45 = vadd.f32 %v4134_v13, %v4100_v20 }
 0xfd7   :  { %v14016_v37 = vadd.f32 %v4130_v53, %v4102_v24  ;;  %v4104_v50 = vpop.f32.mrb[31].mxu1  ;;  %v4201_v27 = vmul.f32 %v14020_v38, %v14020_v38 }
 0xfd8   :  { %v14018_v52 = vadd.f32 %v4134_v13, %v4104_v50  ;;  %v4202_v21 = vmul.f32 %v14022_v45, %v14022_v45 }
 0xfd9   :  { %v4203_v55 = vmul.f32 %v14016_v37, %v14016_v37  ;;  %v4183_v22 = vadd.f32 %v14016_v37, %v14020_v38 }
 0xfda   :  { %v4204_v54 = vmul.f32 %v14018_v52, %v14018_v52  ;;  %v4192_v26 = vadd.f32 %v14018_v52, %v14022_v45 }
 0xfdb   :  { %v4209_v36 = vadd.f32 %v4203_v55, %v4201_v27  ;;  %v4180_v55 = vld [vmem:[%s14896_s7 + $0x8] sm:$0xff]  ;;  %v4179_v27 = vld [vmem:[%s14896_s7] sm:$0xff] }
 0xfdc   :  { %v4108_v18 = vpop.f32.mrb[32].mxu1  ;;  %v4218_v56 = vadd.f32 %v4204_v54, %v4202_v21  ;;  %v4182_v54 = vld [vmem:[%s14896_s7 + $0x18] sm:$0xff]  ;;  %v12135_v21 = vld [vmem:[%s14901_s8 + $0x40] sm:$0xff]  }
 0xfdd   :  { %v14032_v44 = vadd.f32 %v4130_v53, %v4108_v18  ;;  %v4110_v25 = vpop.f32.mrb[33].mxu1  ;;  %v11572_v18 = vpack.c.bf16 %v4182_v54, %v4180_v55 }
 0xfde   :  { %v14038_v28 = vadd.f32 %v4134_v13, %v4110_v25  ;;  %v4112_v34 = vpop.f32.mrb[34].mxu1 }
 0xfdf   :  { %v4184_v39 = vadd.f32 %v4183_v22, %v14032_v44  ;;  %v4205_v42 = vmul.f32 %v14032_v44, %v14032_v44  ;;  %v14043_v47 = vadd.f32 %v4130_v53, %v4112_v34  ;;  %v4114_v51 = vpop.f32.mrb[35].mxu1  ;;  %v4181_v22 = vld [vmem:[%s14896_s7 + $0x10] sm:$0xff]  ;;  %11573 = vmatprep.subr.bf16.mxu0 %v11572_v18 }
 0xfe0   :  { %v4193_v16 = vadd.f32 %v4192_v26, %v14038_v28  ;;  %v4206_v17 = vmul.f32 %v14038_v28, %v14038_v28  ;;  %v14048_v48 = vadd.f32 %v4134_v13, %v4114_v51  ;;  %v11574_v25 = vpack.c.bf16 %v4181_v22, %v4179_v27 }
 0xfe1   :  { %v4210_v30 = vadd.f32 %v4209_v36, %v4205_v42  ;;  %v4185_v57 = vadd.f32 %v4184_v39, %v14043_v47  ;;  %v4207_v33 = vmul.f32 %v14043_v47, %v14043_v47 }
 0xfe2   :  { %v4219_v58 = vadd.f32 %v4218_v56, %v4206_v17  ;;  %v4194_v35 = vadd.f32 %v4193_v16, %v14048_v48  ;;  %v4208_v12 = vmul.f32 %v14048_v48, %v14048_v48 }
 0xfe3   :  { %v4186_v59 = vrot.slane %v4185_v57, 4  ;;  %v4211_v60 = vadd.f32 %v4210_v30, %v4207_v33  ;;  %v4145_v33 = vld [vmem:[%s14902_s11] sm:$0x1] }
 0xfe4   :  { %v4195_v61 = vrot.slane %v4194_v35, 4  ;;  %v4220_v62 = vadd.f32 %v4219_v58, %v4208_v12  ;;  %v4146_v12 = vld [vmem:[#allocation7] sm:$0x1] }
 0xfe5   :  { %v4187_v63 = vadd.f32 %v4186_v59, %v4185_v57  ;;  %v4212_v0 = vrot.slane %v4211_v60, 4 }
 0xfe6   :  { %v4196_v15 = vadd.f32 %v4195_v61, %v4194_v35  ;;  %v4221_v1 = vrot.slane %v4220_v62, 4 }
 0xfe7   :  { %v4188_v2 = vrot.slane %v4187_v63, 2  ;;  %v4213_v3 = vadd.f32 %v4212_v0, %v4211_v60 }
 0xfe8   :  { %v4197_v4 = vrot.slane %v4196_v15, 2  ;;  %v4222_v5 = vadd.f32 %v4221_v1, %v4220_v62  ;;  %v12136_v62 = vld [vmem:[%s14901_s8] sm:$0xff]   ;;  %v12139_v1 = vld [vmem:[%s14901_s8 + $0x50] sm:$0xff]  }
 0xfe9   :  { %v4189_v23 = vadd.f32 %v4188_v2, %v4187_v63  ;;  %v4214_v6 = vrot.slane %v4213_v3, 2  ;;  %v12137_v63 = vld [vmem:[%s14901_s8 + $0x48] sm:$0xff]   ;;  %v12140_v2 = vld [vmem:[%s14901_s8 + $0x10] sm:$0xff]  }
 0xfea   :  { %v4198_v8 = vadd.f32 %v4197_v4, %v4196_v15  ;;  %v4223_v9 = vrot.slane %v4222_v5, 2  ;;  %v12138_v15 = vld [vmem:[%s14901_s8 + $0x8] sm:$0xff]   ;;  %v12142_v4 = vld [vmem:[%s14901_s8 + $0x18] sm:$0xff]  }
 0xfeb   :  { %v4215_v19 = vadd.f32 %v4214_v6, %v4213_v3  ;;  %v4190_v11 = vrot.slane %v4189_v23, 1  ;;  %v12141_v3 = vld [vmem:[%s14901_s8 + $0x58] sm:$0xff]   ;;  %v12145_v6 = vld [vmem:[%s14901_s8 + $0x68] sm:$0xff]  }
 0xfec   :  { %v4199_v10 = vrot.slane %v4198_v8, 1  ;;  %v4224_v14 = vadd.f32 %v4223_v9, %v4222_v5  ;;  %v12143_v5 = vld [vmem:[%s14901_s8 + $0x60] sm:$0xff]   ;;  %v12147_v9 = vld [vmem:[%s14901_s8 + $0x70] sm:$0xff]  }
 0xfed   :  { %v4216_v29 = vrot.slane %v4215_v19, 1  ;;  %v4191_v13 = vadd.f32 %v4190_v11, %v4189_v23  ;;  %v12144_v23 = vld [vmem:[%s14901_s8 + $0x20] sm:$0xff]  }
 0xfee   :  { %v4225_v49 = vrot.slane %v4224_v14, 1  ;;  %v4200_v53 = vadd.f32 %v4199_v10, %v4198_v8  ;;  %v12146_v8 = vld [vmem:[%s14901_s8 + $0x28] sm:$0xff]   ;;  %v12149_v10 = vld [vmem:[%s14901_s8 + $0x78] sm:$0xff]   ;;  %v12151_v11 = vld [vmem:[%s14903_s29 + $0x40] sm:$0xff]  }
 0xfef   :  { %v4217_v46 = vadd.f32 %v4216_v29, %v4215_v19  ;;  %v12148_v19 = vld [vmem:[%s14901_s8 + $0x30] sm:$0xff]  }
 0xff0   :  { %v4226_v20 = vadd.f32 %v4225_v49, %v4224_v14  ;;  %v12150_v14 = vld [vmem:[%s14901_s8 + $0x38] sm:$0xff]  }
 0xff1   :  { %v4227_v50 = vsel %vm1518_vm9, %v4191_v13, %v4217_v46 }
 0xff2   :  { %v4228_v24 = vsel %vm1518_vm9, %v4200_v53, %v4226_v20 }
 0xff3   :  { %4293 = vmatprep.mubr.f32.mxu0 %v4228_v24 }
 0xff4   :  { %4294 = vmatmul.mubr.f32.vlgmr.msra.gmra.mrb[18].mxu0 %v4227_v50 }
 0xff5   :  { %4401 = vmatprep.mubr.f32.mxu0 %v12946_v41  ;;  %11575 = vmatpush1.bf16.msra.mxu0 %v11574_v25 }
 0xff6   :  { %10734 = vmatprep.subr.bf16.mxu0 %v12135_v21 }
0x10c7   :  { %v10731_v26 = vpop.f32.mrb[18].mxu0 }
0x10c8   :  { %v10732_v34 = vpop.f32.mrb[19].mxu0 }
0x10c9   :  { %v10733_v36 = vadd.f32 %v10732_v34, %v10731_v26 }
0x10cb   :  { %v4299_v39 = vmul.f32 0.001953125, %v10733_v36 }
0x10cd   :  { %v4300_v42 = vmul.f32 %v4299_v39, %v4299_v39 }
0x10cf   :  { %v4302_v51 = vrot.slane %v4300_v42, 7 }
0x10d1   :  { %v4304_v56 = vsub.f32 %v4299_v39, %v4302_v51 }
0x10d3   :  { %v4305_v16 = vadd.f32 1e-05, %v4304_v56  ;;  %v12152_v56 = vld [vmem:[%s14903_s29] sm:$0xff]  }
0x10d5   :  { %12596 = vrsqrt.f32 %v4305_v16 }
0x10df   :  { %v12597_v17 = vpop.eup %12596 }
0x10e0   :  { %v4314_v30 = vrot.slane %v12597_v17, %v13534_v7  ;;  %v12153_v17 = vld [vmem:[%s14903_s29 + $0x48] sm:$0xff]  }
0x10e2   :  { %v4315_v57 = vcombine.high %v4314_v30, %v4314_v30 }
0x10e4   :  { %v4322_v58 = vrot.slane %v4315_v57, %v13534_v7 }
0x10e6   :  { %v4324_v35 = vmul.f32 %v4322_v58, %v4145_v33 }
0x10e8   :  { %v4325_v59 = vmul.f32 %v4324_v35, %v4299_v39 }
0x10ea   :  { %v4326_v60 = vsub.f32 %v4146_v12, %v4325_v59  ;;  %v12156_v12 = vld [vmem:[%s14903_s29 + $0x10] sm:$0xff]  }
0x10ec   :  { %v4331_v61 = vrot.slane %v4326_v60, %v13406_v40  ;;  %v12157_v60 = vld [vmem:[%s14903_s29 + $0x58] sm:$0xff]  }
0x10ee   :  { %v4333_v0 = vsel %vm1518_vm9, %v4324_v35, %v4331_v61  ;;  %v12158_v61 = vld [vmem:[%s14903_s29 + $0x18] sm:$0xff]  }
0x10ef   :  { %9833 = vmatmul.mubr.msk.f32.vlgmr.msra.gmra.mrb[28].mxu0 %vm3146_vm13, %v4333_v0  ;;  %v12161_v0 = vld [vmem:[%s14903_s29 + $0x68] sm:$0xff]  }
0x10f0   :  { %10735 = vmatpush3.bf16.msra.mxu0 %v12136_v62  ;;  %v12159_v62 = vld [vmem:[%s14903_s29 + $0x60] sm:$0xff]  }
0x10f1   :  { %10736 = vmatprep.subr.bf16.mxu0 %v12137_v63  ;;  %v12160_v63 = vld [vmem:[%s14903_s29 + $0x20] sm:$0xff]  }
0x10f4   :  { %10737 = vmatpush3.bf16.msra.mxu0 %v12138_v15  ;;  %v12162_v15 = vld [vmem:[%s14903_s29 + $0x28] sm:$0xff]  }
0x10f5   :  { %10738 = vmatprep.subr.bf16.mxu0 %v12139_v1  ;;  %v12163_v1 = vld [vmem:[%s14903_s29 + $0x70] sm:$0xff]  }
0x10f8   :  { %10739 = vmatpush3.bf16.msra.mxu0 %v12140_v2  ;;  %v12164_v2 = vld [vmem:[%s14903_s29 + $0x30] sm:$0xff]  }
0x10f9   :  { %10740 = vmatprep.subr.bf16.mxu0 %v12141_v3  ;;  %v12165_v3 = vld [vmem:[%s14903_s29 + $0x78] sm:$0xff]  }
0x10fc   :  { %10741 = vmatpush3.bf16.msra.mxu0 %v12142_v4  ;;  %v12166_v4 = vld [vmem:[%s14903_s29 + $0x38] sm:$0xff]  }
0x10fd   :  { %10742 = vmatprep.subr.bf16.mxu0 %v12143_v5 }
0x1100   :  { %10743 = vmatpush3.bf16.msra.mxu0 %v12144_v23 }
0x1101   :  { %10744 = vmatprep.subr.bf16.mxu0 %v12145_v6 }
0x1104   :  { %10745 = vmatpush3.bf16.msra.mxu0 %v12146_v8 }
0x1105   :  { %10746 = vmatprep.subr.bf16.mxu0 %v12147_v9 }
0x1108   :  { %10747 = vmatpush3.bf16.msra.mxu0 %v12148_v19 }
0x1109   :  { %10748 = vmatprep.subr.bf16.mxu0 %v12149_v10 }
0x110c   :  { %10749 = vmatpush3.bf16.msra.mxu0 %v12150_v14 }
0x110d   :  { %10762 = vmatprep.subr.bf16.mxu0 %v12151_v11 }
0x11c2   :  { %v4403_v29 = vpop.f32.mrb[28].mxu0 }
0x11c3   :  { %v4411_v49 = vrot.slane %v4403_v29, %v13406_v40  ;;  %v4405_v46 = vpop.f32.mrb[29].mxu0  ;;  %v4427_v24 = vrot.slane %v4403_v29, %v13410_v43 }
0x11c4   :  { %v4415_v53 = vrot.slane %v4405_v46, %v13406_v40  ;;  %v4431_v50 = vrot.slane %v4405_v46, %v13410_v43 }
0x11c5   :  { %v4416_v20 = vmul.f32 %v4411_v49, %v14020_v38  ;;  %v4418_v13 = vmul.f32 %v4411_v49, %v14016_v37  ;;  %v4420_v39 = vmul.f32 %v4411_v49, %v14032_v44  ;;  %v12154_v44 = vld [vmem:[%s14903_s29 + $0x8] sm:$0xff]  }
0x11c6   :  { %v4417_v55 = vmul.f32 %v4415_v53, %v14022_v45  ;;  %v4419_v54 = vmul.f32 %v4415_v53, %v14018_v52  ;;  %v4421_v18 = vmul.f32 %v4415_v53, %v14038_v28  ;;  %v4423_v27 = vmul.f32 %v4415_v53, %v14048_v48 }
0x11c7   :  { %v4432_v22 = vadd.f32 %v4427_v24, %v4416_v20  ;;  %v4434_v25 = vadd.f32 %v4427_v24, %v4418_v13  ;;  %v4422_v45 = vmul.f32 %v4411_v49, %v14043_v47  ;;  %v4436_v30 = vadd.f32 %v4427_v24, %v4420_v39  ;;  %v12155_v47 = vld [vmem:[%s14903_s29 + $0x50] sm:$0xff]  }
0x11c8   :  { %v4433_v21 = vadd.f32 %v4431_v50, %v4417_v55  ;;  %v4435_v38 = vadd.f32 %v4431_v50, %v4419_v54  ;;  %v4437_v26 = vadd.f32 %v4431_v50, %v4421_v18  ;;  %v4439_v37 = vadd.f32 %v4431_v50, %v4423_v27 }
0x11c9   :  { %v4440_v34 = vmax.f32 %v4432_v22, 0.0  ;;  %v4442_v36 = vmax.f32 %v4434_v25, 0.0  ;;  %v4438_v57 = vadd.f32 %v4427_v24, %v4422_v45  ;;  %v4444_v58 = vmax.f32 %v4436_v30, 0.0  ;;  %v12167_v45 = vld [vmem:[%s14904_s15] sm:$0xff]   ;;  %v12178_v30 = vld [vmem:[%s14905_s5 + $0xb0] ss:$8 sps:$4 sm:$0xff]  }
0x11ca   :  { %v4441_v52 = vmax.f32 %v4433_v21, 0.0  ;;  %v4443_v42 = vmax.f32 %v4435_v38, 0.0  ;;  %v4445_v28 = vmax.f32 %v4437_v26, 0.0  ;;  %v4447_v48 = vmax.f32 %v4439_v37, 0.0 }
0x11cb   :  { %v4448_v16 = vpack.c.bf16 %v4442_v36, %v4440_v34  ;;  %v4446_v35 = vmax.f32 %v4438_v57, 0.0  ;;  %v12183_v57 = vld [vmem:[%s14905_s5 + $0xc4] ss:$8 sps:$4 sm:$0xff]  }
0x11cc   :  { %v4449_v51 = vpack.c.bf16 %v4443_v42, %v4441_v52  ;;  %v4451_v33 = vpack.c.bf16 %v4447_v48, %v4445_v28  ;;  %v12171_v52 = vld [vmem:[%s14905_s5 + $0x84] ss:$8 sps:$4 sm:$0xff]   ;;  %v12169_v28 = vld [vmem:[%s14905_s5 + $0x80] ss:$8 sps:$4 sm:$0xff]   ;;  %v12174_v48 = vld [vmem:[%s14905_s5 + $0x94] ss:$8 sps:$4 sm:$0xff]  }
0x11cd   :  { %v4450_v59 = vpack.c.bf16 %v4446_v35, %v4444_v58  ;;  %v12168_v42 = vld [vmem:[%s14906_s9] sm:$0xff]  }
0x11ce   :  { %4612 = vmatprep.mubr.bf16.mxu0 %v4449_v51  ;;  %v12187_v58 = vld [vmem:[%s14905_s5 + $0xe0] ss:$8 sps:$4 sm:$0xff]   ;;  %v12189_v35 = vld [vmem:[%s14905_s5 + $0xe4] ss:$8 sps:$4 sm:$0xff]  }
0x11cf   :  { %4613 = vmatmul.mubr.bf16.vlgmr.msra.gmra.mrb[32].mxu0 %v4448_v16 }
0x11d0   :  { %10763 = vmatpush3.bf16.msra.mxu0 %v12152_v56  ;;  %4620 = vmatprep.mubr.bf16.mxu0 %v4451_v33  ;;  %v12175_v56 = vld [vmem:[%s14905_s5 + $0xa0] ss:$8 sps:$4 sm:$0xff]  }
0x11d1   :  { %10764 = vmatprep.subr.bf16.mxu0 %v12153_v17  ;;  %v12180_v17 = vld [vmem:[%s14905_s5 + $0xb4] ss:$8 sps:$4 sm:$0xff]  }
0x11d4   :  { %10765 = vmatpush3.bf16.msra.mxu0 %v12154_v44  ;;  %v12186_v44 = vld [vmem:[%s14905_s5 + $0xd4] ss:$8 sps:$4 sm:$0xff]  }
0x11d5   :  { %10766 = vmatprep.subr.bf16.mxu0 %v12155_v47  ;;  %v12184_v47 = vld [vmem:[%s14905_s5 + $0xd0] ss:$8 sps:$4 sm:$0xff]  }
0x11d7   :  { %4621 = vmatmul.mubr.bf16.gmra.mrb[36].mxu0 %v4450_v59 }
0x11d8   :  { %10767 = vmatpush3.bf16.msra.mxu0 %v12156_v12  ;;  %4789 = vmatprep.mubr.bf16.mxu0 %v4449_v51  ;;  %v12172_v51 = vld [vmem:[%s14905_s5 + $0x90] ss:$8 sps:$4 sm:$0xff]   ;;  %v12192_v12 = vld [vmem:[%s14905_s5 + $0xf4] ss:$8 sps:$4 sm:$0xff]  }
0x11d9   :  { %10768 = vmatprep.subr.bf16.mxu0 %v12157_v60  ;;  %v12195_v60 = vld [vmem:[%s14905_s5 + $0x4] ss:$8 sps:$4 sm:$0xff]  }
0x11dc   :  { %10769 = vmatpush3.bf16.msra.mxu0 %v12158_v61  ;;  %v5424_v61 = vld [vmem:[%s14907_s13 + $0x80] sm:$0xff] }
0x11dd   :  { %10770 = vmatprep.subr.bf16.mxu0 %v12159_v62  ;;  %v5425_v62 = vld [vmem:[%s14907_s13 + $0x88] sm:$0xff] }
0x11e0   :  { %10771 = vmatpush3.bf16.msra.mxu0 %v12160_v63  ;;  %v5408_v63 = vld [vmem:[%s14907_s13] sm:$0xff] }
0x11e1   :  { %10772 = vmatprep.subr.bf16.mxu0 %v12161_v0  ;;  %v14146_v0 = vpack.c.bf16 %v5425_v62, %v5424_v61  ;;  %v12226_v61 = vld [vmem:[%s14905_s5 + $0x120] ss:$8 sps:$4 sm:$0xff]   ;;  %v12231_v62 = vld [vmem:[%s14905_s5 + $0x134] ss:$8 sps:$4 sm:$0xff]  }
0x11e3   :  { %11577 = vmatprep.subr.bf16.mxu1 %v14146_v0 }
0x11e4   :  { %10773 = vmatpush3.bf16.msra.mxu0 %v12162_v15  ;;  %v5409_v15 = vld [vmem:[%s14907_s13 + $0x8] sm:$0xff] }
0x11e5   :  { %10774 = vmatprep.subr.bf16.mxu0 %v12163_v1  ;;  %v5426_v1 = vld [vmem:[%s14907_s13 + $0x90] sm:$0xff] }
0x11e8   :  { %10775 = vmatpush3.bf16.msra.mxu0 %v12164_v2  ;;  %v5427_v2 = vld [vmem:[%s14907_s13 + $0x98] sm:$0xff] }
0x11e9   :  { %10776 = vmatprep.subr.bf16.mxu0 %v12165_v3  ;;  %v14151_v3 = vpack.c.bf16 %v5409_v15, %v5408_v63  ;;  %v12229_v63 = vld [vmem:[%s14905_s5 + $0x130] ss:$8 sps:$4 sm:$0xff]   ;;  %v12234_v15 = vld [vmem:[%s14905_s5 + $0x144] ss:$8 sps:$4 sm:$0xff]  }
0x11eb   :  { %11579 = vmatpush3.bf16.msra.mxu1 %v14151_v3 }
0x11ec   :  { %10777 = vmatpush3.bf16.msra.mxu0 %v12166_v4  ;;  %v14153_v4 = vpack.c.bf16 %v5427_v2, %v5426_v1  ;;  %v12232_v1 = vld [vmem:[%s14905_s5 + $0x140] ss:$8 sps:$4 sm:$0xff]   ;;  %v12237_v2 = vld [vmem:[%s14905_s5 + $0x154] ss:$8 sps:$4 sm:$0xff]  }
0x11ed   :  { %11304 = vmatprep.subr.bf16.mxu0 %v12946_v41 }
0x11ee   :  { %11581 = vmatprep.subr.bf16.mxu1 %v14153_v4 }
0x11ef   :  { %4790 = vmatmul.mubr.bf16.vlgmr.msra.gmra.mrb[40].mxu0 %v4448_v16  ;;  %v12177_v16 = vld [vmem:[%s14905_s5 + $0xa4] ss:$8 sps:$4 sm:$0xff]  }
0x11f0   :  { %4797 = vmatprep.mubr.bf16.mxu0 %v4451_v33  ;;  %v12181_v33 = vld [vmem:[%s14905_s5 + $0xc0] ss:$8 sps:$4 sm:$0xff]  }
0x11f7   :  { %4798 = vmatmul.mubr.bf16.gmra.mrb[44].mxu0 %v4450_v59  ;;  %v12190_v59 = vld [vmem:[%s14905_s5 + $0xf0] ss:$8 sps:$4 sm:$0xff]  }
0x11f8   :  { %11308 = vmatprep.mubr.msk.bf16.mxu0 %vm12947_vm0, %v12946_v41 }
0x12a2   :  { %v10750_v5 = vpop.f32.mrb[32].mxu0 }
0x12a3   :  { %v10751_v23 = vpop.f32.mrb[33].mxu0 }
0x12a4   :  { %v10752_v6 = vadd.f32 %v10751_v23, %v10750_v5  ;;  %v10753_v8 = vpop.f32.mrb[34].mxu0  ;;  %v5410_v5 = vld [vmem:[%s14907_s13 + $0x10] sm:$0xff]  ;;  %v5411_v23 = vld [vmem:[%s14907_s13 + $0x18] sm:$0xff] }
0x12a5   :  { %v10754_v9 = vpop.f32.mrb[35].mxu0 }
0x12a6   :  { %v10755_v19 = vadd.f32 %v10754_v9, %v10753_v8 }
0x12aa   :  { %v10756_v10 = vpop.f32.mrb[36].mxu0 }
0x12ab   :  { %v10757_v14 = vpop.f32.mrb[37].mxu0 }
0x12ac   :  { %v10758_v11 = vadd.f32 %v10757_v14, %v10756_v10  ;;  %v10759_v29 = vpop.f32.mrb[38].mxu0 }
0x12ad   :  { %v10760_v49 = vpop.f32.mrb[39].mxu0 }
0x12ae   :  { %v10761_v46 = vadd.f32 %v10760_v49, %v10759_v29 }
0x12c2   :  { %v10778_v53 = vpop.f32.mrb[40].mxu0 }
0x12c3   :  { %v10779_v20 = vpop.f32.mrb[41].mxu0 }
0x12c4   :  { %v10780_v13 = vadd.f32 %v10779_v20, %v10778_v53  ;;  %v10781_v24 = vpop.f32.mrb[42].mxu0 }
0x12c5   :  { %v10782_v50 = vpop.f32.mrb[43].mxu0 }
0x12c6   :  { %v4806_v55 = vmax.f32 %v10752_v6, %v10780_v13  ;;  %v10783_v54 = vadd.f32 %v10782_v50, %v10781_v24  ;;  %v14159_v6 = vpack.c.bf16 %v5411_v23, %v5410_v5  ;;  %v12235_v5 = vld [vmem:[%s14905_s5 + $0x150] ss:$8 sps:$4 sm:$0xff]   ;;  %v12240_v23 = vld [vmem:[%s14905_s5 + $0x164] ss:$8 sps:$4 sm:$0xff]  }
0x12c8   :  { %v4807_v18 = vmax.f32 %v10755_v19, %v10783_v54  ;;  %11583 = vmatpush3.bf16.msra.mxu1 %v14159_v6 }
0x12ca   :  { %v4810_v27 = vpack.c.bf16 %v4807_v18, %v4806_v55  ;;  %v10784_v22 = vpop.f32.mrb[44].mxu0 }
0x12cb   :  { %v10785_v25 = vpop.f32.mrb[45].mxu0 }
0x12cc   :  { %v10786_v21 = vadd.f32 %v10785_v25, %v10784_v22  ;;  %v10787_v38 = vpop.f32.mrb[46].mxu0  ;;  %11305 = vmatpush3.bf16.msra.mxu0 %v4810_v27 }
0x12cd   :  { %v10788_v26 = vpop.f32.mrb[47].mxu0  ;;  %11306 = vmatprep.subr.bf16.mxu0 %v12946_v41 }
0x12ce   :  { %v4808_v37 = vmax.f32 %v10758_v11, %v10786_v21  ;;  %v10789_v34 = vadd.f32 %v10788_v26, %v10787_v38  ;;  %v12193_v38 = vld [vmem:[%s14905_s5] ss:$8 sps:$4 sm:$0xff]  }
0x12d0   :  { %v4809_v36 = vmax.f32 %v10761_v46, %v10789_v34  ;;  %v12200_v34 = vld [vmem:[%s14905_s5 + $0x14] ss:$8 sps:$4 sm:$0xff]  }
0x12d2   :  { %v4811_v39 = vpack.c.bf16 %v4809_v36, %v4808_v37 }
0x12d4   :  { %11307 = vmatpush3.bf16.msra.mxu0 %v4811_v39 }
0x12d5   :  { %11312 = vmatprep.subr.bf16.mxu0 %v12946_v41 }
0x12d7   :  { %11309 = vmatmul.mubr.msk.bf16.vlgmr.msra.gmra.mrb[48].mxu0 %vm862_vm2, %v12167_v45  ;;  %v12203_v45 = vld [vmem:[%s14905_s5 + $0x24] ss:$8 sps:$4 sm:$0xff]  }
0x12d8   :  { %11313 = vmatpush3.bf16.msra.mxu0 %v4810_v27  ;;  %11316 = vmatprep.mubr.msk.bf16.mxu0 %vm12947_vm0, %v12946_v41 }
0x12d9   :  { %11314 = vmatprep.subr.bf16.mxu0 %v12946_v41 }
0x12dc   :  { %11315 = vmatpush3.bf16.msra.mxu0 %v4811_v39  ;;  %v12198_v39 = vld [vmem:[%s14905_s5 + $0x10] ss:$8 sps:$4 sm:$0xff]  }
0x12dd   :  { %5064 = vmatprep.subr.bf16.mxu0 %v12171_v52  ;;  %v12201_v52 = vld [vmem:[%s14905_s5 + $0x20] ss:$8 sps:$4 sm:$0xff]  }
0x12df   :  { %11317 = vmatmul.mubr.msk.bf16.vlgmr.msra.gmra.mrb[52].mxu0 %vm862_vm2, %v12168_v42  ;;  %v12206_v42 = vld [vmem:[%s14905_s5 + $0x34] ss:$8 sps:$4 sm:$0xff]  }
0x12e0   :  { %5065 = vmatpush1.bf16.msra.mxu0 %v12169_v28  ;;  %5096 = vmatprep.mubr.bf16.mxu0 %v12948_v31  ;;  %v12204_v28 = vld [vmem:[%s14905_s5 + $0x30] ss:$8 sps:$4 sm:$0xff]  }
0x12e1   :  { %5066 = vmatprep.subr.bf16.mxu0 %v12174_v48  ;;  %v12209_v48 = vld [vmem:[%s14905_s5 + $0x44] ss:$8 sps:$4 sm:$0xff]  }
0x12e4   :  { %5067 = vmatpush1.bf16.msra.mxu0 %v12172_v51  ;;  %v12207_v51 = vld [vmem:[%s14905_s5 + $0x40] ss:$8 sps:$4 sm:$0xff]  }
0x12e5   :  { %5068 = vmatprep.subr.bf16.mxu0 %v12177_v16  ;;  %v12210_v16 = vld [vmem:[%s14905_s5 + $0x50] ss:$8 sps:$4 sm:$0xff]  }
0x12e8   :  { %5069 = vmatpush1.bf16.msra.mxu0 %v12175_v56  ;;  %v12212_v56 = vld [vmem:[%s14905_s5 + $0x54] ss:$8 sps:$4 sm:$0xff]  }
0x12e9   :  { %5070 = vmatprep.subr.bf16.mxu0 %v12180_v17  ;;  %v12215_v17 = vld [vmem:[%s14905_s5 + $0x64] ss:$8 sps:$4 sm:$0xff]  }
0x12ec   :  { %5071 = vmatpush1.bf16.msra.mxu0 %v12178_v30  ;;  %v12213_v30 = vld [vmem:[%s14905_s5 + $0x60] ss:$8 sps:$4 sm:$0xff]  }
0x12ed   :  { %5072 = vmatprep.subr.bf16.mxu0 %v12183_v57  ;;  %v12218_v57 = vld [vmem:[%s14905_s5 + $0x74] ss:$8 sps:$4 sm:$0xff]  }
0x12f0   :  { %5073 = vmatpush1.bf16.msra.mxu0 %v12181_v33  ;;  %v12216_v33 = vld [vmem:[%s14905_s5 + $0x70] ss:$8 sps:$4 sm:$0xff]  }
0x12f1   :  { %5074 = vmatprep.subr.bf16.mxu0 %v12186_v44  ;;  %v12222_v44 = vld [vmem:[%s14905_s5 + $0x104] ss:$8 sps:$4 sm:$0xff]  }
0x12f4   :  { %5075 = vmatpush1.bf16.msra.mxu0 %v12184_v47 }
0x12f5   :  { %5076 = vmatprep.subr.bf16.mxu0 %v12189_v35 }
0x12f8   :  { %5077 = vmatpush1.bf16.msra.mxu0 %v12187_v58  ;;  %v12220_v58 = vld [vmem:[%s14905_s5 + $0x100] ss:$8 sps:$4 sm:$0xff]  }
0x12f9   :  { %5078 = vmatprep.subr.bf16.mxu0 %v12192_v12  ;;  %v12225_v12 = vld [vmem:[%s14905_s5 + $0x114] ss:$8 sps:$4 sm:$0xff]  }
0x12fc   :  { %5079 = vmatpush1.bf16.msra.mxu0 %v12190_v59  ;;  %v12223_v59 = vld [vmem:[%s14905_s5 + $0x110] ss:$8 sps:$4 sm:$0xff]  }
0x12fd   :  { %5191 = vmatprep.subr.bf16.mxu0 %v12195_v60  ;;  %v12228_v60 = vld [vmem:[%s14905_s5 + $0x124] ss:$8 sps:$4 sm:$0xff]  }
0x13aa   :  { %v4856_v8 = vpop.f32.mrb[48].mxu0 }
0x13ab   :  { %v11310_v9 = vpop.f32.mrb[49].mxu0 }
0x13ac   :  { %v4859_v19 = vpop.f32.mrb[50].mxu0  ;;  %v12243_v9 = vld [vmem:[%s14905_s5 + $0x174] ss:$8 sps:$4 sm:$0xff]  }
0x13ad   :  { %v11311_v10 = vpop.f32.mrb[51].mxu0 }
0x13b2   :  { %v4907_v14 = vpop.f32.mrb[52].mxu0 }
0x13b3   :  { %v4914_v11 = vmax.f32 %v4856_v8, %v4907_v14  ;;  %v11318_v29 = vpop.f32.mrb[53].mxu0  ;;  %v12238_v8 = vld [vmem:[%s14905_s5 + $0x160] ss:$8 sps:$4 sm:$0xff]  }
0x13b4   :  { %v4910_v49 = vpop.f32.mrb[54].mxu0 }
0x13b5   :  { %v10522_v46 = vpack.c.bf16 %v4914_v11, %v4914_v11  ;;  %v4915_v53 = vmax.f32 %v4859_v19, %v4910_v49  ;;  %v11319_v20 = vpop.f32.mrb[55].mxu0  ;;  %v12241_v11 = vld [vmem:[%s14905_s5 + $0x170] ss:$8 sps:$4 sm:$0xff]  }
0x13b6   :  { %v5429_v20 = vld [vmem:[%s14907_s13 + $0xa8] sm:$0xff] }
0x13b7   :  { %v14163_v13 = vrot.slane %v10522_v46, 7  ;;  %v10523_v24 = vpack.c.bf16 %v4915_v53, %v4915_v53  ;;  %v5428_v53 = vld [vmem:[%s14907_s13 + $0xa0] sm:$0xff] }
0x13b9   :  { %v4925_v50 = vrot.slane %v14163_v13, 4  ;;  %4932 = vst [vmem:[#allocation5] sm:$0xe] %v14163_v13  ;;  %v14167_v55 = vrot.slane %v10523_v24, 7  ;;  %v14220_v24 = vpack.c.bf16 %v5429_v20, %v5428_v53 }
0x13bb   :  { %v14172_v54 = vsel %vm13558_vm12, %v4925_v50, %v14167_v55  ;;  %v4928_v18 = vrot.slane %v14167_v55, 4  ;;  %v5412_v50 = vld [vmem:[%s14907_s13 + $0x20] sm:$0xff]  ;;  %11585 = vmatprep.subr.bf16.mxu1 %v14220_v24  ;;  %v12299_v55 = vld [vmem:[%s14910_s25 + $0x10] ss:$8 sps:$4 sm:$0xff]  }
0x13bc   :  { %4933 = vst [vmem:[#allocation5 + $0x4] sm:$0xf] %v14172_v54 }
0x13bd   :  { %4934 = vst [vmem:[#allocation5 + $0x8] sm:$0x1] %v4928_v18 }
0x13c0   :  { %v4953_v22 = vld [vmem:[#allocation5] sm:$0xe] }
0x13c1   :  { %v4935_v47 = vld [vmem:[#allocation5] sm:$0xf] }
0x13c2   :  { %v5234_v19 = vld [vmem:[#allocation5] sm:$0xc] }
0x13c3   :  { %v14178_v27 = vld [vmem:[#allocation5 + $0x4] sm:$0xf] }
0x13c4   :  { %v9888_v25 = vcombine.low %v4953_v22, %v14178_v27  ;;  %v12197_v21 = vld [vmem:[#allocation5 + $0x8] ss:$0 sps:$4 sm:$0x11]   ;;  %v9906_v35 = vcombine.low %v4935_v47, %v14178_v27  ;;  %v9939_v10 = vcombine.low %v5234_v19, %v14178_v27  ;;  %v5413_v27 = vld [vmem:[%s14907_s13 + $0x28] sm:$0xff]  ;;  %v5420_v47 = vld [vmem:[%s14907_s13 + $0x60] sm:$0xff] }
0x13c5   :  { %v4981_v37 = vrot.slane %v12197_v21, 1  ;;  %v12245_v14 = vld [vmem:[#allocation5 + $0x8] ss:$0 sps:$4 sm:$0x33]   ;;  %v14224_v22 = vpack.c.bf16 %v5413_v27, %v5412_v50 }
0x13c6   :  { %v4980_v26 = vrot.slane %v9888_v25, 1  ;;  %v5259_v29 = vrot.slane %v9939_v10, 2  ;;  %v5260_v49 = vrot.slane %v12245_v14, 2  ;;  %v5430_v25 = vld [vmem:[%s14907_s13 + $0xb0] sm:$0xff]  ;;  %v5431_v21 = vld [vmem:[%s14907_s13 + $0xb8] sm:$0xff] }
0x13c7   :  { %11587 = vmatpush3.bf16.msra.mxu1 %v14224_v22 }
0x13c8   :  { %v4982_v36 = vsel %vm1233_vm7, %v4980_v26, %v4981_v37  ;;  %v5261_v46 = vsel %vm1389_vm8, %v5259_v29, %v5260_v49  ;;  %v5414_v26 = vld [vmem:[%s14907_s13 + $0x30] sm:$0xff]  ;;  %v5415_v37 = vld [vmem:[%s14907_s13 + $0x38] sm:$0xff] }
0x13c9   :  { %5097 = vmatmul.mubr.bf16.vlgmr.msra.gmra.mrb[56].mxu0 %v4982_v36  ;;  %v5432_v36 = vld [vmem:[%s14907_s13 + $0xc0] sm:$0xff] }
0x13ca   :  { %5192 = vmatpush1.bf16.msra.mxu0 %v12193_v38  ;;  %5223 = vmatprep.mubr.bf16.mxu0 %v12948_v31  ;;  %v14230_v38 = vpack.c.bf16 %v5431_v21, %v5430_v25 }
0x13cb   :  { %5193 = vmatprep.subr.bf16.mxu0 %v12200_v34  ;;  %v14234_v34 = vpack.c.bf16 %v5415_v37, %v5414_v26 }
0x13cc   :  { %11589 = vmatprep.subr.bf16.mxu1 %v14230_v38 }
0x13cd   :  { %11591 = vmatpush3.bf16.msra.mxu1 %v14234_v34 }
0x13ce   :  { %5194 = vmatpush1.bf16.msra.mxu0 %v12198_v39  ;;  %v5433_v39 = vld [vmem:[%s14907_s13 + $0xc8] sm:$0xff] }
0x13cf   :  { %5195 = vmatprep.subr.bf16.mxu0 %v12203_v45  ;;  %v14240_v45 = vpack.c.bf16 %v5433_v39, %v5432_v36 }
0x13d1   :  { %11593 = vmatprep.subr.bf16.mxu1 %v14240_v45 }
0x13d2   :  { %5196 = vmatpush1.bf16.msra.mxu0 %v12201_v52  ;;  %v5416_v52 = vld [vmem:[%s14907_s13 + $0x40] sm:$0xff] }
0x13d3   :  { %5197 = vmatprep.subr.bf16.mxu0 %v12206_v42  ;;  %v5417_v42 = vld [vmem:[%s14907_s13 + $0x48] sm:$0xff] }
0x13d6   :  { %5198 = vmatpush1.bf16.msra.mxu0 %v12204_v28  ;;  %v14244_v28 = vpack.c.bf16 %v5417_v42, %v5416_v52 }
0x13d7   :  { %5199 = vmatprep.subr.bf16.mxu0 %v12209_v48  ;;  %v5434_v48 = vld [vmem:[%s14907_s13 + $0xd0] sm:$0xff] }
0x13d8   :  { %11595 = vmatpush3.bf16.msra.mxu1 %v14244_v28 }
0x13da   :  { %5200 = vmatpush1.bf16.msra.mxu0 %v12207_v51  ;;  %v5435_v51 = vld [vmem:[%s14907_s13 + $0xd8] sm:$0xff] }
0x13db   :  { %5201 = vmatprep.subr.bf16.mxu0 %v12212_v56  ;;  %v14250_v56 = vpack.c.bf16 %v5435_v51, %v5434_v48 }
0x13dd   :  { %11597 = vmatprep.subr.bf16.mxu1 %v14250_v56 }
0x13de   :  { %5202 = vmatpush1.bf16.msra.mxu0 %v12210_v16  ;;  %v5418_v16 = vld [vmem:[%s14907_s13 + $0x50] sm:$0xff] }
0x13df   :  { %5203 = vmatprep.subr.bf16.mxu0 %v12215_v17  ;;  %v5419_v17 = vld [vmem:[%s14907_s13 + $0x58] sm:$0xff] }
0x13e2   :  { %5204 = vmatpush1.bf16.msra.mxu0 %v12213_v30  ;;  %v14254_v30 = vpack.c.bf16 %v5419_v17, %v5418_v16 }
0x13e3   :  { %5205 = vmatprep.subr.bf16.mxu0 %v12218_v57  ;;  %v5436_v57 = vld [vmem:[%s14907_s13 + $0xe0] sm:$0xff] }
0x13e4   :  { %11599 = vmatpush3.bf16.msra.mxu1 %v14254_v30 }
0x13e6   :  { %5206 = vmatpush1.bf16.msra.mxu0 %v12216_v33  ;;  %v5437_v33 = vld [vmem:[%s14907_s13 + $0xe8] sm:$0xff] }
0x13e7   :  { %5343 = vmatprep.subr.bf16.mxu0 %v12222_v44  ;;  %v14260_v44 = vpack.c.bf16 %v5437_v33, %v5436_v57 }
0x13e9   :  { %5224 = vmatmul.mubr.bf16.vlgmr.msra.gmra.mrb[56].mxu0 %v9906_v35  ;;  %11601 = vmatprep.subr.bf16.mxu1 %v14260_v44 }
0x13ea   :  { %5344 = vmatpush1.bf16.msra.mxu0 %v12220_v58  ;;  %5375 = vmatprep.mubr.bf16.mxu0 %v12948_v31  ;;  %v5421_v58 = vld [vmem:[%s14907_s13 + $0x68] sm:$0xff] }
0x13eb   :  { %5345 = vmatprep.subr.bf16.mxu0 %v12225_v12  ;;  %v14264_v35 = vpack.c.bf16 %v5421_v58, %v5420_v47  ;;  %v5438_v12 = vld [vmem:[%s14907_s13 + $0xf0] sm:$0xff] }
0x13ed   :  { %11603 = vmatpush3.bf16.msra.mxu1 %v14264_v35 }
0x13ee   :  { %5346 = vmatpush1.bf16.msra.mxu0 %v12223_v59  ;;  %v5439_v59 = vld [vmem:[%s14907_s13 + $0xf8] sm:$0xff] }
0x13ef   :  { %5347 = vmatprep.subr.bf16.mxu0 %v12228_v60  ;;  %v5422_v60 = vld [vmem:[%s14907_s13 + $0x70] sm:$0xff] }
0x13f2   :  { %5348 = vmatpush1.bf16.msra.mxu0 %v12226_v61  ;;  %v14270_v61 = vpack.c.bf16 %v5439_v59, %v5438_v12 }
0x13f3   :  { %5349 = vmatprep.subr.bf16.mxu0 %v12231_v62  ;;  %v5423_v62 = vld [vmem:[%s14907_s13 + $0x78] sm:$0xff] }
0x13f4   :  { %11605 = vmatprep.subr.bf16.mxu1 %v14270_v61 }
0x13f6   :  { %5350 = vmatpush1.bf16.msra.mxu0 %v12229_v63  ;;  %v14274_v63 = vpack.c.bf16 %v5423_v62, %v5422_v60 }
0x13f7   :  { %5351 = vmatprep.subr.bf16.mxu0 %v12234_v15  ;;  %v5390_v15 = vld [vmem:[%s14908_s17] sm:$0x3] }
0x13f8   :  { %11607 = vmatpush3.bf16.msra.mxu1 %v14274_v63 }
0x13fa   :  { %5352 = vmatpush1.bf16.msra.mxu0 %v12232_v1  ;;  %v5395_v1 = vrot.slane %v5390_v15, %v13406_v40 }
0x13fb   :  { %5353 = vmatprep.subr.bf16.mxu0 %v12237_v2  ;;  %v5399_v2 = vrot.slane %v5390_v15, %v13410_v43 }
0x13fe   :  { %5354 = vmatpush1.bf16.msra.mxu0 %v12235_v5 }
0x13ff   :  { %5355 = vmatprep.subr.bf16.mxu0 %v12240_v23 }
0x1402   :  { %5356 = vmatpush1.bf16.msra.mxu0 %v12238_v8 }
0x1403   :  { %5357 = vmatprep.subr.bf16.mxu0 %v12243_v9 }
0x1406   :  { %5358 = vmatpush1.bf16.msra.mxu0 %v12241_v11 }
0x1409   :  { %5376 = vmatmul.mubr.bf16.vlgmr.msra.gmra.mrb[56].mxu0 %v5261_v46 }
0x14dc   :  { %v5377_v5 = vpop.f32.mrb[56].mxu0 }
0x14dd   :  { %v14281_v23 = vadd.f32 %v5395_v1, %v5377_v5  ;;  %v5379_v8 = vpop.f32.mrb[57].mxu0 }
0x14de   :  { %v14283_v9 = vadd.f32 %v5399_v2, %v5379_v8  ;;  %v5381_v19 = vpop.f32.mrb[58].mxu0 }
0x14df   :  { %v14285_v10 = vadd.f32 %v5395_v1, %v5381_v19  ;;  %v5383_v14 = vpop.f32.mrb[59].mxu0  ;;  %v5462_v29 = vmul.f32 %v14281_v23, %v14281_v23 }
0x14e0   :  { %v14287_v11 = vadd.f32 %v5399_v2, %v5383_v14  ;;  %v5463_v53 = vmul.f32 %v14283_v9, %v14283_v9 }
0x14e1   :  { %v5448_v49 = vadd.f32 %v14285_v10, %v14281_v23  ;;  %v5464_v46 = vmul.f32 %v14285_v10, %v14285_v10 }
0x14e2   :  { %v5455_v20 = vadd.f32 %v14287_v11, %v14283_v9  ;;  %v5465_v50 = vmul.f32 %v14287_v11, %v14287_v11 }
0x14e3   :  { %v5449_v27 = vrot.slane %v5448_v49, 4  ;;  %v5466_v25 = vadd.f32 %v5464_v46, %v5462_v29  ;;  %v5441_v29 = vld [vmem:[%s14909_s21 + $0x8] sm:$0xff] }
0x14e4   :  { %v5456_v21 = vrot.slane %v5455_v20, 4  ;;  %v5473_v26 = vadd.f32 %v5465_v50, %v5463_v53  ;;  %v5440_v53 = vld [vmem:[%s14909_s21] sm:$0xff] }
0x14e5   :  { %v5450_v37 = vadd.f32 %v5449_v27, %v5448_v49  ;;  %v5467_v36 = vrot.slane %v5466_v25, 4  ;;  %v5443_v49 = vld [vmem:[%s14909_s21 + $0x18] sm:$0xff]  ;;  %v5445_v27 = vld [vmem:[%s14909_s21 + $0x28] sm:$0xff] }
0x14e6   :  { %v5457_v39 = vadd.f32 %v5456_v21, %v5455_v20  ;;  %v5474_v52 = vrot.slane %v5473_v26, 4  ;;  %v14306_v46 = vpack.c.bf16 %v5443_v49, %v5441_v29  ;;  %v5442_v20 = vld [vmem:[%s14909_s21 + $0x10] sm:$0xff] }
0x14e7   :  { %v5451_v42 = vrot.slane %v5450_v37, 2  ;;  %v5468_v48 = vadd.f32 %v5467_v36, %v5466_v25  ;;  %v14310_v50 = vpack.c.bf16 %v5442_v20, %v5440_v53  ;;  %v5447_v25 = vld [vmem:[%s14909_s21 + $0x38] sm:$0xff] }
0x14e8   :  { %v5458_v51 = vrot.slane %v5457_v39, 2  ;;  %v5475_v16 = vadd.f32 %v5474_v52, %v5473_v26  ;;  %11609 = vmatprep.subr.bf16.mxu1 %v14306_v46  ;;  %v14316_v21 = vpack.c.bf16 %v5447_v25, %v5445_v27  ;;  %v5444_v26 = vld [vmem:[%s14909_s21 + $0x20] sm:$0xff] }
0x14e9   :  { %v5452_v17 = vadd.f32 %v5451_v42, %v5450_v37  ;;  %v5469_v57 = vrot.slane %v5468_v48, 2  ;;  %v5446_v37 = vld [vmem:[%s14909_s21 + $0x30] sm:$0xff]  ;;  %v12248_v52 = vld [vmem:[%s14910_s25 + $0x104] ss:$8 sps:$4 sm:$0xff]  }
0x14ea   :  { %v5459_v33 = vadd.f32 %v5458_v51, %v5457_v39  ;;  %v5476_v47 = vrot.slane %v5475_v16, 2  ;;  %v14320_v36 = vpack.c.bf16 %v5446_v37, %v5444_v26  ;;  %v12246_v39 = vld [vmem:[%s14910_s25 + $0x100] ss:$8 sps:$4 sm:$0xff]   ;;  %v12251_v42 = vld [vmem:[%s14910_s25 + $0x114] ss:$8 sps:$4 sm:$0xff]   ;;  %5962 = vmatprep.subr.bf16.mxu0 %v12248_v52 }
0x14eb   :  { %v5470_v58 = vadd.f32 %v5469_v57, %v5468_v48  ;;  %v5453_v60 = vrot.slane %v5452_v17, 1  ;;  %5963 = vmatpush1.bf16.msra.mxu0 %v12246_v39  ;;  %v12249_v48 = vld [vmem:[%s14910_s25 + $0x110] ss:$8 sps:$4 sm:$0xff]   ;;  %v12254_v51 = vld [vmem:[%s14910_s25 + $0x124] ss:$8 sps:$4 sm:$0xff]  }
0x14ec   :  { %v5460_v12 = vrot.slane %v5459_v33, 1  ;;  %v5477_v59 = vadd.f32 %v5476_v47, %v5475_v16  ;;  %5964 = vmatprep.subr.bf16.mxu0 %v12251_v42  ;;  %v12252_v16 = vld [vmem:[%s14910_s25 + $0x120] ss:$8 sps:$4 sm:$0xff]   ;;  %v12260_v57 = vld [vmem:[%s14910_s25 + $0x144] ss:$8 sps:$4 sm:$0xff]  }
0x14ed   :  { %v5471_v62 = vrot.slane %v5470_v58, 1  ;;  %v5454_v8 = vadd.f32 %v5453_v60, %v5452_v17  ;;  %v12257_v17 = vld [vmem:[%s14910_s25 + $0x134] ss:$8 sps:$4 sm:$0xff]   ;;  %v5407_v52 = vld [vmem:[#allocation11] sm:$0x1] }
0x14ee   :  { %v5478_v15 = vrot.slane %v5477_v59, 1  ;;  %v5461_v2 = vadd.f32 %v5460_v12, %v5459_v33  ;;  %v12258_v33 = vld [vmem:[%s14910_s25 + $0x140] ss:$8 sps:$4 sm:$0xff]   ;;  %v12263_v47 = vld [vmem:[%s14910_s25 + $0x154] ss:$8 sps:$4 sm:$0xff]  }
0x14ef   :  { %v5472_v1 = vadd.f32 %v5471_v62, %v5470_v58  ;;  %5965 = vmatpush1.bf16.msra.mxu0 %v12249_v48  ;;  %v12261_v58 = vld [vmem:[%s14910_s25 + $0x150] ss:$8 sps:$4 sm:$0xff]   ;;  %v12266_v12 = vld [vmem:[%s14910_s25 + $0x164] ss:$8 sps:$4 sm:$0xff]   ;;  %v12269_v60 = vld [vmem:[%s14910_s25 + $0x174] ss:$8 sps:$4 sm:$0xff]  }
0x14f0   :  { %v5479_v5 = vadd.f32 %v5478_v15, %v5477_v59  ;;  %5966 = vmatprep.subr.bf16.mxu0 %v12254_v51  ;;  %v12264_v59 = vld [vmem:[%s14910_s25 + $0x160] ss:$8 sps:$4 sm:$0xff]   ;;  %v12267_v62 = vld [vmem:[%s14910_s25 + $0x170] ss:$8 sps:$4 sm:$0xff]   ;;  %v12272_v15 = vld [vmem:[%s14910_s25 + $0x184] ss:$8 sps:$4 sm:$0xff]  }
0x14f1   :  { %v5480_v14 = vsel %vm1518_vm9, %v5454_v8, %v5472_v1  ;;  %v12270_v1 = vld [vmem:[%s14910_s25 + $0x180] ss:$8 sps:$4 sm:$0xff]   ;;  %v5406_v26 = vld [vmem:[#allocation9] sm:$0x1] }
0x14f2   :  { %v5481_v19 = vsel %vm1518_vm9, %v5461_v2, %v5479_v5 }
0x14f3   :  { %5546 = vmatprep.mubr.f32.mxu1 %v5481_v19  ;;  %5967 = vmatpush1.bf16.msra.mxu0 %v12252_v16 }
0x14f4   :  { %5547 = vmatmul.mubr.f32.vlgmr.msra.gmra.mrb[26].mxu1 %v5480_v14  ;;  %5968 = vmatprep.subr.bf16.mxu0 %v12257_v17 }
0x14f5   :  { %5654 = vmatprep.mubr.f32.mxu1 %v12946_v41  ;;  %11611 = vmatpush1.bf16.msra.mxu1 %v14310_v50 }
0x14f6   :  { %11613 = vmatprep.subr.bf16.mxu1 %v14316_v21 }
0x14f9   :  { %11615 = vmatpush1.bf16.msra.mxu1 %v14320_v36 }
0x14fa   :  { %11617 = vmatprep.subr.bf16.mxu1 %v14146_v0  ;;  %v12255_v0 = vld [vmem:[%s14910_s25 + $0x130] ss:$8 sps:$4 sm:$0xff]  }
0x14fb   :  { %5969 = vmatpush1.bf16.msra.mxu0 %v12255_v0 }
0x14fc   :  { %5970 = vmatprep.subr.bf16.mxu0 %v12260_v57 }
0x14ff   :  { %5971 = vmatpush1.bf16.msra.mxu0 %v12258_v33 }
0x1500   :  { %5972 = vmatprep.subr.bf16.mxu0 %v12263_v47 }
0x1503   :  { %5973 = vmatpush1.bf16.msra.mxu0 %v12261_v58 }
0x1504   :  { %5974 = vmatprep.subr.bf16.mxu0 %v12266_v12 }
0x1507   :  { %5975 = vmatpush1.bf16.msra.mxu0 %v12264_v59 }
0x1508   :  { %5976 = vmatprep.subr.bf16.mxu0 %v12269_v60 }
0x150b   :  { %5977 = vmatpush1.bf16.msra.mxu0 %v12267_v62 }
0x150c   :  { %5978 = vmatprep.subr.bf16.mxu0 %v12272_v15 }
0x150f   :  { %5979 = vmatpush1.bf16.msra.mxu0 %v12270_v1 }
0x15c7   :  { %v10828_v2 = vpop.f32.mrb[26].mxu1 }
0x15c8   :  { %v10829_v5 = vpop.f32.mrb[27].mxu1 }
0x15c9   :  { %v10830_v8 = vadd.f32 %v10829_v5, %v10828_v2 }
0x15cb   :  { %v5552_v19 = vmul.f32 0.0078125, %v10830_v8 }
0x15cd   :  { %v5553_v14 = vmul.f32 %v5552_v19, %v5552_v19 }
0x15cf   :  { %v5555_v29 = vrot.slane %v5553_v14, 7 }
0x15d1   :  { %v5557_v49 = vsub.f32 %v5552_v19, %v5555_v29 }
0x15d3   :  { %v5558_v53 = vadd.f32 1e-05, %v5557_v49 }
0x15d5   :  { %12598 = vrsqrt.f32 %v5558_v53 }
0x15df   :  { %v12599_v20 = vpop.eup %12598 }
0x15e0   :  { %v5567_v27 = vrot.slane %v12599_v20, %v13534_v7 }
0x15e2   :  { %v5568_v25 = vcombine.high %v5567_v27, %v5567_v27 }
0x15e4   :  { %v5575_v37 = vrot.slane %v5568_v25, %v13534_v7 }
0x15e6   :  { %v5577_v39 = vmul.f32 %v5575_v37, %v5406_v26 }
0x15e8   :  { %v5578_v42 = vmul.f32 %v5577_v39, %v5552_v19 }
0x15ea   :  { %v5579_v48 = vsub.f32 %v5407_v52, %v5578_v42 }
0x15ec   :  { %v5584_v51 = vrot.slane %v5579_v48, %v13406_v40 }
0x15ee   :  { %v5586_v16 = vsel %vm1518_vm9, %v5577_v39, %v5584_v51 }
0x15ef   :  { %9957 = vmatmul.mubr.msk.f32.vlgmr.msra.gmra.mrb[36].mxu1 %vm862_vm2, %v5586_v16 }
0x15f0   :  { %11619 = vmatpush3.bf16.msra.mxu1 %v14151_v3  ;;  %v12275_v3 = vld [vmem:[%s14910_s25 + $0x194] ss:$8 sps:$4 sm:$0xff]  }
0x15f1   :  { %11621 = vmatprep.subr.bf16.mxu1 %v14153_v4  ;;  %v12273_v4 = vld [vmem:[%s14910_s25 + $0x190] ss:$8 sps:$4 sm:$0xff]   ;;  %5980 = vmatprep.subr.bf16.mxu0 %v12275_v3 }
0x15f2   :  { %5981 = vmatpush1.bf16.msra.mxu0 %v12273_v4  ;;  %v12295_v4 = vld [vmem:[%s14910_s25] ss:$8 sps:$4 sm:$0xff]  }
0x15f4   :  { %11623 = vmatpush3.bf16.msra.mxu1 %v14159_v6  ;;  %v12278_v6 = vld [vmem:[%s14910_s25 + $0x1a4] ss:$8 sps:$4 sm:$0xff]  }
0x15f5   :  { %11625 = vmatprep.subr.bf16.mxu1 %v14220_v24  ;;  %v12276_v24 = vld [vmem:[%s14910_s25 + $0x1a0] ss:$8 sps:$4 sm:$0xff]   ;;  %5982 = vmatprep.subr.bf16.mxu0 %v12278_v6 }
0x15f6   :  { %5983 = vmatpush1.bf16.msra.mxu0 %v12276_v24  ;;  %v12301_v24 = vld [vmem:[%s14910_s25 + $0x14] ss:$8 sps:$4 sm:$0xff]  }
0x15f8   :  { %11627 = vmatpush3.bf16.msra.mxu1 %v14224_v22  ;;  %v12281_v22 = vld [vmem:[%s14910_s25 + $0x1b4] ss:$8 sps:$4 sm:$0xff]  }
0x15f9   :  { %11629 = vmatprep.subr.bf16.mxu1 %v14230_v38  ;;  %v12279_v38 = vld [vmem:[%s14910_s25 + $0x1b0] ss:$8 sps:$4 sm:$0xff]   ;;  %5984 = vmatprep.subr.bf16.mxu0 %v12281_v22  ;;  %v12302_v22 = vld [vmem:[%s14910_s25 + $0x20] ss:$8 sps:$4 sm:$0xff]  }
0x15fa   :  { %5985 = vmatpush1.bf16.msra.mxu0 %v12279_v38  ;;  %v12307_v38 = vld [vmem:[%s14910_s25 + $0x34] ss:$8 sps:$4 sm:$0xff]  }
0x15fc   :  { %11631 = vmatpush3.bf16.msra.mxu1 %v14234_v34  ;;  %v12284_v34 = vld [vmem:[%s14910_s25 + $0x1c4] ss:$8 sps:$4 sm:$0xff]  }
0x15fd   :  { %11633 = vmatprep.subr.bf16.mxu1 %v14240_v45  ;;  %v12282_v45 = vld [vmem:[%s14910_s25 + $0x1c0] ss:$8 sps:$4 sm:$0xff]   ;;  %5986 = vmatprep.subr.bf16.mxu0 %v12284_v34  ;;  %v12305_v34 = vld [vmem:[%s14910_s25 + $0x30] ss:$8 sps:$4 sm:$0xff]  }
0x15fe   :  { %5987 = vmatpush1.bf16.msra.mxu0 %v12282_v45  ;;  %v12310_v45 = vld [vmem:[%s14910_s25 + $0x44] ss:$8 sps:$4 sm:$0xff]  }
0x1600   :  { %11635 = vmatpush3.bf16.msra.mxu1 %v14244_v28  ;;  %v12287_v28 = vld [vmem:[%s14910_s25 + $0x1d4] ss:$8 sps:$4 sm:$0xff]  }
0x1601   :  { %11637 = vmatprep.subr.bf16.mxu1 %v14250_v56  ;;  %v12285_v56 = vld [vmem:[%s14910_s25 + $0x1d0] ss:$8 sps:$4 sm:$0xff]   ;;  %5988 = vmatprep.subr.bf16.mxu0 %v12287_v28  ;;  %v12308_v28 = vld [vmem:[%s14910_s25 + $0x40] ss:$8 sps:$4 sm:$0xff]  }
0x1602   :  { %5989 = vmatpush1.bf16.msra.mxu0 %v12285_v56  ;;  %v12313_v56 = vld [vmem:[%s14910_s25 + $0x54] ss:$8 sps:$4 sm:$0xff]  }
0x1604   :  { %11639 = vmatpush3.bf16.msra.mxu1 %v14254_v30  ;;  %v12288_v30 = vld [vmem:[%s14910_s25 + $0x1e0] ss:$8 sps:$4 sm:$0xff]  }
0x1605   :  { %11641 = vmatprep.subr.bf16.mxu1 %v14260_v44  ;;  %v12290_v44 = vld [vmem:[%s14910_s25 + $0x1e4] ss:$8 sps:$4 sm:$0xff]  }
0x1606   :  { %5990 = vmatprep.subr.bf16.mxu0 %v12290_v44  ;;  %v12316_v44 = vld [vmem:[%s14910_s25 + $0x64] ss:$8 sps:$4 sm:$0xff]  }
0x1607   :  { %5991 = vmatpush1.bf16.msra.mxu0 %v12288_v30  ;;  %v12311_v30 = vld [vmem:[%s14910_s25 + $0x50] ss:$8 sps:$4 sm:$0xff]  }
0x1608   :  { %11643 = vmatpush3.bf16.msra.mxu1 %v14264_v35  ;;  %v12293_v35 = vld [vmem:[%s14910_s25 + $0x1f4] ss:$8 sps:$4 sm:$0xff]  }
0x1609   :  { %11645 = vmatprep.subr.bf16.mxu1 %v14270_v61  ;;  %v12291_v61 = vld [vmem:[%s14910_s25 + $0x1f0] ss:$8 sps:$4 sm:$0xff]   ;;  %5992 = vmatprep.subr.bf16.mxu0 %v12293_v35  ;;  %v12314_v35 = vld [vmem:[%s14910_s25 + $0x60] ss:$8 sps:$4 sm:$0xff]  }
0x160b   :  { %5993 = vmatpush1.bf16.msra.mxu0 %v12291_v61  ;;  %v12319_v61 = vld [vmem:[%s14910_s25 + $0x74] ss:$8 sps:$4 sm:$0xff]  }
0x160c   :  { %11647 = vmatpush3.bf16.msra.mxu1 %v14274_v63  ;;  %v12297_v63 = vld [vmem:[%s14910_s25 + $0x4] ss:$8 sps:$4 sm:$0xff]  }
0x160d   :  { %11649 = vmatprep.subr.bf16.mxu1 %v14306_v46  ;;  %6172 = vmatprep.subr.bf16.mxu0 %v12297_v63  ;;  %v12317_v63 = vld [vmem:[%s14910_s25 + $0x70] ss:$8 sps:$4 sm:$0xff]  }
0x16c2   :  { %v5656_v46 = vpop.f32.mrb[36].mxu1 }
0x16c3   :  { %v5664_v17 = vrot.slane %v5656_v46, %v13406_v40  ;;  %v5658_v0 = vpop.f32.mrb[37].mxu1  ;;  %v5676_v58 = vrot.slane %v5656_v46, %v13410_v43  ;;  %v12322_v46 = vld [vmem:[%s14910_s25 + $0x84] ss:$8 sps:$4 sm:$0xff]  }
0x16c4   :  { %v5668_v57 = vrot.slane %v5658_v0, %v13406_v40  ;;  %v5680_v60 = vrot.slane %v5658_v0, %v13410_v43  ;;  %v12325_v0 = vld [vmem:[%s14910_s25 + $0x94] ss:$8 sps:$4 sm:$0xff]  }
0x16c5   :  { %v5669_v33 = vmul.f32 %v5664_v17, %v14281_v23  ;;  %v5671_v47 = vmul.f32 %v5664_v17, %v14285_v10  ;;  %v12320_v17 = vld [vmem:[%s14910_s25 + $0x80] ss:$8 sps:$4 sm:$0xff]  }
0x16c6   :  { %v5670_v12 = vmul.f32 %v5668_v57, %v14283_v9  ;;  %v5672_v59 = vmul.f32 %v5668_v57, %v14287_v11  ;;  %v12323_v57 = vld [vmem:[%s14910_s25 + $0x90] ss:$8 sps:$4 sm:$0xff]  }
0x16c7   :  { %v5681_v62 = vadd.f32 %v5676_v58, %v5669_v33  ;;  %v5683_v15 = vadd.f32 %v5676_v58, %v5671_v47  ;;  %v12328_v33 = vld [vmem:[%s14910_s25 + $0xa4] ss:$8 sps:$4 sm:$0xff]   ;;  %v12326_v47 = vld [vmem:[%s14910_s25 + $0xa0] ss:$8 sps:$4 sm:$0xff]   ;;  %v12331_v58 = vld [vmem:[%s14910_s25 + $0xb4] ss:$8 sps:$4 sm:$0xff]  }
0x16c8   :  { %v5682_v1 = vadd.f32 %v5680_v60, %v5670_v12  ;;  %v5684_v2 = vadd.f32 %v5680_v60, %v5672_v59  ;;  %v12329_v12 = vld [vmem:[%s14910_s25 + $0xb0] ss:$8 sps:$4 sm:$0xff]   ;;  %v12334_v59 = vld [vmem:[%s14910_s25 + $0xc4] ss:$8 sps:$4 sm:$0xff]   ;;  %v12332_v60 = vld [vmem:[%s14910_s25 + $0xc0] ss:$8 sps:$4 sm:$0xff]  }
0x16c9   :  { %v5685_v5 = vmax.f32 %v5681_v62, 0.0  ;;  %v5687_v8 = vmax.f32 %v5683_v15, 0.0  ;;  %v12337_v62 = vld [vmem:[%s14910_s25 + $0xd4] ss:$8 sps:$4 sm:$0xff]   ;;  %v12335_v15 = vld [vmem:[%s14910_s25 + $0xd0] ss:$8 sps:$4 sm:$0xff]  }
0x16ca   :  { %v5686_v19 = vmax.f32 %v5682_v1, 0.0  ;;  %v5688_v14 = vmax.f32 %v5684_v2, 0.0  ;;  %v12340_v1 = vld [vmem:[%s14910_s25 + $0xe4] ss:$8 sps:$4 sm:$0xff]   ;;  %v12338_v2 = vld [vmem:[%s14910_s25 + $0xe0] ss:$8 sps:$4 sm:$0xff]  }
0x16cc   :  { %v10524_v29 = vpack.c.bf16 %v5686_v19, %v5685_v5  ;;  %v10525_v23 = vpack.c.bf16 %v5688_v14, %v5687_v8  ;;  %v12343_v5 = vld [vmem:[%s14910_s25 + $0xf4] ss:$8 sps:$4 sm:$0xff]   ;;  %v12341_v19 = vld [vmem:[%s14910_s25 + $0xf0] ss:$8 sps:$4 sm:$0xff]   ;;  %v12346_v14 = vld [vmem:[%s14910_s25 + $0x204] ss:$8 sps:$4 sm:$0xff]  }
0x16ce   :  { %v5701_v49 = vrot.slane %v10524_v29, 7  ;;  %v5703_v10 = vrot.slane %v10525_v23, 7 }
0x16d0   :  { %v5702_v53 = vrot.slane %v5701_v49, 4  ;;  %v5705_v20 = vrot.slane %v5703_v10, 4  ;;  %5709 = vst [vmem:[#allocation6] sm:$0xee] %v5701_v49  ;;  %v12344_v49 = vld [vmem:[%s14910_s25 + $0x200] ss:$8 sps:$4 sm:$0xff]  }
0x16d2   :  { %v14389_v9 = vsel %vm13558_vm12, %v5702_v53, %v5703_v10  ;;  %5711 = vst [vmem:[#allocation6 + $0x10] sm:$0x11] %v5705_v20  ;;  %v12350_v20 = vld [vmem:[%s14910_s25 + $0x214] ss:$8 sps:$4 sm:$0xff]  }
0x16d3   :  { %5710 = vst [vmem:[#allocation6 + $0x8] sm:$0xff] %v14389_v9 }
0x16d4   :  { %7556 = vst [vmem:[#allocation6 + $0xc] sm:$0xf] %v14172_v54 }
0x16d7   :  { %v5746_v11 = vld [vmem:[#allocation6] sm:$0xee] }
0x16d8   :  { %v14393_v27 = vld [vmem:[#allocation6] sm:$0xff]  ;;  %v9993_v26 = vcombine.high %v5746_v11, %v14389_v9  ;;  %v9992_v37 = vcombine.low %v5746_v11, %v14389_v9 }
0x16d9   :  { %v14395_v25 = vld [vmem:[#allocation6] sm:$0xcc]  ;;  %7536 = vst [vmem:[#allocation6] sm:$0x11] %v12948_v31  ;;  %v5747_v39 = vld [vmem:[#allocation6 + $0x10] sm:$0x11]  ;;  %v10028_v10 = vcombine.low %v14393_v27, %v14389_v9 }
0x16da   :  { %7555 = vst [vmem:[#allocation6 + $0x4] sm:$0xe] %v14163_v13  ;;  %v14401_v52 = vld [vmem:[#allocation6 + $0x10] sm:$0x33]  ;;  %v9995_v42 = vcombine.high %v5747_v39, %v5747_v39  ;;  %v9994_v54 = vcombine.low %v5747_v39, %v5747_v39  ;;  %v5797_v48 = vrot.slane %v9993_v26, 1  ;;  %v5794_v16 = vrot.slane %v9992_v37, 1 }
0x16db   :  { %7537 = vst [vmem:[#allocation6 + $0x10] sm:$0x22] %v12948_v31  ;;  %7557 = vst [vmem:[#allocation6 + $0x14] sm:$0x1] %v4928_v18  ;;  %v10029_v31 = vcombine.high %v14393_v27, %v14389_v9  ;;  %v12304_v18 = vld [vmem:[%s14910_s25 + $0x24] ss:$8 sps:$4 sm:$0xff]   ;;  %v10097_v8 = vcombine.high %v14401_v52, %v14401_v52  ;;  %v10095_v29 = vcombine.high %v14395_v25, %v14389_v9 }
0x16dc   :  { %v5798_v51 = vrot.slane %v9995_v42, 1  ;;  %v5795_v3 = vrot.slane %v9994_v54, 1  ;;  %v12348_v26 = vld [vmem:[%s14910_s25 + $0x210] ss:$8 sps:$4 sm:$0xff]   ;;  %v12353_v37 = vld [vmem:[%s14910_s25 + $0x224] ss:$8 sps:$4 sm:$0xff]  }
0x16dd   :  { %v6264_v23 = vrot.slane %v10097_v8, 2  ;;  %v6263_v53 = vrot.slane %v10095_v29, 2  ;;  %v12351_v39 = vld [vmem:[%s14910_s25 + $0x220] ss:$8 sps:$4 sm:$0xff]   ;;  %v12356_v27 = vld [vmem:[%s14910_s25 + $0x234] ss:$8 sps:$4 sm:$0xff]  }
0x16de   :  { %v5799_v13 = vsel %vm1233_vm7, %v5797_v48, %v5798_v51  ;;  %v5796_v6 = vsel %vm1233_vm7, %v5794_v16, %v5795_v3  ;;  %v12354_v42 = vld [vmem:[%s14910_s25 + $0x230] ss:$8 sps:$4 sm:$0xff]   ;;  %v12359_v54 = vld [vmem:[%s14910_s25 + $0x244] ss:$8 sps:$4 sm:$0xff]   ;;  %v12357_v48 = vld [vmem:[%s14910_s25 + $0x240] ss:$8 sps:$4 sm:$0xff]  }
0x16df   :  { %5994 = vmatprep.mubr.bf16.mxu0 %v5799_v13  ;;  %v6265_v11 = vsel %vm1389_vm8, %v6263_v53, %v6264_v23  ;;  %v12362_v51 = vld [vmem:[%s14910_s25 + $0x254] ss:$8 sps:$4 sm:$0xff]   ;;  %v12360_v16 = vld [vmem:[%s14910_s25 + $0x250] ss:$8 sps:$4 sm:$0xff]   ;;  %v12365_v3 = vld [vmem:[%s14910_s25 + $0x264] ss:$8 sps:$4 sm:$0xff]  }
0x16e0   :  { %5995 = vmatmul.mubr.bf16.vlgmr.msra.gmra.mrb[60].mxu0 %v5796_v6  ;;  %v12368_v13 = vld [vmem:[%s14910_s25 + $0x274] ss:$8 sps:$4 sm:$0xff]   ;;  %v12366_v6 = vld [vmem:[%s14910_s25 + $0x270] ss:$8 sps:$4 sm:$0xff]  }
0x16e1   :  { %6173 = vmatpush1.bf16.msra.mxu0 %v12295_v4  ;;  %6204 = vmatprep.mubr.bf16.mxu0 %v10029_v31  ;;  %v12363_v4 = vld [vmem:[%s14910_s25 + $0x260] ss:$8 sps:$4 sm:$0xff]  }
0x16e2   :  { %6174 = vmatprep.subr.bf16.mxu0 %v12301_v24  ;;  %v12371_v24 = vld [vmem:[%s14910_s25 + $0x284] ss:$8 sps:$4 sm:$0xff]   ;;  %v12369_v31 = vld [vmem:[%s14910_s25 + $0x280] ss:$8 sps:$4 sm:$0xff]  }
0x16e5   :  { %6175 = vmatpush1.bf16.msra.mxu0 %v12299_v55  ;;  %v12374_v55 = vld [vmem:[%s14910_s25 + $0x294] ss:$8 sps:$4 sm:$0xff]  }
0x16e6   :  { %6176 = vmatprep.subr.bf16.mxu0 %v12304_v18  ;;  %v12372_v18 = vld [vmem:[%s14910_s25 + $0x290] ss:$8 sps:$4 sm:$0xff]  }
0x16e9   :  { %6177 = vmatpush1.bf16.msra.mxu0 %v12302_v22  ;;  %v12377_v22 = vld [vmem:[%s14910_s25 + $0x2a4] ss:$8 sps:$4 sm:$0xff]  }
0x16ea   :  { %6178 = vmatprep.subr.bf16.mxu0 %v12307_v38  ;;  %v12375_v38 = vld [vmem:[%s14910_s25 + $0x2a0] ss:$8 sps:$4 sm:$0xff]  }
0x16ed   :  { %6179 = vmatpush1.bf16.msra.mxu0 %v12305_v34  ;;  %v12380_v34 = vld [vmem:[%s14910_s25 + $0x2b4] ss:$8 sps:$4 sm:$0xff]  }
0x16ee   :  { %6180 = vmatprep.subr.bf16.mxu0 %v12310_v45  ;;  %v12378_v45 = vld [vmem:[%s14910_s25 + $0x2b0] ss:$8 sps:$4 sm:$0xff]  }
0x16f1   :  { %6181 = vmatpush1.bf16.msra.mxu0 %v12308_v28  ;;  %v12383_v28 = vld [vmem:[%s14910_s25 + $0x2c4] ss:$8 sps:$4 sm:$0xff]  }
0x16f2   :  { %6182 = vmatprep.subr.bf16.mxu0 %v12313_v56  ;;  %v12381_v56 = vld [vmem:[%s14910_s25 + $0x2c0] ss:$8 sps:$4 sm:$0xff]  }
0x16f5   :  { %6183 = vmatpush1.bf16.msra.mxu0 %v12311_v30  ;;  %v12386_v30 = vld [vmem:[%s14910_s25 + $0x2d4] ss:$8 sps:$4 sm:$0xff]  }
0x16f6   :  { %6184 = vmatprep.subr.bf16.mxu0 %v12316_v44  ;;  %v12384_v44 = vld [vmem:[%s14910_s25 + $0x2d0] ss:$8 sps:$4 sm:$0xff]  }
0x16f9   :  { %6185 = vmatpush1.bf16.msra.mxu0 %v12314_v35  ;;  %v12389_v35 = vld [vmem:[%s14910_s25 + $0x2e4] ss:$8 sps:$4 sm:$0xff]  }
0x16fa   :  { %6186 = vmatprep.subr.bf16.mxu0 %v12319_v61  ;;  %v12387_v61 = vld [vmem:[%s14910_s25 + $0x2e0] ss:$8 sps:$4 sm:$0xff]  }
0x16fd   :  { %6187 = vmatpush1.bf16.msra.mxu0 %v12317_v63  ;;  %v12392_v63 = vld [vmem:[%s14910_s25 + $0x2f4] ss:$8 sps:$4 sm:$0xff]  }
0x16fe   :  { %6188 = vmatprep.subr.bf16.mxu0 %v12322_v46  ;;  %v10096_v46 = vcombine.low %v14401_v52, %v14401_v52 }
0x1701   :  { %6189 = vmatpush1.bf16.msra.mxu0 %v12320_v17  ;;  %v12390_v17 = vld [vmem:[%s14910_s25 + $0x2f0] ss:$8 sps:$4 sm:$0xff]  }
0x1702   :  { %6190 = vmatprep.subr.bf16.mxu0 %v12325_v0  ;;  %v10094_v0 = vcombine.low %v14395_v25, %v14389_v9 }
0x1705   :  { %6191 = vmatpush1.bf16.msra.mxu0 %v12323_v57  ;;  %v6261_v57 = vrot.slane %v10096_v46, 2 }
0x1706   :  { %6192 = vmatprep.subr.bf16.mxu0 %v12328_v33  ;;  %v6260_v33 = vrot.slane %v10094_v0, 2 }
0x1709   :  { %6193 = vmatpush1.bf16.msra.mxu0 %v12326_v47  ;;  %v6262_v47 = vsel %vm1389_vm8, %v6260_v33, %v6261_v57 }
0x170a   :  { %6194 = vmatprep.subr.bf16.mxu0 %v12331_v58  ;;  %v6475_v58 = vld [vmem:[%s14911_s30] sm:$0x3] }
0x170b   :  { %v6480_v52 = vrot.slane %v6475_v58, %v13406_v40 }
0x170d   :  { %6195 = vmatpush1.bf16.msra.mxu0 %v12329_v12  ;;  %v6484_v12 = vrot.slane %v6475_v58, %v13410_v43 }
0x170e   :  { %6196 = vmatprep.subr.bf16.mxu0 %v12334_v59 }
0x1711   :  { %6197 = vmatpush1.bf16.msra.mxu0 %v12332_v60 }
0x1712   :  { %6198 = vmatprep.subr.bf16.mxu0 %v12337_v62 }
0x1715   :  { %6199 = vmatpush1.bf16.msra.mxu0 %v12335_v15 }
0x1716   :  { %6200 = vmatprep.subr.bf16.mxu0 %v12340_v1 }
0x1719   :  { %6201 = vmatpush1.bf16.msra.mxu0 %v12338_v2 }
0x171a   :  { %6202 = vmatprep.subr.bf16.mxu0 %v12343_v5 }
0x171d   :  { %6203 = vmatpush1.bf16.msra.mxu0 %v12341_v19 }
0x171e   :  { %6428 = vmatprep.subr.bf16.mxu0 %v12346_v14 }
0x1720   :  { %6205 = vmatmul.mubr.bf16.vlgmr.msra.gmra.mrb[60].mxu0 %v10028_v10 }
0x1721   :  { %6429 = vmatpush1.bf16.msra.mxu0 %v12344_v49  ;;  %6460 = vmatprep.mubr.bf16.mxu0 %v6265_v11 }
0x1722   :  { %6430 = vmatprep.subr.bf16.mxu0 %v12350_v20 }
0x1725   :  { %6431 = vmatpush1.bf16.msra.mxu0 %v12348_v26 }
0x1726   :  { %6432 = vmatprep.subr.bf16.mxu0 %v12353_v37 }
0x1729   :  { %6433 = vmatpush1.bf16.msra.mxu0 %v12351_v39 }
0x172a   :  { %6434 = vmatprep.subr.bf16.mxu0 %v12356_v27 }
0x172d   :  { %6435 = vmatpush1.bf16.msra.mxu0 %v12354_v42 }
0x172e   :  { %6436 = vmatprep.subr.bf16.mxu0 %v12359_v54 }
0x1731   :  { %6437 = vmatpush1.bf16.msra.mxu0 %v12357_v48 }
0x1732   :  { %6438 = vmatprep.subr.bf16.mxu0 %v12362_v51 }
0x1735   :  { %6439 = vmatpush1.bf16.msra.mxu0 %v12360_v16 }
0x1736   :  { %6440 = vmatprep.subr.bf16.mxu0 %v12365_v3 }
0x1739   :  { %6441 = vmatpush1.bf16.msra.mxu0 %v12363_v4 }
0x173a   :  { %6442 = vmatprep.subr.bf16.mxu0 %v12368_v13 }
0x173d   :  { %6443 = vmatpush1.bf16.msra.mxu0 %v12366_v6 }
0x173e   :  { %6444 = vmatprep.subr.bf16.mxu0 %v12371_v24 }
0x1741   :  { %6445 = vmatpush1.bf16.msra.mxu0 %v12369_v31 }
0x1742   :  { %6446 = vmatprep.subr.bf16.mxu0 %v12374_v55 }
0x1745   :  { %6447 = vmatpush1.bf16.msra.mxu0 %v12372_v18 }
0x1746   :  { %6448 = vmatprep.subr.bf16.mxu0 %v12377_v22 }
0x1749   :  { %6449 = vmatpush1.bf16.msra.mxu0 %v12375_v38 }
0x174a   :  { %6450 = vmatprep.subr.bf16.mxu0 %v12380_v34 }
0x174d   :  { %6451 = vmatpush1.bf16.msra.mxu0 %v12378_v45 }
0x174e   :  { %6452 = vmatprep.subr.bf16.mxu0 %v12383_v28 }
0x1751   :  { %6453 = vmatpush1.bf16.msra.mxu0 %v12381_v56 }
0x1752   :  { %6454 = vmatprep.subr.bf16.mxu0 %v12386_v30  ;;  %v12393_v30 = vld [vmem:[%s14912_s16 + $0x40] sm:$0xff]  }
0x1755   :  { %6455 = vmatpush1.bf16.msra.mxu0 %v12384_v44 }
0x1756   :  { %6456 = vmatprep.subr.bf16.mxu0 %v12389_v35 }
0x1759   :  { %6457 = vmatpush1.bf16.msra.mxu0 %v12387_v61 }
0x175a   :  { %6458 = vmatprep.subr.bf16.mxu0 %v12392_v63 }
0x175d   :  { %6459 = vmatpush1.bf16.msra.mxu0 %v12390_v17 }
0x175e   :  { %11378 = vmatprep.subr.bf16.mxu0 %v12946_v41 }
0x1760   :  { %6461 = vmatmul.mubr.bf16.vlgmr.msra.gmra.mrb[60].mxu0 %v6262_v47 }
0x1761   :  { %11380 = vmatprep.mubr.msk.bf16.mxu0 %vm12947_vm0, %v12946_v41 }
0x1833   :  { %v6462_v59 = vpop.f32.mrb[60].mxu0 }
0x1834   :  { %v14491_v60 = vadd.f32 %v6480_v52, %v6462_v59  ;;  %v6464_v9 = vpop.f32.mrb[61].mxu0 }
0x1835   :  { %v14493_v25 = vadd.f32 %v6484_v12, %v6464_v9  ;;  %v6466_v62 = vpop.f32.mrb[62].mxu0 }
0x1836   :  { %v14495_v15 = vadd.f32 %v6480_v52, %v6466_v62  ;;  %v6468_v1 = vpop.f32.mrb[63].mxu0  ;;  %v6547_v5 = vmul.f32 %v14491_v60, %v14491_v60  ;;  %v6492_v52 = vld [vmem:[#allocation14] sm:$0x1]  ;;  %v12394_v62 = vld [vmem:[%s14912_s16] sm:$0xff]  }
0x1837   :  { %v14497_v2 = vadd.f32 %v6484_v12, %v6468_v1  ;;  %v6548_v14 = vmul.f32 %v14493_v25, %v14493_v25  ;;  %v12395_v1 = vld [vmem:[%s14912_s16 + $0x48] sm:$0xff]  }
0x1838   :  { %v6533_v8 = vadd.f32 %v14495_v15, %v14491_v60  ;;  %v6549_v19 = vmul.f32 %v14495_v15, %v14495_v15 }
0x1839   :  { %v6540_v29 = vadd.f32 %v14497_v2, %v14493_v25  ;;  %v6550_v23 = vmul.f32 %v14497_v2, %v14497_v2 }
0x183a   :  { %v6534_v49 = vrot.slane %v6533_v8, 4  ;;  %v6551_v10 = vadd.f32 %v6549_v19, %v6547_v5  ;;  %v12398_v19 = vld [vmem:[%s14912_s16 + $0x10] sm:$0xff]  }
0x183b   :  { %v6541_v53 = vrot.slane %v6540_v29, 4  ;;  %v6558_v20 = vadd.f32 %v6550_v23, %v6548_v14  ;;  %v12399_v14 = vld [vmem:[%s14912_s16 + $0x58] sm:$0xff]   ;;  %v12401_v23 = vld [vmem:[%s14912_s16 + $0x60] sm:$0xff]  }
0x183c   :  { %v6535_v11 = vadd.f32 %v6534_v49, %v6533_v8  ;;  %v6552_v26 = vrot.slane %v6551_v10, 4  ;;  %v12396_v8 = vld [vmem:[%s14912_s16 + $0x8] sm:$0xff]   ;;  %v12402_v49 = vld [vmem:[%s14912_s16 + $0x20] sm:$0xff]  }
0x183d   :  { %v6542_v37 = vadd.f32 %v6541_v53, %v6540_v29  ;;  %v6559_v39 = vrot.slane %v6558_v20, 4  ;;  %v12400_v29 = vld [vmem:[%s14912_s16 + $0x18] sm:$0xff]   ;;  %v12404_v53 = vld [vmem:[%s14912_s16 + $0x28] sm:$0xff]  }
0x183e   :  { %v6536_v27 = vrot.slane %v6535_v11, 2  ;;  %v6553_v42 = vadd.f32 %v6552_v26, %v6551_v10  ;;  %v12403_v10 = vld [vmem:[%s14912_s16 + $0x68] sm:$0xff]   ;;  %v12407_v26 = vld [vmem:[%s14912_s16 + $0x78] sm:$0xff]  }
0x183f   :  { %v6543_v54 = vrot.slane %v6542_v37, 2  ;;  %v6560_v48 = vadd.f32 %v6559_v39, %v6558_v20  ;;  %v12405_v20 = vld [vmem:[%s14912_s16 + $0x70] sm:$0xff]   ;;  %v12409_v39 = vld [vmem:[%s14913_s18 + $0x40] sm:$0xff]  }
0x1840   :  { %v6537_v51 = vadd.f32 %v6536_v27, %v6535_v11  ;;  %v6554_v16 = vrot.slane %v6553_v42, 2  ;;  %v12406_v11 = vld [vmem:[%s14912_s16 + $0x30] sm:$0xff]  }
0x1841   :  { %v6544_v3 = vadd.f32 %v6543_v54, %v6542_v37  ;;  %v6561_v4 = vrot.slane %v6560_v48, 2  ;;  %v12408_v37 = vld [vmem:[%s14912_s16 + $0x38] sm:$0xff]  }
0x1842   :  { %v6555_v13 = vadd.f32 %v6554_v16, %v6553_v42  ;;  %v6538_v31 = vrot.slane %v6537_v51, 1 }
0x1843   :  { %v6545_v6 = vrot.slane %v6544_v3, 1  ;;  %v6562_v24 = vadd.f32 %v6561_v4, %v6560_v48 }
0x1844   :  { %v6556_v55 = vrot.slane %v6555_v13, 1  ;;  %v6539_v45 = vadd.f32 %v6538_v31, %v6537_v51 }
0x1845   :  { %v6563_v18 = vrot.slane %v6562_v24, 1  ;;  %v6546_v38 = vadd.f32 %v6545_v6, %v6544_v3 }
0x1846   :  { %v6557_v22 = vadd.f32 %v6556_v55, %v6555_v13 }
0x1847   :  { %v6564_v34 = vadd.f32 %v6563_v18, %v6562_v24 }
0x1848   :  { %v6565_v56 = vsel %vm1518_vm9, %v6539_v45, %v6557_v22  ;;  %v12410_v45 = vld [vmem:[%s14913_s18] sm:$0xff]  }
0x1849   :  { %v6566_v28 = vsel %vm1518_vm9, %v6546_v38, %v6564_v34 }
0x184a   :  { %6631 = vmatprep.mubr.f32.mxu1 %v6566_v28  ;;  %v12413_v28 = vld [vmem:[%s14913_s18 + $0x50] sm:$0xff]  }
0x184b   :  { %6632 = vmatmul.mubr.f32.vlgmr.msra.gmra.mrb[38].mxu1 %v6565_v56  ;;  %v12414_v56 = vld [vmem:[%s14913_s18 + $0x10] sm:$0xff]  }
0x184c   :  { %11651 = vmatpush1.bf16.msra.mxu1 %v14310_v50  ;;  %6739 = vmatprep.mubr.f32.mxu1 %v12946_v41 }
0x184d   :  { %11653 = vmatprep.subr.bf16.mxu1 %v14316_v21 }
0x1850   :  { %11655 = vmatpush1.bf16.msra.mxu1 %v14320_v36  ;;  %v6491_v36 = vld [vmem:[#allocation12] sm:$0x1] }
0x1851   :  { %10866 = vmatprep.subr.bf16.mxu1 %v12393_v30  ;;  %v12415_v30 = vld [vmem:[%s14913_s18 + $0x58] sm:$0xff]  }
0x191e   :  { %v10863_v44 = vpop.f32.mrb[38].mxu1 }
0x191f   :  { %v10864_v35 = vpop.f32.mrb[39].mxu1 }
0x1920   :  { %v10865_v61 = vadd.f32 %v10864_v35, %v10863_v44  ;;  %v12416_v44 = vld [vmem:[%s14913_s18 + $0x18] sm:$0xff]   ;;  %v12417_v35 = vld [vmem:[%s14913_s18 + $0x60] sm:$0xff]  }
0x1922   :  { %v6637_v63 = vmul.f32 0.0078125, %v10865_v61  ;;  %v12418_v61 = vld [vmem:[%s14913_s18 + $0x20] sm:$0xff]  }
0x1924   :  { %v6638_v46 = vmul.f32 %v6637_v63, %v6637_v63 }
0x1926   :  { %v6640_v17 = vrot.slane %v6638_v46, 7  ;;  %v12420_v46 = vld [vmem:[%s14913_s18 + $0x28] sm:$0xff]  }
0x1928   :  { %v6642_v0 = vsub.f32 %v6637_v63, %v6640_v17  ;;  %v12421_v17 = vld [vmem:[%s14913_s18 + $0x70] sm:$0xff]  }
0x192a   :  { %v6643_v57 = vadd.f32 1e-05, %v6642_v0  ;;  %v12422_v0 = vld [vmem:[%s14913_s18 + $0x30] sm:$0xff]  }
0x192c   :  { %12600 = vrsqrt.f32 %v6643_v57  ;;  %v12423_v57 = vld [vmem:[%s14913_s18 + $0x78] sm:$0xff]  }
0x1936   :  { %v12601_v50 = vpop.eup %12600 }
0x1937   :  { %v6652_v33 = vrot.slane %v12601_v50, %v13534_v7  ;;  %v12424_v50 = vld [vmem:[%s14913_s18 + $0x38] sm:$0xff]  }
0x1939   :  { %v6653_v21 = vcombine.high %v6652_v33, %v6652_v33 }
0x193b   :  { %v6660_v47 = vrot.slane %v6653_v21, %v13534_v7  ;;  %v12397_v7 = vld [vmem:[%s14912_s16 + $0x50] sm:$0xff]  }
0x193d   :  { %v6662_v58 = vmul.f32 %v6660_v47, %v6491_v36 }
0x193f   :  { %v6663_v12 = vmul.f32 %v6662_v58, %v6637_v63  ;;  %v12419_v63 = vld [vmem:[%s14913_s18 + $0x68] sm:$0xff]  }
0x1941   :  { %v6664_v59 = vsub.f32 %v6492_v52, %v6663_v12 }
0x1943   :  { %v6669_v9 = vrot.slane %v6664_v59, %v13406_v40 }
0x1945   :  { %v6671_v5 = vsel %vm1518_vm9, %v6662_v58, %v6669_v9 }
0x1946   :  { %10130 = vmatmul.mubr.msk.f32.vlgmr.msra.gmra.mrb[40].mxu1 %vm862_vm2, %v6671_v5 }
0x1947   :  { %10867 = vmatpush3.bf16.msra.mxu1 %v12394_v62 }
0x1948   :  { %10868 = vmatprep.subr.bf16.mxu1 %v12395_v1 }
0x194b   :  { %10869 = vmatpush3.bf16.msra.mxu1 %v12396_v8 }
0x194c   :  { %10870 = vmatprep.subr.bf16.mxu1 %v12397_v7 }
0x194f   :  { %10871 = vmatpush3.bf16.msra.mxu1 %v12398_v19 }
0x1950   :  { %10872 = vmatprep.subr.bf16.mxu1 %v12399_v14  ;;  %v7117_v14 = vld [vmem:[%s14914_s12] sm:$0xf] }
0x1953   :  { %10873 = vmatpush3.bf16.msra.mxu1 %v12400_v29  ;;  %v7161_v29 = vld [vmem:[%s14915_s22] sm:$0xf] }
0x1954   :  { %10874 = vmatprep.subr.bf16.mxu1 %v12401_v23  ;;  %v12425_v23 = vld [vmem:[%s14916_s24] sm:$0xff]  }
0x1957   :  { %10875 = vmatpush3.bf16.msra.mxu1 %v12402_v49  ;;  %v12426_v49 = vld [vmem:[%s14916_s24 + $0x8] sm:$0xff]  }
0x1958   :  { %10876 = vmatprep.subr.bf16.mxu1 %v12403_v10  ;;  %v12427_v10 = vld [vmem:[%s14916_s24 + $0x10] sm:$0xff]  }
0x195b   :  { %10877 = vmatpush3.bf16.msra.mxu1 %v12404_v53  ;;  %v12428_v53 = vld [vmem:[%s14916_s24 + $0x18] sm:$0xff]  }
0x195c   :  { %10878 = vmatprep.subr.bf16.mxu1 %v12405_v20  ;;  %v12429_v20 = vld [vmem:[%s14916_s24 + $0x20] sm:$0xff]  }
0x195f   :  { %10879 = vmatpush3.bf16.msra.mxu1 %v12406_v11  ;;  %v12430_v11 = vld [vmem:[%s14916_s24 + $0x28] sm:$0xff]  }
0x1960   :  { %10880 = vmatprep.subr.bf16.mxu1 %v12407_v26  ;;  %v12431_v26 = vld [vmem:[%s14916_s24 + $0x30] sm:$0xff]  }
0x1963   :  { %10881 = vmatpush3.bf16.msra.mxu1 %v12408_v37  ;;  %v12432_v37 = vld [vmem:[%s14916_s24 + $0x38] sm:$0xff]  }
0x1964   :  { %10888 = vmatprep.subr.bf16.mxu1 %v12409_v39 }
0x1a19   :  { %v6741_v27 = vpop.f32.mrb[40].mxu1 }
0x1a1a   :  { %v6749_v42 = vrot.slane %v6741_v27, %v13406_v40  ;;  %v6743_v54 = vpop.f32.mrb[41].mxu1  ;;  %v6761_v3 = vrot.slane %v6741_v27, %v13410_v43 }
0x1a1b   :  { %v6753_v48 = vrot.slane %v6743_v54, %v13406_v40  ;;  %v6765_v6 = vrot.slane %v6743_v54, %v13410_v43  ;;  %v12412_v43 = vld [vmem:[%s14913_s18 + $0x8] sm:$0xff]  }
0x1a1c   :  { %v6754_v51 = vmul.f32 %v6749_v42, %v14491_v60  ;;  %v6756_v16 = vmul.f32 %v6749_v42, %v14495_v15 }
0x1a1d   :  { %v6755_v4 = vmul.f32 %v6753_v48, %v14493_v25  ;;  %v6757_v13 = vmul.f32 %v6753_v48, %v14497_v2  ;;  %v12411_v2 = vld [vmem:[%s14913_s18 + $0x48] sm:$0xff]  }
0x1a1e   :  { %v6766_v24 = vadd.f32 %v6761_v3, %v6754_v51  ;;  %v6768_v31 = vadd.f32 %v6761_v3, %v6756_v16 }
0x1a1f   :  { %v6767_v55 = vadd.f32 %v6765_v6, %v6755_v4  ;;  %v6769_v18 = vadd.f32 %v6765_v6, %v6757_v13  ;;  %v12433_v4 = vld [vmem:[%s14916_s24 + $0x40] sm:$0xff]  }
0x1a20   :  { %v6770_v22 = vmax.f32 %v6766_v24, 0.0  ;;  %v6772_v60 = vmax.f32 %v6768_v31, 0.0  ;;  %v12434_v24 = vld [vmem:[%s14916_s24 + $0x48] sm:$0xff]   ;;  %v12435_v31 = vld [vmem:[%s14916_s24 + $0x50] sm:$0xff]  }
0x1a21   :  { %v6771_v38 = vmax.f32 %v6767_v55, 0.0  ;;  %v6773_v15 = vmax.f32 %v6769_v18, 0.0  ;;  %v12436_v55 = vld [vmem:[%s14916_s24 + $0x58] sm:$0xff]   ;;  %v12437_v18 = vld [vmem:[%s14916_s24 + $0x60] sm:$0xff]  }
0x1a22   :  { %v6774_v25 = vpack.c.bf16 %v6772_v60, %v6770_v22  ;;  %v12438_v22 = vld [vmem:[%s14916_s24 + $0x68] sm:$0xff]   ;;  %v12439_v60 = vld [vmem:[%s14916_s24 + $0x70] sm:$0xff]  }
0x1a23   :  { %v6775_v34 = vpack.c.bf16 %v6773_v15, %v6771_v38  ;;  %v12440_v38 = vld [vmem:[%s14916_s24 + $0x78] sm:$0xff]  }
0x1a25   :  { %6936 = vmatprep.mubr.bf16.mxu1 %v6775_v34 }
0x1a26   :  { %6937 = vmatmul.mubr.bf16.vlgmr.msra.gmra.mrb[44].mxu1 %v6774_v25 }
0x1a27   :  { %10889 = vmatpush3.bf16.msra.mxu1 %v12410_v45  ;;  %7105 = vmatprep.mubr.bf16.mxu1 %v6775_v34 }
0x1a28   :  { %10890 = vmatprep.subr.bf16.mxu1 %v12411_v2 }
0x1a2b   :  { %10891 = vmatpush3.bf16.msra.mxu1 %v12412_v43 }
0x1a2c   :  { %10892 = vmatprep.subr.bf16.mxu1 %v12413_v28 }
0x1a2f   :  { %10893 = vmatpush3.bf16.msra.mxu1 %v12414_v56  ;;  %v12441_v56 = vld [vmem:[%s14918_s0] sm:$0xff]  }
0x1a30   :  { %10894 = vmatprep.subr.bf16.mxu1 %v12415_v30  ;;  %v12444_v30 = vld [vmem:[%s14917_s23] sm:$0xff]  }
0x1a33   :  { %10895 = vmatpush3.bf16.msra.mxu1 %v12416_v44  ;;  %v12447_v44 = vld [vmem:[%s14917_s23 + $0x48] sm:$0xff]  }
0x1a34   :  { %10896 = vmatprep.subr.bf16.mxu1 %v12417_v35  ;;  %v12448_v35 = vld [vmem:[%s14917_s23 + $0x8] sm:$0xff]  }
0x1a37   :  { %10897 = vmatpush3.bf16.msra.mxu1 %v12418_v61 }
0x1a38   :  { %10898 = vmatprep.subr.bf16.mxu1 %v12419_v63 }
0x1a3b   :  { %10899 = vmatpush3.bf16.msra.mxu1 %v12420_v46 }
0x1a3c   :  { %10900 = vmatprep.subr.bf16.mxu1 %v12421_v17  ;;  %v12445_v17 = vld [vmem:[%s14917_s23 + $0xc0] sm:$0xff]  }
0x1a3f   :  { %10901 = vmatpush3.bf16.msra.mxu1 %v12422_v0 }
0x1a40   :  { %10902 = vmatprep.subr.bf16.mxu1 %v12423_v57 }
0x1a43   :  { %10903 = vmatpush3.bf16.msra.mxu1 %v12424_v50 }
0x1a44   :  { %11320 = vmatprep.subr.bf16.mxu1 %v12946_v41 }
0x1a46   :  { %7106 = vmatmul.mubr.bf16.vlgmr.msra.gmra.mrb[48].mxu1 %v6774_v25  ;;  %v12443_v25 = vld [vmem:[%s14917_s23 + $0x40] sm:$0xff]  }
0x1a47   :  { %11322 = vmatprep.mubr.msk.bf16.mxu1 %vm12947_vm0, %v12946_v41 }
0x1af9   :  { %v10882_v33 = vpop.f32.mrb[44].mxu1 }
0x1afa   :  { %v10883_v21 = vpop.f32.mrb[45].mxu1 }
0x1afb   :  { %v10884_v36 = vadd.f32 %v10883_v21, %v10882_v33  ;;  %v10885_v47 = vpop.f32.mrb[46].mxu1  ;;  %v12442_v33 = vld [vmem:[%s14919_s14] sm:$0xff]  }
0x1afc   :  { %v10886_v58 = vpop.f32.mrb[47].mxu1  ;;  %v12446_v21 = vld [vmem:[%s14917_s23 + $0x80] sm:$0xff]  }
0x1afd   :  { %v10887_v52 = vadd.f32 %v10886_v58, %v10885_v47  ;;  %v12450_v47 = vld [vmem:[%s14917_s23 + $0x88] sm:$0xff]   ;;  %v12451_v58 = vld [vmem:[%s14917_s23 + $0x50] sm:$0xff]  }
0x1b19   :  { %v10904_v12 = vpop.f32.mrb[48].mxu1 }
0x1b1a   :  { %v10905_v59 = vpop.f32.mrb[49].mxu1 }
0x1b1b   :  { %v10906_v9 = vadd.f32 %v10905_v59, %v10904_v12  ;;  %v10907_v62 = vpop.f32.mrb[50].mxu1  ;;  %v12453_v12 = vld [vmem:[%s14917_s23 + $0xd0] sm:$0xff]  }
0x1b1c   :  { %v10908_v1 = vpop.f32.mrb[51].mxu1  ;;  %v12454_v59 = vld [vmem:[%s14917_s23 + $0x90] sm:$0xff]  }
0x1b1d   :  { %v7114_v5 = vmax.f32 %v10884_v36, %v10906_v9  ;;  %v10909_v8 = vadd.f32 %v10908_v1, %v10907_v62  ;;  %v12449_v36 = vld [vmem:[%s14917_s23 + $0xc8] sm:$0xff]   ;;  %v12455_v9 = vld [vmem:[%s14917_s23 + $0x58] sm:$0xff]  }
0x1b1e   :  { %v12456_v62 = vld [vmem:[%s14917_s23 + $0x18] sm:$0xff]  }
0x1b1f   :  { %v7115_v7 = vmax.f32 %v10887_v52, %v10909_v8  ;;  %v12452_v52 = vld [vmem:[%s14917_s23 + $0x10] sm:$0xff]   ;;  %v12457_v1 = vld [vmem:[%s14917_s23 + $0xd8] sm:$0xff]   ;;  %v12459_v8 = vld [vmem:[%s14917_s23 + $0x60] sm:$0xff]  }
0x1b21   :  { %v7116_v19 = vpack.c.bf16 %v7115_v7, %v7114_v5  ;;  %v12458_v5 = vld [vmem:[%s14917_s23 + $0x98] sm:$0xff]   ;;  %v12460_v7 = vld [vmem:[%s14917_s23 + $0x20] sm:$0xff]  }
0x1b23   :  { %11321 = vmatpush3.bf16.msra.mxu1 %v7116_v19 }
0x1b24   :  { %11326 = vmatprep.subr.bf16.mxu1 %v12946_v41 }
0x1b26   :  { %11323 = vmatmul.mubr.msk.bf16.vlgmr.msra.gmra.mrb[52].mxu1 %vm3146_vm13, %v7117_v14  ;;  %v12462_v14 = vld [vmem:[%s14917_s23 + $0xa0] sm:$0xff]  }
0x1b27   :  { %11327 = vmatpush3.bf16.msra.mxu1 %v7116_v19  ;;  %11328 = vmatprep.mubr.msk.bf16.mxu1 %vm12947_vm0, %v12946_v41  ;;  %v12461_v19 = vld [vmem:[%s14917_s23 + $0xe0] sm:$0xff]  }
0x1b28   :  { %11332 = vmatprep.subr.bf16.mxu1 %v12946_v41 }
0x1b2e   :  { %11329 = vmatmul.mubr.msk.bf16.vlgmr.msra.gmra.mrb[56].mxu1 %vm3146_vm13, %v7161_v29  ;;  %v12463_v29 = vld [vmem:[%s14917_s23 + $0x68] sm:$0xff]  }
0x1b2f   :  { %11333 = vmatpush3.bf16.msra.mxu1 %v12425_v23  ;;  %11348 = vmatprep.mubr.msk.bf16.mxu1 %vm12947_vm0, %v12946_v41  ;;  %v12464_v23 = vld [vmem:[%s14917_s23 + $0x28] sm:$0xff]  }
0x1b30   :  { %11334 = vmatprep.subr.bf16.mxu1 %v12946_v41 }
0x1b33   :  { %11335 = vmatpush3.bf16.msra.mxu1 %v12426_v49  ;;  %v12465_v49 = vld [vmem:[%s14917_s23 + $0xe8] sm:$0xff]  }
0x1b34   :  { %11336 = vmatprep.subr.bf16.mxu1 %v12946_v41 }
0x1b37   :  { %11337 = vmatpush3.bf16.msra.mxu1 %v12427_v10  ;;  %v12466_v10 = vld [vmem:[%s14917_s23 + $0xa8] sm:$0xff]  }
0x1b38   :  { %11338 = vmatprep.subr.bf16.mxu1 %v12946_v41 }
0x1b3b   :  { %11339 = vmatpush3.bf16.msra.mxu1 %v12428_v53  ;;  %v12467_v53 = vld [vmem:[%s14917_s23 + $0x70] sm:$0xff]  }
0x1b3c   :  { %11340 = vmatprep.subr.bf16.mxu1 %v12946_v41 }
0x1b3f   :  { %11341 = vmatpush3.bf16.msra.mxu1 %v12429_v20  ;;  %v12468_v20 = vld [vmem:[%s14917_s23 + $0x30] sm:$0xff]  }
0x1b40   :  { %11342 = vmatprep.subr.bf16.mxu1 %v12946_v41 }
0x1b43   :  { %11343 = vmatpush3.bf16.msra.mxu1 %v12430_v11  ;;  %v12469_v11 = vld [vmem:[%s14917_s23 + $0xf0] sm:$0xff]  }
0x1b44   :  { %11344 = vmatprep.subr.bf16.mxu1 %v12946_v41 }
0x1b47   :  { %11345 = vmatpush3.bf16.msra.mxu1 %v12431_v26  ;;  %v12471_v26 = vld [vmem:[%s14917_s23 + $0x78] sm:$0xff]  }
0x1b48   :  { %11346 = vmatprep.subr.bf16.mxu1 %v12946_v41 }
0x1b4b   :  { %11347 = vmatpush3.bf16.msra.mxu1 %v12432_v37  ;;  %v12470_v37 = vld [vmem:[%s14917_s23 + $0xb0] sm:$0xff]  }
0x1b4c   :  { %11352 = vmatprep.subr.bf16.mxu1 %v12946_v41 }
0x1bf9   :  { %v7155_v39 = vpop.f32.mrb[52].mxu1 }
0x1bfa   :  { %v11324_v27 = vpop.f32.mrb[53].mxu1 }
0x1bfb   :  { %v7158_v42 = vpop.f32.mrb[54].mxu1  ;;  %v12473_v27 = vld [vmem:[%s14917_s23 + $0xf8] sm:$0xff]  }
0x1bfc   :  { %v11325_v54 = vpop.f32.mrb[55].mxu1  ;;  %v12476_v42 = vld [vmem:[%s14917_s23 + $0xb8] sm:$0xff]  }
0x1bfd   :  { %v12479_v54 = vld [vmem:[%s14917_s23 + $0x140] sm:$0xff]  }
0x1c01   :  { %v7199_v48 = vpop.f32.mrb[56].mxu1 }
0x1c02   :  { %v7205_v51 = vmax.f32 %v7155_v39, %v7199_v48  ;;  %v11330_v16 = vpop.f32.mrb[57].mxu1  ;;  %v12472_v39 = vld [vmem:[%s14917_s23 + $0x38] sm:$0xff]  }
0x1c03   :  { %v7202_v3 = vpop.f32.mrb[58].mxu1 }
0x1c04   :  { %v7206_v13 = vpack.c.bf16 %v7205_v51, %v7205_v51  ;;  %v11331_v6 = vpop.f32.mrb[59].mxu1 }
0x1c06   :  { %11349 = vmatmul.mubr.bf16.vlgmr.msra.gmra.mrb[60].mxu1 %v7206_v13 }
0x1c07   :  { %11353 = vmatpush3.bf16.msra.mxu1 %v12433_v4  ;;  %11368 = vmatprep.mubr.msk.bf16.mxu1 %vm12947_vm0, %v12946_v41 }
0x1c08   :  { %11354 = vmatprep.subr.bf16.mxu1 %v12946_v41 }
0x1c0b   :  { %11355 = vmatpush3.bf16.msra.mxu1 %v12434_v24 }
0x1c0c   :  { %11356 = vmatprep.subr.bf16.mxu1 %v12946_v41 }
0x1c0f   :  { %11357 = vmatpush3.bf16.msra.mxu1 %v12435_v31 }
0x1c10   :  { %11358 = vmatprep.subr.bf16.mxu1 %v12946_v41 }
0x1c13   :  { %11359 = vmatpush3.bf16.msra.mxu1 %v12436_v55 }
0x1c14   :  { %11360 = vmatprep.subr.bf16.mxu1 %v12946_v41 }
0x1c17   :  { %11361 = vmatpush3.bf16.msra.mxu1 %v12437_v18 }
0x1c18   :  { %11362 = vmatprep.subr.bf16.mxu1 %v12946_v41 }
0x1c1b   :  { %11363 = vmatpush3.bf16.msra.mxu1 %v12438_v22 }
0x1c1c   :  { %11364 = vmatprep.subr.bf16.mxu1 %v12946_v41 }
0x1c1f   :  { %11365 = vmatpush3.bf16.msra.mxu1 %v12439_v60 }
0x1c20   :  { %11366 = vmatprep.subr.bf16.mxu1 %v12946_v41 }
0x1c23   :  { %11367 = vmatpush3.bf16.msra.mxu1 %v12440_v38 }
0x1c24   :  { %11372 = vmatprep.subr.bf16.mxu1 %v12946_v41 }
0x1c26   :  { %11369 = vmatmul.mubr.bf16.vlgmr.msra.gmra.mrb[64].mxu1 %v7206_v13  ;;  %v10201_v13 = vld [vmem:[#allocation15] ss:$0 sm:$0xff] }
0x1c27   :  { %11374 = vmatprep.mubr.msk.bf16.mxu1 %vm12947_vm0, %v12946_v41 }
0x1cd9   :  { %v7305_v15 = vpop.f32.mrb[60].mxu1 }
0x1cda   :  { %v7311_v34 = vpack.c.bf16 %v7305_v15, %v7305_v15  ;;  %v11350_v45 = vpop.f32.mrb[61].mxu1 }
0x1cdb   :  { %v7308_v2 = vpop.f32.mrb[62].mxu1 }
0x1cdc   :  { %v7484_v43 = vsel %vm7430_vm14, %v7311_v34, 0  ;;  %v11351_v28 = vpop.f32.mrb[63].mxu1 }
0x1cdd   :  { %11379 = vmatpush3.bf16.msra.mxu0 %v7484_v43 }
0x1cde   :  { %10958 = vmatprep.subr.bf16.mxu0 %v12443_v25 }
0x1ce0   :  { %11381 = vmatmul.mubr.msk.bf16.vlgmr.msra.gmra.mrb[64].mxu0 %vm1625_vm10, %v12441_v56 }
0x1ce1   :  { %10959 = vmatpush3.bf16.msra.mxu0 %v12444_v30 }
0x1ce2   :  { %10960 = vmatprep.subr.bf16.mxu0 %v12447_v44 }
0x1ce5   :  { %10961 = vmatpush3.bf16.msra.mxu0 %v12448_v35 }
0x1ce6   :  { %10962 = vmatprep.subr.bf16.mxu0 %v12451_v58 }
0x1ce9   :  { %10963 = vmatpush3.bf16.msra.mxu0 %v12452_v52 }
0x1cea   :  { %10964 = vmatprep.subr.bf16.mxu0 %v12455_v9  ;;  %v12482_v9 = vld [vmem:[%s14917_s23 + $0x100] sm:$0xff]  }
0x1ced   :  { %10965 = vmatpush3.bf16.msra.mxu0 %v12456_v62 }
0x1cee   :  { %10966 = vmatprep.subr.bf16.mxu0 %v12459_v8 }
0x1cf1   :  { %10967 = vmatpush3.bf16.msra.mxu0 %v12460_v7  ;;  %v12486_v7 = vld [vmem:[%s14917_s23 + $0x108] sm:$0xff]  }
0x1cf2   :  { %10968 = vmatprep.subr.bf16.mxu0 %v12463_v29  ;;  %v12489_v29 = vld [vmem:[%s14917_s23 + $0x158] sm:$0xff]  }
0x1cf5   :  { %10969 = vmatpush3.bf16.msra.mxu0 %v12464_v23  ;;  %v12490_v23 = vld [vmem:[%s14917_s23 + $0x118] sm:$0xff]  }
0x1cf6   :  { %10970 = vmatprep.subr.bf16.mxu0 %v12467_v53  ;;  %v12493_v53 = vld [vmem:[%s14917_s23 + $0x168] sm:$0xff]  }
0x1cf9   :  { %v7411_v61 = vpop.f32.mrb[64].mxu1  ;;  %10971 = vmatpush3.bf16.msra.mxu0 %v12468_v20  ;;  %v12494_v20 = vld [vmem:[%s14917_s23 + $0x128] sm:$0xff]  }
0x1cfa   :  { %v7417_v63 = vpack.c.bf16 %v7411_v61, %v7411_v61  ;;  %v11370_v46 = vpop.f32.mrb[65].mxu1  ;;  %10972 = vmatprep.subr.bf16.mxu0 %v12471_v26  ;;  %v12496_v26 = vld [vmem:[%s14917_s23 + $0x130] sm:$0xff]  }
0x1cfb   :  { %v7414_v0 = vpop.f32.mrb[66].mxu1 }
0x1cfc   :  { %v7432_v57 = vsel %vm7430_vm14, %v7417_v63, 0  ;;  %v11371_v50 = vpop.f32.mrb[67].mxu1 }
0x1cfd   :  { %11373 = vmatpush3.bf16.msra.mxu1 %v7432_v57  ;;  %10973 = vmatpush3.bf16.msra.mxu0 %v12472_v39 }
0x1cfe   :  { %10936 = vmatprep.subr.bf16.mxu1 %v12445_v17  ;;  %11384 = vmatprep.subr.bf16.mxu0 %v12946_v41 }
0x1d00   :  { %11375 = vmatmul.mubr.msk.bf16.vlgmr.msra.gmra.mrb[68].mxu1 %vm1625_vm10, %v12442_v33 }
0x1d01   :  { %10937 = vmatpush3.bf16.msra.mxu1 %v12446_v21 }
0x1d02   :  { %10938 = vmatprep.subr.bf16.mxu1 %v12449_v36 }
0x1d05   :  { %10939 = vmatpush3.bf16.msra.mxu1 %v12450_v47 }
0x1d06   :  { %10940 = vmatprep.subr.bf16.mxu1 %v12453_v12 }
0x1d09   :  { %10941 = vmatpush3.bf16.msra.mxu1 %v12454_v59 }
0x1d0a   :  { %10942 = vmatprep.subr.bf16.mxu1 %v12457_v1 }
0x1d0d   :  { %10943 = vmatpush3.bf16.msra.mxu1 %v12458_v5  ;;  %v12485_v5 = vld [vmem:[%s14917_s23 + $0x148] sm:$0xff]  }
0x1d0e   :  { %10944 = vmatprep.subr.bf16.mxu1 %v12461_v19  ;;  %v12487_v19 = vld [vmem:[%s14917_s23 + $0x150] sm:$0xff]  }
0x1d11   :  { %10945 = vmatpush3.bf16.msra.mxu1 %v12462_v14  ;;  %v12488_v14 = vld [vmem:[%s14917_s23 + $0x110] sm:$0xff]  }
0x1d12   :  { %10946 = vmatprep.subr.bf16.mxu1 %v12465_v49  ;;  %v12491_v49 = vld [vmem:[%s14917_s23 + $0x160] sm:$0xff]  }
0x1d15   :  { %10947 = vmatpush3.bf16.msra.mxu1 %v12466_v10  ;;  %v12492_v10 = vld [vmem:[%s14917_s23 + $0x120] sm:$0xff]  }
0x1d16   :  { %10948 = vmatprep.subr.bf16.mxu1 %v12469_v11  ;;  %v12495_v11 = vld [vmem:[%s14917_s23 + $0x170] sm:$0xff]  }
0x1d19   :  { %10949 = vmatpush3.bf16.msra.mxu1 %v12470_v37  ;;  %v12497_v37 = vld [vmem:[%s14917_s23 + $0x178] sm:$0xff]  }
0x1d1a   :  { %10950 = vmatprep.subr.bf16.mxu1 %v12473_v27 }
0x1d1d   :  { %10951 = vmatpush3.bf16.msra.mxu1 %v12476_v42  ;;  %v12498_v42 = vld [vmem:[%s14917_s23 + $0x138] sm:$0xff]  }
0x1d1e   :  { %10980 = vmatprep.subr.bf16.mxu1 %v12479_v54 }
0x1db3   :  { %v7520_v48 = vpop.f32.mrb[64].mxu0 }
0x1db4   :  { %v11382_v51 = vpop.f32.mrb[65].mxu0 }
0x1db5   :  { %v7523_v16 = vpop.f32.mrb[66].mxu0 }
0x1db6   :  { %v11383_v3 = vpop.f32.mrb[67].mxu0 }
0x1db7   :  { %v12502_v3 = vld [vmem:[%s14920_s27 + $0x40] sm:$0xff]  }
0x1dd3   :  { %v7468_v4 = vpop.f32.mrb[68].mxu1 }
0x1dd4   :  { %v7521_v6 = vadd.f32 %v7520_v48, %v7468_v4  ;;  %v11376_v24 = vpop.f32.mrb[69].mxu1  ;;  %v12503_v4 = vld [vmem:[%s14920_s27 + $0x8] sm:$0xff]  }
0x1dd5   :  { %v7471_v31 = vpop.f32.mrb[70].mxu1  ;;  %v12506_v24 = vld [vmem:[%s14920_s27 + $0x50] sm:$0xff]  }
0x1dd6   :  { %v7534_v55 = vadd.f32 %v10201_v13, %v7521_v6  ;;  %v7524_v18 = vadd.f32 %v7523_v16, %v7471_v31  ;;  %v11377_v22 = vpop.f32.mrb[71].mxu1  ;;  %v12501_v16 = vld [vmem:[%s14920_s27] sm:$0xff]   ;;  %v12505_v6 = vld [vmem:[%s14920_s27 + $0x10] sm:$0xff]   ;;  %v12507_v31 = vld [vmem:[%s14920_s27 + $0x18] sm:$0xff]  }
0x1dd7   :  { %v12510_v22 = vld [vmem:[%s14920_s27 + $0x60] sm:$0xff]  }
0x1dd8   :  { %v10526_v60 = vpack.c.bf16 %v7534_v55, %v7534_v55  ;;  %v7535_v38 = vadd.f32 %v10201_v13, %v7524_v18  ;;  %v12504_v13 = vld [vmem:[%s14920_s27 + $0x48] sm:$0xff]   ;;  %v12508_v55 = vld [vmem:[%s14920_s27 + $0x58] sm:$0xff]   ;;  %v12509_v18 = vld [vmem:[%s14920_s27 + $0x20] sm:$0xff]  }
0x1dda   :  { %v7544_v15 = vrot.slane %v10526_v60, 7  ;;  %v10527_v34 = vpack.c.bf16 %v7535_v38, %v7535_v38  ;;  %v12511_v60 = vld [vmem:[%s14920_s27 + $0x28] sm:$0xff]  }
0x1ddb   :  { %v12512_v38 = vld [vmem:[%s14920_s27 + $0x68] sm:$0xff]  }
0x1ddc   :  { %v7545_v45 = vrot.slane %v7544_v15, 4  ;;  %7552 = vst [vmem:[#allocation6] sm:$0xe] %v7544_v15  ;;  %v7546_v25 = vrot.slane %v10527_v34, 7  ;;  %v12513_v15 = vld [vmem:[%s14920_s27 + $0x30] sm:$0xff]  }
0x1ddd   :  { %v12514_v34 = vld [vmem:[%s14920_s27 + $0x70] sm:$0xff]  }
0x1dde   :  { %v7547_v2 = vsel %vm13558_vm12, %v7545_v45, %v7546_v25  ;;  %v7548_v43 = vrot.slane %v7546_v25, 4  ;;  %v12515_v45 = vld [vmem:[%s14920_s27 + $0x38] sm:$0xff]  }
0x1ddf   :  { %7553 = vst [vmem:[#allocation6 + $0x8] sm:$0xf] %v7547_v2  ;;  %v12516_v25 = vld [vmem:[%s14920_s27 + $0x78] sm:$0xff]  }
0x1de0   :  { %7554 = vst [vmem:[#allocation6 + $0x10] sm:$0x1] %v7548_v43 }
0x1de3   :  { %v7558_v28 = vld [vmem:[#allocation6] sm:$0xff] }
0x1de4   :  { %v7592_v30 = vld [vmem:[#allocation6] sm:$0xee] }
0x1de5   :  { %v7929_v17 = vld [vmem:[#allocation6] sm:$0xcc] }
0x1de6   :  { %v7559_v56 = vld [vmem:[#allocation6 + $0x8] sm:$0xff] }
0x1de7   :  { %v10256_v44 = vcombine.low %v7558_v28, %v7559_v56  ;;  %v10257_v35 = vcombine.high %v7558_v28, %v7559_v56  ;;  %v7593_v61 = vld [vmem:[#allocation6 + $0x10] sm:$0x11]  ;;  %v10237_v63 = vcombine.high %v7592_v30, %v7559_v56  ;;  %v10236_v46 = vcombine.low %v7592_v30, %v7559_v56 }
0x1de8   :  { %v7930_v0 = vld [vmem:[#allocation6 + $0x10] sm:$0x33]  ;;  %v10239_v57 = vcombine.high %v7593_v61, %v7593_v61  ;;  %v10238_v50 = vcombine.low %v7593_v61, %v7593_v61  ;;  %v10307_v33 = vcombine.high %v7929_v17, %v7559_v56  ;;  %v10306_v39 = vcombine.low %v7929_v17, %v7559_v56 }
0x1de9   :  { %v10309_v21 = vcombine.high %v7930_v0, %v7930_v0  ;;  %7920 = vmatprep.mubr.bf16.mxu0 %v10257_v35  ;;  %v7643_v36 = vrot.slane %v10237_v63, 1  ;;  %v7640_v47 = vrot.slane %v10236_v46, 1  ;;  %v10308_v27 = vcombine.low %v7930_v0, %v7930_v0 }
0x1dea   :  { %7921 = vmatmul.mubr.bf16.vlgmr.msra.gmra.mrb[68].mxu0 %v10256_v44  ;;  %v7644_v58 = vrot.slane %v10239_v57, 1  ;;  %v7641_v52 = vrot.slane %v10238_v50, 1  ;;  %v7977_v12 = vrot.slane %v10307_v33, 2  ;;  %v7974_v54 = vrot.slane %v10306_v39, 2 }
0x1deb   :  { %v7978_v59 = vrot.slane %v10309_v21, 2  ;;  %11400 = vmatprep.mubr.msk.bf16.mxu0 %vm12947_vm0, %v12946_v41  ;;  %v7975_v48 = vrot.slane %v10308_v27, 2  ;;  %11385 = vmatpush3.bf16.msra.mxu0 %v12501_v16  ;;  %v12520_v16 = vld [vmem:[%s14923_s1 + $0x8] sm:$0xff]  }
0x1dec   :  { %v7645_v62 = vsel %vm1233_vm7, %v7643_v36, %v7644_v58  ;;  %v7642_v1 = vsel %vm1233_vm7, %v7640_v47, %v7641_v52  ;;  %11386 = vmatprep.subr.bf16.mxu0 %v12946_v41 }
0x1ded   :  { %7776 = vmatprep.mubr.bf16.mxu1 %v7645_v62  ;;  %v7979_v8 = vsel %vm1389_vm8, %v7977_v12, %v7978_v59  ;;  %v7976_v51 = vsel %vm1389_vm8, %v7974_v54, %v7975_v48  ;;  %v10326_v12 = vld [vmem:[#allocation17] ss:$0 sm:$0xff]  ;;  %v12518_v54 = vld [vmem:[%s14921_s26 + $0x8] sm:$0xff]  }
0x1dee   :  { %7777 = vmatmul.mubr.bf16.vlgmr.msra.gmra.mrb[72].mxu1 %v7642_v1  ;;  %v12519_v48 = vld [vmem:[%s14923_s1] sm:$0xff]  }
0x1def   :  { %10981 = vmatpush3.bf16.msra.mxu1 %v12482_v9  ;;  %8110 = vmatprep.mubr.bf16.mxu1 %v7979_v8  ;;  %v12521_v8 = vld [vmem:[%s14922_s28 + $0x40] sm:$0xff]  }
0x1df0   :  { %10982 = vmatprep.subr.bf16.mxu1 %v12485_v5  ;;  %11387 = vmatpush3.bf16.msra.mxu0 %v12503_v4  ;;  %v12517_v5 = vld [vmem:[%s14921_s26] sm:$0xff]   ;;  %v12527_v4 = vld [vmem:[%s14922_s28 + $0xc8] sm:$0xff]  }
0x1df1   :  { %11388 = vmatprep.subr.bf16.mxu0 %v12946_v41 }
0x1df3   :  { %10983 = vmatpush3.bf16.msra.mxu1 %v12486_v7  ;;  %v12522_v7 = vld [vmem:[%s14922_s28] sm:$0xff]  }
0x1df4   :  { %10984 = vmatprep.subr.bf16.mxu1 %v12487_v19  ;;  %11389 = vmatpush3.bf16.msra.mxu0 %v12505_v6  ;;  %v12524_v19 = vld [vmem:[%s14922_s28 + $0x48] sm:$0xff]   ;;  %v12531_v6 = vld [vmem:[%s14922_s28 + $0xd0] sm:$0xff]  }
0x1df5   :  { %11390 = vmatprep.subr.bf16.mxu0 %v12946_v41 }
0x1df7   :  { %10985 = vmatpush3.bf16.msra.mxu1 %v12488_v14  ;;  %v12526_v14 = vld [vmem:[%s14922_s28 + $0x8] sm:$0xff]  }
0x1df8   :  { %10986 = vmatprep.subr.bf16.mxu1 %v12489_v29  ;;  %11391 = vmatpush3.bf16.msra.mxu0 %v12507_v31  ;;  %v12528_v29 = vld [vmem:[%s14922_s28 + $0x50] sm:$0xff]  }
0x1df9   :  { %11392 = vmatprep.subr.bf16.mxu0 %v12946_v41  ;;  %v12533_v31 = vld [vmem:[%s14922_s28 + $0x90] sm:$0xff]  }
0x1dfb   :  { %10987 = vmatpush3.bf16.msra.mxu1 %v12490_v23  ;;  %v12530_v23 = vld [vmem:[%s14922_s28 + $0x10] sm:$0xff]  }
0x1dfc   :  { %10988 = vmatprep.subr.bf16.mxu1 %v12491_v49  ;;  %11393 = vmatpush3.bf16.msra.mxu0 %v12509_v18  ;;  %v12535_v18 = vld [vmem:[%s14922_s28 + $0xd8] sm:$0xff]  }
0x1dfd   :  { %11394 = vmatprep.subr.bf16.mxu0 %v12946_v41 }
0x1dff   :  { %10989 = vmatpush3.bf16.msra.mxu1 %v12492_v10 }
0x1e00   :  { %10990 = vmatprep.subr.bf16.mxu1 %v12493_v53  ;;  %11395 = vmatpush3.bf16.msra.mxu0 %v12511_v60  ;;  %v12537_v60 = vld [vmem:[%s14922_s28 + $0x98] sm:$0xff]  }
0x1e01   :  { %11396 = vmatprep.subr.bf16.mxu0 %v12946_v41 }
0x1e03   :  { %10991 = vmatpush3.bf16.msra.mxu1 %v12494_v20 }
0x1e04   :  { %10992 = vmatprep.subr.bf16.mxu1 %v12495_v11  ;;  %11397 = vmatpush3.bf16.msra.mxu0 %v12513_v15  ;;  %v12539_v15 = vld [vmem:[%s14922_s28 + $0xe0] sm:$0xff]  }
0x1e05   :  { %11398 = vmatprep.subr.bf16.mxu0 %v12946_v41 }
0x1e07   :  { %10993 = vmatpush3.bf16.msra.mxu1 %v12496_v26 }
0x1e08   :  { %10994 = vmatprep.subr.bf16.mxu1 %v12497_v37  ;;  %11399 = vmatpush3.bf16.msra.mxu0 %v12515_v45  ;;  %v12541_v45 = vld [vmem:[%s14922_s28 + $0xa0] sm:$0xff]  }
0x1e0b   :  { %10995 = vmatpush3.bf16.msra.mxu1 %v12498_v42 }
0x1e0c   :  { %11404 = vmatprep.subr.bf16.mxu1 %v12946_v41 }
0x1e0e   :  { %8111 = vmatmul.mubr.bf16.vlgmr.msra.gmra.mrb[76].mxu1 %v7976_v51  ;;  %v12523_v51 = vld [vmem:[%s14922_s28 + $0xc0] sm:$0xff]  }
0x1e0f   :  { %11420 = vmatprep.mubr.msk.bf16.mxu1 %vm12947_vm0, %v12946_v41  ;;  %11405 = vmatpush3.bf16.msra.mxu1 %v12502_v3  ;;  %v12525_v3 = vld [vmem:[%s14922_s28 + $0x80] sm:$0xff]  }
0x1e10   :  { %11406 = vmatprep.subr.bf16.mxu1 %v12946_v41 }
0x1e13   :  { %11407 = vmatpush3.bf16.msra.mxu1 %v12504_v13  ;;  %v12529_v13 = vld [vmem:[%s14922_s28 + $0x88] sm:$0xff]  }
0x1e14   :  { %11408 = vmatprep.subr.bf16.mxu1 %v12946_v41 }
0x1e17   :  { %11409 = vmatpush3.bf16.msra.mxu1 %v12506_v24  ;;  %v12532_v24 = vld [vmem:[%s14922_s28 + $0x58] sm:$0xff]  }
0x1e18   :  { %11410 = vmatprep.subr.bf16.mxu1 %v12946_v41 }
0x1e1b   :  { %11411 = vmatpush3.bf16.msra.mxu1 %v12508_v55  ;;  %v12534_v55 = vld [vmem:[%s14922_s28 + $0x18] sm:$0xff]  }
0x1e1c   :  { %11412 = vmatprep.subr.bf16.mxu1 %v12946_v41 }
0x1e1f   :  { %11413 = vmatpush3.bf16.msra.mxu1 %v12510_v22  ;;  %v12536_v22 = vld [vmem:[%s14922_s28 + $0x60] sm:$0xff]  }
0x1e20   :  { %11414 = vmatprep.subr.bf16.mxu1 %v12946_v41 }
0x1e23   :  { %11415 = vmatpush3.bf16.msra.mxu1 %v12512_v38  ;;  %v12538_v38 = vld [vmem:[%s14922_s28 + $0x20] sm:$0xff]  }
0x1e24   :  { %11416 = vmatprep.subr.bf16.mxu1 %v12946_v41 }
0x1e27   :  { %11417 = vmatpush3.bf16.msra.mxu1 %v12514_v34  ;;  %v12540_v34 = vld [vmem:[%s14922_s28 + $0x68] sm:$0xff]  }
0x1e28   :  { %11418 = vmatprep.subr.bf16.mxu1 %v12946_v41 }
0x1e2b   :  { %11419 = vmatpush3.bf16.msra.mxu1 %v12516_v25  ;;  %v12542_v25 = vld [vmem:[%s14922_s28 + $0x28] sm:$0xff]  }
0x1e2c   :  { %11054 = vmatprep.subr.bf16.mxu1 %v12521_v8 }
0x1ebd   :  { %v10974_v2 = vpop.f32.mrb[68].mxu0 }
0x1ebe   :  { %v10975_v43 = vpop.f32.mrb[69].mxu0 }
0x1ebf   :  { %v10976_v28 = vadd.f32 %v10975_v43, %v10974_v2  ;;  %v10977_v56 = vpop.f32.mrb[70].mxu0  ;;  %v12543_v2 = vld [vmem:[%s14922_s28 + $0xe8] sm:$0xff]   ;;  %v12544_v43 = vld [vmem:[%s14922_s28 + $0x70] sm:$0xff]  }
0x1ec0   :  { %v10978_v30 = vpop.f32.mrb[71].mxu0 }
0x1ec1   :  { %v10979_v44 = vadd.f32 %v10978_v30, %v10977_v56  ;;  %v10952_v35 = vpop.f32.mrb[72].mxu1  ;;  %v12546_v56 = vld [vmem:[%s14922_s28 + $0x30] sm:$0xff]  }
0x1ec2   :  { %v10953_v61 = vpop.f32.mrb[73].mxu1  ;;  %v12547_v30 = vld [vmem:[%s14922_s28 + $0xf0] sm:$0xff]  }
0x1ec3   :  { %v10954_v63 = vadd.f32 %v10953_v61, %v10952_v35  ;;  %v10955_v46 = vpop.f32.mrb[74].mxu1  ;;  %v12549_v35 = vld [vmem:[%s14922_s28 + $0xb0] sm:$0xff]   ;;  %v12550_v61 = vld [vmem:[%s14922_s28 + $0x38] sm:$0xff]  }
0x1ec4   :  { %v10956_v17 = vpop.f32.mrb[75].mxu1 }
0x1ec5   :  { %v7923_v0 = vadd.f32 %v10976_v28, %v10954_v63  ;;  %v10957_v57 = vadd.f32 %v10956_v17, %v10955_v46  ;;  %v12545_v28 = vld [vmem:[%s14922_s28 + $0xa8] sm:$0xff]   ;;  %v12553_v63 = vld [vmem:[%s14922_s28 + $0xf8] sm:$0xff]   ;;  %v12559_v17 = vld [vmem:[%s14922_s28 + $0x140] sm:$0xff]  }
0x1ec6   :  { %v12554_v46 = vld [vmem:[%s14922_s28 + $0xb8] sm:$0xff]  }
0x1ec7   :  { %v7926_v50 = vadd.f32 %v10979_v44, %v10957_v57  ;;  %v12548_v44 = vld [vmem:[%s14922_s28 + $0x78] sm:$0xff]  }
0x1ee1   :  { %v10996_v41 = vpop.f32.mrb[76].mxu1 }
0x1ee2   :  { %v10997_v33 = vpop.f32.mrb[77].mxu1 }
0x1ee3   :  { %v10998_v21 = vadd.f32 %v10997_v33, %v10996_v41  ;;  %v10999_v36 = vpop.f32.mrb[78].mxu1 }
0x1ee4   :  { %v11000_v47 = vpop.f32.mrb[79].mxu1 }
0x1ee5   :  { %v8119_v58 = vadd.f32 %v10998_v21, %v7923_v0  ;;  %v11001_v52 = vadd.f32 %v11000_v47, %v10999_v36  ;;  %v10367_v0 = vld [vmem:[#allocation18] ss:$0 sm:$0xff] }
0x1ee7   :  { %v8120_v59 = vadd.f32 %v11001_v52, %v7926_v50  ;;  %v8128_v9 = vadd.f32 %v10326_v12, %v8119_v58 }
0x1ee9   :  { %v8129_v62 = vadd.f32 %v10326_v12, %v8120_v59 }
0x1eeb   :  { %v8130_v1 = vpack.c.bf16 %v8129_v62, %v8128_v9 }
0x1eed   :  { %11401 = vmatmul.mubr.bf16.vlgmr.msra.gmra.mrb[72].mxu0 %v8130_v1  ;;  %11421 = vmatmul.mubr.bf16.vlgmr.msra.gmra.mrb[80].mxu1 %v8130_v1 }
0x1eee   :  { %11426 = vmatprep.mubr.msk.bf16.mxu0 %vm3146_vm13, %v12517_v5  ;;  %11055 = vmatpush3.bf16.msra.mxu1 %v12522_v7 }
0x1eef   :  { %11056 = vmatprep.subr.bf16.mxu1 %v12524_v19 }
0x1ef2   :  { %11057 = vmatpush3.bf16.msra.mxu1 %v12526_v14 }
0x1ef3   :  { %11058 = vmatprep.subr.bf16.mxu1 %v12528_v29 }
0x1ef6   :  { %11059 = vmatpush3.bf16.msra.mxu1 %v12530_v23 }
0x1ef7   :  { %11060 = vmatprep.subr.bf16.mxu1 %v12532_v24 }
0x1efa   :  { %11061 = vmatpush3.bf16.msra.mxu1 %v12534_v55  ;;  %v12563_v55 = vld [vmem:[%s14922_s28 + $0x148] sm:$0xff]  }
0x1efb   :  { %11062 = vmatprep.subr.bf16.mxu1 %v12536_v22 }
0x1efe   :  { %11063 = vmatpush3.bf16.msra.mxu1 %v12538_v38 }
0x1eff   :  { %11064 = vmatprep.subr.bf16.mxu1 %v12540_v34  ;;  %v12565_v34 = vld [vmem:[%s14922_s28 + $0x150] sm:$0xff]  }
0x1f02   :  { %11065 = vmatpush3.bf16.msra.mxu1 %v12542_v25 }
0x1f03   :  { %11066 = vmatprep.subr.bf16.mxu1 %v12544_v43  ;;  %v12567_v43 = vld [vmem:[%s14922_s28 + $0x110] sm:$0xff]  }
0x1f06   :  { %11067 = vmatpush3.bf16.msra.mxu1 %v12546_v56 }
0x1f07   :  { %11068 = vmatprep.subr.bf16.mxu1 %v12548_v44  ;;  %v12571_v44 = vld [vmem:[%s14922_s28 + $0x118] sm:$0xff]  }
0x1f0a   :  { %11069 = vmatpush3.bf16.msra.mxu1 %v12550_v61  ;;  %v12573_v61 = vld [vmem:[%s14922_s28 + $0x120] sm:$0xff]  }
0x1fc0   :  { %v8229_v49 = vpop.f32.mrb[72].mxu0  ;;  %v8336_v10 = vpop.f32.mrb[80].mxu1 }
0x1fc1   :  { %v11402_v53 = vpop.f32.mrb[73].mxu0  ;;  %v11422_v20 = vpop.f32.mrb[81].mxu1 }
0x1fc2   :  { %v8232_v11 = vpop.f32.mrb[74].mxu0  ;;  %v8339_v26 = vpop.f32.mrb[82].mxu1 }
0x1fc3   :  { %v8236_v37 = vpack.c.bf16 %v8232_v11, %v8229_v49  ;;  %v8343_v39 = vpack.c.bf16 %v8339_v26, %v8336_v10  ;;  %v11403_v27 = vpop.f32.mrb[75].mxu0  ;;  %v11423_v42 = vpop.f32.mrb[83].mxu1 }
0x1fc5   :  { %11424 = vmatprep.subr.bf16.mxu0 %v8343_v39 }
0x1fc6   :  { %11425 = vmatpush3.bf16.msra.mxu0 %v8343_v39 }
0x1fc7   :  { %11430 = vmatprep.subr.bf16.mxu0 %v8236_v37 }
0x1fc9   :  { %11427 = vmatmul.mubr.msk.bf16.vlgmr.msra.gmra.mrb[76].mxu0 %vm3146_vm13, %v12518_v54 }
0x1fca   :  { %11431 = vmatpush3.bf16.msra.mxu0 %v8236_v37  ;;  %11432 = vmatprep.mubr.msk.bf16.mxu0 %vm3146_vm13, %v12519_v48 }
0x1fcb   :  { %11026 = vmatprep.subr.bf16.mxu0 %v12523_v51 }
0x1fd5   :  { %11433 = vmatmul.mubr.msk.bf16.vlgmr.msra.gmra.mrb[76].mxu0 %vm3146_vm13, %v12520_v16 }
0x1fd6   :  { %11027 = vmatpush3.bf16.msra.mxu0 %v12525_v3  ;;  %v8629_v3 = vrot.slane %v14762_v32, 1 }
0x1fd7   :  { %11028 = vmatprep.subr.bf16.mxu0 %v12527_v4 }
0x1fda   :  { %11029 = vmatpush3.bf16.msra.mxu0 %v12529_v13 }
0x1fdb   :  { %11030 = vmatprep.subr.bf16.mxu0 %v12531_v6  ;;  %v12561_v6 = vld [vmem:[%s14922_s28 + $0x100] sm:$0xff]  }
0x1fde   :  { %11031 = vmatpush3.bf16.msra.mxu0 %v12533_v31 }
0x1fdf   :  { %11032 = vmatprep.subr.bf16.mxu0 %v12535_v18 }
0x1fe2   :  { %11033 = vmatpush3.bf16.msra.mxu0 %v12537_v60 }
0x1fe3   :  { %11034 = vmatprep.subr.bf16.mxu0 %v12539_v15  ;;  %v12564_v15 = vld [vmem:[%s14922_s28 + $0x108] sm:$0xff]  }
0x1fe6   :  { %11035 = vmatpush3.bf16.msra.mxu0 %v12541_v45 }
0x1fe7   :  { %11036 = vmatprep.subr.bf16.mxu0 %v12543_v2  ;;  %v8987_v2 = vrot.slane %v14762_v32, 2 }
0x1fea   :  { %11037 = vmatpush3.bf16.msra.mxu0 %v12545_v28  ;;  %v12570_v28 = vld [vmem:[%s14922_s28 + $0x158] sm:$0xff]  }
0x1feb   :  { %11038 = vmatprep.subr.bf16.mxu0 %v12547_v30 }
0x1fee   :  { %11039 = vmatpush3.bf16.msra.mxu0 %v12549_v35  ;;  %v12572_v35 = vld [vmem:[%s14922_s28 + $0x160] sm:$0xff]  }
0x1fef   :  { %11040 = vmatprep.subr.bf16.mxu0 %v12553_v63  ;;  %v12574_v63 = vld [vmem:[%s14922_s28 + $0x168] sm:$0xff]  }
0x1ff2   :  { %11041 = vmatpush3.bf16.msra.mxu0 %v12554_v46  ;;  %v12575_v46 = vld [vmem:[%s14922_s28 + $0x128] sm:$0xff]  }
0x1ff3   :  { %11082 = vmatprep.subr.bf16.mxu0 %v12559_v17  ;;  %v12576_v17 = vld [vmem:[%s14922_s28 + $0x170] sm:$0xff]  }
0x20a8   :  { %v11434_v57 = vpop.f32.mrb[76].mxu0 }
0x20a9   :  { %v8491_v50 = vadd.f32 %v11434_v57, %v10367_v0  ;;  %v8467_v41 = vpop.f32.mrb[77].mxu0 }
0x20aa   :  { %v8489_v33 = vadd.f32 %v10367_v0, %v8467_v41  ;;  %v11435_v21 = vpop.f32.mrb[78].mxu0 }
0x20ab   :  { %v10530_v36 = vpack.c.bf16 %v8491_v50, %v8491_v50  ;;  %v8492_v47 = vadd.f32 %v11435_v21, %v10367_v0  ;;  %v8470_v58 = vpop.f32.mrb[79].mxu0  ;;  %v12578_v50 = vld [vmem:[%s14922_s28 + $0x178] sm:$0xff]  }
0x20ac   :  { %v10528_v52 = vpack.c.bf16 %v8489_v33, %v8489_v33  ;;  %v8490_v12 = vadd.f32 %v10367_v0, %v8470_v58  ;;  %v12577_v0 = vld [vmem:[%s14922_s28 + $0x130] sm:$0xff]   ;;  %v12579_v21 = vld [vmem:[%s14922_s28 + $0x138] sm:$0xff]  }
0x20ad   :  { %v8512_v59 = vrot.slane %v10530_v36, 7  ;;  %v10531_v9 = vpack.c.bf16 %v8492_v47, %v8492_v47 }
0x20ae   :  { %v8507_v62 = vrot.slane %v10528_v52, 7  ;;  %v10529_v1 = vpack.c.bf16 %v8490_v12, %v8490_v12 }
0x20af   :  { %v8514_v5 = vrot.slane %v8512_v59, 4  ;;  %v8515_v8 = vrot.slane %v10531_v9, 7 }
0x20b0   :  { %v8508_v7 = vrot.slane %v8507_v62, 4  ;;  %8523 = vst [vmem:[#allocation4] sm:$0xe] %v8507_v62  ;;  %v8509_v19 = vrot.slane %v10529_v1, 7  ;;  %v12582_v1 = vld [vmem:[%s13257_s4] sm:$0xff]  }
0x20b1   :  { %v8516_v14 = vsel %vm13558_vm12, %v8514_v5, %v8515_v8  ;;  %v8517_v29 = vrot.slane %v8515_v8, 4  ;;  %v12583_v5 = vld [vmem:[%s13257_s4 + $0x8] sm:$0xff]   ;;  %11436 = vmatprep.subr.bf16.mxu1 %v12582_v1  ;;  %v12584_v8 = vld [vmem:[%s13257_s4 + $0x10] sm:$0xff]  }
0x20b2   :  { %8526 = vst [vmem:[#allocation4 + $0x18] sm:$0xf] %v8516_v14  ;;  %v8510_v23 = vsel %vm13558_vm12, %v8508_v7, %v8509_v19  ;;  %v8511_v49 = vrot.slane %v8509_v19, 4  ;;  %v12585_v7 = vld [vmem:[%s13257_s4 + $0x18] sm:$0xff]   ;;  %v12586_v19 = vld [vmem:[%s13257_s4 + $0x20] sm:$0xff]   ;;  %v12587_v14 = vld [vmem:[%s13257_s4 + $0x28] sm:$0xff]  }
0x20b3   :  { %8527 = vst [vmem:[#allocation4 + $0x20] sm:$0x1] %v8517_v29  ;;  %8524 = vst [vmem:[#allocation4 + $0x8] sm:$0xf] %v8510_v23  ;;  %v12588_v29 = vld [vmem:[%s13257_s4 + $0x30] sm:$0xff]   ;;  %v12589_v23 = vld [vmem:[%s13257_s4 + $0x38] sm:$0xff]  }
0x20b4   :  { %v8513_v10 = vsel %vm13558_vm12, %v8511_v49, %v8512_v59 }
0x20b5   :  { %8525 = vst [vmem:[#allocation4 + $0x10] sm:$0xf] %v8513_v10 }
0x20b7   :  { %v8533_v53 = vld [vmem:[#allocation4] sm:$0xff] }
0x20b8   :  { %v8569_v11 = vld [vmem:[#allocation4] sm:$0xee] }
0x20b9   :  { %v8938_v22 = vld [vmem:[#allocation4] sm:$0xcc] }
0x20ba   :  { %v14754_v20 = vld [vmem:[#allocation4 + $0x8] sm:$0xff]  ;;  %v8570_v26 = vld [vmem:[#allocation4 + $0x20] sm:$0x11] }
0x20bb   :  { %v10426_v37 = vcombine.low %v8533_v53, %v14754_v20  ;;  %v10427_v39 = vcombine.high %v8533_v53, %v14754_v20  ;;  %v10405_v27 = vcombine.high %v8569_v11, %v14754_v20  ;;  %v10404_v42 = vcombine.low %v8569_v11, %v14754_v20  ;;  %v8939_v57 = vld [vmem:[#allocation4 + $0x20] sm:$0x33] }
0x20bc   :  { %v14760_v54 = vld [vmem:[#allocation4 + $0x10] ss:$8 sps:$4 sm:$0xff]   ;;  %v10409_v48 = vcombine.high %v8570_v26, %v8570_v26  ;;  %v10408_v18 = vcombine.low %v8570_v26, %v8570_v26  ;;  %v10477_v38 = vcombine.high %v8938_v22, %v14754_v20  ;;  %v10476_v41 = vcombine.low %v8938_v22, %v14754_v20 }
0x20bd   :  { %8921 = vmatprep.mubr.bf16.mxu1 %v10427_v39  ;;  %v8628_v51 = vrot.slane %v10405_v27, 1  ;;  %v8625_v16 = vrot.slane %v10404_v42, 1  ;;  %v8626_v4 = vrot.slane %v14760_v54, 1  ;;  %v10479_v33 = vcombine.high %v8939_v57, %v8939_v57 }
0x20be   :  { %8922 = vmatmul.mubr.bf16.vlgmr.msra.gmra.mrb[84].mxu1 %v10426_v37  ;;  %v8633_v13 = vrot.slane %v10409_v48, 1  ;;  %v8631_v45 = vrot.slane %v10408_v18, 1  ;;  %v8986_v25 = vrot.slane %v10477_v38, 2  ;;  %v8983_v36 = vrot.slane %v10476_v41, 2 }
0x20bf   :  { %8929 = vmatprep.mubr.bf16.mxu1 %v14762_v32  ;;  %v8630_v24 = vsel %vm1233_vm7, %v8628_v51, %v8629_v3  ;;  %v8627_v31 = vsel %vm1233_vm7, %v8625_v16, %v8626_v4  ;;  %v8984_v47 = vrot.slane %v14760_v54, 2  ;;  %v8991_v58 = vrot.slane %v10479_v33, 2  ;;  %11437 = vmatpush3.bf16.msra.mxu1 %v12582_v1 }
0x20c0   :  { %8767 = vmatprep.mubr.bf16.mxu0 %v8630_v24  ;;  %v8634_v60 = vsel %vm1233_vm7, %v8629_v3, %v8633_v13  ;;  %v8632_v56 = vsel %vm1233_vm7, %v8626_v4, %v8631_v45  ;;  %v8988_v30 = vsel %vm1389_vm8, %v8986_v25, %v8987_v2  ;;  %v10478_v12 = vcombine.low %v8939_v57, %v8939_v57 }
0x20c1   :  { %8768 = vmatmul.mubr.bf16.vlgmr.msra.gmra.mrb[80].mxu0 %v8627_v31  ;;  %v8985_v52 = vsel %vm1389_vm8, %v8983_v36, %v8984_v47  ;;  %v8992_v59 = vsel %vm1389_vm8, %v8987_v2, %v8991_v58  ;;  %11438 = vmatprep.subr.bf16.mxu1 %v12583_v5 }
0x20c2   :  { %11083 = vmatpush3.bf16.msra.mxu0 %v12561_v6  ;;  %8775 = vmatprep.mubr.bf16.mxu0 %v8634_v60  ;;  %v8989_v9 = vrot.slane %v10478_v12, 2  ;;  %v10497_v12 = vld [vmem:[#allocation21] ss:$0 sm:$0xff] }
0x20c3   :  { %11084 = vmatprep.subr.bf16.mxu0 %v12563_v55  ;;  %11439 = vmatpush3.bf16.msra.mxu1 %v12583_v5 }
0x20c4   :  { %v8990_v62 = vsel %vm1389_vm8, %v8984_v47, %v8989_v9  ;;  %11440 = vmatprep.subr.bf16.mxu1 %v12584_v8 }
0x20c6   :  { %8930 = vmatmul.mubr.bf16.gmra.mrb[88].mxu1 %v14760_v54  ;;  %11085 = vmatpush3.bf16.msra.mxu0 %v12564_v15 }
0x20c7   :  { %11086 = vmatprep.subr.bf16.mxu0 %v12565_v34  ;;  %11441 = vmatpush3.bf16.msra.mxu1 %v12584_v8 }
0x20c8   :  { %11442 = vmatprep.subr.bf16.mxu1 %v12585_v7 }
0x20c9   :  { %8776 = vmatmul.mubr.bf16.gmra.mrb[84].mxu0 %v8632_v56 }
0x20ca   :  { %11087 = vmatpush3.bf16.msra.mxu0 %v12567_v43  ;;  %9125 = vmatprep.mubr.bf16.mxu0 %v8988_v30 }
0x20cb   :  { %11088 = vmatprep.subr.bf16.mxu0 %v12570_v28  ;;  %11443 = vmatpush3.bf16.msra.mxu1 %v12585_v7 }
0x20cc   :  { %11444 = vmatprep.subr.bf16.mxu1 %v12586_v19 }
0x20ce   :  { %11089 = vmatpush3.bf16.msra.mxu0 %v12571_v44  ;;  %v10496_v44 = vld [vmem:[#allocation20] ss:$0 sm:$0xff] }
0x20cf   :  { %11090 = vmatprep.subr.bf16.mxu0 %v12572_v35  ;;  %11445 = vmatpush3.bf16.msra.mxu1 %v12586_v19 }
0x20d0   :  { %11446 = vmatprep.subr.bf16.mxu1 %v12587_v14 }
0x20d2   :  { %11091 = vmatpush3.bf16.msra.mxu0 %v12573_v61 }
0x20d3   :  { %11092 = vmatprep.subr.bf16.mxu0 %v12574_v63  ;;  %11447 = vmatpush3.bf16.msra.mxu1 %v12587_v14 }
0x20d4   :  { %11448 = vmatprep.subr.bf16.mxu1 %v12588_v29 }
0x20d6   :  { %11093 = vmatpush3.bf16.msra.mxu0 %v12575_v46 }
0x20d7   :  { %11094 = vmatprep.subr.bf16.mxu0 %v12576_v17  ;;  %11449 = vmatpush3.bf16.msra.mxu1 %v12588_v29 }
0x20d8   :  { %11450 = vmatprep.subr.bf16.mxu1 %v12589_v23 }
0x20da   :  { %11095 = vmatpush3.bf16.msra.mxu0 %v12577_v0 }
0x20db   :  { %11096 = vmatprep.subr.bf16.mxu0 %v12578_v50  ;;  %11451 = vmatpush3.bf16.msra.mxu1 %v12589_v23 }
0x20de   :  { %11097 = vmatpush3.bf16.msra.mxu0 %v12579_v21 }
0x20e1   :  { %9126 = vmatmul.mubr.bf16.vlgmr.msra.gmra.mrb[88].mxu0 %v8985_v52 }
0x20e2   :  { %9133 = vmatprep.mubr.bf16.mxu0 %v8992_v59 }
0x20e9   :  { %9134 = vmatmul.mubr.bf16.gmra.mrb[92].mxu0 %v8990_v62 }
0x2191   :  { %v11070_v49 = vpop.f32.mrb[84].mxu1 }
0x2192   :  { %v11071_v10 = vpop.f32.mrb[85].mxu1 }
0x2193   :  { %v11072_v53 = vadd.f32 %v11071_v10, %v11070_v49  ;;  %v11073_v20 = vpop.f32.mrb[86].mxu1 }
0x2194   :  { %v11074_v11 = vpop.f32.mrb[87].mxu1  ;;  %v11042_v37 = vpop.f32.mrb[80].mxu0 }
0x2195   :  { %v11075_v26 = vadd.f32 %v11074_v11, %v11073_v20  ;;  %v11043_v39 = vpop.f32.mrb[81].mxu0 }
0x2196   :  { %v11044_v27 = vadd.f32 %v11043_v39, %v11042_v37  ;;  %v11045_v42 = vpop.f32.mrb[82].mxu0 }
0x2197   :  { %v11046_v54 = vpop.f32.mrb[83].mxu0 }
0x2198   :  { %v8924_v32 = vadd.f32 %v11072_v53, %v11044_v27  ;;  %v11047_v48 = vadd.f32 %v11046_v54, %v11045_v42 }
0x2199   :  { %v11076_v51 = vpop.f32.mrb[88].mxu1 }
0x219a   :  { %v11077_v16 = vpop.f32.mrb[89].mxu1  ;;  %v8927_v3 = vadd.f32 %v11075_v26, %v11047_v48 }
0x219b   :  { %v11078_v4 = vadd.f32 %v11077_v16, %v11076_v51  ;;  %v11079_v13 = vpop.f32.mrb[90].mxu1 }
0x219c   :  { %v11080_v6 = vpop.f32.mrb[91].mxu1  ;;  %v11048_v31 = vpop.f32.mrb[84].mxu0 }
0x219d   :  { %v11081_v24 = vadd.f32 %v11080_v6, %v11079_v13  ;;  %v11049_v55 = vpop.f32.mrb[85].mxu0 }
0x219e   :  { %v11050_v18 = vadd.f32 %v11049_v55, %v11048_v31  ;;  %v11051_v22 = vpop.f32.mrb[86].mxu0 }
0x219f   :  { %v11052_v60 = vpop.f32.mrb[87].mxu0 }
0x21a0   :  { %v8932_v38 = vadd.f32 %v11078_v4, %v11050_v18  ;;  %v11053_v15 = vadd.f32 %v11052_v60, %v11051_v22 }
0x21a2   :  { %v8935_v34 = vadd.f32 %v11081_v24, %v11053_v15 }
0x21b4   :  { %v11098_v45 = vpop.f32.mrb[88].mxu0 }
0x21b5   :  { %v11099_v25 = vpop.f32.mrb[89].mxu0 }
0x21b6   :  { %v11100_v2 = vadd.f32 %v11099_v25, %v11098_v45  ;;  %v11101_v43 = vpop.f32.mrb[90].mxu0 }
0x21b7   :  { %v11102_v28 = vpop.f32.mrb[91].mxu0 }
0x21b8   :  { %v9142_v56 = vadd.f32 %v11100_v2, %v8924_v32  ;;  %v11103_v30 = vadd.f32 %v11102_v28, %v11101_v43  ;;  %v9279_v32 = vld [vmem:[#allocation23] sm:$0x1] }
0x21b9   :  { %v9314_v16 = vsub.f32 1.0, %v9279_v32 }
0x21ba   :  { %v9143_v35 = vadd.f32 %v11103_v30, %v8927_v3  ;;  %v9153_v61 = vadd.f32 %v10496_v44, %v9142_v56  ;;  %v9308_v3 = vrot.slane %v9279_v32, %v13406_v40 }
0x21bb   :  { %v9319_v4 = vrot.slane %v9314_v16, %v13406_v40 }
0x21bc   :  { %v9154_v63 = vadd.f32 %v10496_v44, %v9143_v35  ;;  %v11104_v46 = vpop.f32.mrb[92].mxu0 }
0x21bd   :  { %v11105_v17 = vpop.f32.mrb[93].mxu0 }
0x21be   :  { %v11106_v0 = vadd.f32 %v11105_v17, %v11104_v46  ;;  %v11107_v57 = vpop.f32.mrb[94].mxu0  ;;  %v9157_v50 = vpack.c.bf16 %v9154_v63, %v9153_v61 }
0x21bf   :  { %v11108_v41 = vpop.f32.mrb[95].mxu0 }
0x21c0   :  { %v9144_v33 = vadd.f32 %v11106_v0, %v8932_v38  ;;  %v11109_v21 = vadd.f32 %v11108_v41, %v11107_v57  ;;  %11452 = vmatprep.mubr.bf16.mxu1 %v9157_v50 }
0x21c2   :  { %v9145_v36 = vadd.f32 %v11109_v21, %v8935_v34  ;;  %v9155_v47 = vadd.f32 %v10496_v44, %v9144_v33 }
0x21c4   :  { %v9156_v58 = vadd.f32 %v10496_v44, %v9145_v36 }
0x21c6   :  { %v9158_v52 = vpack.c.bf16 %v9156_v58, %v9155_v47 }
0x21c8   :  { %11453 = vmatmul.mubr.bf16.vlgmr.msra.gmra.mrb[92].mxu1 %v9158_v52 }
0x229b   :  { %v11454_v59 = vpop.f32.mrb[92].mxu1 }
0x229c   :  { %v9273_v9 = vadd.f32 %v11454_v59, %v10497_v12  ;;  %v9264_v62 = vpop.f32.mrb[93].mxu1 }
0x229d   :  { %v9265_v1 = vadd.f32 %v10497_v12, %v9264_v62  ;;  %v11455_v5 = vpop.f32.mrb[94].mxu1 }
0x229e   :  { %v9282_v8 = vsub.f32 0.0, %v9273_v9  ;;  %v9276_v7 = vadd.f32 %v11455_v5, %v10497_v12  ;;  %v9267_v19 = vpop.f32.mrb[95].mxu1  ;;  %v9323_v31 = vmul.f32 %v9319_v4, %v9273_v9 }
0x229f   :  { %v9280_v14 = vsub.f32 0.0, %v9265_v1  ;;  %v9268_v29 = vadd.f32 %v10497_v12, %v9267_v19  ;;  %v9321_v22 = vmul.f32 %v9319_v4, %v9265_v1 }
0x22a0   :  { %v9288_v23 = vmul.f32 1.442695, %v9282_v8  ;;  %v9283_v49 = vsub.f32 0.0, %v9276_v7  ;;  %v9324_v34 = vmul.f32 %v9319_v4, %v9276_v7 }
0x22a1   :  { %v9284_v10 = vmul.f32 1.442695, %v9280_v14  ;;  %v9281_v53 = vsub.f32 0.0, %v9268_v29  ;;  %v9322_v2 = vmul.f32 %v9319_v4, %v9268_v29 }
0x22a2   :  { %12602 = vpow2.f32 %v9288_v23  ;;  %v9290_v20 = vmul.f32 1.442695, %v9283_v49 }
0x22a3   :  { %12604 = vpow2.f32 %v9284_v10  ;;  %v9286_v11 = vmul.f32 1.442695, %v9281_v53 }
0x22a4   :  { %12606 = vpow2.f32 %v9290_v20 }
0x22a5   :  { %12608 = vpow2.f32 %v9286_v11 }
0x22ac   :  { %v12603_v26 = vpop.eup %12602 }
0x22ad   :  { %v12605_v37 = vpop.eup %12604  ;;  %v9294_v39 = vadd.f32 1.0, %v12603_v26 }
0x22ae   :  { %v12607_v27 = vpop.eup %12606  ;;  %v9292_v42 = vadd.f32 1.0, %v12605_v37 }
0x22af   :  { %v12609_v54 = vpop.eup %12608  ;;  %12610 = vrcp.f32 %v9294_v39  ;;  %v9295_v48 = vadd.f32 1.0, %v12607_v27 }
0x22b0   :  { %12612 = vrcp.f32 %v9292_v42  ;;  %v9293_v51 = vadd.f32 1.0, %v12609_v54 }
0x22b1   :  { %12614 = vrcp.f32 %v9295_v48 }
0x22b2   :  { %12616 = vrcp.f32 %v9293_v51 }
0x22b9   :  { %v12611_v13 = vpop.eup %12610 }
0x22ba   :  { %v12613_v6 = vpop.eup %12612  ;;  %v9312_v24 = vmul.f32 %v12611_v13, %v9308_v3 }
0x22bb   :  { %v12615_v55 = vpop.eup %12614  ;;  %v9310_v18 = vmul.f32 %v12613_v6, %v9308_v3 }
0x22bc   :  { %v12617_v60 = vpop.eup %12616  ;;  %v9327_v38 = vadd.f32 %v9323_v31, %v9312_v24  ;;  %v9313_v15 = vmul.f32 %v12615_v55, %v9308_v3 }
0x22bd   :  { %v9325_v45 = vadd.f32 %v9321_v22, %v9310_v18  ;;  %v9311_v25 = vmul.f32 %v12617_v60, %v9308_v3 }
0x22be   :  { %9331 = vst [vmem:[%s13272_s3 + $0x10] sm:$0xff] %v9327_v38  ;;  %v9328_v43 = vadd.f32 %v9324_v34, %v9313_v15 }
0x22bf   :  { %9329 = vst [vmem:[%s13272_s3] sm:$0xff] %v9325_v45  ;;  %v9326_v40 = vadd.f32 %v9322_v2, %v9311_v25 }
0x22c0   :  { %9332 = vst [vmem:[%s13272_s3 + $0x18] sm:$0xff] %v9328_v43 }
0x22c1   :  { %9330 = vst [vmem:[%s13272_s3 + $0x8] sm:$0xff] %v9326_v40 }
0x22c2   :  { %9337 = vsyncpa [#allocation8], 1 }
0x22c3   :  { %9338 = vsyncpa [#allocation10], 1 }
0x22c4   :  { %9339 = vsyncpa [#allocation13], 1 }
0x22c5   :  { %9340 = vsyncpa [#allocation16], 1 }
0x22c6   :  { %9341 = vsyncpa [#allocation19], 1 }
0x22c7   :  { %9342 = vsyncpa [#allocation22], 1 }

</bundles_post_ra>
